<compile_context>
chip_gen: v7x
topology: tpu7x:2x2x1
jax: 0.10.0
libtpu: 0.0.40
codegen_flags: <defaults>
</compile_context>

<pallas_src>
import functools

import jax
import jax.numpy as jnp
from jax import lax
from jax.experimental import pallas as pl
from jax.experimental.pallas import tpu as pltpu

KSIZE = 7
PAD = 3          # padding = 3 for kernel_size = 7 (matches the PyTorch module)

_LANE = 128
_SUBLANE = 8


def _round_up(x, m):
    return (x + m - 1) // m * m


def _padded_tile_bytes(h, w, itemsize=4):
    # VMEM footprint of an (h, w) f32 tile after (8, 128) layout padding.
    return _round_up(h, _SUBLANE) * _round_up(w, _LANE) * itemsize


def _pick_batch_tile(B, max_bt=8):
    """Largest divisor of B that is <= max_bt and (when B >= 2) leaves >= 2
    grid steps so both TensorCores stay busy on v7x."""
    best = 1
    for d in range(1, min(B, max_bt) + 1):
        if B % d == 0 and (B // d >= 2 or B == 1):
            best = d
    return best


def _pick_channel_tile(C, Bt, H, W, max_in_block_bytes):
    """Largest divisor of C whose double-buffered (Bt, Ct, H, W) input block
    fits the per-block VMEM budget."""
    img = _padded_tile_bytes(H, W)
    best = 0
    for d in range(1, C + 1):
        if C % d == 0 and 2 * Bt * d * img <= max_in_block_bytes:
            best = d
    if best == 0:
        # TODO(synk): add an H-row grid axis for very large spatial maps
        # instead of failing here.
        raise ValueError(
            "spatial_attention: a (Bt=%d, Ct=1, %d, %d) block does not fit the "
            "VMEM budget; spatial tiling would be required." % (Bt, H, W))
    return best


def _spatial_attention_kernel(w_ref, x_ref, o_ref, sum_ref, max_ref, slab_ref,
                              *, H, W, Wp, C, Ct, Bt, Lacc):
    """One (batch-tile, channel-chunk) grid step.

    w_ref   : (2*7*7,) f32 conv weights in SMEM (scalar reads).
    x_ref   : (Bt, Ct, H, W) input block in VMEM.
    o_ref   : (Bt, 1, H, W) output block (written on the last channel chunk).
    sum_ref : (Bt, H, W) running channel sum (scratch, persists across chunks).
    max_ref : (Bt, H, W) running channel max (scratch).
    slab_ref: (2, H+6, Lacc+128) zero-padded, batch-packed [mean, max] slab.
    """
    ci = pl.program_id(1)

    # ---- init running channel sum / max on the first channel chunk ----------
    @pl.when(ci == 0)
    def _():
        sum_ref[...] = jnp.zeros_like(sum_ref)
        max_ref[...] = jnp.full_like(max_ref, -jnp.inf)

    # ---- fused single-pass partial reduction over this channel chunk --------
    for b in range(Bt):
        def body(c, carry, b=b):
            s, m = carry
            xc = x_ref[b, c]                       # (H, W), one channel image
            return s + xc, jnp.maximum(m, xc)
        s_b, m_b = lax.fori_loop(0, Ct, body, (sum_ref[b], max_ref[b]),
                                 unroll=Ct <= 8)
        sum_ref[b] = s_b
        max_ref[b] = m_b

    # ---- last channel chunk: 7x7 conv over [mean, max] + sigmoid ------------
    @pl.when(ci == pl.num_programs(1) - 1)
    def _():
        inv_c = 1.0 / C

        # Build the zero-padded, lane-packed slab: image b's padded (H+6, Wp)
        # panel occupies columns [b*Wp, (b+1)*Wp); zero borders give the conv
        # padding (zero padding commutes with channel mean/max).
        slab_ref[...] = jnp.zeros_like(slab_ref)
        for b in range(Bt):
            col = b * Wp + PAD
            slab_ref[0, PAD:PAD + H, col:col + W] = sum_ref[b] * inv_c   # mean
            slab_ref[1, PAD:PAD + H, col:col + W] = max_ref[b]           # max

        # 2 x 7 x 7 taps, unrolled over the whole batch tile at once.
        # One lane-offset shift per (channel, kw) -- 14 cross-lane moves total,
        # hoisted out of the kh loop; kh taps are sublane-only slices.
        # Four independent accumulators keep the VALU slots filled.
        accs = [jnp.zeros((H, Lacc), jnp.float32) for _ in range(4)]
        t = 0
        for cin in range(2):
            f = slab_ref[cin]                        # (H+6, Lacc+128)
            for kw in range(KSIZE):
                fkw = f[:, kw:kw + Lacc]             # single lane shift
                for kh in range(KSIZE):
                    wv = w_ref[(cin * KSIZE + kh) * KSIZE + kw]
                    accs[t % 4] = accs[t % 4] + wv * fkw[kh:kh + H, :]
                    t += 1
        att = jax.nn.sigmoid((accs[0] + accs[1]) + (accs[2] + accs[3]))

        # Unpack the valid W columns of each batch panel into the output block.
        for b in range(Bt):
            o_ref[b, 0, :, :] = att[:, b * Wp:b * Wp + W]


def spatial_attention(x, conv_weight, *, max_in_block_bytes=12 * 1024 * 1024):
    """x: (B, C, H, W) float; conv_weight: (1, 2, 7, 7) float (OIHW, no bias)."""
    B, C, H, W = x.shape
    assert conv_weight.shape == (1, 2, KSIZE, KSIZE), conv_weight.shape

    Hp, Wp = H + 2 * PAD, W + 2 * PAD
    Bt = _pick_batch_tile(B)
    try:
        Ct = _pick_channel_tile(C, Bt, H, W, max_in_block_bytes)
    except ValueError:
        Bt = 1
        Ct = _pick_channel_tile(C, Bt, H, W, max_in_block_bytes)

    Lacc = _round_up(Bt * Wp, _LANE)   # lane-packed conv accumulator width
    Lslab = Lacc + _LANE               # + one lane-tile of slack for kw taps

    # Explicit VMEM budget: v5e's default scoped limit is 16 MiB and v7x only
    # has 64 MiB physical VMEM, so compute the working set and raise the limit.
    img = _padded_tile_bytes(H, W)
    vmem_need = (2 * Bt * Ct * img                       # double-buffered input
                 + 2 * Bt * img                          # double-buffered output
                 + 2 * Bt * img                          # sum/max scratch
                 + 2 * _round_up(Hp, _SUBLANE) * Lslab * 4)  # feature slab
    vmem_limit = 32 * 1024 * 1024
    assert vmem_need <= vmem_limit - 2 * 1024 * 1024, (vmem_need, vmem_limit)

    w_flat = conv_weight.reshape(-1).astype(jnp.float32)   # (98,), SMEM scalars
    x = x.astype(jnp.float32)

    kernel = functools.partial(
        _spatial_attention_kernel,
        H=H, W=W, Wp=Wp, C=C, Ct=Ct, Bt=Bt, Lacc=Lacc)

    return pl.pallas_call(
        kernel,
        out_shape=jax.ShapeDtypeStruct((B, 1, H, W), jnp.float32),
        grid_spec=pltpu.PrefetchScalarGridSpec(
            num_scalar_prefetch=0,
            grid=(B // Bt, C // Ct),                 # channel (reduction) axis last
            in_specs=[
                # conv weights: small, whole-array, scalar-indexed -> SMEM
                pl.BlockSpec(memory_space=pltpu.MemorySpace.SMEM),
                # unpadded input block: read from HBM exactly once
                pl.BlockSpec((Bt, Ct, H, W), lambda s, c: (s, c, 0, 0)),
            ],
            out_specs=pl.BlockSpec((Bt, 1, H, W), lambda s, c: (s, 0, 0, 0)),
            scratch_shapes=[
                pltpu.VMEM((Bt, H, W), jnp.float32),       # running channel sum
                pltpu.VMEM((Bt, H, W), jnp.float32),       # running channel max
                pltpu.VMEM((2, Hp, Lslab), jnp.float32),   # padded packed slab
            ],
        ),
        compiler_params=pltpu.CompilerParams(
            dimension_semantics=("parallel", "arbitrary"),
            vmem_limit_bytes=vmem_limit,
        ),
    )(w_flat, x)


def spatial_attention_ref(x, conv_weight):
    """Pure-JAX reference mirroring the PyTorch forward."""
    avg = jnp.mean(x, axis=1, keepdims=True)
    mx = jnp.max(x, axis=1, keepdims=True)
    cat = jnp.concatenate([avg, mx], axis=1)
    y = jax.lax.conv_general_dilated(
        cat, conv_weight, window_strides=(1, 1),
        padding=[(PAD, PAD), (PAD, PAD)],
        dimension_numbers=("NCHW", "OIHW", "NCHW"))
    return jax.nn.sigmoid(y)


if __name__ == "__main__":
    key = jax.random.PRNGKey(0)
    k_x, k_w, k_x2, k_w2 = jax.random.split(key, 4)

    fan_in = 2 * KSIZE * KSIZE
    bound = 1.0 / (fan_in ** 0.5)

    # Test 1: module-sized small shapes (B=2 -> Bt=1, 2 parallel grid steps).
    B, C, H, W = 2, 4, 16, 16
    x = jax.random.normal(k_x, (B, C, H, W), dtype=jnp.float32)
    conv_weight = jax.random.uniform(
        k_w, (1, 2, KSIZE, KSIZE), minval=-bound, maxval=bound, dtype=jnp.float32)

    out = jax.block_until_ready(spatial_attention(x, conv_weight))
    ref = spatial_attention_ref(x, conv_weight)
    assert out.shape == (B, 1, H, W), out.shape
    assert jnp.allclose(out, ref, atol=1e-5, rtol=1e-5), \
        f"max abs diff = {jnp.max(jnp.abs(out - ref))}"

    # Test 2: exercises batch packing (Bt=2) and the multi-chunk channel
    # reduction (Ct < C) by shrinking the per-block VMEM budget.
    B2, C2, H2, W2 = 4, 8, 16, 16
    x2 = jax.random.normal(k_x2, (B2, C2, H2, W2), dtype=jnp.float32)
    conv_weight2 = jax.random.uniform(
        k_w2, (1, 2, KSIZE, KSIZE), minval=-bound, maxval=bound, dtype=jnp.float32)
    out2 = jax.block_until_ready(
        spatial_attention(x2, conv_weight2, max_in_block_bytes=64 * 1024))
    ref2 = spatial_attention_ref(x2, conv_weight2)
    assert jnp.allclose(out2, ref2, atol=1e-5, rtol=1e-5), \
        f"max abs diff = {jnp.max(jnp.abs(out2 - ref2))}"

    print("KERNEL_OK")
</pallas_src>

<mosaic_0001>
module attributes {stable_mosaic.version = 11 : i64} {
  func.func @_spatial_attention_kernel(%arg0: i32, %arg1: i32, %arg2: memref<98xf32, #tpu.memory_space<smem>>, %arg3: memref<1x4x16x16xf32, #tpu.memory_space<vmem>>, %arg4: memref<1x1x16x16xf32, #tpu.memory_space<vmem>>, %arg5: memref<1x16x16xf32, #tpu.memory_space<vmem>>, %arg6: memref<1x16x16xf32, #tpu.memory_space<vmem>>, %arg7: memref<2x22x256xf32, #tpu.memory_space<vmem>>) attributes {dimension_semantics = [#tpu.dimension_semantics<parallel>, #tpu.dimension_semantics<arbitrary>], iteration_bounds = array<i64: 2, 1>, scalar_prefetch = 0 : i64, scratch_operands = 3 : i64, tpu.core_type = #tpu.core_type<tc>, window_params = [{transform_indices = @transform_0, window_bounds = array<i64: 98>}, {transform_indices = @transform_1, window_bounds = array<i64: 1, 4, 16, 16>}, {transform_indices = @transform_2, window_bounds = array<i64: 1, 1, 16, 16>}]} {
    %c0_i32 = arith.constant 0 : i32
    %0 = arith.cmpi eq, %arg1, %c0_i32 : i32
    %1 = arith.extui %0 : i1 to i32
    %c0_i32_0 = arith.constant 0 : i32
    %2 = arith.cmpi ne, %1, %c0_i32_0 : i32
    scf.if %2 {
      %cst = arith.constant 0.000000e+00 : f32
      %36 = vector.broadcast %cst : f32 to vector<1x16x16xf32>
      %c0_27 = arith.constant 0 : index
      %c0_28 = arith.constant 0 : index
      %c0_29 = arith.constant 0 : index
      %37 = vector.load %arg5[%c0_27, %c0_28, %c0_29] : memref<1x16x16xf32, #tpu.memory_space<vmem>>, vector<1x16x16xf32>
      tpu.vector_store %arg5[%c0_27, %c0_28, %c0_29], %36 {strides = array<i32>} : memref<1x16x16xf32, #tpu.memory_space<vmem>>, vector<1x16x16xf32>,
      %cst_30 = arith.constant 0xFF800000 : f32
      %38 = vector.broadcast %cst_30 : f32 to vector<1x16x16xf32>
      %c0_31 = arith.constant 0 : index
      %c0_32 = arith.constant 0 : index
      %c0_33 = arith.constant 0 : index
      %39 = vector.load %arg6[%c0_31, %c0_32, %c0_33] : memref<1x16x16xf32, #tpu.memory_space<vmem>>, vector<1x16x16xf32>
      tpu.vector_store %arg6[%c0_31, %c0_32, %c0_33], %38 {strides = array<i32>} : memref<1x16x16xf32, #tpu.memory_space<vmem>>, vector<1x16x16xf32>,
    } else {
    }
    %c0 = arith.constant 0 : index
    %c0_1 = arith.constant 0 : index
    %c0_2 = arith.constant 0 : index
    %3 = vector.load %arg5[%c0, %c0_1, %c0_2] : memref<1x16x16xf32, #tpu.memory_space<vmem>>, vector<1x16x16xf32>
    %4 = vector.shape_cast %3 : vector<1x16x16xf32> to vector<16x16xf32>
    %c0_3 = arith.constant 0 : index
    %c0_4 = arith.constant 0 : index
    %c0_5 = arith.constant 0 : index
    %5 = vector.load %arg6[%c0_3, %c0_4, %c0_5] : memref<1x16x16xf32, #tpu.memory_space<vmem>>, vector<1x16x16xf32>
    %6 = vector.shape_cast %5 : vector<1x16x16xf32> to vector<16x16xf32>
    %c0_i32_6 = arith.constant 0 : i32
    %c0_7 = arith.constant 0 : index
    %7 = arith.index_cast %c0_i32_6 : i32 to index
    %c0_8 = arith.constant 0 : index
    %c0_9 = arith.constant 0 : index
    %8 = vector.load %arg3[%c0_7, %7, %c0_8, %c0_9] : memref<1x4x16x16xf32, #tpu.memory_space<vmem>>, vector<1x1x16x16xf32>
    %9 = vector.shape_cast %8 : vector<1x1x16x16xf32> to vector<16x16xf32>
    %10 = arith.addf %4, %9 : vector<16x16xf32>
    %11 = arith.maximumf %6, %9 : vector<16x16xf32>
    %c1_i32 = arith.constant 1 : i32
    %c0_10 = arith.constant 0 : index
    %12 = arith.index_cast %c1_i32 : i32 to index
    %c0_11 = arith.constant 0 : index
    %c0_12 = arith.constant 0 : index
    %13 = vector.load %arg3[%c0_10, %12, %c0_11, %c0_12] : memref<1x4x16x16xf32, #tpu.memory_space<vmem>>, vector<1x1x16x16xf32>
    %14 = vector.shape_cast %13 : vector<1x1x16x16xf32> to vector<16x16xf32>
    %15 = arith.addf %10, %14 : vector<16x16xf32>
    %16 = arith.maximumf %11, %14 : vector<16x16xf32>
    %c2_i32 = arith.constant 2 : i32
    %c0_13 = arith.constant 0 : index
    %17 = arith.index_cast %c2_i32 : i32 to index
    %c0_14 = arith.constant 0 : index
    %c0_15 = arith.constant 0 : index
    %18 = vector.load %arg3[%c0_13, %17, %c0_14, %c0_15] : memref<1x4x16x16xf32, #tpu.memory_space<vmem>>, vector<1x1x16x16xf32>
    %19 = vector.shape_cast %18 : vector<1x1x16x16xf32> to vector<16x16xf32>
    %20 = arith.addf %15, %19 : vector<16x16xf32>
    %21 = arith.maximumf %16, %19 : vector<16x16xf32>
    %c3_i32 = arith.constant 3 : i32
    %c0_16 = arith.constant 0 : index
    %22 = arith.index_cast %c3_i32 : i32 to index
    %c0_17 = arith.constant 0 : index
    %c0_18 = arith.constant 0 : index
    %23 = vector.load %arg3[%c0_16, %22, %c0_17, %c0_18] : memref<1x4x16x16xf32, #tpu.memory_space<vmem>>, vector<1x1x16x16xf32>
    %24 = vector.shape_cast %23 : vector<1x1x16x16xf32> to vector<16x16xf32>
    %25 = arith.addf %20, %24 : vector<16x16xf32>
    %26 = arith.maximumf %21, %24 : vector<16x16xf32>
    %c4_i32 = arith.constant 4 : i32
    %c0_19 = arith.constant 0 : index
    %c0_20 = arith.constant 0 : index
    %c0_21 = arith.constant 0 : index
    %27 = vector.load %arg5[%c0_19, %c0_20, %c0_21] : memref<1x16x16xf32, #tpu.memory_space<vmem>>, vector<1x16x16xf32>
    %28 = vector.shape_cast %27 : vector<1x16x16xf32> to vector<16x16xf32>
    %29 = vector.shape_cast %25 : vector<16x16xf32> to vector<1x16x16xf32>
    tpu.vector_store %arg5[%c0_19, %c0_20, %c0_21], %29 {strides = array<i32>} : memref<1x16x16xf32, #tpu.memory_space<vmem>>, vector<1x16x16xf32>,
    %c0_22 = arith.constant 0 : index
    %c0_23 = arith.constant 0 : index
    %c0_24 = arith.constant 0 : index
    %30 = vector.load %arg6[%c0_22, %c0_23, %c0_24] : memref<1x16x16xf32, #tpu.memory_space<vmem>>, vector<1x16x16xf32>
    %31 = vector.shape_cast %30 : vector<1x16x16xf32> to vector<16x16xf32>
    %32 = vector.shape_cast %26 : vector<16x16xf32> to vector<1x16x16xf32>
    tpu.vector_store %arg6[%c0_22, %c0_23, %c0_24], %32 {strides = array<i32>} : memref<1x16x16xf32, #tpu.memory_space<vmem>>, vector<1x16x16xf32>,
    %c0_i32_25 = arith.constant 0 : i32
    %33 = arith.cmpi eq, %arg1, %c0_i32_25 : i32
    %34 = arith.extui %33 : i1 to i32
    %c0_i32_26 = arith.constant 0 : i32
    %35 = arith.cmpi ne, %34, %c0_i32_26 : i32
    scf.if %35 {
      %cst = arith.constant 0.000000e+00 : f32
      %36 = vector.broadcast %cst : f32 to vector<2x22x256xf32>
      %c0_27 = arith.constant 0 : index
      %c0_28 = arith.constant 0 : index
      %c0_29 = arith.constant 0 : index
      %37 = vector.load %arg7[%c0_27, %c0_28, %c0_29] : memref<2x22x256xf32, #tpu.memory_space<vmem>>, vector<2x22x256xf32>
      tpu.vector_store %arg7[%c0_27, %c0_28, %c0_29], %36 {strides = array<i32>} : memref<2x22x256xf32, #tpu.memory_space<vmem>>, vector<2x22x256xf32>,
      %c0_30 = arith.constant 0 : index
      %c0_31 = arith.constant 0 : index
      %c0_32 = arith.constant 0 : index
      %38 = vector.load %arg5[%c0_30, %c0_31, %c0_32] : memref<1x16x16xf32, #tpu.memory_space<vmem>>, vector<1x16x16xf32>
      %39 = vector.shape_cast %38 : vector<1x16x16xf32> to vector<16x16xf32>
      %cst_33 = arith.constant 2.500000e-01 : f32
      %40 = vector.broadcast %cst_33 : f32 to vector<16x16xf32>
      %41 = arith.mulf %39, %40 : vector<16x16xf32>
      %c0_34 = arith.constant 0 : index
      %c3 = arith.constant 3 : index
      %c3_35 = arith.constant 3 : index
      %42 = vector.load %arg7[%c0_34, %c3, %c3_35] : memref<2x22x256xf32, #tpu.memory_space<vmem>>, vector<1x16x16xf32>
      %43 = vector.shape_cast %42 : vector<1x16x16xf32> to vector<16x16xf32>
      %44 = vector.shape_cast %41 : vector<16x16xf32> to vector<1x16x16xf32>
      tpu.vector_store %arg7[%c0_34, %c3, %c3_35], %44 {strides = array<i32>} : memref<2x22x256xf32, #tpu.memory_space<vmem>>, vector<1x16x16xf32>,
      %c0_36 = arith.constant 0 : index
      %c0_37 = arith.constant 0 : index
      %c0_38 = arith.constant 0 : index
      %45 = vector.load %arg6[%c0_36, %c0_37, %c0_38] : memref<1x16x16xf32, #tpu.memory_space<vmem>>, vector<1x16x16xf32>
      %46 = vector.shape_cast %45 : vector<1x16x16xf32> to vector<16x16xf32>
      %c1 = arith.constant 1 : index
      %c3_39 = arith.constant 3 : index
      %c3_40 = arith.constant 3 : index
      %47 = vector.load %arg7[%c1, %c3_39, %c3_40] : memref<2x22x256xf32, #tpu.memory_space<vmem>>, vector<1x16x16xf32>
      %48 = vector.shape_cast %47 : vector<1x16x16xf32> to vector<16x16xf32>
      %49 = vector.shape_cast %46 : vector<16x16xf32> to vector<1x16x16xf32>
      tpu.vector_store %arg7[%c1, %c3_39, %c3_40], %49 {strides = array<i32>} : memref<2x22x256xf32, #tpu.memory_space<vmem>>, vector<1x16x16xf32>,
      %cst_41 = arith.constant 0.000000e+00 : f32
      %50 = vector.broadcast %cst_41 : f32 to vector<16x128xf32>
      %cst_42 = arith.constant 0.000000e+00 : f32
      %51 = vector.broadcast %cst_42 : f32 to vector<16x128xf32>
      %cst_43 = arith.constant 0.000000e+00 : f32
      %52 = vector.broadcast %cst_43 : f32 to vector<16x128xf32>
      %cst_44 = arith.constant 0.000000e+00 : f32
      %53 = vector.broadcast %cst_44 : f32 to vector<16x128xf32>
      %c0_45 = arith.constant 0 : index
      %c0_46 = arith.constant 0 : index
      %c0_47 = arith.constant 0 : index
      %54 = vector.load %arg7[%c0_45, %c0_46, %c0_47] : memref<2x22x256xf32, #tpu.memory_space<vmem>>, vector<1x22x256xf32>
      %55 = vector.shape_cast %54 : vector<1x22x256xf32> to vector<22x256xf32>
      %56 = vector.extract_strided_slice %55 {offsets = [0, 0], sizes = [22, 128], strides = [1, 1]} : vector<22x256xf32> to vector<22x128xf32>
      %c0_48 = arith.constant 0 : index
      %57 = memref.load %arg2[%c0_48] : memref<98xf32, #tpu.memory_space<smem>>
      %58 = vector.extract_strided_slice %56 {offsets = [0, 0], sizes = [16, 128], strides = [1, 1]} : vector<22x128xf32> to vector<16x128xf32>
      %59 = vector.broadcast %57 : f32 to vector<16x128xf32>
      %60 = arith.mulf %59, %58 : vector<16x128xf32>
      %61 = arith.addf %50, %60 : vector<16x128xf32>
      %c7 = arith.constant 7 : index
      %62 = memref.load %arg2[%c7] : memref<98xf32, #tpu.memory_space<smem>>
      %63 = vector.extract_strided_slice %56 {offsets = [1, 0], sizes = [16, 128], strides = [1, 1]} : vector<22x128xf32> to vector<16x128xf32>
      %64 = vector.broadcast %62 : f32 to vector<16x128xf32>
      %65 = arith.mulf %64, %63 : vector<16x128xf32>
      %66 = arith.addf %51, %65 : vector<16x128xf32>
      %c14 = arith.constant 14 : index
      %67 = memref.load %arg2[%c14] : memref<98xf32, #tpu.memory_space<smem>>
      %68 = vector.extract_strided_slice %56 {offsets = [2, 0], sizes = [16, 128], strides = [1, 1]} : vector<22x128xf32> to vector<16x128xf32>
      %69 = vector.broadcast %67 : f32 to vector<16x128xf32>
      %70 = arith.mulf %69, %68 : vector<16x128xf32>
      %71 = arith.addf %52, %70 : vector<16x128xf32>
      %c21 = arith.constant 21 : index
      %72 = memref.load %arg2[%c21] : memref<98xf32, #tpu.memory_space<smem>>
      %73 = vector.extract_strided_slice %56 {offsets = [3, 0], sizes = [16, 128], strides = [1, 1]} : vector<22x128xf32> to vector<16x128xf32>
      %74 = vector.broadcast %72 : f32 to vector<16x128xf32>
      %75 = arith.mulf %74, %73 : vector<16x128xf32>
      %76 = arith.addf %53, %75 : vector<16x128xf32>
      %c28 = arith.constant 28 : index
      %77 = memref.load %arg2[%c28] : memref<98xf32, #tpu.memory_space<smem>>
      %78 = vector.extract_strided_slice %56 {offsets = [4, 0], sizes = [16, 128], strides = [1, 1]} : vector<22x128xf32> to vector<16x128xf32>
      %79 = vector.broadcast %77 : f32 to vector<16x128xf32>
      %80 = arith.mulf %79, %78 : vector<16x128xf32>
      %81 = arith.addf %61, %80 : vector<16x128xf32>
      %c35 = arith.constant 35 : index
      %82 = memref.load %arg2[%c35] : memref<98xf32, #tpu.memory_space<smem>>
      %83 = vector.extract_strided_slice %56 {offsets = [5, 0], sizes = [16, 128], strides = [1, 1]} : vector<22x128xf32> to vector<16x128xf32>
      %84 = vector.broadcast %82 : f32 to vector<16x128xf32>
      %85 = arith.mulf %84, %83 : vector<16x128xf32>
      %86 = arith.addf %66, %85 : vector<16x128xf32>
      %c42 = arith.constant 42 : index
      %87 = memref.load %arg2[%c42] : memref<98xf32, #tpu.memory_space<smem>>
      %88 = vector.extract_strided_slice %56 {offsets = [6, 0], sizes = [16, 128], strides = [1, 1]} : vector<22x128xf32> to vector<16x128xf32>
      %89 = vector.broadcast %87 : f32 to vector<16x128xf32>
      %90 = arith.mulf %89, %88 : vector<16x128xf32>
      %91 = arith.addf %71, %90 : vector<16x128xf32>
      %92 = vector.extract_strided_slice %55 {offsets = [0, 1], sizes = [22, 128], strides = [1, 1]} : vector<22x256xf32> to vector<22x128xf32>
      %c1_49 = arith.constant 1 : index
      %93 = memref.load %arg2[%c1_49] : memref<98xf32, #tpu.memory_space<smem>>
      %94 = vector.extract_strided_slice %92 {offsets = [0, 0], sizes = [16, 128], strides = [1, 1]} : vector<22x128xf32> to vector<16x128xf32>
      %95 = vector.broadcast %93 : f32 to vector<16x128xf32>
      %96 = arith.mulf %95, %94 : vector<16x128xf32>
      %97 = arith.addf %76, %96 : vector<16x128xf32>
      %c8 = arith.constant 8 : index
      %98 = memref.load %arg2[%c8] : memref<98xf32, #tpu.memory_space<smem>>
      %99 = vector.extract_strided_slice %92 {offsets = [1, 0], sizes = [16, 128], strides = [1, 1]} : vector<22x128xf32> to vector<16x128xf32>
      %100 = vector.broadcast %98 : f32 to vector<16x128xf32>
      %101 = arith.mulf %100, %99 : vector<16x128xf32>
      %102 = arith.addf %81, %101 : vector<16x128xf32>
      %c15 = arith.constant 15 : index
      %103 = memref.load %arg2[%c15] : memref<98xf32, #tpu.memory_space<smem>>
      %104 = vector.extract_strided_slice %92 {offsets = [2, 0], sizes = [16, 128], strides = [1, 1]} : vector<22x128xf32> to vector<16x128xf32>
      %105 = vector.broadcast %103 : f32 to vector<16x128xf32>
      %106 = arith.mulf %105, %104 : vector<16x128xf32>
      %107 = arith.addf %86, %106 : vector<16x128xf32>
      %c22 = arith.constant 22 : index
      %108 = memref.load %arg2[%c22] : memref<98xf32, #tpu.memory_space<smem>>
      %109 = vector.extract_strided_slice %92 {offsets = [3, 0], sizes = [16, 128], strides = [1, 1]} : vector<22x128xf32> to vector<16x128xf32>
      %110 = vector.broadcast %108 : f32 to vector<16x128xf32>
      %111 = arith.mulf %110, %109 : vector<16x128xf32>
      %112 = arith.addf %91, %111 : vector<16x128xf32>
      %c29 = arith.constant 29 : index
      %113 = memref.load %arg2[%c29] : memref<98xf32, #tpu.memory_space<smem>>
      %114 = vector.extract_strided_slice %92 {offsets = [4, 0], sizes = [16, 128], strides = [1, 1]} : vector<22x128xf32> to vector<16x128xf32>
      %115 = vector.broadcast %113 : f32 to vector<16x128xf32>
      %116 = arith.mulf %115, %114 : vector<16x128xf32>
      %117 = arith.addf %97, %116 : vector<16x128xf32>
      %c36 = arith.constant 36 : index
      %118 = memref.load %arg2[%c36] : memref<98xf32, #tpu.memory_space<smem>>
      %119 = vector.extract_strided_slice %92 {offsets = [5, 0], sizes = [16, 128], strides = [1, 1]} : vector<22x128xf32> to vector<16x128xf32>
      %120 = vector.broadcast %118 : f32 to vector<16x128xf32>
      %121 = arith.mulf %120, %119 : vector<16x128xf32>
      %122 = arith.addf %102, %121 : vector<16x128xf32>
      %c43 = arith.constant 43 : index
      %123 = memref.load %arg2[%c43] : memref<98xf32, #tpu.memory_space<smem>>
      %124 = vector.extract_strided_slice %92 {offsets = [6, 0], sizes = [16, 128], strides = [1, 1]} : vector<22x128xf32> to vector<16x128xf32>
      %125 = vector.broadcast %123 : f32 to vector<16x128xf32>
      %126 = arith.mulf %125, %124 : vector<16x128xf32>
      %127 = arith.addf %107, %126 : vector<16x128xf32>
      %128 = vector.extract_strided_slice %55 {offsets = [0, 2], sizes = [22, 128], strides = [1, 1]} : vector<22x256xf32> to vector<22x128xf32>
      %c2 = arith.constant 2 : index
      %129 = memref.load %arg2[%c2] : memref<98xf32, #tpu.memory_space<smem>>
      %130 = vector.extract_strided_slice %128 {offsets = [0, 0], sizes = [16, 128], strides = [1, 1]} : vector<22x128xf32> to vector<16x128xf32>
      %131 = vector.broadcast %129 : f32 to vector<16x128xf32>
      %132 = arith.mulf %131, %130 : vector<16x128xf32>
      %133 = arith.addf %112, %132 : vector<16x128xf32>
      %c9 = arith.constant 9 : index
      %134 = memref.load %arg2[%c9] : memref<98xf32, #tpu.memory_space<smem>>
      %135 = vector.extract_strided_slice %128 {offsets = [1, 0], sizes = [16, 128], strides = [1, 1]} : vector<22x128xf32> to vector<16x128xf32>
      %136 = vector.broadcast %134 : f32 to vector<16x128xf32>
      %137 = arith.mulf %136, %135 : vector<16x128xf32>
      %138 = arith.addf %117, %137 : vector<16x128xf32>
      %c16 = arith.constant 16 : index
      %139 = memref.load %arg2[%c16] : memref<98xf32, #tpu.memory_space<smem>>
      %140 = vector.extract_strided_slice %128 {offsets = [2, 0], sizes = [16, 128], strides = [1, 1]} : vector<22x128xf32> to vector<16x128xf32>
      %141 = vector.broadcast %139 : f32 to vector<16x128xf32>
      %142 = arith.mulf %141, %140 : vector<16x128xf32>
      %143 = arith.addf %122, %142 : vector<16x128xf32>
      %c23 = arith.constant 23 : index
      %144 = memref.load %arg2[%c23] : memref<98xf32, #tpu.memory_space<smem>>
      %145 = vector.extract_strided_slice %128 {offsets = [3, 0], sizes = [16, 128], strides = [1, 1]} : vector<22x128xf32> to vector<16x128xf32>
      %146 = vector.broadcast %144 : f32 to vector<16x128xf32>
      %147 = arith.mulf %146, %145 : vector<16x128xf32>
      %148 = arith.addf %127, %147 : vector<16x128xf32>
      %c30 = arith.constant 30 : index
      %149 = memref.load %arg2[%c30] : memref<98xf32, #tpu.memory_space<smem>>
      %150 = vector.extract_strided_slice %128 {offsets = [4, 0], sizes = [16, 128], strides = [1, 1]} : vector<22x128xf32> to vector<16x128xf32>
      %151 = vector.broadcast %149 : f32 to vector<16x128xf32>
      %152 = arith.mulf %151, %150 : vector<16x128xf32>
      %153 = arith.addf %133, %152 : vector<16x128xf32>
      %c37 = arith.constant 37 : index
      %154 = memref.load %arg2[%c37] : memref<98xf32, #tpu.memory_space<smem>>
      %155 = vector.extract_strided_slice %128 {offsets = [5, 0], sizes = [16, 128], strides = [1, 1]} : vector<22x128xf32> to vector<16x128xf32>
      %156 = vector.broadcast %154 : f32 to vector<16x128xf32>
      %157 = arith.mulf %156, %155 : vector<16x128xf32>
      %158 = arith.addf %138, %157 : vector<16x128xf32>
      %c44 = arith.constant 44 : index
      %159 = memref.load %arg2[%c44] : memref<98xf32, #tpu.memory_space<smem>>
      %160 = vector.extract_strided_slice %128 {offsets = [6, 0], sizes = [16, 128], strides = [1, 1]} : vector<22x128xf32> to vector<16x128xf32>
      %161 = vector.broadcast %159 : f32 to vector<16x128xf32>
      %162 = arith.mulf %161, %160 : vector<16x128xf32>
      %163 = arith.addf %143, %162 : vector<16x128xf32>
      %164 = vector.extract_strided_slice %55 {offsets = [0, 3], sizes = [22, 128], strides = [1, 1]} : vector<22x256xf32> to vector<22x128xf32>
      %c3_50 = arith.constant 3 : index
      %165 = memref.load %arg2[%c3_50] : memref<98xf32, #tpu.memory_space<smem>>
      %166 = vector.extract_strided_slice %164 {offsets = [0, 0], sizes = [16, 128], strides = [1, 1]} : vector<22x128xf32> to vector<16x128xf32>
      %167 = vector.broadcast %165 : f32 to vector<16x128xf32>
      %168 = arith.mulf %167, %166 : vector<16x128xf32>
      %169 = arith.addf %148, %168 : vector<16x128xf32>
      %c10 = arith.constant 10 : index
      %170 = memref.load %arg2[%c10] : memref<98xf32, #tpu.memory_space<smem>>
      %171 = vector.extract_strided_slice %164 {offsets = [1, 0], sizes = [16, 128], strides = [1, 1]} : vector<22x128xf32> to vector<16x128xf32>
      %172 = vector.broadcast %170 : f32 to vector<16x128xf32>
      %173 = arith.mulf %172, %171 : vector<16x128xf32>
      %174 = arith.addf %153, %173 : vector<16x128xf32>
      %c17 = arith.constant 17 : index
      %175 = memref.load %arg2[%c17] : memref<98xf32, #tpu.memory_space<smem>>
      %176 = vector.extract_strided_slice %164 {offsets = [2, 0], sizes = [16, 128], strides = [1, 1]} : vector<22x128xf32> to vector<16x128xf32>
      %177 = vector.broadcast %175 : f32 to vector<16x128xf32>
      %178 = arith.mulf %177, %176 : vector<16x128xf32>
      %179 = arith.addf %158, %178 : vector<16x128xf32>
      %c24 = arith.constant 24 : index
      %180 = memref.load %arg2[%c24] : memref<98xf32, #tpu.memory_space<smem>>
      %181 = vector.extract_strided_slice %164 {offsets = [3, 0], sizes = [16, 128], strides = [1, 1]} : vector<22x128xf32> to vector<16x128xf32>
      %182 = vector.broadcast %180 : f32 to vector<16x128xf32>
      %183 = arith.mulf %182, %181 : vector<16x128xf32>
      %184 = arith.addf %163, %183 : vector<16x128xf32>
      %c31 = arith.constant 31 : index
      %185 = memref.load %arg2[%c31] : memref<98xf32, #tpu.memory_space<smem>>
      %186 = vector.extract_strided_slice %164 {offsets = [4, 0], sizes = [16, 128], strides = [1, 1]} : vector<22x128xf32> to vector<16x128xf32>
      %187 = vector.broadcast %185 : f32 to vector<16x128xf32>
      %188 = arith.mulf %187, %186 : vector<16x128xf32>
      %189 = arith.addf %169, %188 : vector<16x128xf32>
      %c38 = arith.constant 38 : index
      %190 = memref.load %arg2[%c38] : memref<98xf32, #tpu.memory_space<smem>>
      %191 = vector.extract_strided_slice %164 {offsets = [5, 0], sizes = [16, 128], strides = [1, 1]} : vector<22x128xf32> to vector<16x128xf32>
      %192 = vector.broadcast %190 : f32 to vector<16x128xf32>
      %193 = arith.mulf %192, %191 : vector<16x128xf32>
      %194 = arith.addf %174, %193 : vector<16x128xf32>
      %c45 = arith.constant 45 : index
      %195 = memref.load %arg2[%c45] : memref<98xf32, #tpu.memory_space<smem>>
      %196 = vector.extract_strided_slice %164 {offsets = [6, 0], sizes = [16, 128], strides = [1, 1]} : vector<22x128xf32> to vector<16x128xf32>
      %197 = vector.broadcast %195 : f32 to vector<16x128xf32>
      %198 = arith.mulf %197, %196 : vector<16x128xf32>
      %199 = arith.addf %179, %198 : vector<16x128xf32>
      %200 = vector.extract_strided_slice %55 {offsets = [0, 4], sizes = [22, 128], strides = [1, 1]} : vector<22x256xf32> to vector<22x128xf32>
      %c4 = arith.constant 4 : index
      %201 = memref.load %arg2[%c4] : memref<98xf32, #tpu.memory_space<smem>>
      %202 = vector.extract_strided_slice %200 {offsets = [0, 0], sizes = [16, 128], strides = [1, 1]} : vector<22x128xf32> to vector<16x128xf32>
      %203 = vector.broadcast %201 : f32 to vector<16x128xf32>
      %204 = arith.mulf %203, %202 : vector<16x128xf32>
      %205 = arith.addf %184, %204 : vector<16x128xf32>
      %c11 = arith.constant 11 : index
      %206 = memref.load %arg2[%c11] : memref<98xf32, #tpu.memory_space<smem>>
      %207 = vector.extract_strided_slice %200 {offsets = [1, 0], sizes = [16, 128], strides = [1, 1]} : vector<22x128xf32> to vector<16x128xf32>
      %208 = vector.broadcast %206 : f32 to vector<16x128xf32>
      %209 = arith.mulf %208, %207 : vector<16x128xf32>
      %210 = arith.addf %189, %209 : vector<16x128xf32>
      %c18 = arith.constant 18 : index
      %211 = memref.load %arg2[%c18] : memref<98xf32, #tpu.memory_space<smem>>
      %212 = vector.extract_strided_slice %200 {offsets = [2, 0], sizes = [16, 128], strides = [1, 1]} : vector<22x128xf32> to vector<16x128xf32>
      %213 = vector.broadcast %211 : f32 to vector<16x128xf32>
      %214 = arith.mulf %213, %212 : vector<16x128xf32>
      %215 = arith.addf %194, %214 : vector<16x128xf32>
      %c25 = arith.constant 25 : index
      %216 = memref.load %arg2[%c25] : memref<98xf32, #tpu.memory_space<smem>>
      %217 = vector.extract_strided_slice %200 {offsets = [3, 0], sizes = [16, 128], strides = [1, 1]} : vector<22x128xf32> to vector<16x128xf32>
      %218 = vector.broadcast %216 : f32 to vector<16x128xf32>
      %219 = arith.mulf %218, %217 : vector<16x128xf32>
      %220 = arith.addf %199, %219 : vector<16x128xf32>
      %c32 = arith.constant 32 : index
      %221 = memref.load %arg2[%c32] : memref<98xf32, #tpu.memory_space<smem>>
      %222 = vector.extract_strided_slice %200 {offsets = [4, 0], sizes = [16, 128], strides = [1, 1]} : vector<22x128xf32> to vector<16x128xf32>
      %223 = vector.broadcast %221 : f32 to vector<16x128xf32>
      %224 = arith.mulf %223, %222 : vector<16x128xf32>
      %225 = arith.addf %205, %224 : vector<16x128xf32>
      %c39 = arith.constant 39 : index
      %226 = memref.load %arg2[%c39] : memref<98xf32, #tpu.memory_space<smem>>
      %227 = vector.extract_strided_slice %200 {offsets = [5, 0], sizes = [16, 128], strides = [1, 1]} : vector<22x128xf32> to vector<16x128xf32>
      %228 = vector.broadcast %226 : f32 to vector<16x128xf32>
      %229 = arith.mulf %228, %227 : vector<16x128xf32>
      %230 = arith.addf %210, %229 : vector<16x128xf32>
      %c46 = arith.constant 46 : index
      %231 = memref.load %arg2[%c46] : memref<98xf32, #tpu.memory_space<smem>>
      %232 = vector.extract_strided_slice %200 {offsets = [6, 0], sizes = [16, 128], strides = [1, 1]} : vector<22x128xf32> to vector<16x128xf32>
      %233 = vector.broadcast %231 : f32 to vector<16x128xf32>
      %234 = arith.mulf %233, %232 : vector<16x128xf32>
      %235 = arith.addf %215, %234 : vector<16x128xf32>
      %236 = vector.extract_strided_slice %55 {offsets = [0, 5], sizes = [22, 128], strides = [1, 1]} : vector<22x256xf32> to vector<22x128xf32>
      %c5 = arith.constant 5 : index
      %237 = memref.load %arg2[%c5] : memref<98xf32, #tpu.memory_space<smem>>
      %238 = vector.extract_strided_slice %236 {offsets = [0, 0], sizes = [16, 128], strides = [1, 1]} : vector<22x128xf32> to vector<16x128xf32>
      %239 = vector.broadcast %237 : f32 to vector<16x128xf32>
      %240 = arith.mulf %239, %238 : vector<16x128xf32>
      %241 = arith.addf %220, %240 : vector<16x128xf32>
      %c12 = arith.constant 12 : index
      %242 = memref.load %arg2[%c12] : memref<98xf32, #tpu.memory_space<smem>>
      %243 = vector.extract_strided_slice %236 {offsets = [1, 0], sizes = [16, 128], strides = [1, 1]} : vector<22x128xf32> to vector<16x128xf32>
      %244 = vector.broadcast %242 : f32 to vector<16x128xf32>
      %245 = arith.mulf %244, %243 : vector<16x128xf32>
      %246 = arith.addf %225, %245 : vector<16x128xf32>
      %c19 = arith.constant 19 : index
      %247 = memref.load %arg2[%c19] : memref<98xf32, #tpu.memory_space<smem>>
      %248 = vector.extract_strided_slice %236 {offsets = [2, 0], sizes = [16, 128], strides = [1, 1]} : vector<22x128xf32> to vector<16x128xf32>
      %249 = vector.broadcast %247 : f32 to vector<16x128xf32>
      %250 = arith.mulf %249, %248 : vector<16x128xf32>
      %251 = arith.addf %230, %250 : vector<16x128xf32>
      %c26 = arith.constant 26 : index
      %252 = memref.load %arg2[%c26] : memref<98xf32, #tpu.memory_space<smem>>
      %253 = vector.extract_strided_slice %236 {offsets = [3, 0], sizes = [16, 128], strides = [1, 1]} : vector<22x128xf32> to vector<16x128xf32>
      %254 = vector.broadcast %252 : f32 to vector<16x128xf32>
      %255 = arith.mulf %254, %253 : vector<16x128xf32>
      %256 = arith.addf %235, %255 : vector<16x128xf32>
      %c33 = arith.constant 33 : index
      %257 = memref.load %arg2[%c33] : memref<98xf32, #tpu.memory_space<smem>>
      %258 = vector.extract_strided_slice %236 {offsets = [4, 0], sizes = [16, 128], strides = [1, 1]} : vector<22x128xf32> to vector<16x128xf32>
      %259 = vector.broadcast %257 : f32 to vector<16x128xf32>
      %260 = arith.mulf %259, %258 : vector<16x128xf32>
      %261 = arith.addf %241, %260 : vector<16x128xf32>
      %c40 = arith.constant 40 : index
      %262 = memref.load %arg2[%c40] : memref<98xf32, #tpu.memory_space<smem>>
      %263 = vector.extract_strided_slice %236 {offsets = [5, 0], sizes = [16, 128], strides = [1, 1]} : vector<22x128xf32> to vector<16x128xf32>
      %264 = vector.broadcast %262 : f32 to vector<16x128xf32>
      %265 = arith.mulf %264, %263 : vector<16x128xf32>
      %266 = arith.addf %246, %265 : vector<16x128xf32>
      %c47 = arith.constant 47 : index
      %267 = memref.load %arg2[%c47] : memref<98xf32, #tpu.memory_space<smem>>
      %268 = vector.extract_strided_slice %236 {offsets = [6, 0], sizes = [16, 128], strides = [1, 1]} : vector<22x128xf32> to vector<16x128xf32>
      %269 = vector.broadcast %267 : f32 to vector<16x128xf32>
      %270 = arith.mulf %269, %268 : vector<16x128xf32>
      %271 = arith.addf %251, %270 : vector<16x128xf32>
      %272 = vector.extract_strided_slice %55 {offsets = [0, 6], sizes = [22, 128], strides = [1, 1]} : vector<22x256xf32> to vector<22x128xf32>
      %c6 = arith.constant 6 : index
      %273 = memref.load %arg2[%c6] : memref<98xf32, #tpu.memory_space<smem>>
      %274 = vector.extract_strided_slice %272 {offsets = [0, 0], sizes = [16, 128], strides = [1, 1]} : vector<22x128xf32> to vector<16x128xf32>
      %275 = vector.broadcast %273 : f32 to vector<16x128xf32>
      %276 = arith.mulf %275, %274 : vector<16x128xf32>
      %277 = arith.addf %256, %276 : vector<16x128xf32>
      %c13 = arith.constant 13 : index
      %278 = memref.load %arg2[%c13] : memref<98xf32, #tpu.memory_space<smem>>
      %279 = vector.extract_strided_slice %272 {offsets = [1, 0], sizes = [16, 128], strides = [1, 1]} : vector<22x128xf32> to vector<16x128xf32>
      %280 = vector.broadcast %278 : f32 to vector<16x128xf32>
      %281 = arith.mulf %280, %279 : vector<16x128xf32>
      %282 = arith.addf %261, %281 : vector<16x128xf32>
      %c20 = arith.constant 20 : index
      %283 = memref.load %arg2[%c20] : memref<98xf32, #tpu.memory_space<smem>>
      %284 = vector.extract_strided_slice %272 {offsets = [2, 0], sizes = [16, 128], strides = [1, 1]} : vector<22x128xf32> to vector<16x128xf32>
      %285 = vector.broadcast %283 : f32 to vector<16x128xf32>
      %286 = arith.mulf %285, %284 : vector<16x128xf32>
      %287 = arith.addf %266, %286 : vector<16x128xf32>
      %c27 = arith.constant 27 : index
      %288 = memref.load %arg2[%c27] : memref<98xf32, #tpu.memory_space<smem>>
      %289 = vector.extract_strided_slice %272 {offsets = [3, 0], sizes = [16, 128], strides = [1, 1]} : vector<22x128xf32> to vector<16x128xf32>
      %290 = vector.broadcast %288 : f32 to vector<16x128xf32>
      %291 = arith.mulf %290, %289 : vector<16x128xf32>
      %292 = arith.addf %271, %291 : vector<16x128xf32>
      %c34 = arith.constant 34 : index
      %293 = memref.load %arg2[%c34] : memref<98xf32, #tpu.memory_space<smem>>
      %294 = vector.extract_strided_slice %272 {offsets = [4, 0], sizes = [16, 128], strides = [1, 1]} : vector<22x128xf32> to vector<16x128xf32>
      %295 = vector.broadcast %293 : f32 to vector<16x128xf32>
      %296 = arith.mulf %295, %294 : vector<16x128xf32>
      %297 = arith.addf %277, %296 : vector<16x128xf32>
      %c41 = arith.constant 41 : index
      %298 = memref.load %arg2[%c41] : memref<98xf32, #tpu.memory_space<smem>>
      %299 = vector.extract_strided_slice %272 {offsets = [5, 0], sizes = [16, 128], strides = [1, 1]} : vector<22x128xf32> to vector<16x128xf32>
      %300 = vector.broadcast %298 : f32 to vector<16x128xf32>
      %301 = arith.mulf %300, %299 : vector<16x128xf32>
      %302 = arith.addf %282, %301 : vector<16x128xf32>
      %c48 = arith.constant 48 : index
      %303 = memref.load %arg2[%c48] : memref<98xf32, #tpu.memory_space<smem>>
      %304 = vector.extract_strided_slice %272 {offsets = [6, 0], sizes = [16, 128], strides = [1, 1]} : vector<22x128xf32> to vector<16x128xf32>
      %305 = vector.broadcast %303 : f32 to vector<16x128xf32>
      %306 = arith.mulf %305, %304 : vector<16x128xf32>
      %307 = arith.addf %287, %306 : vector<16x128xf32>
      %c1_51 = arith.constant 1 : index
      %c0_52 = arith.constant 0 : index
      %c0_53 = arith.constant 0 : index
      %308 = vector.load %arg7[%c1_51, %c0_52, %c0_53] : memref<2x22x256xf32, #tpu.memory_space<vmem>>, vector<1x22x256xf32>
      %309 = vector.shape_cast %308 : vector<1x22x256xf32> to vector<22x256xf32>
      %310 = vector.extract_strided_slice %309 {offsets = [0, 0], sizes = [22, 128], strides = [1, 1]} : vector<22x256xf32> to vector<22x128xf32>
      %c49 = arith.constant 49 : index
      %311 = memref.load %arg2[%c49] : memref<98xf32, #tpu.memory_space<smem>>
      %312 = vector.extract_strided_slice %310 {offsets = [0, 0], sizes = [16, 128], strides = [1, 1]} : vector<22x128xf32> to vector<16x128xf32>
      %313 = vector.broadcast %311 : f32 to vector<16x128xf32>
      %314 = arith.mulf %313, %312 : vector<16x128xf32>
      %315 = arith.addf %292, %314 : vector<16x128xf32>
      %c56 = arith.constant 56 : index
      %316 = memref.load %arg2[%c56] : memref<98xf32, #tpu.memory_space<smem>>
      %317 = vector.extract_strided_slice %310 {offsets = [1, 0], sizes = [16, 128], strides = [1, 1]} : vector<22x128xf32> to vector<16x128xf32>
      %318 = vector.broadcast %316 : f32 to vector<16x128xf32>
      %319 = arith.mulf %318, %317 : vector<16x128xf32>
      %320 = arith.addf %297, %319 : vector<16x128xf32>
      %c63 = arith.constant 63 : index
      %321 = memref.load %arg2[%c63] : memref<98xf32, #tpu.memory_space<smem>>
      %322 = vector.extract_strided_slice %310 {offsets = [2, 0], sizes = [16, 128], strides = [1, 1]} : vector<22x128xf32> to vector<16x128xf32>
      %323 = vector.broadcast %321 : f32 to vector<16x128xf32>
      %324 = arith.mulf %323, %322 : vector<16x128xf32>
      %325 = arith.addf %302, %324 : vector<16x128xf32>
      %c70 = arith.constant 70 : index
      %326 = memref.load %arg2[%c70] : memref<98xf32, #tpu.memory_space<smem>>
      %327 = vector.extract_strided_slice %310 {offsets = [3, 0], sizes = [16, 128], strides = [1, 1]} : vector<22x128xf32> to vector<16x128xf32>
      %328 = vector.broadcast %326 : f32 to vector<16x128xf32>
      %329 = arith.mulf %328, %327 : vector<16x128xf32>
      %330 = arith.addf %307, %329 : vector<16x128xf32>
      %c77 = arith.constant 77 : index
      %331 = memref.load %arg2[%c77] : memref<98xf32, #tpu.memory_space<smem>>
      %332 = vector.extract_strided_slice %310 {offsets = [4, 0], sizes = [16, 128], strides = [1, 1]} : vector<22x128xf32> to vector<16x128xf32>
      %333 = vector.broadcast %331 : f32 to vector<16x128xf32>
      %334 = arith.mulf %333, %332 : vector<16x128xf32>
      %335 = arith.addf %315, %334 : vector<16x128xf32>
      %c84 = arith.constant 84 : index
      %336 = memref.load %arg2[%c84] : memref<98xf32, #tpu.memory_space<smem>>
      %337 = vector.extract_strided_slice %310 {offsets = [5, 0], sizes = [16, 128], strides = [1, 1]} : vector<22x128xf32> to vector<16x128xf32>
      %338 = vector.broadcast %336 : f32 to vector<16x128xf32>
      %339 = arith.mulf %338, %337 : vector<16x128xf32>
      %340 = arith.addf %320, %339 : vector<16x128xf32>
      %c91 = arith.constant 91 : index
      %341 = memref.load %arg2[%c91] : memref<98xf32, #tpu.memory_space<smem>>
      %342 = vector.extract_strided_slice %310 {offsets = [6, 0], sizes = [16, 128], strides = [1, 1]} : vector<22x128xf32> to vector<16x128xf32>
      %343 = vector.broadcast %341 : f32 to vector<16x128xf32>
      %344 = arith.mulf %343, %342 : vector<16x128xf32>
      %345 = arith.addf %325, %344 : vector<16x128xf32>
      %346 = vector.extract_strided_slice %309 {offsets = [0, 1], sizes = [22, 128], strides = [1, 1]} : vector<22x256xf32> to vector<22x128xf32>
      %c50 = arith.constant 50 : index
      %347 = memref.load %arg2[%c50] : memref<98xf32, #tpu.memory_space<smem>>
      %348 = vector.extract_strided_slice %346 {offsets = [0, 0], sizes = [16, 128], strides = [1, 1]} : vector<22x128xf32> to vector<16x128xf32>
      %349 = vector.broadcast %347 : f32 to vector<16x128xf32>
      %350 = arith.mulf %349, %348 : vector<16x128xf32>
      %351 = arith.addf %330, %350 : vector<16x128xf32>
      %c57 = arith.constant 57 : index
      %352 = memref.load %arg2[%c57] : memref<98xf32, #tpu.memory_space<smem>>
      %353 = vector.extract_strided_slice %346 {offsets = [1, 0], sizes = [16, 128], strides = [1, 1]} : vector<22x128xf32> to vector<16x128xf32>
      %354 = vector.broadcast %352 : f32 to vector<16x128xf32>
      %355 = arith.mulf %354, %353 : vector<16x128xf32>
      %356 = arith.addf %335, %355 : vector<16x128xf32>
      %c64 = arith.constant 64 : index
      %357 = memref.load %arg2[%c64] : memref<98xf32, #tpu.memory_space<smem>>
      %358 = vector.extract_strided_slice %346 {offsets = [2, 0], sizes = [16, 128], strides = [1, 1]} : vector<22x128xf32> to vector<16x128xf32>
      %359 = vector.broadcast %357 : f32 to vector<16x128xf32>
      %360 = arith.mulf %359, %358 : vector<16x128xf32>
      %361 = arith.addf %340, %360 : vector<16x128xf32>
      %c71 = arith.constant 71 : index
      %362 = memref.load %arg2[%c71] : memref<98xf32, #tpu.memory_space<smem>>
      %363 = vector.extract_strided_slice %346 {offsets = [3, 0], sizes = [16, 128], strides = [1, 1]} : vector<22x128xf32> to vector<16x128xf32>
      %364 = vector.broadcast %362 : f32 to vector<16x128xf32>
      %365 = arith.mulf %364, %363 : vector<16x128xf32>
      %366 = arith.addf %345, %365 : vector<16x128xf32>
      %c78 = arith.constant 78 : index
      %367 = memref.load %arg2[%c78] : memref<98xf32, #tpu.memory_space<smem>>
      %368 = vector.extract_strided_slice %346 {offsets = [4, 0], sizes = [16, 128], strides = [1, 1]} : vector<22x128xf32> to vector<16x128xf32>
      %369 = vector.broadcast %367 : f32 to vector<16x128xf32>
      %370 = arith.mulf %369, %368 : vector<16x128xf32>
      %371 = arith.addf %351, %370 : vector<16x128xf32>
      %c85 = arith.constant 85 : index
      %372 = memref.load %arg2[%c85] : memref<98xf32, #tpu.memory_space<smem>>
      %373 = vector.extract_strided_slice %346 {offsets = [5, 0], sizes = [16, 128], strides = [1, 1]} : vector<22x128xf32> to vector<16x128xf32>
      %374 = vector.broadcast %372 : f32 to vector<16x128xf32>
      %375 = arith.mulf %374, %373 : vector<16x128xf32>
      %376 = arith.addf %356, %375 : vector<16x128xf32>
      %c92 = arith.constant 92 : index
      %377 = memref.load %arg2[%c92] : memref<98xf32, #tpu.memory_space<smem>>
      %378 = vector.extract_strided_slice %346 {offsets = [6, 0], sizes = [16, 128], strides = [1, 1]} : vector<22x128xf32> to vector<16x128xf32>
      %379 = vector.broadcast %377 : f32 to vector<16x128xf32>
      %380 = arith.mulf %379, %378 : vector<16x128xf32>
      %381 = arith.addf %361, %380 : vector<16x128xf32>
      %382 = vector.extract_strided_slice %309 {offsets = [0, 2], sizes = [22, 128], strides = [1, 1]} : vector<22x256xf32> to vector<22x128xf32>
      %c51 = arith.constant 51 : index
      %383 = memref.load %arg2[%c51] : memref<98xf32, #tpu.memory_space<smem>>
      %384 = vector.extract_strided_slice %382 {offsets = [0, 0], sizes = [16, 128], strides = [1, 1]} : vector<22x128xf32> to vector<16x128xf32>
      %385 = vector.broadcast %383 : f32 to vector<16x128xf32>
      %386 = arith.mulf %385, %384 : vector<16x128xf32>
      %387 = arith.addf %366, %386 : vector<16x128xf32>
      %c58 = arith.constant 58 : index
      %388 = memref.load %arg2[%c58] : memref<98xf32, #tpu.memory_space<smem>>
      %389 = vector.extract_strided_slice %382 {offsets = [1, 0], sizes = [16, 128], strides = [1, 1]} : vector<22x128xf32> to vector<16x128xf32>
      %390 = vector.broadcast %388 : f32 to vector<16x128xf32>
      %391 = arith.mulf %390, %389 : vector<16x128xf32>
      %392 = arith.addf %371, %391 : vector<16x128xf32>
      %c65 = arith.constant 65 : index
      %393 = memref.load %arg2[%c65] : memref<98xf32, #tpu.memory_space<smem>>
      %394 = vector.extract_strided_slice %382 {offsets = [2, 0], sizes = [16, 128], strides = [1, 1]} : vector<22x128xf32> to vector<16x128xf32>
      %395 = vector.broadcast %393 : f32 to vector<16x128xf32>
      %396 = arith.mulf %395, %394 : vector<16x128xf32>
      %397 = arith.addf %376, %396 : vector<16x128xf32>
      %c72 = arith.constant 72 : index
      %398 = memref.load %arg2[%c72] : memref<98xf32, #tpu.memory_space<smem>>
      %399 = vector.extract_strided_slice %382 {offsets = [3, 0], sizes = [16, 128], strides = [1, 1]} : vector<22x128xf32> to vector<16x128xf32>
      %400 = vector.broadcast %398 : f32 to vector<16x128xf32>
      %401 = arith.mulf %400, %399 : vector<16x128xf32>
      %402 = arith.addf %381, %401 : vector<16x128xf32>
      %c79 = arith.constant 79 : index
      %403 = memref.load %arg2[%c79] : memref<98xf32, #tpu.memory_space<smem>>
      %404 = vector.extract_strided_slice %382 {offsets = [4, 0], sizes = [16, 128], strides = [1, 1]} : vector<22x128xf32> to vector<16x128xf32>
      %405 = vector.broadcast %403 : f32 to vector<16x128xf32>
      %406 = arith.mulf %405, %404 : vector<16x128xf32>
      %407 = arith.addf %387, %406 : vector<16x128xf32>
      %c86 = arith.constant 86 : index
      %408 = memref.load %arg2[%c86] : memref<98xf32, #tpu.memory_space<smem>>
      %409 = vector.extract_strided_slice %382 {offsets = [5, 0], sizes = [16, 128], strides = [1, 1]} : vector<22x128xf32> to vector<16x128xf32>
      %410 = vector.broadcast %408 : f32 to vector<16x128xf32>
      %411 = arith.mulf %410, %409 : vector<16x128xf32>
      %412 = arith.addf %392, %411 : vector<16x128xf32>
      %c93 = arith.constant 93 : index
      %413 = memref.load %arg2[%c93] : memref<98xf32, #tpu.memory_space<smem>>
      %414 = vector.extract_strided_slice %382 {offsets = [6, 0], sizes = [16, 128], strides = [1, 1]} : vector<22x128xf32> to vector<16x128xf32>
      %415 = vector.broadcast %413 : f32 to vector<16x128xf32>
      %416 = arith.mulf %415, %414 : vector<16x128xf32>
      %417 = arith.addf %397, %416 : vector<16x128xf32>
      %418 = vector.extract_strided_slice %309 {offsets = [0, 3], sizes = [22, 128], strides = [1, 1]} : vector<22x256xf32> to vector<22x128xf32>
      %c52 = arith.constant 52 : index
      %419 = memref.load %arg2[%c52] : memref<98xf32, #tpu.memory_space<smem>>
      %420 = vector.extract_strided_slice %418 {offsets = [0, 0], sizes = [16, 128], strides = [1, 1]} : vector<22x128xf32> to vector<16x128xf32>
      %421 = vector.broadcast %419 : f32 to vector<16x128xf32>
      %422 = arith.mulf %421, %420 : vector<16x128xf32>
      %423 = arith.addf %402, %422 : vector<16x128xf32>
      %c59 = arith.constant 59 : index
      %424 = memref.load %arg2[%c59] : memref<98xf32, #tpu.memory_space<smem>>
      %425 = vector.extract_strided_slice %418 {offsets = [1, 0], sizes = [16, 128], strides = [1, 1]} : vector<22x128xf32> to vector<16x128xf32>
      %426 = vector.broadcast %424 : f32 to vector<16x128xf32>
      %427 = arith.mulf %426, %425 : vector<16x128xf32>
      %428 = arith.addf %407, %427 : vector<16x128xf32>
      %c66 = arith.constant 66 : index
      %429 = memref.load %arg2[%c66] : memref<98xf32, #tpu.memory_space<smem>>
      %430 = vector.extract_strided_slice %418 {offsets = [2, 0], sizes = [16, 128], strides = [1, 1]} : vector<22x128xf32> to vector<16x128xf32>
      %431 = vector.broadcast %429 : f32 to vector<16x128xf32>
      %432 = arith.mulf %431, %430 : vector<16x128xf32>
      %433 = arith.addf %412, %432 : vector<16x128xf32>
      %c73 = arith.constant 73 : index
      %434 = memref.load %arg2[%c73] : memref<98xf32, #tpu.memory_space<smem>>
      %435 = vector.extract_strided_slice %418 {offsets = [3, 0], sizes = [16, 128], strides = [1, 1]} : vector<22x128xf32> to vector<16x128xf32>
      %436 = vector.broadcast %434 : f32 to vector<16x128xf32>
      %437 = arith.mulf %436, %435 : vector<16x128xf32>
      %438 = arith.addf %417, %437 : vector<16x128xf32>
      %c80 = arith.constant 80 : index
      %439 = memref.load %arg2[%c80] : memref<98xf32, #tpu.memory_space<smem>>
      %440 = vector.extract_strided_slice %418 {offsets = [4, 0], sizes = [16, 128], strides = [1, 1]} : vector<22x128xf32> to vector<16x128xf32>
      %441 = vector.broadcast %439 : f32 to vector<16x128xf32>
      %442 = arith.mulf %441, %440 : vector<16x128xf32>
      %443 = arith.addf %423, %442 : vector<16x128xf32>
      %c87 = arith.constant 87 : index
      %444 = memref.load %arg2[%c87] : memref<98xf32, #tpu.memory_space<smem>>
      %445 = vector.extract_strided_slice %418 {offsets = [5, 0], sizes = [16, 128], strides = [1, 1]} : vector<22x128xf32> to vector<16x128xf32>
      %446 = vector.broadcast %444 : f32 to vector<16x128xf32>
      %447 = arith.mulf %446, %445 : vector<16x128xf32>
      %448 = arith.addf %428, %447 : vector<16x128xf32>
      %c94 = arith.constant 94 : index
      %449 = memref.load %arg2[%c94] : memref<98xf32, #tpu.memory_space<smem>>
      %450 = vector.extract_strided_slice %418 {offsets = [6, 0], sizes = [16, 128], strides = [1, 1]} : vector<22x128xf32> to vector<16x128xf32>
      %451 = vector.broadcast %449 : f32 to vector<16x128xf32>
      %452 = arith.mulf %451, %450 : vector<16x128xf32>
      %453 = arith.addf %433, %452 : vector<16x128xf32>
      %454 = vector.extract_strided_slice %309 {offsets = [0, 4], sizes = [22, 128], strides = [1, 1]} : vector<22x256xf32> to vector<22x128xf32>
      %c53 = arith.constant 53 : index
      %455 = memref.load %arg2[%c53] : memref<98xf32, #tpu.memory_space<smem>>
      %456 = vector.extract_strided_slice %454 {offsets = [0, 0], sizes = [16, 128], strides = [1, 1]} : vector<22x128xf32> to vector<16x128xf32>
      %457 = vector.broadcast %455 : f32 to vector<16x128xf32>
      %458 = arith.mulf %457, %456 : vector<16x128xf32>
      %459 = arith.addf %438, %458 : vector<16x128xf32>
      %c60 = arith.constant 60 : index
      %460 = memref.load %arg2[%c60] : memref<98xf32, #tpu.memory_space<smem>>
      %461 = vector.extract_strided_slice %454 {offsets = [1, 0], sizes = [16, 128], strides = [1, 1]} : vector<22x128xf32> to vector<16x128xf32>
      %462 = vector.broadcast %460 : f32 to vector<16x128xf32>
      %463 = arith.mulf %462, %461 : vector<16x128xf32>
      %464 = arith.addf %443, %463 : vector<16x128xf32>
      %c67 = arith.constant 67 : index
      %465 = memref.load %arg2[%c67] : memref<98xf32, #tpu.memory_space<smem>>
      %466 = vector.extract_strided_slice %454 {offsets = [2, 0], sizes = [16, 128], strides = [1, 1]} : vector<22x128xf32> to vector<16x128xf32>
      %467 = vector.broadcast %465 : f32 to vector<16x128xf32>
      %468 = arith.mulf %467, %466 : vector<16x128xf32>
      %469 = arith.addf %448, %468 : vector<16x128xf32>
      %c74 = arith.constant 74 : index
      %470 = memref.load %arg2[%c74] : memref<98xf32, #tpu.memory_space<smem>>
      %471 = vector.extract_strided_slice %454 {offsets = [3, 0], sizes = [16, 128], strides = [1, 1]} : vector<22x128xf32> to vector<16x128xf32>
      %472 = vector.broadcast %470 : f32 to vector<16x128xf32>
      %473 = arith.mulf %472, %471 : vector<16x128xf32>
      %474 = arith.addf %453, %473 : vector<16x128xf32>
      %c81 = arith.constant 81 : index
      %475 = memref.load %arg2[%c81] : memref<98xf32, #tpu.memory_space<smem>>
      %476 = vector.extract_strided_slice %454 {offsets = [4, 0], sizes = [16, 128], strides = [1, 1]} : vector<22x128xf32> to vector<16x128xf32>
      %477 = vector.broadcast %475 : f32 to vector<16x128xf32>
      %478 = arith.mulf %477, %476 : vector<16x128xf32>
      %479 = arith.addf %459, %478 : vector<16x128xf32>
      %c88 = arith.constant 88 : index
      %480 = memref.load %arg2[%c88] : memref<98xf32, #tpu.memory_space<smem>>
      %481 = vector.extract_strided_slice %454 {offsets = [5, 0], sizes = [16, 128], strides = [1, 1]} : vector<22x128xf32> to vector<16x128xf32>
      %482 = vector.broadcast %480 : f32 to vector<16x128xf32>
      %483 = arith.mulf %482, %481 : vector<16x128xf32>
      %484 = arith.addf %464, %483 : vector<16x128xf32>
      %c95 = arith.constant 95 : index
      %485 = memref.load %arg2[%c95] : memref<98xf32, #tpu.memory_space<smem>>
      %486 = vector.extract_strided_slice %454 {offsets = [6, 0], sizes = [16, 128], strides = [1, 1]} : vector<22x128xf32> to vector<16x128xf32>
      %487 = vector.broadcast %485 : f32 to vector<16x128xf32>
      %488 = arith.mulf %487, %486 : vector<16x128xf32>
      %489 = arith.addf %469, %488 : vector<16x128xf32>
      %490 = vector.extract_strided_slice %309 {offsets = [0, 5], sizes = [22, 128], strides = [1, 1]} : vector<22x256xf32> to vector<22x128xf32>
      %c54 = arith.constant 54 : index
      %491 = memref.load %arg2[%c54] : memref<98xf32, #tpu.memory_space<smem>>
      %492 = vector.extract_strided_slice %490 {offsets = [0, 0], sizes = [16, 128], strides = [1, 1]} : vector<22x128xf32> to vector<16x128xf32>
      %493 = vector.broadcast %491 : f32 to vector<16x128xf32>
      %494 = arith.mulf %493, %492 : vector<16x128xf32>
      %495 = arith.addf %474, %494 : vector<16x128xf32>
      %c61 = arith.constant 61 : index
      %496 = memref.load %arg2[%c61] : memref<98xf32, #tpu.memory_space<smem>>
      %497 = vector.extract_strided_slice %490 {offsets = [1, 0], sizes = [16, 128], strides = [1, 1]} : vector<22x128xf32> to vector<16x128xf32>
      %498 = vector.broadcast %496 : f32 to vector<16x128xf32>
      %499 = arith.mulf %498, %497 : vector<16x128xf32>
      %500 = arith.addf %479, %499 : vector<16x128xf32>
      %c68 = arith.constant 68 : index
      %501 = memref.load %arg2[%c68] : memref<98xf32, #tpu.memory_space<smem>>
      %502 = vector.extract_strided_slice %490 {offsets = [2, 0], sizes = [16, 128], strides = [1, 1]} : vector<22x128xf32> to vector<16x128xf32>
      %503 = vector.broadcast %501 : f32 to vector<16x128xf32>
      %504 = arith.mulf %503, %502 : vector<16x128xf32>
      %505 = arith.addf %484, %504 : vector<16x128xf32>
      %c75 = arith.constant 75 : index
      %506 = memref.load %arg2[%c75] : memref<98xf32, #tpu.memory_space<smem>>
      %507 = vector.extract_strided_slice %490 {offsets = [3, 0], sizes = [16, 128], strides = [1, 1]} : vector<22x128xf32> to vector<16x128xf32>
      %508 = vector.broadcast %506 : f32 to vector<16x128xf32>
      %509 = arith.mulf %508, %507 : vector<16x128xf32>
      %510 = arith.addf %489, %509 : vector<16x128xf32>
      %c82 = arith.constant 82 : index
      %511 = memref.load %arg2[%c82] : memref<98xf32, #tpu.memory_space<smem>>
      %512 = vector.extract_strided_slice %490 {offsets = [4, 0], sizes = [16, 128], strides = [1, 1]} : vector<22x128xf32> to vector<16x128xf32>
      %513 = vector.broadcast %511 : f32 to vector<16x128xf32>
      %514 = arith.mulf %513, %512 : vector<16x128xf32>
      %515 = arith.addf %495, %514 : vector<16x128xf32>
      %c89 = arith.constant 89 : index
      %516 = memref.load %arg2[%c89] : memref<98xf32, #tpu.memory_space<smem>>
      %517 = vector.extract_strided_slice %490 {offsets = [5, 0], sizes = [16, 128], strides = [1, 1]} : vector<22x128xf32> to vector<16x128xf32>
      %518 = vector.broadcast %516 : f32 to vector<16x128xf32>
      %519 = arith.mulf %518, %517 : vector<16x128xf32>
      %520 = arith.addf %500, %519 : vector<16x128xf32>
      %c96 = arith.constant 96 : index
      %521 = memref.load %arg2[%c96] : memref<98xf32, #tpu.memory_space<smem>>
      %522 = vector.extract_strided_slice %490 {offsets = [6, 0], sizes = [16, 128], strides = [1, 1]} : vector<22x128xf32> to vector<16x128xf32>
      %523 = vector.broadcast %521 : f32 to vector<16x128xf32>
      %524 = arith.mulf %523, %522 : vector<16x128xf32>
      %525 = arith.addf %505, %524 : vector<16x128xf32>
      %526 = vector.extract_strided_slice %309 {offsets = [0, 6], sizes = [22, 128], strides = [1, 1]} : vector<22x256xf32> to vector<22x128xf32>
      %c55 = arith.constant 55 : index
      %527 = memref.load %arg2[%c55] : memref<98xf32, #tpu.memory_space<smem>>
      %528 = vector.extract_strided_slice %526 {offsets = [0, 0], sizes = [16, 128], strides = [1, 1]} : vector<22x128xf32> to vector<16x128xf32>
      %529 = vector.broadcast %527 : f32 to vector<16x128xf32>
      %530 = arith.mulf %529, %528 : vector<16x128xf32>
      %531 = arith.addf %510, %530 : vector<16x128xf32>
      %c62 = arith.constant 62 : index
      %532 = memref.load %arg2[%c62] : memref<98xf32, #tpu.memory_space<smem>>
      %533 = vector.extract_strided_slice %526 {offsets = [1, 0], sizes = [16, 128], strides = [1, 1]} : vector<22x128xf32> to vector<16x128xf32>
      %534 = vector.broadcast %532 : f32 to vector<16x128xf32>
      %535 = arith.mulf %534, %533 : vector<16x128xf32>
      %536 = arith.addf %515, %535 : vector<16x128xf32>
      %c69 = arith.constant 69 : index
      %537 = memref.load %arg2[%c69] : memref<98xf32, #tpu.memory_space<smem>>
      %538 = vector.extract_strided_slice %526 {offsets = [2, 0], sizes = [16, 128], strides = [1, 1]} : vector<22x128xf32> to vector<16x128xf32>
      %539 = vector.broadcast %537 : f32 to vector<16x128xf32>
      %540 = arith.mulf %539, %538 : vector<16x128xf32>
      %541 = arith.addf %520, %540 : vector<16x128xf32>
      %c76 = arith.constant 76 : index
      %542 = memref.load %arg2[%c76] : memref<98xf32, #tpu.memory_space<smem>>
      %543 = vector.extract_strided_slice %526 {offsets = [3, 0], sizes = [16, 128], strides = [1, 1]} : vector<22x128xf32> to vector<16x128xf32>
      %544 = vector.broadcast %542 : f32 to vector<16x128xf32>
      %545 = arith.mulf %544, %543 : vector<16x128xf32>
      %546 = arith.addf %525, %545 : vector<16x128xf32>
      %c83 = arith.constant 83 : index
      %547 = memref.load %arg2[%c83] : memref<98xf32, #tpu.memory_space<smem>>
      %548 = vector.extract_strided_slice %526 {offsets = [4, 0], sizes = [16, 128], strides = [1, 1]} : vector<22x128xf32> to vector<16x128xf32>
      %549 = vector.broadcast %547 : f32 to vector<16x128xf32>
      %550 = arith.mulf %549, %548 : vector<16x128xf32>
      %551 = arith.addf %531, %550 : vector<16x128xf32>
      %c90 = arith.constant 90 : index
      %552 = memref.load %arg2[%c90] : memref<98xf32, #tpu.memory_space<smem>>
      %553 = vector.extract_strided_slice %526 {offsets = [5, 0], sizes = [16, 128], strides = [1, 1]} : vector<22x128xf32> to vector<16x128xf32>
      %554 = vector.broadcast %552 : f32 to vector<16x128xf32>
      %555 = arith.mulf %554, %553 : vector<16x128xf32>
      %556 = arith.addf %536, %555 : vector<16x128xf32>
      %c97 = arith.constant 97 : index
      %557 = memref.load %arg2[%c97] : memref<98xf32, #tpu.memory_space<smem>>
      %558 = vector.extract_strided_slice %526 {offsets = [6, 0], sizes = [16, 128], strides = [1, 1]} : vector<22x128xf32> to vector<16x128xf32>
      %559 = vector.broadcast %557 : f32 to vector<16x128xf32>
      %560 = arith.mulf %559, %558 : vector<16x128xf32>
      %561 = arith.addf %541, %560 : vector<16x128xf32>
      %562 = arith.addf %556, %561 : vector<16x128xf32>
      %563 = arith.addf %546, %551 : vector<16x128xf32>
      %564 = arith.addf %562, %563 : vector<16x128xf32>
      %565 = arith.negf %564 : vector<16x128xf32>
      %566 = math.exp %565 : vector<16x128xf32>
      %cst_54 = arith.constant 1.000000e+00 : f32
      %567 = vector.broadcast %cst_54 : f32 to vector<16x128xf32>
      %568 = arith.addf %567, %566 : vector<16x128xf32>
      %569 = arith.divf %567, %568 : vector<16x128xf32>
      %570 = vector.extract_strided_slice %569 {offsets = [0, 0], sizes = [16, 16], strides = [1, 1]} : vector<16x128xf32> to vector<16x16xf32>
      %c0_55 = arith.constant 0 : index
      %c0_56 = arith.constant 0 : index
      %c0_57 = arith.constant 0 : index
      %c0_58 = arith.constant 0 : index
      %571 = vector.load %arg4[%c0_55, %c0_56, %c0_57, %c0_58] : memref<1x1x16x16xf32, #tpu.memory_space<vmem>>, vector<1x1x16x16xf32>
      %572 = vector.shape_cast %571 : vector<1x1x16x16xf32> to vector<16x16xf32>
      %573 = vector.shape_cast %570 : vector<16x16xf32> to vector<1x1x16x16xf32>
      tpu.vector_store %arg4[%c0_55, %c0_56, %c0_57, %c0_58], %573 {strides = array<i32>} : memref<1x1x16x16xf32, #tpu.memory_space<vmem>>, vector<1x1x16x16xf32>,
    } else {
    }
    return
  }
  func.func @transform_0(%arg0: i32, %arg1: i32) -> i32 {
    %c0_i32 = arith.constant 0 : i32
    %c0_i32_0 = arith.constant 0 : i32
    return %c0_i32 : i32
  }
  func.func @transform_1(%arg0: i32, %arg1: i32) -> (i32, i32, i32, i32) {
    %c0_i32 = arith.constant 0 : i32
    %c0_i32_0 = arith.constant 0 : i32
    %c0_i32_1 = arith.constant 0 : i32
    return %arg0, %arg1, %c0_i32, %c0_i32_0 : i32, i32, i32, i32
  }
  func.func @transform_2(%arg0: i32, %arg1: i32) -> (i32, i32, i32, i32) {
    %c0_i32 = arith.constant 0 : i32
    %c0_i32_0 = arith.constant 0 : i32
    %c0_i32_1 = arith.constant 0 : i32
    %c0_i32_2 = arith.constant 0 : i32
    return %arg0, %c0_i32, %c0_i32_0, %c0_i32_1 : i32, i32, i32, i32
  }
}

</mosaic_0001>

<bundles_post_ra>
// kernel: tpu_custom_call.1
= control target key start
LH: loop header
LB: loop body
LE: loop exit
PB: predicated region body
PF: predicated region fallthrough
CT: control target
= control target key end

     0   :  { %7 = vsyncpa [#allocation8], 0  ;;  %s8363_s0 = inlined_call_operand.hbm [shape: f32[98], index: 0, kind: input, shape index: {}]   ;;  %s8364_s1 = inlined_call_operand.hbm [shape: f32[2,4,16,16], index: 1, kind: input, shape index: {}]   ;;  %s8365_s2 = inlined_call_operand.hbm [shape: f32[2,1,16,16], index: 2, kind: output, shape index: {}]  }
   0x1   :  { %8 = vsyncpa [#allocation6], 0 }
   0x2   :  { %10 = vsyncpa [#allocation6 + $0x1], 0 }
   0x3   :  { %11 = vsyncpa [#allocation7], 0 }
   0x4   :  { %13 = vsyncpa [#allocation7 + $0x1], 0  ;;  %s4513_s9 = smov 0   ;;  %s4515_s10 = smov 0  }
   0x5   :  { %s4517_s11 = smov 0   ;;  %s4519_s12 = smov 0  }
   0x6   :  { %s4521_s13 = smov 0   ;;  %s4523_s14 = smov 0  }
   0x7 LB: > { %s4117_s15 = sadd.s32 4294967295, %s4480_s14   ;;  %s4118_s16 = sadd.s32 4294967294, %s4480_s14   ;;  %s4480_s14 = sphi %s4523_s14, %s19_s14   ;;  %s4476_s13 = sphi %s4521_s13, %s9236_s13   ;;  %s4472_s12 = sphi %s4519_s12, %s9235_s12   ;;  %s4468_s11 = sphi %s4517_s11, %s9234_s11   ;;  %s4464_s10 = sphi %s4515_s10, %s9233_s10   ;;  %s4460_s9 = sphi %s4513_s9, %s9232_s9  }
   0x8   : > { %s61_s17 = sadd.s32 1, %s4468_s11  ;;  %p68_p0 = scmp.ne.s32.totalorder %s4468_s11, %s4464_s10 }
   0x9   : > { %p69_p1 = scmp.eq.s32.totalorder %s4480_s14, 0  ;;  %p74_p2 = scmp.ne.s32.totalorder %s4464_s10, %s4460_s9 }
   0xa   : > { %p4551_p3 = scmp.eq.s32.totalorder %s4117_s15, 0  ;;  %p98_p4 = scmp.eq.s32.totalorder %s4117_s15, 1 }
   0xb   : > { %p70_p5 = por %p69_p1, %p68_p0  ;;  %p104_p6 = scmp.eq.s32.totalorder %s4118_s16, 1 }
   0xc   : > { %s8410_s18 = scalar_select %p4551_p3, 1, 0 }
   0xd   : > { %p4557_p7 = por %p4551_p3, %p74_p2  ;;  %p4561_p8 = por %p98_p4, %p68_p0 }
   0xe   : > { %p4565_p9 = por %p104_p6, %p74_p2  ;;  %p4119_p10 = scmp.ge.s32.totalorder %s4480_s14, 1 }
   0xf   : > { %s8411_s19 = scalar_select %p4557_p7, 1, 0 }
  0x10   : > { %s8412_s20 = scalar_select %p4561_p8, 1, 0 }
  0x11   : > { %s8413_s21 = scalar_select %p4565_p9, 1, 0 }
  0x12   : > { %p111_p11 = scmp.lt.s32.totalorder %s4480_s14, 3  ;;  %p4262_p1 = scmp.lt.s32.totalorder %s4480_s14, 2 }
  0x13   : > { %s133_s23 = sand.u32 1, %s4468_s11   ;;  %s31_s25 = sadd.s32 1, %s4476_s13 }
  0x14   : > { %p4572_p13 = pnand %p4119_p10, %p111_p11  ;;  %p4580_p0 = pnand %p4262_p1, %p70_p5 }
  0x15   : > { %s4122_s26 = sshll.u32 %s133_s23, 6  ;;  %p33_p4 = scmp.ge.s32.totalorder %s31_s25, 2 }
  0x16   : > { %p4249_p7 = pneg %p4572_p13  ;;  %s4351_s29 = scalar_lea.hbm %s8363_s0, 16 }
  0x17   : > { %p4352_p6 = scmp.ne.s32.totalorder %s8363_s0, %s4351_s29  ;;  %p4358_p5 = scmp.lt.u32.totalorder %s4351_s29, %s8363_s0 }
  0x18   : > { %p4250_p2 = pnand %p4249_p7, %p4551_p3 }
  0x1a   : > { %p4353_p10 = pneg %p4250_p2 }
  0x1c   : > { %p4354_p11 = pnand %p4353_p10, %p4352_p6 }
  0x1e   : > { %p4355_p12 = pneg %p4354_p11 }
  0x20   : > { %p4360_p1 = pnand %p4358_p5, %p4355_p12 }
  0x22   : > { %4363 = shalt.err (!%p4360_p1)
}
  0x23   : > { %s4482_s6 = smov [#allocation5]   ;;  %s9238_s25 = smov (%p33_p4, %s31_s25), 0 }
  0x24   : > { %4252 = dma.hbm_to_smem (!%p4250_p2), %s8363_s0, 16, %s4482_s6, [#allocation8]  }
  0x25   : > { %s4239_s15 = sshll.u32 %s4476_s13, 10  ;;  %s56_s16 = ssub.s32 %s4476_s13, %s9238_s25 }
  0x26   : > { %s4607_s29 = scalar_lea.hbm %s8364_s1, %s4239_s15  ;;  %p59_p7 = scmp.eq.s32.totalorder %s56_s16, 0 }
  0x27   : > { %s137_s30 = scalar_lea.vmem [#allocation9], %s4122_s26  ;;  %s4616_s5 = scalar_lea.sflag [#allocation6], %s133_s23 }
  0x28   : > { %s147_s3 = sshll.u32 %s137_s30, 4  ;;  %s4364_s6 = scalar_lea.hbm %s4607_s29, 1024  ;;  %s4609_s3 = int_to_ptr.vmem [resolvable:$true] %s147_s3 }
  0x29   : > { %s4614_s4 = scalar_select %p59_p7, %s4468_s11, %s61_s17  }
  0x2a   : > { %p4365_p12 = scmp.ne.s32.totalorder %s4607_s29, %s4364_s6  ;;  %p4366_p2 = pneg %p4580_p0 }
  0x2b   : > { %s4369_s26 = scalar_lea.hbm %s8364_s1, 2048  ;;  %p4370_p10 = scmp.lt.u32.totalorder %s4607_s29, %s8364_s1 }
  0x2c   : > { %p4367_p4 = pnand %p4366_p2, %p4365_p12  ;;  %p4371_p11 = scmp.lt.u32.totalorder %s4369_s26, %s4364_s6 }
  0x2d   : > { %p4373_p1 = scmp.lt.u32.totalorder %s4364_s6, %s4607_s29 }
  0x2e   : > { %p4368_p6 = pneg %p4367_p4  ;;  %p4372_p5 = por %p4371_p11, %p4370_p10 }
  0x30   : > { %p4374_p7 = por %p4373_p1, %p4372_p5 }
  0x32   : > { %p4375_p9 = pnand %p4374_p7, %p4368_p6 }
  0x34   : > { %4378 = shalt.err (!%p4375_p9)
}
  0x35   : > { %s4379_s17 = scalar_lea.vmem %s4609_s3, 1024  ;;  %s4483_s23 = smov [#allocation9]  }
  0x36   : > { %p4380_p12 = scmp.ne.s32.totalorder %s4609_s3, %s4379_s17  ;;  %s4384_s27 = sshll.u32 %s4483_s23, 4  ;;  %s4385_s27 = int_to_ptr.vmem [resolvable:$false] %s4384_s27 }
  0x37   : > { %s4386_s28 = scalar_lea.vmem %s4385_s27, 2048  ;;  %p4387_p3 = scmp.lt.s32.totalorder %s4609_s3, %s4385_s27 }
  0x38   : > { %p4382_p4 = pnand %p4380_p12, %p4366_p2  ;;  %p4388_p10 = scmp.lt.s32.totalorder %s4386_s28, %s4379_s17 }
  0x3a   : > { %p4383_p8 = pneg %p4382_p4  ;;  %p4389_p11 = por %p4388_p10, %p4387_p3 }
  0x3c   : > { %p4390_p5 = pnand %p4389_p11, %p4383_p8 }
  0x3e   : > { %4393 = shalt.err (!%p4390_p5)
}
  0x3f   : > { %s4484_s30 = smov 128   ;;  %s4485_s6 = smov 8  }
  0x40   : > { %4256 = dma.hbm_to_vmem [thread:$0]  (!%p4580_p0), %s4607_s29, 1024, %s4609_s3, %s4616_s5, %s4484_s30, %s4484_s30, %s4485_s6  }
  0x41   : > { %159 = sbr.rel (%p4572_p13) target bundleno = 1346 (0x542), region = 28 }
  0x48   : > { %p8416_p9 = scmp.ne.s32.totalorder %s8410_s18, 0 }
  0x4a   : > { %4447 = dma.done.wait (%p8416_p9), [#allocation8], 16  }
  0x4b   : > { %4449 = vsyncadd (%p8416_p9), [#allocation8], 4294967280  ;;  %s4651_s7 = sand.u32 1, %s4464_s10   ;;  %p8417_p3 = scmp.ne.s32.totalorder %s8411_s19, 0 }
  0x4c   : > { %s4127_s8 = sshll.u32 %s4651_s7, 6  ;;  %s166_s26 = scalar_lea.sflag [#allocation6], %s4651_s7 }
  0x4d   : > { %s4655_s15 = scalar_lea.vmem [#allocation9], %s4127_s8 }
  0x4e   : > { %4451 = dma.done.wait (%p8417_p3), %s166_s26, 1024  }
  0x4f   : > { %4453 = vsyncadd (%p8417_p3), %s166_s26, 4294966272 }
  0x50   : > { %174 = sfence }
  0x51   : > { %s4141_s22 = sld [smem:[#allocation5 + $0x1]]  ;;  %v4486_v0 = vmov 0.0   ;;  %s4142_s18 = sld [smem:[#allocation5 + $0x8]]  ;;  %vm196_vm0 = vcmask 130048   ;;  %v4487_v1 = vmov -inf   ;;  %v205_v4 = vld [vmem:[%s4655_s15] sm:$0xff] }
  0x52   : > { %241 = vst [vmem:[#allocation4 + $0x8] sm:$0xff] %v4486_v0  ;;  %240 = vst [vmem:[#allocation4] sm:$0xff] %v4486_v0  ;;  %v206_v5 = vld [vmem:[%s4655_s15 + $0x8] sm:$0xff]  ;;  %v4129_v7 = vld [vmem:[%s4655_s15 + $0x10] sm:$0xff]  ;;  %s4488_s19 = smov 127   ;;  %vm258_vm1 = vcmask 1042432  }
  0x53   : > { %242 = vst [vmem:[#allocation4 + $0x10] sm:$0xff] %v4486_v0  ;;  %244 = vst [vmem:[#allocation4 + $0x20] sm:$0x3f] %v4486_v0  ;;  %v4130_v8 = vld [vmem:[%s4655_s15 + $0x18] sm:$0xff]  ;;  %v4131_v18 = vld [vmem:[%s4655_s15 + $0x20] sm:$0xff]  ;;  %vm441_vm2 = vcmask 1046528  }
  0x54   : > { %245 = vst [vmem:[#allocation4 + $0x28] sm:$0x3f] %v4486_v0  ;;  %246 = vst [vmem:[#allocation4 + $0x30] sm:$0xff] %v4486_v0  ;;  %v4132_v19 = vld [vmem:[%s4655_s15 + $0x28] sm:$0xff]  ;;  %v4133_v24 = vld [vmem:[%s4655_s15 + $0x30] sm:$0xff]  ;;  %s4143_s24 = sld [smem:[#allocation5 + $0xf]] }
  0x55   : > { %248 = vst [vmem:[#allocation4 + $0x40] sm:$0xff] %v4486_v0  ;;  %250 = vst [vmem:[#allocation4 + $0x50] sm:$0x3f] %v4486_v0  ;;  %v4134_v25 = vld [vmem:[%s4655_s15 + $0x38] sm:$0xff]  ;;  %s4489_s29 = smov 3   ;;  %s4144_s3 = sld [smem:[#allocation5 + $0x16]] }
  0x56   : > { %251 = vst [vmem:[#allocation4 + $0x58] sm:$0x3f] %v4486_v0  ;;  %199 = vst.msk [vmem:[#allocation3] sm:$0xff] %vm196_vm0, %v4487_v1  ;;  %s4145_s5 = sld [smem:[#allocation5 + $0x1d]]  ;;  %s4146_s16 = sld [smem:[#allocation5 + $0x24]]  ;;  %vm694_vm3 = vcmask 1041408  }
  0x57   : > { %200 = vst.msk [vmem:[#allocation3 + $0x8] sm:$0xff] %vm196_vm0, %v4487_v1  ;;  %197 = vst.msk [vmem:[#allocation2] sm:$0xff] %vm196_vm0, %v4486_v0  ;;  %v4665_v2 = vstv %s4141_s22  ;;  %v4670_v6 = vstv %s4142_s18  ;;  %s4147_s17 = sld [smem:[#allocation5 + $0x2b]]  ;;  %s4148_s23 = sld [smem:[#allocation5 + $0x2]]  ;;  %vm782_vm4 = vcmask 1045504   ;;  %vm271_vm5 = vcmask 154651  }
  0x58   : > { %198 = vst.msk [vmem:[#allocation2 + $0x8] sm:$0xff] %vm196_vm0, %v4486_v0  ;;  %v392_v3 = vmul.f32 0.0, %v4665_v2  ;;  %v430_v17 = vmul.f32 0.0, %v4670_v6  ;;  %s4149_s27 = sld [smem:[#allocation5 + $0x9]]  ;;  %s4490_s28 = smov 126   ;;  %vm273_vm6 = vcmask 154648  }
  0x59   : > { %s4150_s30 = sld [smem:[#allocation5 + $0x10]]  ;;  %s4151_s6 = sld [smem:[#allocation5 + $0x17]]  ;;  %vm275_vm7 = vcmask 149528   ;;  %vm990_vm8 = vcmask 1040384   ;;  %vm1123_vm9 = vcmask 1044480   ;;  %vm341_vm10 = vcmask 1043456  }
  0x5a   : > { %v400_v9 = vrot.slane %v392_v3, 5  ;;  %v445_v30 = vrot.slane %v430_v17, 1  ;;  %v4692_v50 = vstv %s4143_s24  ;;  %s4152_s8 = sld [smem:[#allocation5 + $0x1e]]  ;;  %s4153_s26 = sld [smem:[#allocation5 + $0x25]]  ;;  %vm417_vm11 = vcmask 1039360  }
  0x5b   : > { %v4686_v36 = vld [vmem:[#allocation4 + $0x28] sm:$0x3f]  ;;  %v469_v52 = vmul.f32 0.0, %v4692_v50  ;;  %v4700_v57 = vstv %s4144_s3  ;;  %s4154_s15 = sld [smem:[#allocation5 + $0x2c]]  ;;  %s4155_s22 = sld [smem:[#allocation5 + $0x3]]  ;;  %vm713_vm12 = vcmask 1031168  }
  0x5c   : > { %407 = vrot.lane.b32.xlu1 %v400_v9, %s4488_s19  ;;  %v434_v40 = vmul.f32 %v4670_v6, %v4686_v36  ;;  %v473_v55 = vmul.f32 %v4692_v50, %v4686_v36  ;;  %v514_v59 = vmul.f32 0.0, %v4700_v57  ;;  %v518_v61 = vmul.f32 %v4700_v57, %v4686_v36  ;;  %s4156_s18 = sld [smem:[#allocation5 + $0xa]]  ;;  %s4491_s24 = smov 125  }
  0x5d   : > { %v203_v10 = vld [vmem:[#allocation3] sm:$0xff]  ;;  %v483_v54 = vrot.slane %v469_v52, 1  ;;  %v4709_v63 = vstv %s4145_s5  ;;  %s4158_s3 = sld [smem:[#allocation5 + $0x18]]  ;;  %s4159_s5 = sld [smem:[#allocation5 + $0x1f]]  ;;  %vm1009_vm13 = vcmask 1022976   ;;  %vm1301_vm14 = vcmask 1014784  }
  0x5e   : > { %v204_v11 = vld [vmem:[#allocation3 + $0x8] sm:$0xff]  ;;  %v201_v12 = vld [vmem:[#allocation2] sm:$0xff]  ;;  %v209_v13 = vmax.f32 %v203_v10, %v205_v4  ;;  %v450_v48 = vrot.slane %v434_v40, 1  ;;  %v488_v56 = vrot.slane %v473_v55, 1  ;;  %v528_v60 = vrot.slane %v514_v59, 1  ;;  %p9229_p13 = scmp.ne.s32.totalorder %s8412_s20, 0 }
  0x5f   : > { %v210_v14 = vmax.f32 %v204_v11, %v206_v5  ;;  %v207_v15 = vadd.f32 %v205_v4, %v201_v12  ;;  %v202_v16 = vld [vmem:[#allocation2 + $0x8] sm:$0xff]  ;;  %v533_v62 = vrot.slane %v518_v61, 1  ;;  %v559_v1 = vmul.f32 0.0, %v4709_v63 }
  0x60   : > { %v208_v20 = vadd.f32 %v206_v5, %v202_v16  ;;  %v216_v21 = vmax.f32 %v209_v13, %v4129_v7  ;;  %415 = vrot.lane.b32.xlu1 %v400_v9, %s4488_s19  ;;  %v451_v51 = vsel %vm441_vm2, %v445_v30, %v450_v48  ;;  %v489_v58 = vsel %vm441_vm2, %v483_v54, %v488_v56 }
  0x61   : > { %v217_v22 = vmax.f32 %v210_v14, %v4130_v8  ;;  %v214_v23 = vadd.f32 %v4129_v7, %v207_v15  ;;  %v534_v0 = vsel %vm441_vm2, %v528_v60, %v533_v62  ;;  %v573_v3 = vrot.slane %v559_v1, 1 }
  0x62   : > { %v215_v26 = vadd.f32 %v4130_v8, %v208_v20  ;;  %v223_v27 = vmax.f32 %v216_v21, %v4131_v18  ;;  %v563_v4 = vmul.f32 %v4709_v63, %v4686_v36  ;;  %v4718_v7 = vstv %s4146_s16  ;;  %s4160_s16 = sld [smem:[#allocation5 + $0x26]] }
  0x63   : > { %v224_v28 = vmax.f32 %v217_v22, %v4132_v19  ;;  %v221_v29 = vadd.f32 %v4131_v18, %v214_v23  ;;  %v608_v11 = vmul.f32 %v4718_v7, %v4686_v36  ;;  %v4726_v12 = vstv %s4147_s17  ;;  %s4161_s17 = sld [smem:[#allocation5 + $0x2d]] }
  0x64   : > { %v222_v31 = vadd.f32 %v4132_v19, %v215_v26  ;;  %v230_v32 = vmax.f32 %v223_v27, %v4133_v24  ;;  %411 = vrot.lane.b32.xlu1 %v400_v9, %s4488_s19  ;;  %v578_v5 = vrot.slane %v563_v4, 1  ;;  %v604_v9 = vmul.f32 0.0, %v4718_v7 }
  0x65   : > { %v231_v33 = vmax.f32 %v224_v28, %v4134_v25  ;;  %v228_v34 = vadd.f32 %v4133_v24, %v221_v29  ;;  %v623_v13 = vrot.slane %v608_v11, 5  ;;  %v642_v14 = vmul.f32 0.0, %v4726_v12 }
  0x66   : > { %v229_v35 = vadd.f32 %v4134_v25, %v222_v31  ;;  %235 = vst.msk [vmem:[#allocation3] sm:$0xff] %vm196_vm0, %v230_v32  ;;  %v579_v8 = vsel %vm441_vm2, %v573_v3, %v578_v5  ;;  %v618_v10 = vrot.slane %v604_v9, 5  ;;  %v646_v17 = vmul.f32 %v4726_v12, %v4686_v36 }
  0x67   : > { %236 = vst.msk [vmem:[#allocation3 + $0x8] sm:$0xff] %vm196_vm0, %v231_v33  ;;  %233 = vst.msk [vmem:[#allocation2] sm:$0xff] %vm196_vm0, %v228_v34  ;;  %v656_v16 = vrot.slane %v642_v14, 5  ;;  %v4737_v20 = vstv %s4148_s23  ;;  %v4743_v23 = vstv %s4149_s27  ;;  %v4750_v27 = vstv %s4150_s30  ;;  %s4162_s23 = sld [smem:[#allocation5 + $0x4]]  ;;  %s4163_s27 = sld [smem:[#allocation5 + $0xb]] }
  0x68   : > { %234 = vst.msk [vmem:[#allocation2 + $0x8] sm:$0xff] %vm196_vm0, %v229_v35  ;;  %454 = vrot.lane.b32.xlu1 %v445_v30, %s4488_s19  ;;  %v624_v15 = vsel %vm258_vm1, %v618_v10, %v623_v13  ;;  %v661_v18 = vrot.slane %v646_v17, 5  ;;  %v687_v21 = vmul.f32 0.0, %v4737_v20  ;;  %v726_v24 = vmul.f32 0.0, %v4743_v23  ;;  %s4492_s30 = smov 124  }
  0x69   : > { %v730_v26 = vmul.f32 %v4743_v23, %v4686_v36  ;;  %v771_v29 = vmul.f32 0.0, %v4750_v27  ;;  %v775_v32 = vmul.f32 %v4750_v27, %v4686_v36  ;;  %v4759_v33 = vstv %s4151_s6  ;;  %s4164_s6 = sld [smem:[#allocation5 + $0x12]] }
  0x6a   : > { %v662_v19 = vsel %vm258_vm1, %v656_v16, %v661_v18  ;;  %v696_v22 = vrot.slane %v687_v21, 6  ;;  %v738_v25 = vrot.slane %v726_v24, 6  ;;  %v810_v35 = vmul.f32 0.0, %v4759_v33 }
  0x6b   : > { %v745_v28 = vrot.slane %v730_v26, 6  ;;  %v786_v31 = vrot.slane %v771_v29, 2  ;;  %v791_v34 = vrot.slane %v775_v32, 2  ;;  %v814_v40 = vmul.f32 %v4759_v33, %v4686_v36 }
  0x6c   : > { %vm1569_vm15 = vcmask 1006592  }
  0x6d   : > { %v277_v37 = vld [vmem:[#allocation3] sm:$0xff]  ;;  %v746_v30 = vsel %vm694_vm3, %v738_v25, %v745_v28 }
  0x6e   : > { %v278_v38 = vld [vmem:[#allocation3 + $0x8] sm:$0xff]  ;;  %v252_v39 = vld [vmem:[#allocation2] sm:$0xff]  ;;  %v281_v41 = vrot.slane %v277_v37, 5 }
  0x6f   : > { %v282_v42 = vrot.slane %v278_v38, 5  ;;  %v254_v43 = vmul.f32 0.25, %v252_v39  ;;  %v253_v44 = vld [vmem:[#allocation2 + $0x8] sm:$0xff]  ;;  %v792_v38 = vsel %vm782_vm4, %v786_v31, %v791_v34  ;;  %v824_v39 = vrot.slane %v810_v35, 2 }
  0x70   : > { %v255_v45 = vmul.f32 0.25, %v253_v44  ;;  %284 = vrot.lane.b32.xlu1 %v281_v41, %s4489_s29 }
  0x71   : > { %v283_v46 = vsel %vm258_vm1, %v281_v41, %v282_v42  ;;  %v259_v47 = vrot.slane %v254_v43, 5  ;;  %v4772_v43 = vstv %s4152_s8  ;;  %s4165_s8 = sld [smem:[#allocation5 + $0x19]] }
  0x72   : > { %286 = vrot.lane.b32.xlu0 %v283_v46, %s4489_s29  ;;  %v260_v49 = vrot.slane %v255_v45, 5  ;;  %v855_v46 = vmul.f32 0.0, %v4772_v43 }
  0x74   : > { %288 = vrot.lane.b32.xlu1 %v282_v42, %s4489_s29  ;;  %v261_v53 = vsel %vm258_vm1, %v259_v47, %v260_v49  ;;  %v829_v42 = vrot.slane %v814_v40, 2  ;;  %v869_v48 = vrot.slane %v855_v46, 2  ;;  %v4885_v46 = vstv %s4155_s22  ;;  %s4168_s22 = sld [smem:[#allocation5 + $0x2e]] }
  0x76   : > { %262 = vrot.lane.b32.xlu0 %v259_v47, %s4489_s29  ;;  %v830_v45 = vsel %vm782_vm4, %v824_v39, %v829_v42 }
  0x78   : > { %458 = vrot.lane.b32.xlu1 %v451_v51, %s4488_s19 }
  0x7a   : > { %264 = vrot.lane.b32.xlu0 %v261_v53, %s4489_s29 }
  0x7c   : > { %266 = vrot.lane.b32.xlu1 %v260_v49, %s4489_s29  ;;  %v859_v49 = vmul.f32 %v4772_v43, %v4686_v36  ;;  %s4157_s29 = sld [smem:[#allocation5 + $0x11]] }
  0x7e   : > { %v874_v51 = vrot.slane %v859_v49, 2  ;;  %v983_v49 = vmul.f32 0.0, %v4885_v46 }
  0x80   : > { %492 = vrot.lane.b32.xlu1 %v483_v54, %s4488_s19  ;;  %v4787_v54 = vstv %s4153_s26  ;;  %v875_v55 = vsel %vm782_vm4, %v869_v48, %v874_v51  ;;  %s4166_s26 = sld [smem:[#allocation5 + $0x20]] }
  0x81   : > { %v904_v61 = vmul.f32 %v4787_v54, %v4686_v36 }
  0x83   : > { %v919_v1 = vrot.slane %v904_v61, 2 }
  0x84   : > { %496 = vrot.lane.b32.xlu1 %v489_v58, %s4488_s19 }
  0x88   : > { %500 = vrot.lane.b32.xlu1 %v488_v56, %s4488_s19  ;;  %v900_v56 = vmul.f32 0.0, %v4787_v54 }
  0x8c   : > { %537 = vrot.lane.b32.xlu1 %v528_v60, %s4488_s19  ;;  %v914_v60 = vrot.slane %v900_v56, 2  ;;  %v992_v56 = vrot.slane %v983_v49, 7 }
  0x90   : > { %541 = vrot.lane.b32.xlu1 %v534_v0, %s4488_s19 }
  0x94   : > { %545 = vrot.lane.b32.xlu1 %v533_v62, %s4488_s19 }
  0x98   : > { %582 = vrot.lane.b32.xlu1 %v573_v3, %s4488_s19 }
  0x9c   : > { %586 = vrot.lane.b32.xlu1 %v579_v8, %s4488_s19  ;;  %v920_v8 = vsel %vm782_vm4, %v914_v60, %v919_v1 }
  0xa0   : > { %590 = vrot.lane.b32.xlu1 %v578_v5, %s4488_s19 }
  0xa4   : > { %627 = vrot.lane.b32.xlu1 %v618_v10, %s4488_s19 }
  0xa8   : > { %631 = vrot.lane.b32.xlu1 %v624_v15, %s4488_s19 }
  0xac   : > { %665 = vrot.lane.b32.xlu1 %v656_v16, %s4488_s19 }
  0xb0   : > { %669 = vrot.lane.b32.xlu1 %v662_v19, %s4488_s19 }
  0xb4   : > { %673 = vrot.lane.b32.xlu1 %v661_v18, %s4488_s19 }
  0xb8   : > { %703 = vrot.lane.b32.xlu1 %v696_v22, %s4490_s28 }
  0xbc   : > { %707 = vrot.lane.b32.xlu1 %v696_v22, %s4490_s28 }
  0xc0   : > { %711 = vrot.lane.b32.xlu1 %v696_v22, %s4490_s28 }
  0xc4   : > { %749 = vrot.lane.b32.xlu1 %v738_v25, %s4490_s28 }
  0xc8   : > { %753 = vrot.lane.b32.xlu1 %v738_v25, %s4490_s28 }
  0xcc   : > { %757 = vrot.lane.b32.xlu1 %v746_v30, %s4490_s28  ;;  %v4865_v30 = vstv %s4154_s15  ;;  %s4167_s15 = sld [smem:[#allocation5 + $0x27]] }
  0xcd   : > { %v945_v34 = vmul.f32 0.0, %v4865_v30 }
  0xce   : > { %v4763_v37 = vpop.permute.xlu1 %407 }
  0xd0   : > { %795 = vrot.lane.b32.xlu1 %v786_v31, %s4490_s28 }
  0xd2   : > { %v4769_v41 = vpop.permute.xlu1 %415 }
  0xd4   : > { %799 = vrot.lane.b32.xlu1 %v792_v38, %s4490_s28  ;;  %v949_v38 = vmul.f32 %v4865_v30, %v4686_v36 }
  0xd6   : > { %v4774_v44 = vpop.permute.xlu1 %411  ;;  %v964_v40 = vrot.slane %v949_v38, 6 }
  0xd7   : > { %8418 = vst [vmem:[#allocation14_spill] sm:$0xff] %v4774_v44 }
  0xd8   : > { %833 = vrot.lane.b32.xlu1 %v824_v39, %s4490_s28  ;;  %v959_v39 = vrot.slane %v945_v34, 6 }
  0xda   : > { %v4779_v47 = vpop.permute.xlu1 %454 }
  0xdb   : > { %8419 = vst [vmem:[#allocation15_spill] sm:$0xff] %v4779_v47 }
  0xdc   : > { %837 = vrot.lane.b32.xlu1 %v830_v45, %s4490_s28 }
  0xe0   : > { %841 = vrot.lane.b32.xlu1 %v829_v42, %s4490_s28 }
  0xe2   : > { %v285_v52 = vpop.permute.xlu1 %284 }
  0xe3   : > { %294 = vst.msk [vmem:[#allocation4 + $0x30] sm:$0xf8] %vm271_vm5, %v285_v52 }
  0xe4   : > { %v287_v53 = vpop.permute.xlu0 %286  ;;  %878 = vrot.lane.b32.xlu1 %v869_v48, %s4490_s28 }
  0xe5   : > { %295 = vst.msk [vmem:[#allocation4 + $0x40] sm:$0xff] %vm273_vm6, %v287_v53 }
  0xe6   : > { %v289_v58 = vpop.permute.xlu1 %288 }
  0xe7   : > { %296 = vst.msk [vmem:[#allocation4 + $0x50] sm:$0x7] %vm275_vm7, %v289_v58 }
  0xe8   : > { %v263_v59 = vpop.permute.xlu0 %262  ;;  %882 = vrot.lane.b32.xlu1 %v875_v55, %s4490_s28 }
  0xe9   : > { %272 = vst.msk [vmem:[#allocation4] sm:$0xf8] %vm271_vm5, %v263_v59 }
  0xea   : > { %v4796_v62 = vpop.permute.xlu1 %458 }
  0xeb   : > { %8420 = vst [vmem:[#allocation16_spill] sm:$0xff] %v4796_v62 }
  0xec   : > { %v265_v0 = vpop.permute.xlu0 %264  ;;  %886 = vrot.lane.b32.xlu1 %v874_v51, %s4490_s28  ;;  %v965_v51 = vsel %vm694_vm3, %v959_v39, %v964_v40 }
  0xed   : > { %274 = vst.msk [vmem:[#allocation4 + $0x10] sm:$0xff] %vm273_vm6, %v265_v0 }
  0xee   : > { %v267_v3 = vpop.permute.xlu1 %266 }
  0xef   : > { %276 = vst.msk [vmem:[#allocation4 + $0x20] sm:$0x7] %vm275_vm7, %v267_v3 }
  0xf0   : > { %v4800_v4 = vld [vmem:[#allocation4] sm:$0xff]  ;;  %923 = vrot.lane.b32.xlu1 %v914_v60, %s4490_s28 }
  0xf1   : > { %v4805_v5 = vmul.f32 %v4665_v2, %v4800_v4  ;;  %v4858_v28 = vmul.f32 %v4737_v20, %v4800_v4  ;;  %v4870_v32 = vmul.f32 %v4743_v23, %v4800_v4 }
  0xf2   : > { %v4810_v10 = vpop.permute.xlu1 %492 }
  0xf3   : > { %v399_v9 = vrot.slane %v4805_v5, 5  ;;  %8421 = vst [vmem:[#allocation17_spill] sm:$0xff] %v4810_v10  ;;  %v8374_v31 = vrot.slane %v4858_v28, 6  ;;  %v8373_v42 = vrot.slane %v4870_v32, 6  ;;  %v468_v5 = vmul.f32 %v4692_v50, %v4800_v4 }
  0xf4   : > { %927 = vrot.lane.b32.xlu1 %v920_v8, %s4490_s28  ;;  %v4911_v60 = vld [vmem:[#allocation4 + $0x10] sm:$0xff]  ;;  %v4925_v8 = vstv %s4156_s18  ;;  %s4169_s18 = sld [smem:[#allocation5 + $0x5]] }
  0xf5   : > { %405 = vrot.lane.b32.xlu0 %v399_v9, %s4488_s19  ;;  %v1022_v34 = vmul.f32 0.0, %v4925_v8 }
  0xf6   : > { %v4816_v11 = vld [vmem:[#allocation4 + $0x20] sm:$0x3f]  ;;  %v4818_v13 = vpop.permute.xlu1 %496 }
  0xf7   : > { %8422 = vst [vmem:[#allocation18_spill] sm:$0xff] %v4818_v13  ;;  %v4822_v14 = vmul.f32 %v4692_v50, %v4816_v11  ;;  %v4828_v16 = vmul.f32 %v4700_v57, %v4816_v11  ;;  %v4838_v19 = vmul.f32 %v4709_v63, %v4816_v11  ;;  %v4848_v24 = vmul.f32 %v4726_v12, %v4816_v11 }
  0xf8   : > { %931 = vrot.lane.b32.xlu1 %v919_v1, %s4490_s28  ;;  %v4883_v45 = vmul.f32 %v4759_v33, %v4816_v11  ;;  %v4898_v53 = vmul.f32 %v4772_v43, %v4816_v11  ;;  %v4909_v59 = vmul.f32 %v4787_v54, %v4816_v11  ;;  %v393_v1 = vmul.f32 %v4665_v2, %v4911_v60 }
  0xf9   : > { %v486_v15 = vrot.slane %v4822_v14, 1  ;;  %v531_v18 = vrot.slane %v4828_v16, 1  ;;  %v8377_v22 = vrot.slane %v4838_v19, 1  ;;  %v8375_v26 = vrot.slane %v4848_v24, 5 }
  0xfa   : > { %v4830_v17 = vpop.permute.xlu1 %500  ;;  %v8372_v52 = vrot.slane %v4883_v45, 2  ;;  %v8371_v58 = vrot.slane %v4898_v53, 2  ;;  %v8370_v0 = vrot.slane %v4909_v59, 2  ;;  %v401_v38 = vrot.slane %v393_v1, 5 }
  0xfb   : > { %498 = vrot.lane.b32.xlu0 %v486_v15, %s4488_s19  ;;  %v1034_v2 = vrot.slane %v1022_v34, 7  ;;  %v431_v1 = vmul.f32 %v4670_v6, %v4911_v60  ;;  %v4952_v34 = vstv %s4157_s29  ;;  %v558_v14 = vmul.f32 %v4709_v63, %v4800_v4  ;;  %s4170_s29 = sld [smem:[#allocation5 + $0xc]] }
  0xfc   : > { %968 = vrot.lane.b32.xlu1 %v959_v39, %s4490_s28  ;;  %v4933_v39 = vmul.f32 %v4737_v20, %v4911_v60  ;;  %v1026_v20 = vmul.f32 %v4925_v8, %v4686_v36  ;;  %v605_v16 = vmul.f32 %v4718_v7, %v4911_v60 }
  0xfe   : > { %v4840_v21 = vpop.permute.xlu1 %537  ;;  %v8376_v49 = vrot.slane %v4933_v39, 6 }
  0xff   : > { %8423 = vst [vmem:[#allocation19_spill] sm:$0xff] %v4840_v21  ;;  %543 = vrot.lane.b32.xlu0 %v531_v18, %s4488_s19 }
 0x100   : > { %972 = vrot.lane.b32.xlu1 %v965_v51, %s4490_s28  ;;  %v429_v51 = vmul.f32 %v4670_v6, %v4800_v4 }
 0x102   : > { %v4850_v25 = vpop.permute.xlu1 %541 }
 0x103   : > { %8424 = vst [vmem:[#allocation20_spill] sm:$0xff] %v4850_v25  ;;  %588 = vrot.lane.b32.xlu0 %v8377_v22, %s4488_s19  ;;  %v5304_v25 = vstv %s4169_s18  ;;  %s4180_s18 = sld [smem:[#allocation5 + $0x22]] }
 0x104   : > { %999 = vrot.lane.b32.xlu1 %v992_v56, %s4491_s24 }
 0x106   : > { %v4860_v29 = vpop.permute.xlu1 %545 }
 0x107   : > { %671 = vrot.lane.b32.xlu0 %v8375_v26, %s4488_s19 }
 0x108   : > { %1003 = vrot.lane.b32.xlu1 %v992_v56, %s4491_s24 }
 0x10a   : > { %v4873_v35 = vpop.permute.xlu1 %582 }
 0x10b   : > { %8425 = vst [vmem:[#allocation21_spill] sm:$0xff] %v4873_v35  ;;  %701 = vrot.lane.b32.xlu0 %v8374_v31, %s4490_s28  ;;  %v433_v31 = vmul.f32 %v4670_v6, %v4816_v11 }
 0x10c   : > { %1007 = vrot.lane.b32.xlu1 %v992_v56, %s4491_s24  ;;  %v1041_v56 = vrot.slane %v1026_v20, 7  ;;  %v1067_v20 = vmul.f32 0.0, %v4952_v34 }
 0x10e   : > { %v4887_v48 = vpop.permute.xlu1 %586 }
 0x10f   : > { %8426 = vst [vmem:[#allocation22_spill] sm:$0xff] %v4887_v48  ;;  %747 = vrot.lane.b32.xlu0 %v8373_v42, %s4490_s28  ;;  %v443_v42 = vrot.slane %v431_v1, 1  ;;  %v1079_v1 = vrot.slane %v1067_v20, 7 }
 0x110   : > { %1045 = vrot.lane.b32.xlu1 %v1034_v2, %s4491_s24 }
 0x112   : > { %v4900_v55 = vpop.permute.xlu1 %590 }
 0x113   : > { %839 = vrot.lane.b32.xlu0 %v8372_v52, %s4490_s28  ;;  %v442_v52 = vrot.slane %v429_v51, 1  ;;  %v470_v51 = vmul.f32 %v4692_v50, %v4911_v60  ;;  %v1071_v50 = vmul.f32 %v4952_v34, %v4686_v36 }
 0x114   : > { %1049 = vrot.lane.b32.xlu1 %v1034_v2, %s4491_s24 }
 0x116   : > { %v4913_v61 = vpop.permute.xlu1 %627 }
 0x117   : > { %8427 = vst [vmem:[#allocation23_spill] sm:$0xff] %v4913_v61  ;;  %884 = vrot.lane.b32.xlu0 %v8371_v58, %s4490_s28  ;;  %v402_v58 = vsel %vm258_vm1, %v399_v9, %v401_v38  ;;  %v444_v9 = vsel %vm441_vm2, %v442_v52, %v443_v42 }
 0x11a   : > { %v4922_v3 = vpop.permute.xlu1 %631 }
 0x11b   : > { %8428 = vst [vmem:[#allocation24_spill] sm:$0xff] %v4922_v3  ;;  %929 = vrot.lane.b32.xlu0 %v8370_v0, %s4490_s28 }
 0x11e   : > { %v4935_v40 = vpop.permute.xlu1 %665 }
 0x11f   : > { %8429 = vst [vmem:[#allocation25_spill] sm:$0xff] %v4935_v40  ;;  %413 = vrot.lane.b32.xlu0 %v401_v38, %s4488_s19  ;;  %v448_v38 = vrot.slane %v433_v31, 1  ;;  %v1086_v31 = vrot.slane %v1071_v50, 7 }
 0x122   : > { %v4944_v0 = vpop.permute.xlu1 %669 }
 0x123   : > { %8430 = vst [vmem:[#allocation26_spill] sm:$0xff] %v4944_v0  ;;  %709 = vrot.lane.b32.xlu0 %v8376_v49, %s4490_s28  ;;  %v1042_v49 = vsel %vm990_vm8, %v1034_v2, %v1041_v56  ;;  %v480_v2 = vrot.slane %v468_v5, 1  ;;  %v481_v56 = vrot.slane %v470_v51, 1  ;;  %v4989_v5 = vstv %s4158_s3  ;;  %s8378_s3 = smov 123  }
 0x124   : > { %1053 = vrot.lane.b32.xlu1 %v1042_v49, %s4491_s24  ;;  %v513_v49 = vmul.f32 %v4700_v57, %v4800_v4 }
 0x125   : > { %v482_v52 = vsel %vm441_vm2, %v480_v2, %v481_v56 }
 0x126   : > { %v4959_v26 = vpop.permute.xlu1 %673  ;;  %v525_v2 = vrot.slane %v513_v49, 1  ;;  %v5011_v49 = vstv %s4159_s5  ;;  %s4171_s5 = sld [smem:[#allocation5 + $0x13]] }
 0x127   : > { %409 = vrot.lane.b32.xlu0 %v402_v58, %s4488_s19  ;;  %v449_v58 = vsel %vm441_vm2, %v443_v42, %v448_v38  ;;  %v515_v42 = vmul.f32 %v4700_v57, %v4911_v60  ;;  %v1112_v38 = vmul.f32 0.0, %v4989_v5 }
 0x128   : > { %1090 = vrot.lane.b32.xlu1 %v1079_v1, %s4491_s24 }
 0x129   : > { %v1127_v51 = vrot.slane %v1112_v38, 3  ;;  %v526_v57 = vrot.slane %v515_v42, 1 }
 0x12a   : > { %v4970_v6 = vpop.permute.xlu1 %703 }
 0x12b   : > { %8431 = vst [vmem:[#allocation27_spill] sm:$0xff] %v4970_v6  ;;  %452 = vrot.lane.b32.xlu0 %v444_v9, %s4488_s19  ;;  %v1087_v9 = vsel %vm990_vm8, %v1079_v1, %v1086_v31  ;;  %v527_v31 = vsel %vm441_vm2, %v525_v2, %v526_v57  ;;  %v570_v2 = vrot.slane %v558_v14, 1  ;;  %v5035_v14 = vstv %s4160_s16  ;;  %s4172_s16 = sld [smem:[#allocation5 + $0x1a]] }
 0x12c   : > { %1094 = vrot.lane.b32.xlu1 %v1079_v1, %s4491_s24 }
 0x12e   : > { %v4975_v22 = vpop.permute.xlu1 %707 }
 0x12f   : > { %8432 = vst [vmem:[#allocation28_spill] sm:$0xff] %v4975_v22  ;;  %456 = vrot.lane.b32.xlu0 %v449_v58, %s4488_s19  ;;  %v487_v58 = vsel %vm441_vm2, %v481_v56, %v486_v15  ;;  %v560_v15 = vmul.f32 %v4709_v63, %v4911_v60 }
 0x130   : > { %1098 = vrot.lane.b32.xlu1 %v1087_v9, %s4491_s24  ;;  %v1151_v9 = vmul.f32 0.0, %v5011_v49 }
 0x131   : > { %v571_v63 = vrot.slane %v560_v15, 1  ;;  %v8437_v15 = vrot.slane %v4838_v19, 1  ;;  %v641_v19 = vmul.f32 %v4726_v12, %v4800_v4 }
 0x132   : > { %v4986_v20 = vpop.permute.xlu1 %711  ;;  %v1165_v38 = vrot.slane %v1151_v9, 3  ;;  %v603_v9 = vmul.f32 %v4718_v7, %v4800_v4 }
 0x133   : > { %490 = vrot.lane.b32.xlu0 %v482_v52, %s4488_s19  ;;  %v1116_v52 = vmul.f32 %v4989_v5, %v4686_v36 }
 0x134   : > { %1136 = vrot.lane.b32.xlu1 %v1127_v51, %s4491_s24 }
 0x135   : > { %v1132_v1 = vrot.slane %v1116_v52, 3 }
 0x136   : > { %v4997_v50 = vpop.permute.xlu1 %749 }
 0x137   : > { %8433 = vst [vmem:[#allocation29_spill] sm:$0xff] %v4997_v50  ;;  %494 = vrot.lane.b32.xlu0 %v487_v58, %s4488_s19  ;;  %v1133_v42 = vsel %vm1123_vm9, %v1127_v51, %v1132_v1  ;;  %v532_v58 = vsel %vm441_vm2, %v526_v57, %v531_v18  ;;  %v572_v1 = vsel %vm441_vm2, %v570_v2, %v571_v63  ;;  %v616_v2 = vrot.slane %v605_v16, 5 }
 0x138   : > { %1140 = vrot.lane.b32.xlu1 %v1133_v42, %s4491_s24  ;;  %v577_v42 = vsel %vm441_vm2, %v571_v63, %v8437_v15  ;;  %v643_v63 = vmul.f32 %v4726_v12, %v4911_v60  ;;  %v653_v15 = vrot.slane %v641_v19, 5 }
 0x13a   : > { %v5008_v56 = vpop.permute.xlu1 %753 }
 0x13b   : > { %8434 = vst [vmem:[#allocation30_spill] sm:$0xff] %v5008_v56  ;;  %535 = vrot.lane.b32.xlu0 %v527_v31, %s4488_s19  ;;  %v1155_v31 = vmul.f32 %v5011_v49, %v4686_v36 }
 0x13c   : > { %1174 = vrot.lane.b32.xlu1 %v1165_v38, %s4491_s24 }
 0x13d   : > { %v1170_v51 = vrot.slane %v1155_v31, 3  ;;  %v607_v31 = vmul.f32 %v4718_v7, %v4816_v11  ;;  %v1200_v7 = vmul.f32 %v5035_v14, %v4686_v36 }
 0x13e   : > { %v5019_v52 = vpop.permute.xlu1 %757 }
 0x13f   : > { %8435 = vst [vmem:[#allocation31_spill] sm:$0xff] %v5019_v52  ;;  %539 = vrot.lane.b32.xlu0 %v532_v58, %s4488_s19  ;;  %v1171_v57 = vsel %vm1123_vm9, %v1165_v38, %v1170_v51  ;;  %v615_v58 = vrot.slane %v603_v9, 5  ;;  %v621_v22 = vrot.slane %v607_v31, 5  ;;  %v1215_v16 = vrot.slane %v1200_v7, 3 }
 0x140   : > { %1178 = vrot.lane.b32.xlu1 %v1171_v57, %s4491_s24  ;;  %v8441_v31 = vrot.slane %v4848_v24, 5  ;;  %v8443_v24 = vrot.slane %v4858_v28, 6 }
 0x141   : > { %v622_v57 = vsel %vm258_vm1, %v616_v2, %v621_v22 }
 0x142   : > { %v5030_v18 = vpop.permute.xlu1 %795 }
 0x143   : > { %8436 = vst [vmem:[#allocation32_spill] sm:$0xff] %v5030_v18  ;;  %580 = vrot.lane.b32.xlu0 %v572_v1, %s4488_s19  ;;  %v1196_v1 = vmul.f32 0.0, %v5035_v14  ;;  %v617_v18 = vsel %vm258_vm1, %v615_v58, %v616_v2 }
 0x144   : > { %1182 = vrot.lane.b32.xlu1 %v1170_v51, %s4491_s24 }
 0x145   : > { %v1210_v38 = vrot.slane %v1196_v1, 3 }
 0x146   : > { %v5042_v56 = vpop.permute.xlu1 %799 }
 0x147   : > { %8438 = vst [vmem:[#allocation33_spill] sm:$0xff] %v5042_v56  ;;  %584 = vrot.lane.b32.xlu0 %v577_v42, %s4488_s19  ;;  %v654_v42 = vrot.slane %v643_v63, 5  ;;  %v1216_v12 = vsel %vm1123_vm9, %v1210_v38, %v1215_v16 }
 0x148   : > { %1219 = vrot.lane.b32.xlu1 %v1210_v38, %s4491_s24  ;;  %v727_v38 = vmul.f32 %v4743_v23, %v4911_v60 }
 0x149   : > { %v655_v51 = vsel %vm258_vm1, %v653_v15, %v654_v42  ;;  %v660_v1 = vsel %vm258_vm1, %v654_v42, %v8441_v31  ;;  %v772_v31 = vmul.f32 %v4750_v27, %v4911_v60 }
 0x14a   : > { %v5056_v9 = vpop.permute.xlu1 %833  ;;  %v739_v42 = vrot.slane %v727_v38, 6  ;;  %v5102_v38 = vstv %s4162_s23  ;;  %s4174_s23 = sld [smem:[#allocation5 + $0x28]] }
 0x14b   : > { %625 = vrot.lane.b32.xlu0 %v617_v18, %s4488_s19  ;;  %8439 = vst [vmem:[#allocation34_spill] sm:$0xff] %v5056_v9  ;;  %v5066_v18 = vstv %s4161_s17  ;;  %s4173_s17 = sld [smem:[#allocation5 + $0x21]] }
 0x14c   : > { %1223 = vrot.lane.b32.xlu1 %v1216_v12, %s4491_s24  ;;  %v1241_v22 = vmul.f32 0.0, %v5066_v18  ;;  %v1245_v19 = vmul.f32 %v5066_v18, %v4686_v36  ;;  %v729_v12 = vmul.f32 %v4743_v23, %v4816_v11 }
 0x14e   : > { %v5063_v58 = vpop.permute.xlu1 %837  ;;  %v1255_v2 = vrot.slane %v1241_v22, 3  ;;  %v1260_v7 = vrot.slane %v1245_v19, 3  ;;  %v8444_v22 = vrot.slane %v4870_v32, 6  ;;  %v743_v28 = vrot.slane %v729_v12, 6 }
 0x14f   : > { %629 = vrot.lane.b32.xlu0 %v622_v57, %s4488_s19  ;;  %8440 = vst [vmem:[#allocation35_spill] sm:$0xff] %v5063_v58  ;;  %v8442_v57 = vrot.slane %v4933_v39, 6  ;;  %v784_v19 = vrot.slane %v772_v31, 2  ;;  %v774_v32 = vmul.f32 %v4750_v27, %v4816_v11  ;;  %v5195_v58 = vld [vmem:[#allocation4 + $0x8] sm:$0xff] }
 0x150   : > { %1227 = vrot.lane.b32.xlu1 %v1215_v16, %s4491_s24  ;;  %v1261_v16 = vsel %vm1123_vm9, %v1255_v2, %v1260_v7  ;;  %v740_v39 = vsel %vm694_vm3, %v8444_v22, %v739_v42 }
 0x151   : > { %v698_v15 = vsel %vm694_vm3, %v8443_v24, %v8442_v57  ;;  %v1286_v57 = vmul.f32 0.0, %v5102_v38  ;;  %v789_v12 = vrot.slane %v774_v32, 2 }
 0x152   : > { %v5079_v63 = vpop.permute.xlu1 %841 }
 0x153   : > { %663 = vrot.lane.b32.xlu0 %v655_v51, %s4488_s19  ;;  %v770_v51 = vmul.f32 %v4750_v27, %v4800_v4 }
 0x154   : > { %1264 = vrot.lane.b32.xlu1 %v1255_v2, %s4491_s24  ;;  %v744_v2 = vsel %vm694_vm3, %v739_v42, %v743_v28  ;;  %v811_v42 = vmul.f32 %v4759_v33, %v4911_v60 }
 0x155   : > { %v783_v23 = vrot.slane %v770_v51, 2  ;;  %v790_v51 = vsel %vm782_vm4, %v784_v19, %v789_v12 }
 0x157   : > { %667 = vrot.lane.b32.xlu0 %v660_v1, %s4488_s19  ;;  %v5098_v1 = vpop.permute.xlu1 %878 }
 0x158   : > { %8445 = vst [vmem:[#allocation36_spill] sm:$0xff] %v5098_v1  ;;  %1268 = vrot.lane.b32.xlu1 %v1261_v16, %s4491_s24  ;;  %v809_v16 = vmul.f32 %v4759_v33, %v4800_v4 }
 0x15a   : > { %v821_v22 = vrot.slane %v809_v16, 2 }
 0x15b   : > { %705 = vrot.lane.b32.xlu0 %v698_v15, %s4490_s28  ;;  %v5110_v24 = vpop.permute.xlu1 %882  ;;  %v785_v15 = vsel %vm782_vm4, %v783_v23, %v784_v19  ;;  %v856_v19 = vmul.f32 %v4772_v43, %v4911_v60 }
 0x15c   : > { %1272 = vrot.lane.b32.xlu1 %v1260_v7, %s4491_s24  ;;  %8446 = vst [vmem:[#allocation37_spill] sm:$0xff] %v5110_v24  ;;  %v5121_v7 = vstv %s4163_s27  ;;  %v8457_v24 = vrot.slane %v4909_v59, 2  ;;  %s4175_s27 = sld [smem:[#allocation5 + $0x2f]] }
 0x15d   : > { %v1311_v31 = vmul.f32 0.0, %v5121_v7 }
 0x15f   : > { %751 = vrot.lane.b32.xlu0 %v740_v39, %s4490_s28  ;;  %v822_v39 = vrot.slane %v811_v42, 2  ;;  %v5124_v28 = vpop.permute.xlu1 %886  ;;  %v867_v42 = vrot.slane %v856_v19, 2 }
 0x160   : > { %1295 = vrot.lane.b32.xlu1 %v1286_v57, %s4492_s30  ;;  %8447 = vst [vmem:[#allocation38_spill] sm:$0xff] %v5124_v28 }
 0x161   : > { %v823_v23 = vsel %vm782_vm4, %v821_v22, %v822_v39  ;;  %v5151_v22 = vstv %s4164_s6  ;;  %s4176_s6 = sld [smem:[#allocation5 + $0x6]] }
 0x163   : > { %755 = vrot.lane.b32.xlu0 %v744_v2, %s4490_s28  ;;  %v854_v2 = vmul.f32 %v4772_v43, %v4800_v4  ;;  %v5138_v32 = vpop.permute.xlu1 %923 }
 0x164   : > { %1299 = vrot.lane.b32.xlu1 %v1286_v57, %s4492_s30  ;;  %8448 = vst [vmem:[#allocation39_spill] sm:$0xff] %v5138_v32 }
 0x165   : > { %v866_v16 = vrot.slane %v854_v2, 2 }
 0x167   : > { %793 = vrot.lane.b32.xlu0 %v785_v15, %s4490_s28  ;;  %v5119_v27 = vpop.permute.xlu0 %405  ;;  %v8449_v15 = vrot.slane %v4883_v45, 2  ;;  %v899_v45 = vmul.f32 %v4787_v54, %v4800_v4  ;;  %v5158_v2 = vpop.permute.xlu1 %927 }
 0x168   : > { %1324 = vrot.lane.b32.xlu1 %v1311_v31, %s4492_s30  ;;  %8451 = vst [vmem:[#allocation41_spill] sm:$0xff] %v5158_v2 }
 0x169   : > { %v828_v12 = vsel %vm782_vm4, %v822_v39, %v8449_v15  ;;  %v901_v39 = vmul.f32 %v4787_v54, %v4911_v60  ;;  %v8452_v15 = vrot.slane %v4898_v53, 2  ;;  %v946_v53 = vmul.f32 %v4865_v30, %v4911_v60 }
 0x16b   : > { %797 = vrot.lane.b32.xlu0 %v790_v51, %s4490_s28  ;;  %v1315_v51 = vmul.f32 %v5121_v7, %v4686_v36  ;;  %v912_v32 = vrot.slane %v901_v39, 2  ;;  %v5170_v54 = vpop.permute.xlu1 %931  ;;  %v957_v1 = vrot.slane %v946_v53, 6  ;;  %v982_v53 = vmul.f32 %v4885_v46, %v4800_v4 }
 0x16c   : > { %1328 = vrot.lane.b32.xlu1 %v1311_v31, %s4492_s30  ;;  %v1346_v31 = vmul.f32 0.0, %v5151_v22  ;;  %8453 = vst [vmem:[#allocation42_spill] sm:$0xff] %v5170_v54 }
 0x16d   : > { %v5129_v33 = vpop.permute.xlu0 %498 }
 0x16f   : > { %831 = vrot.lane.b32.xlu0 %v823_v23, %s4490_s28  ;;  %v868_v23 = vsel %vm782_vm4, %v866_v16, %v867_v42  ;;  %v911_v16 = vrot.slane %v899_v45, 2  ;;  %v5183_v45 = vpop.permute.xlu1 %968 }
 0x170   : > { %1332 = vrot.lane.b32.xlu1 %v1315_v51, %s4492_s30  ;;  %8455 = vst [vmem:[#allocation44_spill] sm:$0xff] %v5183_v45 }
 0x171   : > { %v5140_v57 = vpop.permute.xlu0 %543  ;;  %v913_v2 = vsel %vm782_vm4, %v911_v16, %v912_v32  ;;  %v918_v16 = vsel %vm782_vm4, %v912_v32, %v8457_v24 }
 0x173   : > { %835 = vrot.lane.b32.xlu0 %v828_v12, %s4490_s28  ;;  %v873_v12 = vsel %vm782_vm4, %v867_v42, %v8452_v15  ;;  %v1350_v42 = vmul.f32 %v5151_v22, %v4686_v36 }
 0x174   : > { %1359 = vrot.lane.b32.xlu1 %v1346_v31, %s4492_s30 }
 0x175   : > { %v5149_v43 = vpop.permute.xlu0 %588 }
 0x176   : > { %8450 = vst [vmem:[#allocation40_spill] sm:$0xff] %v5149_v43 }
 0x177   : > { %876 = vrot.lane.b32.xlu0 %v868_v23, %s4490_s28  ;;  %v944_v23 = vmul.f32 %v4865_v30, %v4800_v4 }
 0x178   : > { %1363 = vrot.lane.b32.xlu1 %v1346_v31, %s4492_s30  ;;  %v948_v31 = vmul.f32 %v4865_v30, %v4816_v11 }
 0x179   : > { %v5163_v19 = vpop.permute.xlu0 %671  ;;  %v956_v15 = vrot.slane %v944_v23, 6  ;;  %v5200_v23 = vpop.permute.xlu1 %972 }
 0x17a   : > { %8458 = vst [vmem:[#allocation46_spill] sm:$0xff] %v5200_v23  ;;  %v962_v24 = vrot.slane %v948_v31, 6  ;;  %v5219_v31 = vstv %s4166_s26  ;;  %s4494_s26 = smov 122  }
 0x17b   : > { %880 = vrot.lane.b32.xlu0 %v873_v12, %s4490_s28  ;;  %v5187_v12 = vstv %s4165_s8  ;;  %v958_v59 = vsel %vm694_vm3, %v956_v15, %v957_v1  ;;  %s4177_s8 = sld [smem:[#allocation5 + $0xd]] }
 0x17c   : > { %1367 = vrot.lane.b32.xlu1 %v1350_v42, %s4492_s30  ;;  %v963_v42 = vsel %vm694_vm3, %v957_v1, %v962_v24  ;;  %v1385_v15 = vmul.f32 %v5187_v12, %v4686_v36  ;;  %v991_v1 = vrot.slane %v982_v53, 7  ;;  %v5238_v53 = vstv %s4167_s15  ;;  %s4178_s15 = sld [smem:[#allocation5 + $0x14]] }
 0x17d   : > { %v5172_v51 = vpop.permute.xlu0 %701  ;;  %v5207_v30 = vpop.permute.xlu1 %999 }
 0x17e   : > { %8454 = vst [vmem:[#allocation43_spill] sm:$0xff] %v5172_v51  ;;  %8459 = vst [vmem:[#allocation47_spill] sm:$0xff] %v5207_v30 }
 0x17f   : > { %921 = vrot.lane.b32.xlu0 %v913_v2, %s4490_s28  ;;  %v1381_v2 = vmul.f32 %v5195_v58, %v5187_v12 }
 0x181   : > { %v5185_v39 = vpop.permute.xlu0 %747  ;;  %1394 = vrot.lane.b32.xlu1 %v1381_v2, %s4492_s30  ;;  %v5224_v30 = vpop.permute.xlu1 %1003 }
 0x182   : > { %8456 = vst [vmem:[#allocation45_spill] sm:$0xff] %v5185_v39  ;;  %8461 = vst [vmem:[#allocation49_spill] sm:$0xff] %v5224_v30 }
 0x183   : > { %925 = vrot.lane.b32.xlu0 %v918_v16, %s4490_s28  ;;  %v984_v16 = vmul.f32 %v4885_v46, %v4911_v60 }
 0x185   : > { %v5202_v45 = vpop.permute.xlu0 %839  ;;  %1398 = vrot.lane.b32.xlu1 %v1381_v2, %s4492_s30  ;;  %v993_v46 = vrot.slane %v984_v16, 7  ;;  %v1420_v2 = vmul.f32 %v5219_v31, %v4686_v36  ;;  %v5232_v9 = vpop.permute.xlu1 %1007 }
 0x186   : > { %8463 = vst [vmem:[#allocation51_spill] sm:$0xff] %v5232_v9 }
 0x187   : > { %966 = vrot.lane.b32.xlu0 %v958_v59, %s4490_s28  ;;  %v1416_v59 = vmul.f32 %v5195_v58, %v5219_v31  ;;  %v1435_v56 = vrot.slane %v1420_v2, 4  ;;  %v994_v30 = vsel %vm990_vm8, %v991_v1, %v993_v46  ;;  %v1021_v2 = vmul.f32 %v4925_v8, %v4800_v4 }
 0x189   : > { %v5209_v32 = vpop.permute.xlu0 %884  ;;  %v1430_v24 = vrot.slane %v1416_v59, 4  ;;  %1402 = vrot.lane.b32.xlu1 %v1385_v15, %s4492_s30  ;;  %v1454_v15 = vmul.f32 %v5195_v58, %v5238_v53  ;;  %v5244_v59 = vpop.permute.xlu1 %1045 }
 0x18a   : > { %8460 = vst [vmem:[#allocation48_spill] sm:$0xff] %v5209_v32  ;;  %8464 = vst [vmem:[#allocation52_spill] sm:$0xff] %v5244_v59  ;;  %v1033_v59 = vrot.slane %v1021_v2, 7  ;;  %v5271_v2 = vstv %s4168_s22  ;;  %s4179_s22 = sld [smem:[#allocation5 + $0x1b]] }
 0x18b   : > { %970 = vrot.lane.b32.xlu0 %v963_v42, %s4490_s28  ;;  %v1436_v16 = vsel %vm341_vm10, %v1430_v24, %v1435_v56  ;;  %v1468_v9 = vrot.slane %v1454_v15, 4  ;;  %v1458_v56 = vmul.f32 %v5238_v53, %v4686_v36  ;;  %v1025_v15 = vmul.f32 %v4925_v8, %v4816_v11 }
 0x18d   : > { %v5226_v23 = vpop.permute.xlu0 %929  ;;  %1439 = vrot.lane.b32.xlu1 %v1430_v24, %s4492_s30  ;;  %v1473_v40 = vrot.slane %v1458_v56, 4 }
 0x18e   : > { %8462 = vst [vmem:[#allocation50_spill] sm:$0xff] %v5226_v23 }
 0x18f   : > { %997 = vrot.lane.b32.xlu0 %v991_v1, %s4491_s24  ;;  %v1023_v1 = vmul.f32 %v4925_v8, %v4911_v60  ;;  %v1499_v8 = vmul.f32 %v5195_v58, %v5271_v2 }
 0x191   : > { %v5234_v42 = vpop.permute.xlu0 %413  ;;  %1443 = vrot.lane.b32.xlu1 %v1436_v16, %s4492_s30  ;;  %v1035_v3 = vrot.slane %v1023_v1, 7  ;;  %v1474_v16 = vsel %vm341_vm10, %v1468_v9, %v1473_v40 }
 0x193   : > { %1001 = vrot.lane.b32.xlu0 %v994_v30, %s4491_s24  ;;  %v5256_v30 = vpop.permute.xlu1 %1049  ;;  %v1036_v36 = vsel %vm990_vm8, %v1033_v59, %v1035_v3 }
 0x194   : > { %8465 = vst [vmem:[#allocation53_spill] sm:$0xff] %v5256_v30  ;;  %v1039_v30 = vrot.slane %v1025_v15, 7  ;;  %v1068_v15 = vmul.f32 %v4952_v34, %v4911_v60 }
 0x195   : > { %v5246_v0 = vpop.permute.xlu0 %709  ;;  %1477 = vrot.lane.b32.xlu1 %v1468_v9, %s4492_s30  ;;  %v1066_v9 = vmul.f32 %v4952_v34, %v4800_v4 }
 0x196   : > { %v1080_v35 = vrot.slane %v1068_v15, 7  ;;  %v1111_v15 = vmul.f32 %v4989_v5, %v4800_v4 }
 0x197   : > { %1005 = vrot.lane.b32.xlu0 %v993_v46, %s4491_s24  ;;  %v5265_v46 = vpop.permute.xlu1 %1053 }
 0x198   : > { %8467 = vst [vmem:[#allocation55_spill] sm:$0xff] %v5265_v46  ;;  %v1513_v46 = vrot.slane %v1499_v8, 4  ;;  %v1078_v8 = vrot.slane %v1066_v9, 7  ;;  %v1124_v21 = vrot.slane %v1111_v15, 3  ;;  %v5339_v15 = vstv %s4170_s29  ;;  %s4181_s29 = sld [smem:[#allocation5 + $0x29]] }
 0x199   : > { %v5258_v24 = vpop.permute.xlu0 %409  ;;  %1481 = vrot.lane.b32.xlu1 %v1474_v16, %s4492_s30  ;;  %v5287_v16 = vld [vmem:[#allocation4 + $0x28] sm:$0x3f] }
 0x19a   : > { %8466 = vst [vmem:[#allocation54_spill] sm:$0xff] %v5258_v24 }
 0x19b   : > { %1043 = vrot.lane.b32.xlu0 %v1033_v59, %s4491_s24  ;;  %v5276_v1 = vpop.permute.xlu1 %1090  ;;  %v1040_v59 = vsel %vm990_vm8, %v1035_v3, %v1039_v30  ;;  %v1070_v3 = vmul.f32 %v4952_v34, %v4816_v11  ;;  %v1113_v34 = vmul.f32 %v4989_v5, %v4911_v60 }
 0x19c   : > { %8469 = vst [vmem:[#allocation57_spill] sm:$0xff] %v5276_v1 }
 0x19d   : > { %v5267_v61 = vpop.permute.xlu0 %452  ;;  %1485 = vrot.lane.b32.xlu1 %v1473_v40, %s4492_s30  ;;  %v1084_v9 = vrot.slane %v1070_v3, 7 }
 0x19e   : > { %8468 = vst [vmem:[#allocation56_spill] sm:$0xff] %v5267_v61 }
 0x19f   : > { %1047 = vrot.lane.b32.xlu0 %v1036_v36, %s4491_s24  ;;  %v1503_v36 = vmul.f32 %v5287_v16, %v5271_v2  ;;  %v5291_v1 = vpop.permute.xlu1 %1094  ;;  %v1085_v3 = vsel %vm990_vm8, %v1080_v35, %v1084_v9 }
 0x1a0   : > { %8471 = vst [vmem:[#allocation59_spill] sm:$0xff] %v5291_v1  ;;  %v1081_v1 = vsel %vm990_vm8, %v1078_v8, %v1080_v35  ;;  %v1152_v35 = vmul.f32 %v5011_v49, %v4911_v60 }
 0x1a1   : > { %v5278_v56 = vpop.permute.xlu0 %456  ;;  %v1518_v52 = vrot.slane %v1503_v36, 4  ;;  %1522 = vrot.lane.b32.xlu1 %v1513_v46, %s4492_s30 }
 0x1a2   : > { %8470 = vst [vmem:[#allocation58_spill] sm:$0xff] %v5278_v56 }
 0x1a3   : > { %1051 = vrot.lane.b32.xlu0 %v1040_v59, %s4491_s24  ;;  %v1519_v40 = vsel %vm341_vm10, %v1513_v46, %v1518_v52  ;;  %v5300_v30 = vpop.permute.xlu1 %1098  ;;  %v1544_v46 = vmul.f32 %v5195_v58, %v5304_v25 }
 0x1a4   : > { %8473 = vst [vmem:[#allocation61_spill] sm:$0xff] %v5300_v30 }
 0x1a5   : > { %v5293_v48 = vpop.permute.xlu0 %490  ;;  %1526 = vrot.lane.b32.xlu1 %v1519_v40, %s4492_s30  ;;  %v1552_v40 = vrot.slane %v1544_v46, 5  ;;  %v1163_v46 = vrot.slane %v1152_v35, 3 }
 0x1a6   : > { %8472 = vst [vmem:[#allocation60_spill] sm:$0xff] %v5293_v48 }
 0x1a7   : > { %1088 = vrot.lane.b32.xlu0 %v1078_v8, %s4491_s24  ;;  %v5315_v36 = vpop.permute.xlu1 %1136  ;;  %v1115_v8 = vmul.f32 %v4989_v5, %v4816_v11  ;;  %v1150_v5 = vmul.f32 %v5011_v49, %v4800_v4 }
 0x1a8   : > { %8475 = vst [vmem:[#allocation63_spill] sm:$0xff] %v5315_v36 }
 0x1a9   : > { %v5302_v59 = vpop.permute.xlu0 %494  ;;  %1530 = vrot.lane.b32.xlu1 %v1518_v52, %s4492_s30 }
 0x1aa   : > { %8474 = vst [vmem:[#allocation62_spill] sm:$0xff] %v5302_v59  ;;  %v1125_v59 = vrot.slane %v1113_v34, 3  ;;  %v1162_v34 = vrot.slane %v1150_v5, 3 }
 0x1ab   : > { %1092 = vrot.lane.b32.xlu0 %v1081_v1, %s4491_s24  ;;  %v5324_v1 = vpop.permute.xlu1 %1140 }
 0x1ac   : > { %8477 = vst [vmem:[#allocation65_spill] sm:$0xff] %v5324_v1  ;;  %v1126_v36 = vsel %vm1123_vm9, %v1124_v21, %v1125_v59 }
 0x1ad   : > { %v5317_v30 = vpop.permute.xlu0 %535  ;;  %1559 = vrot.lane.b32.xlu1 %v1552_v40, %s8378_s3 }
 0x1ae   : > { %8476 = vst [vmem:[#allocation64_spill] sm:$0xff] %v5317_v30  ;;  %v1130_v30 = vrot.slane %v1115_v8, 3  ;;  %v1154_v8 = vmul.f32 %v5011_v49, %v4816_v11  ;;  %v1586_v49 = vmul.f32 %v5287_v16, %v5339_v15 }
 0x1af   : > { %1096 = vrot.lane.b32.xlu0 %v1085_v3, %s4491_s24  ;;  %v5335_v52 = vpop.permute.xlu1 %1174 }
 0x1b0   : > { %8479 = vst [vmem:[#allocation67_spill] sm:$0xff] %v5335_v52  ;;  %v1131_v21 = vsel %vm1123_vm9, %v1125_v59, %v1130_v30  ;;  %v1164_v30 = vsel %vm1123_vm9, %v1162_v34, %v1163_v46  ;;  %v1168_v59 = vrot.slane %v1154_v8, 3  ;;  %v1197_v34 = vmul.f32 %v5035_v14, %v4911_v60 }
 0x1b1   : > { %v5326_v13 = vpop.permute.xlu0 %539  ;;  %1563 = vrot.lane.b32.xlu1 %v1552_v40, %s8378_s3 }
 0x1b2   : > { %8478 = vst [vmem:[#allocation66_spill] sm:$0xff] %v5326_v13 }
 0x1b3   : > { %1134 = vrot.lane.b32.xlu0 %v1126_v36, %s4491_s24  ;;  %v1582_v36 = vmul.f32 %v5195_v58, %v5339_v15  ;;  %v5348_v3 = vpop.permute.xlu1 %1178 }
 0x1b4   : > { %8481 = vst [vmem:[#allocation69_spill] sm:$0xff] %v5348_v3  ;;  %v1169_v3 = vsel %vm1123_vm9, %v1163_v46, %v1168_v59 }
 0x1b5   : > { %v5337_v9 = vpop.permute.xlu0 %580  ;;  %v1596_v1 = vrot.slane %v1582_v36, 1  ;;  %1567 = vrot.lane.b32.xlu1 %v1552_v40, %s8378_s3  ;;  %v1195_v36 = vmul.f32 %v5035_v14, %v4800_v4  ;;  %v5367_v40 = vstv %s4171_s5  ;;  %s4182_s5 = sld [smem:[#allocation5 + $0x30]] }
 0x1b6   : > { %8480 = vst [vmem:[#allocation68_spill] sm:$0xff] %v5337_v9  ;;  %v1199_v9 = vmul.f32 %v5035_v14, %v4816_v11 }
 0x1b7   : > { %1138 = vrot.lane.b32.xlu0 %v1131_v21, %s4491_s24  ;;  %v5357_v5 = vpop.permute.xlu1 %1182  ;;  %v1601_v21 = vrot.slane %v1586_v49, 1 }
 0x1b8   : > { %8483 = vst [vmem:[#allocation71_spill] sm:$0xff] %v5357_v5 }
 0x1b9   : > { %v5350_v52 = vpop.permute.xlu0 %584  ;;  %1605 = vrot.lane.b32.xlu1 %v1596_v1, %s8378_s3  ;;  %v1602_v8 = vsel %vm441_vm2, %v1596_v1, %v1601_v21  ;;  %v1624_v1 = vmul.f32 %v5287_v16, %v5367_v40 }
 0x1ba   : > { %8482 = vst [vmem:[#allocation70_spill] sm:$0xff] %v5350_v52  ;;  %v1208_v52 = vrot.slane %v1197_v34, 3 }
 0x1bb   : > { %1172 = vrot.lane.b32.xlu0 %v1164_v30, %s4491_s24  ;;  %v1620_v30 = vmul.f32 %v5195_v58, %v5367_v40  ;;  %v5373_v49 = vpop.permute.xlu1 %1219 }
 0x1bc   : > { %8485 = vst [vmem:[#allocation73_spill] sm:$0xff] %v5373_v49  ;;  %v1639_v49 = vrot.slane %v1624_v1, 1  ;;  %v1242_v1 = vmul.f32 %v5066_v18, %v4911_v60 }
 0x1bd   : > { %v5359_v35 = vpop.permute.xlu0 %625  ;;  %v1634_v5 = vrot.slane %v1620_v30, 1  ;;  %1609 = vrot.lane.b32.xlu1 %v1602_v8, %s8378_s3 }
 0x1be   : > { %8484 = vst [vmem:[#allocation72_spill] sm:$0xff] %v5359_v35  ;;  %v1207_v35 = vrot.slane %v1195_v36, 3  ;;  %v1213_v36 = vrot.slane %v1199_v9, 3  ;;  %v5401_v9 = vstv %s4172_s16  ;;  %s4190_s16 = sld [smem:[#allocation5 + $0x32]] }
 0x1bf   : > { %1176 = vrot.lane.b32.xlu0 %v1169_v3, %s4491_s24  ;;  %v5383_v3 = vpop.permute.xlu1 %1223  ;;  %v1640_v14 = vsel %vm441_vm2, %v1634_v5, %v1639_v49 }
 0x1c0   : > { %8487 = vst [vmem:[#allocation75_spill] sm:$0xff] %v5383_v3  ;;  %v1209_v30 = vsel %vm1123_vm9, %v1207_v35, %v1208_v52  ;;  %v1214_v8 = vsel %vm1123_vm9, %v1208_v52, %v1213_v36  ;;  %v1240_v3 = vmul.f32 %v5066_v18, %v4800_v4 }
 0x1c1   : > { %v5375_v46 = vpop.permute.xlu0 %629  ;;  %1643 = vrot.lane.b32.xlu1 %v1634_v5, %s8378_s3  ;;  %v1665_v5 = vmul.f32 %v5195_v58, %v5401_v9 }
 0x1c2   : > { %8486 = vst [vmem:[#allocation74_spill] sm:$0xff] %v5375_v46 }
 0x1c3   : > { %1180 = vrot.lane.b32.xlu0 %v1168_v59, %s4491_s24  ;;  %v5391_v34 = vpop.permute.xlu1 %1227  ;;  %v1679_v52 = vrot.slane %v1665_v5, 1 }
 0x1c4   : > { %8489 = vst [vmem:[#allocation77_spill] sm:$0xff] %v5391_v34  ;;  %v1252_v34 = vrot.slane %v1240_v3, 3 }
 0x1c5   : > { %v5385_v21 = vpop.permute.xlu0 %663  ;;  %1647 = vrot.lane.b32.xlu1 %v1640_v14, %s8378_s3  ;;  %v1669_v14 = vmul.f32 %v5287_v16, %v5401_v9 }
 0x1c6   : > { %8488 = vst [vmem:[#allocation76_spill] sm:$0xff] %v5385_v21  ;;  %v1244_v21 = vmul.f32 %v5066_v18, %v4816_v11 }
 0x1c7   : > { %1217 = vrot.lane.b32.xlu0 %v1209_v30, %s4491_s24  ;;  %v5406_v35 = vpop.permute.xlu1 %1264 }
 0x1c8   : > { %8491 = vst [vmem:[#allocation79_spill] sm:$0xff] %v5406_v35  ;;  %v1684_v35 = vrot.slane %v1669_v14, 1  ;;  %v1258_v3 = vrot.slane %v1244_v21, 3 }
 0x1c9   : > { %v5393_v59 = vpop.permute.xlu0 %667  ;;  %1651 = vrot.lane.b32.xlu1 %v1639_v49, %s8378_s3 }
 0x1ca   : > { %8490 = vst [vmem:[#allocation78_spill] sm:$0xff] %v5393_v59  ;;  %v1253_v59 = vrot.slane %v1242_v1, 3  ;;  %v1685_v11 = vsel %vm441_vm2, %v1679_v52, %v1684_v35  ;;  %v5430_v1 = vstv %s4173_s17  ;;  %s4191_s17 = sld [smem:[#allocation5 + $0x39]] }
 0x1cb   : > { %1221 = vrot.lane.b32.xlu0 %v1214_v8, %s4491_s24  ;;  %v5416_v8 = vpop.permute.xlu1 %1268  ;;  %v1710_v21 = vmul.f32 %v5195_v58, %v5430_v1 }
 0x1cc   : > { %8493 = vst [vmem:[#allocation81_spill] sm:$0xff] %v5416_v8  ;;  %v1254_v5 = vsel %vm1123_vm9, %v1252_v34, %v1253_v59 }
 0x1cd   : > { %v5408_v30 = vpop.permute.xlu0 %705  ;;  %1688 = vrot.lane.b32.xlu1 %v1679_v52, %s8378_s3  ;;  %v1724_v52 = vrot.slane %v1710_v21, 1 }
 0x1ce   : > { %8492 = vst [vmem:[#allocation80_spill] sm:$0xff] %v5408_v30 }
 0x1cf   : > { %1225 = vrot.lane.b32.xlu0 %v1213_v36, %s4491_s24  ;;  %v5424_v18 = vpop.permute.xlu1 %1272  ;;  %v1259_v36 = vsel %vm1123_vm9, %v1253_v59, %v1258_v3  ;;  %v1714_v59 = vmul.f32 %v5287_v16, %v5430_v1 }
 0x1d0   : > { %8495 = vst [vmem:[#allocation83_spill] sm:$0xff] %v5424_v18 }
 0x1d1   : > { %v5418_v46 = vpop.permute.xlu0 %751  ;;  %1692 = vrot.lane.b32.xlu1 %v1685_v11, %s8378_s3  ;;  %v1729_v18 = vrot.slane %v1714_v59, 1 }
 0x1d2   : > { %8494 = vst [vmem:[#allocation82_spill] sm:$0xff] %v5418_v46 }
 0x1d3   : > { %1262 = vrot.lane.b32.xlu0 %v1254_v5, %s4491_s24  ;;  %v5435_v34 = vpop.permute.xlu1 %1295 }
 0x1d4   : > { %8497 = vst [vmem:[#allocation85_spill] sm:$0xff] %v5435_v34  ;;  %v1287_v34 = vmul.f32 %v5102_v38, %v4911_v60 }
 0x1d5   : > { %v5426_v49 = vpop.permute.xlu0 %755  ;;  %1696 = vrot.lane.b32.xlu1 %v1684_v35, %s8378_s3  ;;  %v1730_v35 = vsel %vm441_vm2, %v1724_v52, %v1729_v18 }
 0x1d6   : > { %8496 = vst [vmem:[#allocation84_spill] sm:$0xff] %v5426_v49 }
 0x1d7   : > { %1266 = vrot.lane.b32.xlu0 %v1259_v36, %s4491_s24  ;;  %v5443_v5 = vpop.permute.xlu1 %1299  ;;  %v1285_v36 = vmul.f32 %v5102_v38, %v4800_v4 }
 0x1d8   : > { %8499 = vst [vmem:[#allocation87_spill] sm:$0xff] %v5443_v5  ;;  %v5459_v5 = vstv %s4174_s23  ;;  %s4192_s23 = sld [smem:[#allocation5 + $0x40]] }
 0x1d9   : > { %v5437_v14 = vpop.permute.xlu0 %793  ;;  %1733 = vrot.lane.b32.xlu1 %v1724_v52, %s8378_s3  ;;  %v1755_v4 = vmul.f32 %v5195_v58, %v5459_v5 }
 0x1da   : > { %8498 = vst [vmem:[#allocation86_spill] sm:$0xff] %v5437_v14 }
 0x1db   : > { %1270 = vrot.lane.b32.xlu0 %v1258_v3, %s4491_s24  ;;  %v5452_v21 = vpop.permute.xlu1 %1324  ;;  %v1769_v38 = vrot.slane %v1755_v4, 5 }
 0x1dc   : > { %8501 = vst [vmem:[#allocation89_spill] sm:$0xff] %v5452_v21 }
 0x1dd   : > { %v5445_v11 = vpop.permute.xlu0 %797  ;;  %1737 = vrot.lane.b32.xlu1 %v1730_v35, %s8378_s3 }
 0x1de   : > { %8500 = vst [vmem:[#allocation88_spill] sm:$0xff] %v5445_v11 }
 0x1df   : > { %1293 = vrot.lane.b32.xlu0 %v1285_v36, %s4492_s30  ;;  %v5464_v59 = vpop.permute.xlu1 %1328  ;;  %v5468_v36 = vld [vmem:[#allocation4] sm:$0xff] }
 0x1e0   : > { %8503 = vst [vmem:[#allocation91_spill] sm:$0xff] %v5464_v59  ;;  %v1310_v21 = vmul.f32 %v5468_v36, %v5121_v7  ;;  %v1312_v59 = vmul.f32 %v5121_v7, %v4911_v60 }
 0x1e1   : > { %v5454_v3 = vpop.permute.xlu0 %831  ;;  %1741 = vrot.lane.b32.xlu1 %v1729_v18, %s8378_s3 }
 0x1e2   : > { %8502 = vst [vmem:[#allocation90_spill] sm:$0xff] %v5454_v3  ;;  %v5483_v3 = vstv %s4175_s27  ;;  %s4193_s27 = sld [smem:[#allocation5 + $0x47]] }
 0x1e3   : > { %1297 = vrot.lane.b32.xlu0 %v1287_v34, %s4492_s30  ;;  %v1759_v34 = vmul.f32 %v5287_v16, %v5459_v5  ;;  %v5476_v35 = vpop.permute.xlu1 %1332 }
 0x1e4   : > { %8505 = vst [vmem:[#allocation93_spill] sm:$0xff] %v5476_v35 }
 0x1e5   : > { %v5466_v52 = vpop.permute.xlu0 %835  ;;  %1778 = vrot.lane.b32.xlu1 %v1769_v38, %s8378_s3 }
 0x1e6   : > { %8504 = vst [vmem:[#allocation92_spill] sm:$0xff] %v5466_v52  ;;  %v1774_v52 = vrot.slane %v1759_v34, 5 }
 0x1e7   : > { %1322 = vrot.lane.b32.xlu0 %v1310_v21, %s4492_s30  ;;  %v1793_v21 = vmul.f32 %v5195_v58, %v5483_v3  ;;  %v5489_v4 = vpop.permute.xlu1 %1359 }
 0x1e8   : > { %v1775_v18 = vsel %vm258_vm1, %v1769_v38, %v1774_v52  ;;  %8507 = vst [vmem:[#allocation95_spill] sm:$0xff] %v5489_v4  ;;  %v1345_v4 = vmul.f32 %v5468_v36, %v5151_v22 }
 0x1e9   : > { %v5478_v8 = vpop.permute.xlu0 %876  ;;  %v1807_v11 = vrot.slane %v1793_v21, 5  ;;  %1782 = vrot.lane.b32.xlu1 %v1775_v18, %s8378_s3 }
 0x1ea   : > { %8506 = vst [vmem:[#allocation94_spill] sm:$0xff] %v5478_v8  ;;  %v5493_v8 = vld [vmem:[#allocation4 + $0x20] sm:$0x3f] }
 0x1eb   : > { %1326 = vrot.lane.b32.xlu0 %v1312_v59, %s4492_s30  ;;  %v1314_v34 = vmul.f32 %v5493_v8, %v5121_v7  ;;  %v1797_v59 = vmul.f32 %v5287_v16, %v5483_v3  ;;  %v5501_v52 = vpop.permute.xlu1 %1363  ;;  %v1419_v46 = vmul.f32 %v5493_v8, %v5219_v31 }
 0x1ec   : > { %8509 = vst [vmem:[#allocation97_spill] sm:$0xff] %v5501_v52  ;;  %v5517_v52 = vstv %s4176_s6  ;;  %s4194_s6 = sld [smem:[#allocation5 + $0x4e]] }
 0x1ed   : > { %v5491_v35 = vpop.permute.xlu0 %880  ;;  %1816 = vrot.lane.b32.xlu1 %v1807_v11, %s8378_s3 }
 0x1ee   : > { %8508 = vst [vmem:[#allocation96_spill] sm:$0xff] %v5491_v35  ;;  %v1812_v35 = vrot.slane %v1797_v59, 5  ;;  %v1838_v59 = vmul.f32 %v5195_v58, %v5517_v52 }
 0x1ef   : > { %1330 = vrot.lane.b32.xlu0 %v1314_v34, %s4492_s30  ;;  %v5510_v18 = vpop.permute.xlu1 %1367  ;;  %v1347_v34 = vmul.f32 %v5151_v22, %v4911_v60 }
 0x1f0   : > { %v1813_v7 = vsel %vm258_vm1, %v1807_v11, %v1812_v35  ;;  %8511 = vst [vmem:[#allocation99_spill] sm:$0xff] %v5510_v18  ;;  %v1349_v11 = vmul.f32 %v5493_v8, %v5151_v22  ;;  %v1846_v18 = vrot.slane %v1838_v59, 6 }
 0x1f1   : > { %v5503_v38 = vpop.permute.xlu0 %921  ;;  %1820 = vrot.lane.b32.xlu1 %v1813_v7, %s8378_s3 }
 0x1f2   : > { %8510 = vst [vmem:[#allocation98_spill] sm:$0xff] %v5503_v38 }
 0x1f3   : > { %1357 = vrot.lane.b32.xlu0 %v1345_v4, %s4492_s30  ;;  %v5522_v38 = vpop.permute.xlu1 %1394 }
 0x1f4   : > { %8513 = vst [vmem:[#allocation101_spill] sm:$0xff] %v5522_v38 }
 0x1f5   : > { %v5512_v21 = vpop.permute.xlu0 %925  ;;  %1824 = vrot.lane.b32.xlu1 %v1812_v35, %s8378_s3  ;;  %v5542_v35 = vld [vmem:[#allocation4 + $0x10] sm:$0xff] }
 0x1f6   : > { %8512 = vst [vmem:[#allocation100_spill] sm:$0xff] %v5512_v21  ;;  %v1382_v59 = vmul.f32 %v5542_v35, %v5187_v12 }
 0x1f7   : > { %1361 = vrot.lane.b32.xlu0 %v1347_v34, %s4492_s30  ;;  %v5530_v60 = vpop.permute.xlu1 %1398  ;;  %v1380_v34 = vmul.f32 %v5468_v36, %v5187_v12 }
 0x1f8   : > { %8515 = vst [vmem:[#allocation103_spill] sm:$0xff] %v5530_v60  ;;  %v1417_v60 = vmul.f32 %v5542_v35, %v5219_v31 }
 0x1f9   : > { %v5524_v4 = vpop.permute.xlu0 %966  ;;  %1853 = vrot.lane.b32.xlu1 %v1846_v18, %s4494_s26 }
 0x1fa   : > { %8514 = vst [vmem:[#allocation102_spill] sm:$0xff] %v5524_v4  ;;  %v1384_v4 = vmul.f32 %v5493_v8, %v5187_v12  ;;  %v1428_v14 = vrot.slane %v1417_v60, 4  ;;  %v1453_v12 = vmul.f32 %v5468_v36, %v5238_v53  ;;  %v1455_v60 = vmul.f32 %v5542_v35, %v5238_v53 }
 0x1fb   : > { %1365 = vrot.lane.b32.xlu0 %v1349_v11, %s4492_s30  ;;  %v5538_v38 = vpop.permute.xlu1 %1402  ;;  %v1415_v11 = vmul.f32 %v5468_v36, %v5219_v31 }
 0x1fc   : > { %8517 = vst [vmem:[#allocation105_spill] sm:$0xff] %v5538_v38 }
 0x1fd   : > { %v5532_v7 = vpop.permute.xlu0 %970  ;;  %1857 = vrot.lane.b32.xlu1 %v1846_v18, %s4494_s26  ;;  %v1427_v21 = vrot.slane %v1415_v11, 4 }
 0x1fe   : > { %8516 = vst [vmem:[#allocation104_spill] sm:$0xff] %v5532_v7  ;;  %v5551_v7 = vstv %s4177_s8  ;;  %s4195_s8 = sld [smem:[#allocation5 + $0x55]] }
 0x1ff   : > { %1392 = vrot.lane.b32.xlu0 %v1380_v34, %s4492_s30  ;;  %v1876_v34 = vmul.f32 %v5195_v58, %v5551_v7  ;;  %v5556_v38 = vpop.permute.xlu1 %1439  ;;  %v1880_v31 = vmul.f32 %v5287_v16, %v5551_v7 }
 0x200   : > { %8519 = vst [vmem:[#allocation107_spill] sm:$0xff] %v5556_v38  ;;  %v1429_v38 = vsel %vm341_vm10, %v1427_v21, %v1428_v14  ;;  %v5583_v21 = vstv %s4178_s15  ;;  %s4196_s15 = sld [smem:[#allocation5 + $0x5c]] }
 0x201   : > { %v5540_v22 = vpop.permute.xlu0 %997  ;;  %1861 = vrot.lane.b32.xlu1 %v1846_v18, %s4494_s26  ;;  %v1888_v30 = vrot.slane %v1876_v34, 6  ;;  %v1895_v11 = vrot.slane %v1880_v31, 6  ;;  %v1465_v34 = vrot.slane %v1453_v12, 4  ;;  %v1924_v13 = vmul.f32 %v5493_v8, %v5583_v21 }
 0x202   : > { %8518 = vst [vmem:[#allocation106_spill] sm:$0xff] %v5540_v22 }
 0x203   : > { %1396 = vrot.lane.b32.xlu0 %v1382_v59, %s4492_s30  ;;  %v5566_v59 = vpop.permute.xlu1 %1443 }
 0x204   : > { %8521 = vst [vmem:[#allocation109_spill] sm:$0xff] %v5566_v59  ;;  %v1466_v59 = vrot.slane %v1455_v60, 4 }
 0x205   : > { %v5558_v22 = vpop.permute.xlu0 %1001  ;;  %1899 = vrot.lane.b32.xlu1 %v1888_v30, %s4494_s26 }
 0x206   : > { %8520 = vst [vmem:[#allocation108_spill] sm:$0xff] %v5558_v22  ;;  %v1433_v22 = vrot.slane %v1419_v46, 4 }
 0x207   : > { %1400 = vrot.lane.b32.xlu0 %v1384_v4, %s4492_s30  ;;  %v5579_v18 = vpop.permute.xlu1 %1477 }
 0x208   : > { %8523 = vst [vmem:[#allocation111_spill] sm:$0xff] %v5579_v18  ;;  %v1434_v46 = vsel %vm341_vm10, %v1428_v14, %v1433_v22  ;;  %v1921_v18 = vmul.f32 %v5195_v58, %v5583_v21  ;;  %v1467_v22 = vsel %vm341_vm10, %v1465_v34, %v1466_v59  ;;  %v5612_v34 = vstv %s4179_s22  ;;  %s4197_s22 = sld [smem:[#allocation5 + $0x33]] }
 0x209   : > { %v5568_v49 = vpop.permute.xlu0 %1005  ;;  %1903 = vrot.lane.b32.xlu1 %v1888_v30, %s4494_s26 }
 0x20a   : > { %8522 = vst [vmem:[#allocation110_spill] sm:$0xff] %v5568_v49  ;;  %v1457_v49 = vmul.f32 %v5493_v8, %v5238_v53  ;;  %v1935_v14 = vrot.slane %v1921_v18, 2  ;;  %v1925_v53 = vmul.f32 %v5287_v16, %v5583_v21  ;;  %v1498_v18 = vmul.f32 %v5468_v36, %v5271_v2 }
 0x20b   : > { %1437 = vrot.lane.b32.xlu0 %v1429_v38, %s4492_s30  ;;  %v1896_v38 = vsel %vm694_vm3, %v1888_v30, %v1895_v11  ;;  %v5593_v31 = vpop.permute.xlu1 %1481 }
 0x20c   : > { %8525 = vst [vmem:[#allocation113_spill] sm:$0xff] %v5593_v31  ;;  %v1471_v12 = vrot.slane %v1457_v49, 4  ;;  %v1940_v11 = vrot.slane %v1925_v53, 2  ;;  %v1500_v49 = vmul.f32 %v5542_v35, %v5271_v2  ;;  %v1510_v31 = vrot.slane %v1498_v18, 4 }
 0x20d   : > { %v5581_v4 = vpop.permute.xlu0 %1043  ;;  %1907 = vrot.lane.b32.xlu1 %v1896_v38, %s4494_s26 }
 0x20e   : > { %8524 = vst [vmem:[#allocation112_spill] sm:$0xff] %v5581_v4  ;;  %v1941_v38 = vsel %vm782_vm4, %v1935_v14, %v1940_v11 }
 0x20f   : > { %1441 = vrot.lane.b32.xlu0 %v1434_v46, %s4492_s30  ;;  %v5602_v60 = vpop.permute.xlu1 %1485  ;;  %v1472_v46 = vsel %vm341_vm10, %v1466_v59, %v1471_v12 }
 0x210   : > { %8527 = vst [vmem:[#allocation115_spill] sm:$0xff] %v5602_v60 }
 0x211   : > { %v5595_v4 = vpop.permute.xlu0 %1047  ;;  %1944 = vrot.lane.b32.xlu1 %v1935_v14, %s4494_s26  ;;  %v1963_v14 = vmul.f32 %v5287_v16, %v5612_v34 }
 0x212   : > { %8526 = vst [vmem:[#allocation114_spill] sm:$0xff] %v5595_v4  ;;  %v1502_v4 = vmul.f32 %v5493_v8, %v5271_v2 }
 0x213   : > { %1475 = vrot.lane.b32.xlu0 %v1467_v22, %s4492_s30  ;;  %v1959_v22 = vmul.f32 %v5195_v58, %v5612_v34  ;;  %v5618_v53 = vpop.permute.xlu1 %1522 }
 0x214   : > { %8529 = vst [vmem:[#allocation117_spill] sm:$0xff] %v5618_v53  ;;  %v1978_v53 = vrot.slane %v1963_v14, 2  ;;  %v1516_v18 = vrot.slane %v1502_v4, 4 }
 0x215   : > { %v5604_v30 = vpop.permute.xlu0 %1051  ;;  %v1973_v60 = vrot.slane %v1959_v22, 2  ;;  %1948 = vrot.lane.b32.xlu1 %v1941_v38, %s4494_s26 }
 0x216   : > { %8528 = vst [vmem:[#allocation116_spill] sm:$0xff] %v5604_v30  ;;  %v1511_v30 = vrot.slane %v1500_v49, 4 }
 0x217   : > { %1479 = vrot.lane.b32.xlu0 %v1472_v46, %s4492_s30  ;;  %v5628_v11 = vpop.permute.xlu1 %1526  ;;  %v1979_v2 = vsel %vm782_vm4, %v1973_v60, %v1978_v53 }
 0x218   : > { %8531 = vst [vmem:[#allocation119_spill] sm:$0xff] %v5628_v11  ;;  %v1512_v22 = vsel %vm341_vm10, %v1510_v31, %v1511_v30  ;;  %v1517_v38 = vsel %vm341_vm10, %v1511_v30, %v1516_v18  ;;  %v5642_v11 = vstv %s4180_s18  ;;  %v1545_v30 = vmul.f32 %v5542_v35, %v5304_v25  ;;  %s4198_s18 = sld [smem:[#allocation5 + $0x3a]] }
 0x219   : > { %v5620_v59 = vpop.permute.xlu0 %1088  ;;  %1982 = vrot.lane.b32.xlu1 %v1973_v60, %s4494_s26  ;;  %v2004_v4 = vmul.f32 %v5195_v58, %v5642_v11  ;;  %v1543_v60 = vmul.f32 %v5468_v36, %v5304_v25 }
 0x21a   : > { %8530 = vst [vmem:[#allocation118_spill] sm:$0xff] %v5620_v59 }
 0x21b   : > { %1483 = vrot.lane.b32.xlu0 %v1471_v12, %s4492_s30  ;;  %v5636_v49 = vpop.permute.xlu1 %1530 }
 0x21c   : > { %8533 = vst [vmem:[#allocation121_spill] sm:$0xff] %v5636_v49  ;;  %v1551_v49 = vrot.slane %v1543_v60, 5  ;;  %v1583_v60 = vmul.f32 %v5542_v35, %v5339_v15 }
 0x21d   : > { %v5630_v46 = vpop.permute.xlu0 %1092  ;;  %1986 = vrot.lane.b32.xlu1 %v1979_v2, %s4494_s26  ;;  %v2008_v2 = vmul.f32 %v5287_v16, %v5642_v11 }
 0x21e   : > { %8532 = vst [vmem:[#allocation120_spill] sm:$0xff] %v5630_v46  ;;  %v1585_v46 = vmul.f32 %v5493_v8, %v5339_v15 }
 0x21f   : > { %1520 = vrot.lane.b32.xlu0 %v1512_v22, %s4492_s30  ;;  %v5647_v31 = vpop.permute.xlu1 %1559  ;;  %v2018_v22 = vrot.slane %v2004_v4, 2 }
 0x220   : > { %8535 = vst [vmem:[#allocation123_spill] sm:$0xff] %v5647_v31 }
 0x221   : > { %v5638_v12 = vpop.permute.xlu0 %1096  ;;  %1990 = vrot.lane.b32.xlu1 %v1978_v53, %s4494_s26 }
 0x222   : > { %8534 = vst [vmem:[#allocation122_spill] sm:$0xff] %v5638_v12  ;;  %v1553_v12 = vrot.slane %v1545_v30, 5  ;;  %v5676_v30 = vstv %s4181_s29  ;;  %s4199_s29 = sld [smem:[#allocation5 + $0x41]] }
 0x223   : > { %1524 = vrot.lane.b32.xlu0 %v1517_v38, %s4492_s30  ;;  %v5659_v38 = vpop.permute.xlu1 %1563 }
 0x224   : > { %8537 = vst [vmem:[#allocation125_spill] sm:$0xff] %v5659_v38  ;;  %v1581_v38 = vmul.f32 %v5468_v36, %v5339_v15  ;;  %v1621_v15 = vmul.f32 %v5542_v35, %v5367_v40 }
 0x225   : > { %v5649_v14 = vpop.permute.xlu0 %1134  ;;  %2027 = vrot.lane.b32.xlu1 %v2018_v22, %s4494_s26 }
 0x226   : > { %8536 = vst [vmem:[#allocation124_spill] sm:$0xff] %v5649_v14  ;;  %v2023_v14 = vrot.slane %v2008_v2, 2 }
 0x227   : > { %1528 = vrot.lane.b32.xlu0 %v1516_v18, %s4492_s30  ;;  %v5666_v53 = vpop.permute.xlu1 %1567  ;;  %v1554_v18 = vsel %vm258_vm1, %v1551_v49, %v1553_v12 }
 0x228   : > { %v2024_v25 = vsel %vm782_vm4, %v2018_v22, %v2023_v14  ;;  %8539 = vst [vmem:[#allocation127_spill] sm:$0xff] %v5666_v53  ;;  %v2049_v22 = vmul.f32 %v5195_v58, %v5676_v30 }
 0x229   : > { %v5661_v31 = vpop.permute.xlu0 %1138  ;;  %2031 = vrot.lane.b32.xlu1 %v2024_v25, %s4494_s26  ;;  %v2053_v25 = vmul.f32 %v5287_v16, %v5676_v30 }
 0x22a   : > { %8538 = vst [vmem:[#allocation126_spill] sm:$0xff] %v5661_v31  ;;  %v1594_v31 = vrot.slane %v1583_v60, 1 }
 0x22b   : > { %1557 = vrot.lane.b32.xlu0 %v1551_v49, %s8378_s3  ;;  %v5681_v2 = vpop.permute.xlu1 %1605  ;;  %v2063_v49 = vrot.slane %v2049_v22, 2 }
 0x22c   : > { %8541 = vst [vmem:[#allocation129_spill] sm:$0xff] %v5681_v2  ;;  %v2068_v2 = vrot.slane %v2053_v25, 2  ;;  %v5707_v25 = vstv %s4182_s5  ;;  %s4200_s5 = sld [smem:[#allocation5 + $0x48]] }
 0x22d   : > { %v5668_v4 = vpop.permute.xlu0 %1172  ;;  %2035 = vrot.lane.b32.xlu1 %v2023_v14, %s4494_s26 }
 0x22e   : > { %8540 = vst [vmem:[#allocation128_spill] sm:$0xff] %v5668_v4  ;;  %v1593_v4 = vrot.slane %v1581_v38, 1  ;;  %v1619_v38 = vmul.f32 %v5468_v36, %v5367_v40 }
 0x22f   : > { %1561 = vrot.lane.b32.xlu0 %v1554_v18, %s8378_s3  ;;  %v5691_v18 = vpop.permute.xlu1 %1609 }
 0x230   : > { %8543 = vst [vmem:[#allocation131_spill] sm:$0xff] %v5691_v18  ;;  %v1595_v22 = vsel %vm441_vm2, %v1593_v4, %v1594_v31  ;;  %v1631_v4 = vrot.slane %v1619_v38, 1  ;;  %v1632_v18 = vrot.slane %v1621_v15, 1 }
 0x231   : > { %v5683_v53 = vpop.permute.xlu0 %1176  ;;  %2072 = vrot.lane.b32.xlu1 %v2063_v49, %s4494_s26 }
 0x232   : > { %8542 = vst [vmem:[#allocation130_spill] sm:$0xff] %v5683_v53  ;;  %v1599_v53 = vrot.slane %v1585_v46, 1 }
 0x233   : > { %1565 = vrot.lane.b32.xlu0 %v1553_v12, %s8378_s3  ;;  %v2069_v12 = vsel %vm782_vm4, %v2063_v49, %v2068_v2  ;;  %v5703_v14 = vpop.permute.xlu1 %1643  ;;  %v2094_v49 = vmul.f32 %v5195_v58, %v5707_v25 }
 0x234   : > { %8545 = vst [vmem:[#allocation133_spill] sm:$0xff] %v5703_v14  ;;  %v1600_v46 = vsel %vm441_vm2, %v1594_v31, %v1599_v53  ;;  %v1633_v31 = vsel %vm441_vm2, %v1631_v4, %v1632_v18 }
 0x235   : > { %v5693_v59 = vpop.permute.xlu0 %1180  ;;  %2076 = vrot.lane.b32.xlu1 %v2069_v12, %s4494_s26 }
 0x236   : > { %8544 = vst [vmem:[#allocation132_spill] sm:$0xff] %v5693_v59  ;;  %v1623_v59 = vmul.f32 %v5493_v8, %v5367_v40  ;;  %v2098_v40 = vmul.f32 %v5287_v16, %v5707_v25 }
 0x237   : > { %1603 = vrot.lane.b32.xlu0 %v1595_v22, %s8378_s3  ;;  %v5716_v22 = vpop.permute.xlu1 %1647 }
 0x238   : > { %8547 = vst [vmem:[#allocation135_spill] sm:$0xff] %v5716_v22  ;;  %v1637_v53 = vrot.slane %v1623_v59, 1  ;;  %v2113_v12 = vrot.slane %v2098_v40, 6  ;;  %v1666_v59 = vmul.f32 %v5542_v35, %v5401_v9 }
 0x239   : > { %v5705_v60 = vpop.permute.xlu0 %1217  ;;  %2080 = vrot.lane.b32.xlu1 %v2068_v2, %s4494_s26 }
 0x23a   : > { %8546 = vst [vmem:[#allocation134_spill] sm:$0xff] %v5705_v60  ;;  %v2108_v60 = vrot.slane %v2094_v49, 6  ;;  %v1664_v49 = vmul.f32 %v5468_v36, %v5401_v9  ;;  %v1677_v40 = vrot.slane %v1666_v59, 1  ;;  %v5760_v59 = vstv %s4191_s17  ;;  %s4202_s17 = sld [smem:[#allocation5 + $0x56]] }
 0x23b   : > { %1607 = vrot.lane.b32.xlu0 %v1600_v46, %s8378_s3  ;;  %v5725_v38 = vpop.permute.xlu1 %1651  ;;  %v1638_v46 = vsel %vm441_vm2, %v1632_v18, %v1637_v53 }
 0x23c   : > { %8549 = vst [vmem:[#allocation137_spill] sm:$0xff] %v5725_v38  ;;  %v2114_v2 = vsel %vm694_vm3, %v2108_v60, %v2113_v12  ;;  %v1676_v18 = vrot.slane %v1664_v49, 1  ;;  %v1668_v38 = vmul.f32 %v5493_v8, %v5401_v9 }
 0x23d   : > { %v5718_v14 = vpop.permute.xlu0 %1221  ;;  %2117 = vrot.lane.b32.xlu1 %v2108_v60, %s4494_s26 }
 0x23e   : > { %8548 = vst [vmem:[#allocation136_spill] sm:$0xff] %v5718_v14 }
 0x23f   : > { %1641 = vrot.lane.b32.xlu0 %v1633_v31, %s8378_s3  ;;  %v5737_v16 = vpop.permute.xlu1 %1688  ;;  %v5741_v31 = vstv %s4190_s16  ;;  %s4201_s16 = sld [smem:[#allocation5 + $0x4f]] }
 0x240   : > { %8551 = vst [vmem:[#allocation139_spill] sm:$0xff] %v5737_v16  ;;  %v2265_v22 = vmul.f32 %v5195_v58, %v5741_v31  ;;  %v1682_v16 = vrot.slane %v1668_v38, 1  ;;  %v2289_v38 = vmul.f32 %v5195_v58, %v5760_v59 }
 0x241   : > { %v5727_v15 = vpop.permute.xlu0 %1225  ;;  %2121 = vrot.lane.b32.xlu1 %v2114_v2, %s4494_s26 }
 0x242   : > { %8550 = vst [vmem:[#allocation138_spill] sm:$0xff] %v5727_v15  ;;  %v1683_v2 = vsel %vm441_vm2, %v1677_v40, %v1682_v16 }
 0x243   : > { %1645 = vrot.lane.b32.xlu0 %v1638_v46, %s8378_s3  ;;  %v5749_v60 = vpop.permute.xlu1 %1692  ;;  %v1678_v46 = vsel %vm441_vm2, %v1676_v18, %v1677_v40 }
 0x244   : > { %8553 = vst [vmem:[#allocation141_spill] sm:$0xff] %v5749_v60  ;;  %v1711_v60 = vmul.f32 %v5542_v35, %v5430_v1 }
 0x245   : > { %v5739_v4 = vpop.permute.xlu0 %1262  ;;  %2274 = vrot.lane.b32.xlu1 %v2265_v22, %s4488_s19 }
 0x246   : > { %8552 = vst [vmem:[#allocation140_spill] sm:$0xff] %v5739_v4  ;;  %v1722_v40 = vrot.slane %v1711_v60, 1 }
 0x247   : > { %1649 = vrot.lane.b32.xlu0 %v1637_v53, %s8378_s3  ;;  %v5756_v49 = vpop.permute.xlu1 %1696  ;;  %v1709_v53 = vmul.f32 %v5468_v36, %v5430_v1 }
 0x248   : > { %8555 = vst [vmem:[#allocation143_spill] sm:$0xff] %v5756_v49 }
 0x249   : > { %v5751_v12 = vpop.permute.xlu0 %1266  ;;  %2278 = vrot.lane.b32.xlu1 %v2265_v22, %s4488_s19  ;;  %v1721_v49 = vrot.slane %v1709_v53, 1  ;;  %v5779_v22 = vld [vmem:[#allocation4 + $0x58] sm:$0x3f] }
 0x24a   : > { %8554 = vst [vmem:[#allocation142_spill] sm:$0xff] %v5751_v12  ;;  %v2293_v60 = vmul.f32 %v5760_v59, %v5779_v22 }
 0x24b   : > { %1686 = vrot.lane.b32.xlu0 %v1678_v46, %s8378_s3  ;;  %v5771_v18 = vpop.permute.xlu1 %1733 }
 0x24c   : > { %8557 = vst [vmem:[#allocation145_spill] sm:$0xff] %v5771_v18 }
 0x24d   : > { %v5758_v9 = vpop.permute.xlu0 %1270  ;;  %2302 = vrot.lane.b32.xlu1 %v2289_v38, %s4488_s19 }
 0x24e   : > { %8556 = vst [vmem:[#allocation144_spill] sm:$0xff] %v5758_v9  ;;  %v1713_v9 = vmul.f32 %v5493_v8, %v5430_v1 }
 0x24f   : > { %1690 = vrot.lane.b32.xlu0 %v1683_v2, %s8378_s3  ;;  %v5781_v12 = vpop.permute.xlu1 %1737  ;;  %v1723_v2 = vsel %vm441_vm2, %v1721_v49, %v1722_v40  ;;  %v1756_v49 = vmul.f32 %v5542_v35, %v5459_v5 }
 0x250   : > { %8559 = vst [vmem:[#allocation147_spill] sm:$0xff] %v5781_v12  ;;  %v1727_v18 = vrot.slane %v1713_v9, 1 }
 0x251   : > { %v5773_v46 = vpop.permute.xlu0 %1293  ;;  %2306 = vrot.lane.b32.xlu1 %v2289_v38, %s4488_s19 }
 0x252   : > { %8558 = vst [vmem:[#allocation146_spill] sm:$0xff] %v5773_v46  ;;  %v1728_v12 = vsel %vm441_vm2, %v1722_v40, %v1727_v18  ;;  %v1767_v40 = vrot.slane %v1756_v49, 5 }
 0x253   : > { %1694 = vrot.lane.b32.xlu0 %v1682_v16, %s8378_s3  ;;  %v5790_v1 = vpop.permute.xlu1 %1741  ;;  %v5794_v16 = vstv %s4192_s23  ;;  %s4203_s23 = sld [smem:[#allocation5 + $0x5d]] }
 0x254   : > { %8561 = vst [vmem:[#allocation149_spill] sm:$0xff] %v5790_v1  ;;  %v2324_v9 = vmul.f32 %v5195_v58, %v5794_v16  ;;  %v1792_v58 = vmul.f32 %v5468_v36, %v5483_v3 }
 0x255   : > { %v5783_v4 = vpop.permute.xlu0 %1297  ;;  %2310 = vrot.lane.b32.xlu1 %v2293_v60, %s4488_s19 }
 0x256   : > { %8560 = vst [vmem:[#allocation148_spill] sm:$0xff] %v5783_v4  ;;  %v1754_v4 = vmul.f32 %v5468_v36, %v5459_v5 }
 0x257   : > { %1731 = vrot.lane.b32.xlu0 %v1723_v2, %s8378_s3  ;;  %v5805_v38 = vpop.permute.xlu1 %1778 }
 0x258   : > { %8563 = vst [vmem:[#allocation151_spill] sm:$0xff] %v5805_v38  ;;  %v1766_v1 = vrot.slane %v1754_v4, 5  ;;  %v1794_v4 = vmul.f32 %v5542_v35, %v5483_v3 }
 0x259   : > { %v5792_v53 = vpop.permute.xlu0 %1322  ;;  %2337 = vrot.lane.b32.xlu1 %v2324_v9, %s4488_s19 }
 0x25a   : > { %8562 = vst [vmem:[#allocation150_spill] sm:$0xff] %v5792_v53  ;;  %v1758_v53 = vmul.f32 %v5493_v8, %v5459_v5  ;;  %v2328_v5 = vmul.f32 %v5794_v16, %v5779_v22 }
 0x25b   : > { %1735 = vrot.lane.b32.xlu0 %v1728_v12, %s8378_s3  ;;  %v5813_v60 = vpop.permute.xlu1 %1782  ;;  %v1768_v12 = vsel %vm258_vm1, %v1766_v1, %v1767_v40 }
 0x25c   : > { %8565 = vst [vmem:[#allocation153_spill] sm:$0xff] %v5813_v60  ;;  %v1772_v38 = vrot.slane %v1758_v53, 5  ;;  %v1804_v60 = vrot.slane %v1792_v58, 5  ;;  %v1805_v53 = vrot.slane %v1794_v4, 5 }
 0x25d   : > { %v5807_v2 = vpop.permute.xlu0 %1326  ;;  %2341 = vrot.lane.b32.xlu1 %v2324_v9, %s4488_s19  ;;  %v5836_v9 = vld [vmem:[#allocation4 + $0x8] sm:$0xff] }
 0x25e   : > { %8564 = vst [vmem:[#allocation152_spill] sm:$0xff] %v5807_v2  ;;  %v1773_v1 = vsel %vm258_vm1, %v1767_v40, %v1772_v38  ;;  %v1796_v2 = vmul.f32 %v5493_v8, %v5483_v3  ;;  %v1806_v38 = vsel %vm258_vm1, %v1804_v60, %v1805_v53 }
 0x25f   : > { %1739 = vrot.lane.b32.xlu0 %v1727_v18, %s8378_s3  ;;  %v5826_v18 = vpop.permute.xlu1 %1816 }
 0x260   : > { %8567 = vst [vmem:[#allocation155_spill] sm:$0xff] %v5826_v18  ;;  %v1810_v40 = vrot.slane %v1796_v2, 5 }
 0x261   : > { %v5815_v46 = vpop.permute.xlu0 %1330  ;;  %2345 = vrot.lane.b32.xlu1 %v2328_v5, %s4488_s19 }
 0x262   : > { %8566 = vst [vmem:[#allocation154_spill] sm:$0xff] %v5815_v46  ;;  %v5830_v46 = vstv %s4193_s27  ;;  %v1811_v5 = vsel %vm258_vm1, %v1805_v53, %v1810_v40  ;;  %v1837_v53 = vmul.f32 %v5468_v36, %v5517_v52  ;;  %s4204_s27 = sld [smem:[#allocation5 + $0x34]] }
 0x263   : > { %1776 = vrot.lane.b32.xlu0 %v1768_v12, %s8378_s3  ;;  %v2359_v12 = vmul.f32 %v5836_v9, %v5830_v46  ;;  %v5841_v18 = vpop.permute.xlu1 %1820 }
 0x264   : > { %8569 = vst [vmem:[#allocation157_spill] sm:$0xff] %v5841_v18  ;;  %v5856_v18 = vstv %s4194_s6  ;;  %s4205_s6 = sld [smem:[#allocation5 + $0x3b]] }
 0x265   : > { %v5828_v49 = vpop.permute.xlu0 %1357  ;;  %2372 = vrot.lane.b32.xlu1 %v2359_v12, %s4488_s19  ;;  %v2394_v2 = vmul.f32 %v5836_v9, %v5856_v18 }
 0x266   : > { %8568 = vst [vmem:[#allocation156_spill] sm:$0xff] %v5828_v49 }
 0x267   : > { %1780 = vrot.lane.b32.xlu0 %v1773_v1, %s8378_s3  ;;  %v5848_v3 = vpop.permute.xlu1 %1824  ;;  %v2363_v1 = vmul.f32 %v5830_v46, %v5779_v22 }
 0x268   : > { %8571 = vst [vmem:[#allocation159_spill] sm:$0xff] %v5848_v3  ;;  %v2408_v3 = vrot.slane %v2394_v2, 4  ;;  %v5878_v2 = vstv %s4195_s8  ;;  %s4206_s8 = sld [smem:[#allocation5 + $0x42]] }
 0x269   : > { %v5843_v58 = vpop.permute.xlu0 %1361  ;;  %2376 = vrot.lane.b32.xlu1 %v2359_v12, %s4488_s19  ;;  %v1839_v12 = vmul.f32 %v5542_v35, %v5517_v52 }
 0x26a   : > { %8570 = vst [vmem:[#allocation158_spill] sm:$0xff] %v5843_v58 }
 0x26b   : > { %1814 = vrot.lane.b32.xlu0 %v1806_v38, %s8378_s3  ;;  %v5861_v60 = vpop.permute.xlu1 %1853  ;;  %v1847_v49 = vrot.slane %v1839_v12, 6  ;;  %v2436_v12 = vmul.f32 %v5878_v2, %v5779_v22 }
 0x26c   : > { %8573 = vst [vmem:[#allocation161_spill] sm:$0xff] %v5861_v60  ;;  %v1845_v60 = vrot.slane %v1837_v53, 6 }
 0x26d   : > { %v5850_v4 = vpop.permute.xlu0 %1365  ;;  %2380 = vrot.lane.b32.xlu1 %v2363_v1, %s4488_s19 }
 0x26e   : > { %8572 = vst [vmem:[#allocation160_spill] sm:$0xff] %v5850_v4  ;;  %v1848_v53 = vsel %vm694_vm3, %v1845_v60, %v1847_v49 }
 0x26f   : > { %1818 = vrot.lane.b32.xlu0 %v1811_v5, %s8378_s3  ;;  %v2398_v5 = vmul.f32 %v5856_v18, %v5779_v22  ;;  %v5873_v4 = vpop.permute.xlu1 %1857 }
 0x270   : > { %8575 = vst [vmem:[#allocation163_spill] sm:$0xff] %v5873_v4 }
 0x271   : > { %v5863_v38 = vpop.permute.xlu0 %1392  ;;  %2417 = vrot.lane.b32.xlu1 %v2408_v3, %s4488_s19 }
 0x272   : > { %8574 = vst [vmem:[#allocation162_spill] sm:$0xff] %v5863_v38  ;;  %v2413_v38 = vrot.slane %v2398_v5, 4 }
 0x273   : > { %1822 = vrot.lane.b32.xlu0 %v1810_v40, %s8378_s3  ;;  %v2432_v40 = vmul.f32 %v5836_v9, %v5878_v2  ;;  %v5884_v1 = vpop.permute.xlu1 %1861 }
 0x274   : > { %v2414_v52 = vsel %vm341_vm10, %v2408_v3, %v2413_v38  ;;  %8577 = vst [vmem:[#allocation165_spill] sm:$0xff] %v5884_v1  ;;  %v1875_v38 = vmul.f32 %v5468_v36, %v5551_v7  ;;  %v2451_v1 = vrot.slane %v2436_v12, 4  ;;  %v5911_v12 = vstv %s4196_s15  ;;  %s4207_s15 = sld [smem:[#allocation5 + $0x49]] }
 0x275   : > { %v5875_v58 = vpop.permute.xlu0 %1396  ;;  %v2446_v4 = vrot.slane %v2432_v40, 4  ;;  %2421 = vrot.lane.b32.xlu1 %v2414_v52, %s4488_s19  ;;  %v1877_v40 = vmul.f32 %v5542_v35, %v5551_v7 }
 0x276   : > { %8576 = vst [vmem:[#allocation164_spill] sm:$0xff] %v5875_v58 }
 0x277   : > { %1851 = vrot.lane.b32.xlu0 %v1845_v60, %s4494_s26  ;;  %v5893_v5 = vpop.permute.xlu1 %1899  ;;  %v2452_v60 = vsel %vm341_vm10, %v2446_v4, %v2451_v1 }
 0x278   : > { %8579 = vst [vmem:[#allocation167_spill] sm:$0xff] %v5893_v5  ;;  %v1887_v5 = vrot.slane %v1875_v38, 6 }
 0x279   : > { %v5886_v15 = vpop.permute.xlu0 %1400  ;;  %2455 = vrot.lane.b32.xlu1 %v2446_v4, %s4488_s19 }
 0x27a   : > { %8578 = vst [vmem:[#allocation166_spill] sm:$0xff] %v5886_v15  ;;  %v1889_v15 = vrot.slane %v1877_v40, 6 }
 0x27b   : > { %1855 = vrot.lane.b32.xlu0 %v1848_v53, %s4494_s26  ;;  %v5904_v52 = vpop.permute.xlu1 %1903 }
 0x27c   : > { %8581 = vst [vmem:[#allocation169_spill] sm:$0xff] %v5904_v52  ;;  %v1890_v38 = vsel %vm694_vm3, %v1887_v5, %v1889_v15 }
 0x27d   : > { %v5895_v3 = vpop.permute.xlu0 %1437  ;;  %2459 = vrot.lane.b32.xlu1 %v2452_v60, %s4488_s19  ;;  %v1922_v60 = vmul.f32 %v5542_v35, %v5583_v21 }
 0x27e   : > { %8580 = vst [vmem:[#allocation168_spill] sm:$0xff] %v5895_v3  ;;  %v1879_v3 = vmul.f32 %v5493_v8, %v5551_v7  ;;  %v1920_v7 = vmul.f32 %v5468_v36, %v5583_v21 }
 0x27f   : > { %1859 = vrot.lane.b32.xlu0 %v1847_v49, %s4494_s26  ;;  %v2477_v49 = vmul.f32 %v5836_v9, %v5911_v12  ;;  %v5916_v58 = vpop.permute.xlu1 %1907  ;;  %v1933_v14 = vrot.slane %v1922_v60, 2 }
 0x280   : > { %8583 = vst [vmem:[#allocation171_spill] sm:$0xff] %v5916_v58  ;;  %v1893_v40 = vrot.slane %v1879_v3, 6 }
 0x281   : > { %v5906_v53 = vpop.permute.xlu0 %1441  ;;  %v2491_v52 = vrot.slane %v2477_v49, 4  ;;  %2463 = vrot.lane.b32.xlu1 %v2451_v1, %s4488_s19 }
 0x282   : > { %8582 = vst [vmem:[#allocation170_spill] sm:$0xff] %v5906_v53  ;;  %v2481_v53 = vmul.f32 %v5911_v12, %v5779_v22  ;;  %v1894_v3 = vsel %vm694_vm3, %v1889_v15, %v1893_v40  ;;  %v1958_v15 = vmul.f32 %v5468_v36, %v5612_v34  ;;  %v1960_v40 = vmul.f32 %v5542_v35, %v5612_v34 }
 0x283   : > { %1897 = vrot.lane.b32.xlu0 %v1887_v5, %s4494_s26  ;;  %v5929_v58 = vpop.permute.xlu1 %1944 }
 0x284   : > { %8585 = vst [vmem:[#allocation173_spill] sm:$0xff] %v5929_v58  ;;  %v2496_v5 = vrot.slane %v2481_v53, 4  ;;  %v1938_v53 = vrot.slane %v1924_v13, 2  ;;  %v1970_v60 = vrot.slane %v1958_v15, 2  ;;  %v2005_v15 = vmul.f32 %v5542_v35, %v5642_v11 }
 0x285   : > { %v5918_v4 = vpop.permute.xlu0 %1475  ;;  %2500 = vrot.lane.b32.xlu1 %v2491_v52, %s4488_s19 }
 0x286   : > { %8584 = vst [vmem:[#allocation172_spill] sm:$0xff] %v5918_v4  ;;  %v1932_v4 = vrot.slane %v1920_v7, 2  ;;  %v2497_v1 = vsel %vm341_vm10, %v2491_v52, %v2496_v5  ;;  %v5952_v52 = vstv %s4197_s22  ;;  %v1939_v13 = vsel %vm782_vm4, %v1933_v14, %v1938_v53  ;;  %s4208_s22 = sld [smem:[#allocation5 + $0x50]] }
 0x287   : > { %1901 = vrot.lane.b32.xlu0 %v1890_v38, %s4494_s26  ;;  %v5939_v38 = vpop.permute.xlu1 %1948  ;;  %v2003_v53 = vmul.f32 %v5468_v36, %v5642_v11 }
 0x288   : > { %8587 = vst [vmem:[#allocation175_spill] sm:$0xff] %v5939_v38  ;;  %v1962_v38 = vmul.f32 %v5493_v8, %v5612_v34 }
 0x289   : > { %v5931_v49 = vpop.permute.xlu0 %1479  ;;  %2504 = vrot.lane.b32.xlu1 %v2497_v1, %s4488_s19 }
 0x28a   : > { %8586 = vst [vmem:[#allocation174_spill] sm:$0xff] %v5931_v49  ;;  %v1934_v49 = vsel %vm782_vm4, %v1932_v4, %v1933_v14  ;;  %v2522_v4 = vmul.f32 %v5836_v9, %v5952_v52 }
 0x28b   : > { %1905 = vrot.lane.b32.xlu0 %v1894_v3, %s4494_s26  ;;  %v5950_v21 = vpop.permute.xlu1 %1982  ;;  %v1971_v3 = vrot.slane %v1960_v40, 2  ;;  %v5983_v40 = vstv %s4198_s18  ;;  %s4209_s18 = sld [smem:[#allocation5 + $0x57]] }
 0x28c   : > { %8589 = vst [vmem:[#allocation177_spill] sm:$0xff] %v5950_v21 }
 0x28d   : > { %v5941_v58 = vpop.permute.xlu0 %1483  ;;  %2508 = vrot.lane.b32.xlu1 %v2496_v5, %s4488_s19 }
 0x28e   : > { %8588 = vst [vmem:[#allocation176_spill] sm:$0xff] %v5941_v58  ;;  %v1976_v58 = vrot.slane %v1962_v38, 2 }
 0x28f   : > { %1942 = vrot.lane.b32.xlu0 %v1934_v49, %s4494_s26  ;;  %v2530_v49 = vrot.slane %v2522_v4, 5  ;;  %v5963_v1 = vpop.permute.xlu1 %1986  ;;  %v2559_v4 = vmul.f32 %v5836_v9, %v5983_v40 }
 0x290   : > { %8591 = vst [vmem:[#allocation179_spill] sm:$0xff] %v5963_v1  ;;  %v1977_v5 = vsel %vm782_vm4, %v1971_v3, %v1976_v58  ;;  %v2563_v1 = vmul.f32 %v5983_v40, %v5779_v22 }
 0x291   : > { %v5954_v7 = vpop.permute.xlu0 %1520  ;;  %2537 = vrot.lane.b32.xlu1 %v2530_v49, %s4490_s28 }
 0x292   : > { %8590 = vst [vmem:[#allocation178_spill] sm:$0xff] %v5954_v7  ;;  %v1972_v7 = vsel %vm782_vm4, %v1970_v60, %v1971_v3  ;;  %v2016_v60 = vrot.slane %v2005_v15, 2  ;;  %v2007_v3 = vmul.f32 %v5493_v8, %v5642_v11  ;;  %v2578_v11 = vrot.slane %v2563_v1, 1 }
 0x293   : > { %1946 = vrot.lane.b32.xlu0 %v1939_v13, %s4494_s26  ;;  %v5970_v14 = vpop.permute.xlu1 %1990  ;;  %v2015_v13 = vrot.slane %v2003_v53, 2 }
 0x294   : > { %8593 = vst [vmem:[#allocation181_spill] sm:$0xff] %v5970_v14 }
 0x295   : > { %v5965_v21 = vpop.permute.xlu0 %1524  ;;  %2541 = vrot.lane.b32.xlu1 %v2530_v49, %s4490_s28 }
 0x296   : > { %8592 = vst [vmem:[#allocation180_spill] sm:$0xff] %v5965_v21 }
 0x297   : > { %1980 = vrot.lane.b32.xlu0 %v1972_v7, %s4494_s26  ;;  %v5981_v38 = vpop.permute.xlu1 %2027 }
 0x298   : > { %8595 = vst [vmem:[#allocation183_spill] sm:$0xff] %v5981_v38 }
 0x299   : > { %v5972_v34 = vpop.permute.xlu0 %1528  ;;  %2545 = vrot.lane.b32.xlu1 %v2530_v49, %s4490_s28  ;;  %v6004_v49 = vstv %s4199_s29  ;;  %s4211_s29 = sld [smem:[#allocation5 + $0x35]] }
 0x29a   : > { %8594 = vst [vmem:[#allocation182_spill] sm:$0xff] %v5972_v34  ;;  %v2021_v34 = vrot.slane %v2007_v3, 2 }
 0x29b   : > { %1984 = vrot.lane.b32.xlu0 %v1977_v5, %s4494_s26  ;;  %v2573_v5 = vrot.slane %v2559_v4, 1  ;;  %v5993_v14 = vpop.permute.xlu1 %2031  ;;  %v2597_v4 = vmul.f32 %v5836_v9, %v6004_v49 }
 0x29c   : > { %8597 = vst [vmem:[#allocation185_spill] sm:$0xff] %v5993_v14  ;;  %v2022_v14 = vsel %vm782_vm4, %v2016_v60, %v2021_v34 }
 0x29d   : > { %v5985_v7 = vpop.permute.xlu0 %1557  ;;  %2582 = vrot.lane.b32.xlu1 %v2573_v5, %s4490_s28  ;;  %v2579_v15 = vsel %vm441_vm2, %v2573_v5, %v2578_v11  ;;  %v2611_v1 = vrot.slane %v2597_v4, 1  ;;  %v2601_v11 = vmul.f32 %v6004_v49, %v5779_v22 }
 0x29e   : > { %8596 = vst [vmem:[#allocation184_spill] sm:$0xff] %v5985_v7  ;;  %v2017_v7 = vsel %vm782_vm4, %v2015_v13, %v2016_v60  ;;  %v2048_v13 = vmul.f32 %v5468_v36, %v5676_v30 }
 0x29f   : > { %1988 = vrot.lane.b32.xlu0 %v1976_v58, %s4494_s26  ;;  %v6002_v53 = vpop.permute.xlu1 %2035 }
 0x2a0   : > { %8599 = vst [vmem:[#allocation187_spill] sm:$0xff] %v6002_v53  ;;  %v2060_v60 = vrot.slane %v2048_v13, 2  ;;  %v6035_v13 = vstv %s4200_s5  ;;  %s4212_s5 = sld [smem:[#allocation5 + $0x3c]] }
 0x2a1   : > { %v5995_v38 = vpop.permute.xlu0 %1561  ;;  %2586 = vrot.lane.b32.xlu1 %v2579_v15, %s4490_s28  ;;  %v2616_v15 = vrot.slane %v2601_v11, 1 }
 0x2a2   : > { %8598 = vst [vmem:[#allocation186_spill] sm:$0xff] %v5995_v38 }
 0x2a3   : > { %2025 = vrot.lane.b32.xlu0 %v2017_v7, %s4494_s26  ;;  %v2050_v7 = vmul.f32 %v5542_v35, %v5676_v30  ;;  %v6018_v3 = vpop.permute.xlu1 %2072  ;;  %v2617_v4 = vsel %vm441_vm2, %v2611_v1, %v2616_v15 }
 0x2a4   : > { %8601 = vst [vmem:[#allocation189_spill] sm:$0xff] %v6018_v3 }
 0x2a5   : > { %v6006_v58 = vpop.permute.xlu0 %1565  ;;  %v2061_v53 = vrot.slane %v2050_v7, 2  ;;  %2620 = vrot.lane.b32.xlu1 %v2611_v1, %s4490_s28  ;;  %v2093_v1 = vmul.f32 %v5468_v36, %v5707_v25  ;;  %v2097_v36 = vmul.f32 %v5493_v8, %v5707_v25 }
 0x2a6   : > { %8600 = vst [vmem:[#allocation188_spill] sm:$0xff] %v6006_v58  ;;  %v2052_v58 = vmul.f32 %v5493_v8, %v5676_v30  ;;  %v2642_v30 = vmul.f32 %v5836_v9, %v6035_v13 }
 0x2a7   : > { %2029 = vrot.lane.b32.xlu0 %v2022_v14, %s4494_s26  ;;  %v6028_v38 = vpop.permute.xlu1 %2076  ;;  %v2062_v3 = vsel %vm782_vm4, %v2060_v60, %v2061_v53 }
 0x2a8   : > { %8603 = vst [vmem:[#allocation191_spill] sm:$0xff] %v6028_v38  ;;  %v2656_v11 = vrot.slane %v2642_v30, 1 }
 0x2a9   : > { %v6020_v5 = vpop.permute.xlu0 %1603  ;;  %2624 = vrot.lane.b32.xlu1 %v2617_v4, %s4490_s28 }
 0x2aa   : > { %8602 = vst [vmem:[#allocation190_spill] sm:$0xff] %v6020_v5  ;;  %v2066_v5 = vrot.slane %v2052_v58, 2  ;;  %v2095_v58 = vmul.f32 %v5542_v35, %v5707_v25 }
 0x2ab   : > { %2033 = vrot.lane.b32.xlu0 %v2021_v34, %s4494_s26  ;;  %v6040_v34 = vpop.permute.xlu1 %2080 }
 0x2ac   : > { %8605 = vst [vmem:[#allocation193_spill] sm:$0xff] %v6040_v34  ;;  %v2067_v38 = vsel %vm782_vm4, %v2061_v53, %v2066_v5  ;;  %v2105_v53 = vrot.slane %v2093_v1, 6  ;;  %v2106_v34 = vrot.slane %v2095_v58, 6  ;;  %v6068_v1 = vstv %s4201_s16  ;;  %v6077_v58 = vld [vmem:[#allocation4 + $0x30] sm:$0xff]  ;;  %s4213_s16 = sld [smem:[#allocation5 + $0x43]] }
 0x2ad   : > { %v6030_v14 = vpop.permute.xlu0 %1607  ;;  %2628 = vrot.lane.b32.xlu1 %v2616_v15, %s4490_s28  ;;  %v2687_v8 = vmul.f32 %v5836_v9, %v6068_v1 }
 0x2ae   : > { %8604 = vst [vmem:[#allocation192_spill] sm:$0xff] %v6030_v14 }
 0x2af   : > { %2070 = vrot.lane.b32.xlu0 %v2062_v3, %s4494_s26  ;;  %v2646_v3 = vmul.f32 %v6035_v13, %v5779_v22  ;;  %v6053_v60 = vpop.permute.xlu1 %2117 }
 0x2b0   : > { %8607 = vst [vmem:[#allocation195_spill] sm:$0xff] %v6053_v60  ;;  %v2107_v60 = vsel %vm694_vm3, %v2105_v53, %v2106_v34 }
 0x2b1   : > { %v6042_v7 = vpop.permute.xlu0 %1641  ;;  %v2661_v30 = vrot.slane %v2646_v3, 1  ;;  %2665 = vrot.lane.b32.xlu1 %v2656_v11, %s4490_s28 }
 0x2b2   : > { %8606 = vst [vmem:[#allocation194_spill] sm:$0xff] %v6042_v7  ;;  %v2111_v7 = vrot.slane %v2097_v36, 6 }
 0x2b3   : > { %2074 = vrot.lane.b32.xlu0 %v2067_v38, %s4494_s26  ;;  %v2662_v35 = vsel %vm441_vm2, %v2656_v11, %v2661_v30  ;;  %v6062_v38 = vpop.permute.xlu1 %2121  ;;  %v2701_v11 = vrot.slane %v2687_v8, 1 }
 0x2b4   : > { %8609 = vst [vmem:[#allocation197_spill] sm:$0xff] %v6062_v38  ;;  %v2112_v3 = vsel %vm694_vm3, %v2106_v34, %v2111_v7  ;;  %v6093_v7 = vld [vmem:[#allocation4 + $0x40] sm:$0xff] }
 0x2b5   : > { %v6055_v4 = vpop.permute.xlu0 %1645  ;;  %2669 = vrot.lane.b32.xlu1 %v2662_v35, %s4490_s28  ;;  %v2264_v35 = vmul.f32 %v5741_v31, %v6077_v58 }
 0x2b6   : > { %8608 = vst [vmem:[#allocation196_spill] sm:$0xff] %v6055_v4 }
 0x2b7   : > { %2078 = vrot.lane.b32.xlu0 %v2066_v5, %s4494_s26  ;;  %v6073_v25 = vpop.permute.xlu1 %2274 }
 0x2b8   : > { %8611 = vst [vmem:[#allocation199_spill] sm:$0xff] %v6073_v25  ;;  %v6102_v25 = vstv %s4202_s17  ;;  %s4214_s17 = sld [smem:[#allocation5 + $0x4a]] }
 0x2b9   : > { %v6064_v15 = vpop.permute.xlu0 %1649  ;;  %2673 = vrot.lane.b32.xlu1 %v2661_v30, %s4490_s28 }
 0x2ba   : > { %8610 = vst [vmem:[#allocation198_spill] sm:$0xff] %v6064_v15 }
 0x2bb   : > { %2115 = vrot.lane.b32.xlu0 %v2107_v60, %s4494_s26  ;;  %v2691_v60 = vmul.f32 %v6068_v1, %v5779_v22  ;;  %v6084_v53 = vpop.permute.xlu1 %2278 }
 0x2bc   : > { %8613 = vst [vmem:[#allocation201_spill] sm:$0xff] %v6084_v53  ;;  %v2266_v53 = vmul.f32 %v5741_v31, %v6093_v7  ;;  %v2736_v31 = vmul.f32 %v6102_v25, %v5779_v22 }
 0x2bd   : > { %v6075_v5 = vpop.permute.xlu0 %1686  ;;  %v2706_v8 = vrot.slane %v2691_v60, 1  ;;  %2710 = vrot.lane.b32.xlu1 %v2701_v11, %s4490_s28  ;;  %v2732_v60 = vmul.f32 %v5836_v9, %v6102_v25 }
 0x2be   : > { %8612 = vst [vmem:[#allocation200_spill] sm:$0xff] %v6075_v5 }
 0x2bf   : > { %2119 = vrot.lane.b32.xlu0 %v2112_v3, %s4494_s26  ;;  %v2707_v34 = vsel %vm441_vm2, %v2701_v11, %v2706_v8  ;;  %v6095_v30 = vpop.permute.xlu1 %2302  ;;  %v2746_v38 = vrot.slane %v2732_v60, 5  ;;  %v6126_v60 = vstv %s4203_s23  ;;  %s4215_s23 = sld [smem:[#allocation5 + $0x51]] }
 0x2c0   : > { %8615 = vst [vmem:[#allocation203_spill] sm:$0xff] %v6095_v30  ;;  %v2288_v30 = vmul.f32 %v5760_v59, %v6077_v58 }
 0x2c1   : > { %v6086_v36 = vpop.permute.xlu0 %1690  ;;  %2714 = vrot.lane.b32.xlu1 %v2707_v34, %s4490_s28 }
 0x2c2   : > { %8614 = vst [vmem:[#allocation202_spill] sm:$0xff] %v6086_v36 }
 0x2c3   : > { %2272 = vrot.lane.b32.xlu0 %v2264_v35, %s4488_s19  ;;  %v6107_v11 = vpop.permute.xlu1 %2306 }
 0x2c4   : > { %8617 = vst [vmem:[#allocation205_spill] sm:$0xff] %v6107_v11  ;;  %v2290_v11 = vmul.f32 %v5760_v59, %v6093_v7 }
 0x2c5   : > { %v6097_v3 = vpop.permute.xlu0 %1694  ;;  %2718 = vrot.lane.b32.xlu1 %v2706_v8, %s4490_s28 }
 0x2c6   : > { %8616 = vst [vmem:[#allocation204_spill] sm:$0xff] %v6097_v3  ;;  %v2751_v3 = vrot.slane %v2736_v31, 5 }
 0x2c7   : > { %2276 = vrot.lane.b32.xlu0 %v2266_v53, %s4488_s19  ;;  %v6117_v34 = vpop.permute.xlu1 %2310 }
 0x2c8   : > { %8619 = vst [vmem:[#allocation207_spill] sm:$0xff] %v6117_v34  ;;  %v2752_v8 = vsel %vm258_vm1, %v2746_v38, %v2751_v3 }
 0x2c9   : > { %v6109_v35 = vpop.permute.xlu0 %1731  ;;  %2755 = vrot.lane.b32.xlu1 %v2746_v38, %s4490_s28 }
 0x2ca   : > { %8618 = vst [vmem:[#allocation206_spill] sm:$0xff] %v6109_v35  ;;  %v6123_v35 = vld [vmem:[#allocation4 + $0x50] sm:$0x3f] }
 0x2cb   : > { %2300 = vrot.lane.b32.xlu0 %v2288_v30, %s4488_s19  ;;  %v2770_v30 = vmul.f32 %v5836_v9, %v6126_v60  ;;  %v6132_v34 = vpop.permute.xlu1 %2337  ;;  %v2292_v31 = vmul.f32 %v5760_v59, %v6123_v35  ;;  %v2397_v15 = vmul.f32 %v5856_v18, %v6123_v35 }
 0x2cc   : > { %8621 = vst [vmem:[#allocation209_spill] sm:$0xff] %v6132_v34  ;;  %v2323_v34 = vmul.f32 %v5794_v16, %v6077_v58 }
 0x2cd   : > { %v6119_v53 = vpop.permute.xlu0 %1735  ;;  %v2784_v36 = vrot.slane %v2770_v30, 5  ;;  %2759 = vrot.lane.b32.xlu1 %v2752_v8, %s4490_s28 }
 0x2ce   : > { %8620 = vst [vmem:[#allocation208_spill] sm:$0xff] %v6119_v53 }
 0x2cf   : > { %2304 = vrot.lane.b32.xlu0 %v2290_v11, %s4488_s19  ;;  %v2774_v11 = vmul.f32 %v6126_v60, %v5779_v22  ;;  %v6142_v38 = vpop.permute.xlu1 %2341 }
 0x2d0   : > { %8623 = vst [vmem:[#allocation211_spill] sm:$0xff] %v6142_v38  ;;  %v6158_v38 = vstv %s4204_s27  ;;  %s4216_s27 = sld [smem:[#allocation5 + $0x58]] }
 0x2d1   : > { %v6134_v53 = vpop.permute.xlu0 %1739  ;;  %2793 = vrot.lane.b32.xlu1 %v2784_v36, %s4490_s28 }
 0x2d2   : > { %8622 = vst [vmem:[#allocation210_spill] sm:$0xff] %v6134_v53  ;;  %v2789_v53 = vrot.slane %v2774_v11, 5  ;;  %v2815_v11 = vmul.f32 %v5836_v9, %v6158_v38 }
 0x2d3   : > { %2308 = vrot.lane.b32.xlu0 %v2292_v31, %s4488_s19  ;;  %v6151_v8 = vpop.permute.xlu1 %2345  ;;  %v2325_v31 = vmul.f32 %v5794_v16, %v6093_v7 }
 0x2d4   : > { %v2790_v59 = vsel %vm258_vm1, %v2784_v36, %v2789_v53  ;;  %8625 = vst [vmem:[#allocation213_spill] sm:$0xff] %v6151_v8  ;;  %v2327_v36 = vmul.f32 %v5794_v16, %v6123_v35  ;;  %v2823_v8 = vrot.slane %v2815_v11, 6  ;;  %v2393_v11 = vmul.f32 %v5856_v18, %v6077_v58 }
 0x2d5   : > { %v6144_v3 = vpop.permute.xlu0 %1776  ;;  %2797 = vrot.lane.b32.xlu1 %v2790_v59, %s4490_s28 }
 0x2d6   : > { %8624 = vst [vmem:[#allocation212_spill] sm:$0xff] %v6144_v3 }
 0x2d7   : > { %2335 = vrot.lane.b32.xlu0 %v2323_v34, %s4488_s19  ;;  %v6163_v3 = vpop.permute.xlu1 %2372 }
 0x2d8   : > { %8627 = vst [vmem:[#allocation215_spill] sm:$0xff] %v6163_v3 }
 0x2d9   : > { %v6153_v30 = vpop.permute.xlu0 %1780  ;;  %2801 = vrot.lane.b32.xlu1 %v2789_v53, %s4490_s28  ;;  %v2360_v53 = vmul.f32 %v5830_v46, %v6093_v7 }
 0x2da   : > { %8626 = vst [vmem:[#allocation214_spill] sm:$0xff] %v6153_v30 }
 0x2db   : > { %2339 = vrot.lane.b32.xlu0 %v2325_v31, %s4488_s19  ;;  %v6171_v59 = vpop.permute.xlu1 %2376  ;;  %v2358_v31 = vmul.f32 %v5830_v46, %v6077_v58 }
 0x2dc   : > { %8629 = vst [vmem:[#allocation217_spill] sm:$0xff] %v6171_v59  ;;  %v6190_v59 = vstv %s4205_s6  ;;  %s4218_s6 = sld [smem:[#allocation5 + $0x36]] }
 0x2dd   : > { %v6165_v34 = vpop.permute.xlu0 %1814  ;;  %2830 = vrot.lane.b32.xlu1 %v2823_v8, %s4491_s24 }
 0x2de   : > { %8628 = vst [vmem:[#allocation216_spill] sm:$0xff] %v6165_v34  ;;  %v2405_v34 = vrot.slane %v2393_v11, 4  ;;  %v2411_v11 = vrot.slane %v2397_v15, 4  ;;  %v2435_v15 = vmul.f32 %v5878_v2, %v6123_v35 }
 0x2df   : > { %2343 = vrot.lane.b32.xlu0 %v2327_v36, %s4488_s19  ;;  %v6179_v3 = vpop.permute.xlu1 %2380  ;;  %v2395_v36 = vmul.f32 %v5856_v18, %v6093_v7  ;;  %v2856_v18 = vmul.f32 %v6190_v59, %v5779_v22 }
 0x2e0   : > { %8631 = vst [vmem:[#allocation219_spill] sm:$0xff] %v6179_v3 }
 0x2e1   : > { %v6173_v30 = vpop.permute.xlu0 %1818  ;;  %2834 = vrot.lane.b32.xlu1 %v2823_v8, %s4491_s24  ;;  %v2406_v5 = vrot.slane %v2395_v36, 4  ;;  %v2433_v36 = vmul.f32 %v5878_v2, %v6093_v7 }
 0x2e2   : > { %8630 = vst [vmem:[#allocation218_spill] sm:$0xff] %v6173_v30  ;;  %v2362_v30 = vmul.f32 %v5830_v46, %v6123_v35 }
 0x2e3   : > { %2370 = vrot.lane.b32.xlu0 %v2358_v31, %s4488_s19  ;;  %v2852_v31 = vmul.f32 %v5836_v9, %v6190_v59  ;;  %v6195_v3 = vpop.permute.xlu1 %2417  ;;  %v2407_v46 = vsel %vm341_vm10, %v2405_v34, %v2406_v5  ;;  %v2444_v34 = vrot.slane %v2433_v36, 4 }
 0x2e4   : > { %8633 = vst [vmem:[#allocation221_spill] sm:$0xff] %v6195_v3  ;;  %v2431_v3 = vmul.f32 %v5878_v2, %v6077_v58  ;;  %v2449_v2 = vrot.slane %v2435_v15, 4  ;;  %v6251_v15 = vstv %s4207_s15  ;;  %s4220_s15 = sld [smem:[#allocation5 + $0x44]] }
 0x2e5   : > { %v6181_v16 = vpop.permute.xlu0 %1822  ;;  %2838 = vrot.lane.b32.xlu1 %v2823_v8, %s4491_s24  ;;  %v2864_v4 = vrot.slane %v2852_v31, 6 }
 0x2e6   : > { %8632 = vst [vmem:[#allocation220_spill] sm:$0xff] %v6181_v16  ;;  %v2443_v31 = vrot.slane %v2431_v3, 4 }
 0x2e7   : > { %2374 = vrot.lane.b32.xlu0 %v2360_v53, %s4488_s19  ;;  %v6205_v53 = vpop.permute.xlu1 %2421 }
 0x2e8   : > { %8635 = vst [vmem:[#allocation223_spill] sm:$0xff] %v6205_v53  ;;  %v2871_v53 = vrot.slane %v2856_v18, 6 }
 0x2e9   : > { %v6197_v16 = vpop.permute.xlu0 %1851  ;;  %2875 = vrot.lane.b32.xlu1 %v2864_v4, %s4491_s24 }
 0x2ea   : > { %8634 = vst [vmem:[#allocation222_spill] sm:$0xff] %v6197_v16  ;;  %v6226_v16 = vstv %s4206_s8  ;;  %s4219_s8 = sld [smem:[#allocation5 + $0x3d]] }
 0x2eb   : > { %2378 = vrot.lane.b32.xlu0 %v2362_v30, %s4488_s19  ;;  %v6218_v8 = vpop.permute.xlu1 %2455  ;;  %v2900_v21 = vmul.f32 %v6226_v16, %v6123_v35 }
 0x2ec   : > { %8637 = vst [vmem:[#allocation225_spill] sm:$0xff] %v6218_v8  ;;  %v2897_v8 = vmul.f32 %v5836_v9, %v6226_v16 }
 0x2ed   : > { %v6207_v14 = vpop.permute.xlu0 %1855  ;;  %2879 = vrot.lane.b32.xlu1 %v2864_v4, %s4491_s24 }
 0x2ee   : > { %8636 = vst [vmem:[#allocation224_spill] sm:$0xff] %v6207_v14  ;;  %v2412_v14 = vsel %vm341_vm10, %v2406_v5, %v2411_v11  ;;  %v2911_v5 = vrot.slane %v2897_v8, 2  ;;  %v2445_v11 = vsel %vm341_vm10, %v2443_v31, %v2444_v34  ;;  %v2476_v8 = vmul.f32 %v5911_v12, %v6077_v58 }
 0x2ef   : > { %2415 = vrot.lane.b32.xlu0 %v2407_v46, %s4488_s19  ;;  %v2872_v46 = vsel %vm694_vm3, %v2864_v4, %v2871_v53  ;;  %v6232_v3 = vpop.permute.xlu1 %2459  ;;  %v2478_v31 = vmul.f32 %v5911_v12, %v6093_v7 }
 0x2f0   : > { %8639 = vst [vmem:[#allocation227_spill] sm:$0xff] %v6232_v3  ;;  %v2450_v3 = vsel %vm341_vm10, %v2444_v34, %v2449_v2 }
 0x2f1   : > { %v6220_v30 = vpop.permute.xlu0 %1859  ;;  %2883 = vrot.lane.b32.xlu1 %v2872_v46, %s4491_s24 }
 0x2f2   : > { %8638 = vst [vmem:[#allocation226_spill] sm:$0xff] %v6220_v30  ;;  %v2480_v30 = vmul.f32 %v5911_v12, %v6123_v35 }
 0x2f3   : > { %2419 = vrot.lane.b32.xlu0 %v2412_v14, %s4488_s19  ;;  %v2901_v14 = vmul.f32 %v6226_v16, %v5779_v22  ;;  %v6241_v36 = vpop.permute.xlu1 %2463 }
 0x2f4   : > { %8641 = vst [vmem:[#allocation229_spill] sm:$0xff] %v6241_v36 }
 0x2f5   : > { %v6234_v18 = vpop.permute.xlu0 %1897  ;;  %v2916_v53 = vrot.slane %v2901_v14, 2  ;;  %2920 = vrot.lane.b32.xlu1 %v2911_v5, %s4491_s24 }
 0x2f6   : > { %8640 = vst [vmem:[#allocation228_spill] sm:$0xff] %v6234_v18  ;;  %v2489_v18 = vrot.slane %v2478_v31, 4 }
 0x2f7   : > { %2453 = vrot.lane.b32.xlu0 %v2445_v11, %s4488_s19  ;;  %v2917_v46 = vsel %vm782_vm4, %v2911_v5, %v2916_v53  ;;  %v2935_v11 = vmul.f32 %v5836_v9, %v6251_v15  ;;  %v6257_v14 = vpop.permute.xlu1 %2500 }
 0x2f8   : > { %8643 = vst [vmem:[#allocation231_spill] sm:$0xff] %v6257_v14 }
 0x2f9   : > { %v6243_v4 = vpop.permute.xlu0 %1901  ;;  %v2949_v36 = vrot.slane %v2935_v11, 2  ;;  %2924 = vrot.lane.b32.xlu1 %v2917_v46, %s4491_s24 }
 0x2fa   : > { %8642 = vst [vmem:[#allocation230_spill] sm:$0xff] %v6243_v4  ;;  %v2488_v4 = vrot.slane %v2476_v8, 4  ;;  %v2494_v8 = vrot.slane %v2480_v30, 4 }
 0x2fb   : > { %2457 = vrot.lane.b32.xlu0 %v2450_v3, %s4488_s19  ;;  %v2939_v3 = vmul.f32 %v6251_v15, %v5779_v22  ;;  %v6267_v5 = vpop.permute.xlu1 %2504 }
 0x2fc   : > { %8645 = vst [vmem:[#allocation233_spill] sm:$0xff] %v6267_v5  ;;  %v2490_v11 = vsel %vm341_vm10, %v2488_v4, %v2489_v18  ;;  %v2495_v46 = vsel %vm341_vm10, %v2489_v18, %v2494_v8  ;;  %v6281_v5 = vstv %s4208_s22  ;;  %v2523_v18 = vmul.f32 %v5952_v52, %v6093_v7  ;;  %s4221_s22 = sld [smem:[#allocation5 + $0x4b]] }
 0x2fd   : > { %v6259_v34 = vpop.permute.xlu0 %1905  ;;  %v2954_v14 = vrot.slane %v2939_v3, 2  ;;  %2958 = vrot.lane.b32.xlu1 %v2949_v36, %s4491_s24  ;;  %v2980_v30 = vmul.f32 %v5836_v9, %v6281_v5 }
 0x2fe   : > { %8644 = vst [vmem:[#allocation232_spill] sm:$0xff] %v6259_v34 }
 0x2ff   : > { %2461 = vrot.lane.b32.xlu0 %v2449_v2, %s4488_s19  ;;  %v2955_v12 = vsel %vm782_vm4, %v2949_v36, %v2954_v14  ;;  %v6275_v31 = vpop.permute.xlu1 %2508  ;;  %v2521_v36 = vmul.f32 %v5952_v52, %v6077_v58 }
 0x300   : > { %8647 = vst [vmem:[#allocation235_spill] sm:$0xff] %v6275_v31 }
 0x301   : > { %v6269_v53 = vpop.permute.xlu0 %1942  ;;  %2962 = vrot.lane.b32.xlu1 %v2955_v12, %s4491_s24  ;;  %v2984_v12 = vmul.f32 %v6281_v5, %v5779_v22  ;;  %v2529_v31 = vrot.slane %v2521_v36, 5  ;;  %v2560_v36 = vmul.f32 %v5983_v40, %v6093_v7 }
 0x302   : > { %8646 = vst [vmem:[#allocation234_spill] sm:$0xff] %v6269_v53 }
 0x303   : > { %2498 = vrot.lane.b32.xlu0 %v2490_v11, %s4488_s19  ;;  %v6286_v4 = vpop.permute.xlu1 %2537  ;;  %v2994_v11 = vrot.slane %v2980_v30, 2  ;;  %v2999_v34 = vrot.slane %v2984_v12, 2 }
 0x304   : > { %8649 = vst [vmem:[#allocation237_spill] sm:$0xff] %v6286_v4 }
 0x305   : > { %v6277_v2 = vpop.permute.xlu0 %1946  ;;  %2966 = vrot.lane.b32.xlu1 %v2954_v14, %s4491_s24  ;;  %v3000_v52 = vsel %vm782_vm4, %v2994_v11, %v2999_v34 }
 0x306   : > { %8648 = vst [vmem:[#allocation236_spill] sm:$0xff] %v6277_v2  ;;  %v2531_v2 = vrot.slane %v2523_v18, 5  ;;  %v6315_v18 = vstv %s4209_s18  ;;  %s4222_s18 = sld [smem:[#allocation5 + $0x52]] }
 0x307   : > { %2502 = vrot.lane.b32.xlu0 %v2495_v46, %s4488_s19  ;;  %v6298_v46 = vpop.permute.xlu1 %2541 }
 0x308   : > { %8651 = vst [vmem:[#allocation239_spill] sm:$0xff] %v6298_v46  ;;  %v2558_v46 = vmul.f32 %v5983_v40, %v6077_v58 }
 0x309   : > { %v6288_v3 = vpop.permute.xlu0 %1980  ;;  %3003 = vrot.lane.b32.xlu1 %v2994_v11, %s4491_s24  ;;  %v3025_v11 = vmul.f32 %v5836_v9, %v6315_v18 }
 0x30a   : > { %8650 = vst [vmem:[#allocation238_spill] sm:$0xff] %v6288_v3  ;;  %v2562_v3 = vmul.f32 %v5983_v40, %v6123_v35  ;;  %v2598_v40 = vmul.f32 %v6004_v49, %v6093_v7 }
 0x30b   : > { %2506 = vrot.lane.b32.xlu0 %v2494_v8, %s4488_s19  ;;  %v6305_v14 = vpop.permute.xlu1 %2545  ;;  %v2532_v8 = vsel %vm258_vm1, %v2529_v31, %v2531_v2  ;;  %s4210_s19 = sld [smem:[#allocation5 + $0x5e]] }
 0x30c   : > { %8653 = vst [vmem:[#allocation241_spill] sm:$0xff] %v6305_v14 }
 0x30d   : > { %v6300_v4 = vpop.permute.xlu0 %1984  ;;  %3007 = vrot.lane.b32.xlu1 %v3000_v52, %s4491_s24  ;;  %v3029_v52 = vmul.f32 %v6315_v18, %v5779_v22 }
 0x30e   : > { %8652 = vst [vmem:[#allocation240_spill] sm:$0xff] %v6300_v4  ;;  %v2571_v4 = vrot.slane %v2560_v36, 1 }
 0x30f   : > { %2535 = vrot.lane.b32.xlu0 %v2529_v31, %s4490_s28  ;;  %v6320_v12 = vpop.permute.xlu1 %2582  ;;  %v3039_v31 = vrot.slane %v3025_v11, 2  ;;  %v2596_v11 = vmul.f32 %v6004_v49, %v6077_v58 }
 0x310   : > { %8655 = vst [vmem:[#allocation243_spill] sm:$0xff] %v6320_v12  ;;  %v2576_v12 = vrot.slane %v2562_v3, 1  ;;  %v2600_v3 = vmul.f32 %v6004_v49, %v6123_v35 }
 0x311   : > { %v6307_v30 = vpop.permute.xlu0 %1988  ;;  %3011 = vrot.lane.b32.xlu1 %v2999_v34, %s4491_s24 }
 0x312   : > { %8654 = vst [vmem:[#allocation242_spill] sm:$0xff] %v6307_v30  ;;  %v2570_v30 = vrot.slane %v2558_v46, 1  ;;  %v3044_v46 = vrot.slane %v3029_v52, 2  ;;  %v2609_v52 = vrot.slane %v2598_v40, 1 }
 0x313   : > { %2539 = vrot.lane.b32.xlu0 %v2532_v8, %s4490_s28  ;;  %v6330_v8 = vpop.permute.xlu1 %2586 }
 0x314   : > { %8657 = vst [vmem:[#allocation245_spill] sm:$0xff] %v6330_v8  ;;  %v2572_v36 = vsel %vm441_vm2, %v2570_v30, %v2571_v4  ;;  %v3045_v34 = vsel %vm782_vm4, %v3039_v31, %v3044_v46  ;;  %v6350_v30 = vstv %s4210_s19  ;;  %s4225_s19 = sld [smem:[#allocation5 + $0x37]] }
 0x315   : > { %v6322_v14 = vpop.permute.xlu0 %2025  ;;  %3048 = vrot.lane.b32.xlu1 %v3039_v31, %s4491_s24  ;;  %v3070_v31 = vmul.f32 %v5836_v9, %v6350_v30  ;;  %v3074_v49 = vmul.f32 %v6350_v30, %v5779_v22 }
 0x316   : > { %8656 = vst [vmem:[#allocation244_spill] sm:$0xff] %v6322_v14  ;;  %v2577_v14 = vsel %vm441_vm2, %v2571_v4, %v2576_v12  ;;  %v2614_v12 = vrot.slane %v2600_v3, 1 }
 0x317   : > { %2543 = vrot.lane.b32.xlu0 %v2531_v2, %s4490_s28  ;;  %v6342_v2 = vpop.permute.xlu1 %2620 }
 0x318   : > { %8659 = vst [vmem:[#allocation247_spill] sm:$0xff] %v6342_v2 }
 0x319   : > { %v6332_v53 = vpop.permute.xlu0 %2029  ;;  %3052 = vrot.lane.b32.xlu1 %v3045_v34, %s4491_s24  ;;  %v3089_v34 = vrot.slane %v3074_v49, 6 }
 0x31a   : > { %8658 = vst [vmem:[#allocation246_spill] sm:$0xff] %v6332_v53  ;;  %v2608_v53 = vrot.slane %v2596_v11, 1  ;;  %v3084_v11 = vrot.slane %v3070_v31, 6  ;;  %v2641_v31 = vmul.f32 %v6035_v13, %v6077_v58 }
 0x31b   : > { %2580 = vrot.lane.b32.xlu0 %v2572_v36, %s4490_s28  ;;  %v6355_v36 = vpop.permute.xlu1 %2624 }
 0x31c   : > { %8661 = vst [vmem:[#allocation249_spill] sm:$0xff] %v6355_v36  ;;  %v2610_v4 = vsel %vm441_vm2, %v2608_v53, %v2609_v52  ;;  %v2615_v36 = vsel %vm441_vm2, %v2609_v52, %v2614_v12  ;;  %v2643_v53 = vmul.f32 %v6035_v13, %v6093_v7  ;;  %v3090_v22 = vsel %vm694_vm3, %v3084_v11, %v3089_v34 }
 0x31d   : > { %v6344_v8 = vpop.permute.xlu0 %2033  ;;  %3056 = vrot.lane.b32.xlu1 %v3044_v46, %s4491_s24  ;;  %v6374_v46 = vstv %s4211_s29  ;;  %v2653_v49 = vrot.slane %v2641_v31, 1  ;;  %s4229_s29 = sld [smem:[#allocation5 + $0x53]] }
 0x31e   : > { %8660 = vst [vmem:[#allocation248_spill] sm:$0xff] %v6344_v8  ;;  %v3108_v3 = vmul.f32 %v5836_v9, %v6374_v46 }
 0x31f   : > { %2584 = vrot.lane.b32.xlu0 %v2577_v14, %s4490_s28  ;;  %v6364_v40 = vpop.permute.xlu1 %2628 }
 0x320   : > { %8663 = vst [vmem:[#allocation251_spill] sm:$0xff] %v6364_v40  ;;  %v2654_v40 = vrot.slane %v2643_v53, 1 }
 0x321   : > { %v6357_v2 = vpop.permute.xlu0 %2070  ;;  %3093 = vrot.lane.b32.xlu1 %v3084_v11, %s4491_s24 }
 0x322   : > { %8662 = vst [vmem:[#allocation250_spill] sm:$0xff] %v6357_v2  ;;  %v3116_v2 = vrot.slane %v3108_v3, 7  ;;  %v2655_v34 = vsel %vm441_vm2, %v2653_v49, %v2654_v40  ;;  %v6405_v3 = vstv %s4212_s5  ;;  %s4224_s5 = sld [smem:[#allocation5 + $0x60]] }
 0x323   : > { %2618 = vrot.lane.b32.xlu0 %v2610_v4, %s4490_s28  ;;  %v6380_v4 = vpop.permute.xlu1 %2665 }
 0x324   : > { %8665 = vst [vmem:[#allocation253_spill] sm:$0xff] %v6380_v4 }
 0x325   : > { %v6366_v14 = vpop.permute.xlu0 %2074  ;;  %3097 = vrot.lane.b32.xlu1 %v3090_v22, %s4491_s24  ;;  %v2688_v22 = vmul.f32 %v6068_v1, %v6093_v7 }
 0x326   : > { %8664 = vst [vmem:[#allocation252_spill] sm:$0xff] %v6366_v14  ;;  %v2645_v14 = vmul.f32 %v6035_v13, %v6123_v35 }
 0x327   : > { %2622 = vrot.lane.b32.xlu0 %v2615_v36, %s4490_s28  ;;  %v6388_v36 = vpop.permute.xlu1 %2669 }
 0x328   : > { %8667 = vst [vmem:[#allocation255_spill] sm:$0xff] %v6388_v36  ;;  %v2659_v4 = vrot.slane %v2645_v14, 1  ;;  %v3145_v14 = vmul.f32 %v5836_v9, %v6405_v3  ;;  %v2690_v36 = vmul.f32 %v6068_v1, %v6123_v35 }
 0x329   : > { %v6382_v52 = vpop.permute.xlu0 %2078  ;;  %3123 = vrot.lane.b32.xlu1 %v3116_v2, %s4492_s30 }
 0x32a   : > { %8666 = vst [vmem:[#allocation254_spill] sm:$0xff] %v6382_v52  ;;  %v2660_v53 = vsel %vm441_vm2, %v2654_v40, %v2659_v4  ;;  %v3157_v52 = vrot.slane %v3145_v14, 7 }
 0x32b   : > { %2626 = vrot.lane.b32.xlu0 %v2614_v12, %s4490_s28  ;;  %v6395_v31 = vpop.permute.xlu1 %2673  ;;  %v2686_v12 = vmul.f32 %v6068_v1, %v6077_v58 }
 0x32c   : > { %8669 = vst [vmem:[#allocation257_spill] sm:$0xff] %v6395_v31  ;;  %v2699_v31 = vrot.slane %v2688_v22, 1 }
 0x32d   : > { %v6390_v11 = vpop.permute.xlu0 %2115  ;;  %3127 = vrot.lane.b32.xlu1 %v3116_v2, %s4492_s30  ;;  %v2698_v40 = vrot.slane %v2686_v12, 1  ;;  %v6425_v12 = vld [vmem:[#allocation4 + $0x58] sm:$0x3f] }
 0x32e   : > { %8668 = vst [vmem:[#allocation256_spill] sm:$0xff] %v6390_v11  ;;  %v3149_v1 = vmul.f32 %v6425_v12, %v6405_v3 }
 0x32f   : > { %2663 = vrot.lane.b32.xlu0 %v2655_v34, %s4490_s28  ;;  %v6410_v49 = vpop.permute.xlu1 %2710  ;;  %v2700_v8 = vsel %vm441_vm2, %v2698_v40, %v2699_v31  ;;  %v2731_v40 = vmul.f32 %v6102_v25, %v6077_v58 }
 0x330   : > { %8671 = vst [vmem:[#allocation259_spill] sm:$0xff] %v6410_v49  ;;  %v2704_v49 = vrot.slane %v2690_v36, 1  ;;  %v2733_v36 = vmul.f32 %v6102_v25, %v6093_v7 }
 0x331   : > { %v6397_v13 = vpop.permute.xlu0 %2119  ;;  %3131 = vrot.lane.b32.xlu1 %v3116_v2, %s4492_s30 }
 0x332   : > { %8670 = vst [vmem:[#allocation258_spill] sm:$0xff] %v6397_v13  ;;  %v2705_v14 = vsel %vm441_vm2, %v2699_v31, %v2704_v49 }
 0x333   : > { %2667 = vrot.lane.b32.xlu0 %v2660_v53, %s4490_s28  ;;  %v6418_v13 = vpop.permute.xlu1 %2714 }
 0x334   : > { %8673 = vst [vmem:[#allocation261_spill] sm:$0xff] %v6418_v13 }
 0x335   : > { %v6412_v34 = vpop.permute.xlu0 %2272  ;;  %3168 = vrot.lane.b32.xlu1 %v3157_v52, %s4492_s30 }
 0x336   : > { %8672 = vst [vmem:[#allocation260_spill] sm:$0xff] %v6412_v34  ;;  %v2735_v34 = vmul.f32 %v6102_v25, %v6123_v35 }
 0x337   : > { %2671 = vrot.lane.b32.xlu0 %v2659_v4, %s4490_s28  ;;  %v6429_v2 = vpop.permute.xlu1 %2718  ;;  %v3164_v4 = vrot.slane %v3149_v1, 7 }
 0x338   : > { %8675 = vst [vmem:[#allocation263_spill] sm:$0xff] %v6429_v2 }
 0x339   : > { %v6420_v53 = vpop.permute.xlu0 %2276  ;;  %3172 = vrot.lane.b32.xlu1 %v3157_v52, %s4492_s30  ;;  %v3165_v13 = vsel %vm990_vm8, %v3157_v52, %v3164_v4  ;;  %v2749_v4 = vrot.slane %v2735_v34, 5  ;;  %v2773_v34 = vmul.f32 %v6126_v60, %v6123_v35 }
 0x33a   : > { %8674 = vst [vmem:[#allocation262_spill] sm:$0xff] %v6420_v53  ;;  %v2744_v53 = vrot.slane %v2733_v36, 5  ;;  %v2771_v36 = vmul.f32 %v6126_v60, %v6093_v7 }
 0x33b   : > { %2708 = vrot.lane.b32.xlu0 %v2700_v8, %s4490_s28  ;;  %v6439_v8 = vstv %s4213_s16  ;;  %v6445_v1 = vpop.permute.xlu1 %2755  ;;  %s4227_s16 = sld [smem:[#allocation5 + $0x45]] }
 0x33c   : > { %v3190_v2 = vmul.f32 %v5836_v9, %v6439_v8  ;;  %8677 = vst [vmem:[#allocation265_spill] sm:$0xff] %v6445_v1  ;;  %v3194_v25 = vmul.f32 %v6425_v12, %v6439_v8 }
 0x33d   : > { %v6431_v22 = vpop.permute.xlu0 %2300  ;;  %3176 = vrot.lane.b32.xlu1 %v3165_v13, %s4492_s30 }
 0x33e   : > { %8676 = vst [vmem:[#allocation264_spill] sm:$0xff] %v6431_v22  ;;  %v2743_v22 = vrot.slane %v2731_v40, 5  ;;  %v3202_v11 = vrot.slane %v3190_v2, 7  ;;  %v2769_v40 = vmul.f32 %v6126_v60, %v6077_v58  ;;  %v3209_v2 = vrot.slane %v3194_v25, 7 }
 0x33f   : > { %2712 = vrot.lane.b32.xlu0 %v2705_v14, %s4490_s28  ;;  %v6453_v14 = vpop.permute.xlu1 %2759 }
 0x340   : > { %8679 = vst [vmem:[#allocation267_spill] sm:$0xff] %v6453_v14  ;;  %v2745_v9 = vsel %vm258_vm1, %v2743_v22, %v2744_v53  ;;  %v2750_v22 = vsel %vm258_vm1, %v2744_v53, %v2749_v4  ;;  %v6474_v14 = vstv %s4214_s17  ;;  %s4228_s17 = sld [smem:[#allocation5 + $0x4c]] }
 0x341   : > { %v6447_v31 = vpop.permute.xlu0 %2304  ;;  %3213 = vrot.lane.b32.xlu1 %v3202_v11, %s4492_s30 }
 0x342   : > { %8678 = vst [vmem:[#allocation266_spill] sm:$0xff] %v6447_v31  ;;  %v2782_v31 = vrot.slane %v2771_v36, 5 }
 0x343   : > { %2716 = vrot.lane.b32.xlu0 %v2704_v49, %s4490_s28  ;;  %v6466_v13 = vpop.permute.xlu1 %2793 }
 0x344   : > { %8681 = vst [vmem:[#allocation269_spill] sm:$0xff] %v6466_v13  ;;  %v6478_v13 = vld [vmem:[#allocation4 + $0x8] sm:$0xff] }
 0x345   : > { %v6455_v52 = vpop.permute.xlu0 %2308  ;;  %3217 = vrot.lane.b32.xlu1 %v3202_v11, %s4492_s30 }
 0x346   : > { %8680 = vst [vmem:[#allocation268_spill] sm:$0xff] %v6455_v52  ;;  %v2781_v52 = vrot.slane %v2769_v40, 5  ;;  %v2787_v40 = vrot.slane %v2773_v34, 5 }
 0x347   : > { %2753 = vrot.lane.b32.xlu0 %v2745_v9, %s4490_s28  ;;  %v3210_v9 = vsel %vm990_vm8, %v3202_v11, %v3209_v2  ;;  %v6482_v60 = vpop.permute.xlu1 %2797  ;;  %v3239_v11 = vmul.f32 %v6425_v12, %v6474_v14 }
 0x348   : > { %8683 = vst [vmem:[#allocation271_spill] sm:$0xff] %v6482_v60  ;;  %v2783_v4 = vsel %vm258_vm1, %v2781_v52, %v2782_v31  ;;  %v2788_v60 = vsel %vm258_vm1, %v2782_v31, %v2787_v40  ;;  %v2816_v31 = vmul.f32 %v6158_v38, %v6093_v7 }
 0x349   : > { %v6468_v49 = vpop.permute.xlu0 %2335  ;;  %3221 = vrot.lane.b32.xlu1 %v3210_v9, %s4492_s30 }
 0x34a   : > { %8682 = vst [vmem:[#allocation270_spill] sm:$0xff] %v6468_v49  ;;  %v3235_v49 = vmul.f32 %v6478_v13, %v6474_v14 }
 0x34b   : > { %2757 = vrot.lane.b32.xlu0 %v2750_v22, %s4490_s28  ;;  %v6491_v36 = vpop.permute.xlu1 %2801  ;;  %v3254_v22 = vrot.slane %v3239_v11, 3  ;;  %v2814_v11 = vmul.f32 %v6158_v38, %v6077_v58 }
 0x34c   : > { %v3249_v53 = vrot.slane %v3235_v49, 3  ;;  %8685 = vst [vmem:[#allocation273_spill] sm:$0xff] %v6491_v36  ;;  %v6497_v49 = vstv %s4215_s23  ;;  %s4138_s23 = sld [smem:[#allocation5 + $0x1c]] }
 0x34d   : > { %v6484_v25 = vpop.permute.xlu0 %2339  ;;  %v3273_v34 = vmul.f32 %v6478_v13, %v6497_v49 }
 0x34e   : > { %8684 = vst [vmem:[#allocation272_spill] sm:$0xff] %v6484_v25  ;;  %3258 = vrot.lane.b32.xlu1 %v3249_v53, %s4492_s30  ;;  %v3255_v52 = vsel %vm1123_vm9, %v3249_v53, %v3254_v22  ;;  %v2824_v25 = vrot.slane %v2816_v31, 6 }
 0x34f   : > { %2791 = vrot.lane.b32.xlu0 %v2783_v4, %s4490_s28  ;;  %v6503_v9 = vpop.permute.xlu1 %2830 }
 0x350   : > { %8687 = vst [vmem:[#allocation275_spill] sm:$0xff] %v6503_v9 }
 0x351   : > { %v6493_v2 = vpop.permute.xlu0 %2343 }
 0x352   : > { %8686 = vst [vmem:[#allocation274_spill] sm:$0xff] %v6493_v2  ;;  %v3287_v2 = vrot.slane %v3273_v34, 3  ;;  %3262 = vrot.lane.b32.xlu1 %v3255_v52, %s4492_s30 }
 0x353   : > { %2795 = vrot.lane.b32.xlu0 %v2788_v60, %s4490_s28  ;;  %v3277_v60 = vmul.f32 %v6425_v12, %v6497_v49  ;;  %v6515_v53 = vpop.permute.xlu1 %2834 }
 0x354   : > { %8689 = vst [vmem:[#allocation277_spill] sm:$0xff] %v6515_v53  ;;  %v6528_v53 = vstv %s4216_s27  ;;  %s6891_s27 = sld [smem:[#allocation5 + $0x23]] }
 0x355   : > { %v6505_v4 = vpop.permute.xlu0 %2370  ;;  %v3292_v9 = vrot.slane %v3277_v60, 3 }
 0x356   : > { %8688 = vst [vmem:[#allocation276_spill] sm:$0xff] %v6505_v4  ;;  %v2822_v4 = vrot.slane %v2814_v11, 6  ;;  %3296 = vrot.lane.b32.xlu1 %v3287_v2, %s4492_s30  ;;  %v3318_v11 = vmul.f32 %v6478_v13, %v6528_v53 }
 0x357   : > { %2799 = vrot.lane.b32.xlu0 %v2787_v40, %s4490_s28  ;;  %v3293_v38 = vsel %vm1123_vm9, %v3287_v2, %v3292_v9  ;;  %v6522_v52 = vpop.permute.xlu1 %2838  ;;  %v2851_v2 = vmul.f32 %v6190_v59, %v6077_v58  ;;  %s4217_s28 = sld [smem:[#allocation5 + $0x5f]] }
 0x358   : > { %8691 = vst [vmem:[#allocation279_spill] sm:$0xff] %v6522_v52  ;;  %v2825_v40 = vsel %vm694_vm3, %v2822_v4, %v2824_v25  ;;  %v2855_v52 = vmul.f32 %v6190_v59, %v6123_v35 }
 0x359   : > { %v6517_v22 = vpop.permute.xlu0 %2374 }
 0x35a   : > { %8690 = vst [vmem:[#allocation278_spill] sm:$0xff] %v6517_v22  ;;  %3300 = vrot.lane.b32.xlu1 %v3293_v38, %s4492_s30  ;;  %v3332_v22 = vrot.slane %v3318_v11, 3  ;;  %v3322_v38 = vmul.f32 %v6425_v12, %v6528_v53 }
 0x35b   : > { %2828 = vrot.lane.b32.xlu0 %v2822_v4, %s4491_s24  ;;  %v6533_v31 = vpop.permute.xlu1 %2875  ;;  %v2853_v4 = vmul.f32 %v6190_v59, %v6093_v7  ;;  %v2898_v59 = vmul.f32 %v6226_v16, %v6093_v7 }
 0x35c   : > { %8693 = vst [vmem:[#allocation281_spill] sm:$0xff] %v6533_v31  ;;  %v2863_v31 = vrot.slane %v2851_v2, 6  ;;  %v3337_v11 = vrot.slane %v3322_v38, 3  ;;  %v2896_v2 = vmul.f32 %v6226_v16, %v6077_v58  ;;  %v2936_v16 = vmul.f32 %v6251_v15, %v6093_v7 }
 0x35d   : > { %v6524_v34 = vpop.permute.xlu0 %2378  ;;  %v2865_v36 = vrot.slane %v2853_v4, 6  ;;  %v6564_v4 = vstv %s4217_s28  ;;  %s6895_s28 = sld [smem:[#allocation5 + $0x15]] }
 0x35e   : > { %8692 = vst [vmem:[#allocation280_spill] sm:$0xff] %v6524_v34  ;;  %3304 = vrot.lane.b32.xlu1 %v3292_v9, %s4492_s30  ;;  %v3338_v9 = vsel %vm1123_vm9, %v3332_v22, %v3337_v11 }
 0x35f   : > { %2832 = vrot.lane.b32.xlu0 %v2825_v40, %s4491_s24  ;;  %v6545_v40 = vpop.permute.xlu1 %2879 }
 0x360   : > { %8695 = vst [vmem:[#allocation283_spill] sm:$0xff] %v6545_v40  ;;  %v2866_v40 = vsel %vm694_vm3, %v2863_v31, %v2865_v36 }
 0x361   : > { %v6535_v60 = vpop.permute.xlu0 %2415 }
 0x362   : > { %8694 = vst [vmem:[#allocation282_spill] sm:$0xff] %v6535_v60  ;;  %3341 = vrot.lane.b32.xlu1 %v3332_v22, %s4492_s30  ;;  %v2869_v60 = vrot.slane %v2855_v52, 6  ;;  %v3363_v22 = vmul.f32 %v6478_v13, %v6564_v4 }
 0x363   : > { %2836 = vrot.lane.b32.xlu0 %v2824_v25, %s4491_s24  ;;  %v6554_v25 = vpop.permute.xlu1 %2883 }
 0x364   : > { %8697 = vst [vmem:[#allocation285_spill] sm:$0xff] %v6554_v25  ;;  %v2870_v25 = vsel %vm694_vm3, %v2865_v36, %v2869_v60  ;;  %v2914_v60 = vrot.slane %v2900_v21, 2  ;;  %v2947_v21 = vrot.slane %v2936_v16, 2  ;;  %v2979_v16 = vmul.f32 %v6281_v5, %v6077_v58 }
 0x365   : > { %v6547_v34 = vpop.permute.xlu0 %2419 }
 0x366   : > { %8696 = vst [vmem:[#allocation284_spill] sm:$0xff] %v6547_v34  ;;  %3345 = vrot.lane.b32.xlu1 %v3338_v9, %s4492_s30  ;;  %v2909_v34 = vrot.slane %v2898_v59, 2 }
 0x367   : > { %2873 = vrot.lane.b32.xlu0 %v2863_v31, %s4491_s24  ;;  %v6569_v38 = vpop.permute.xlu1 %2920  ;;  %v3377_v31 = vrot.slane %v3363_v22, 3 }
 0x368   : > { %8699 = vst [vmem:[#allocation287_spill] sm:$0xff] %v6569_v38  ;;  %v2915_v22 = vsel %vm782_vm4, %v2909_v34, %v2914_v60 }
 0x369   : > { %v6556_v1 = vpop.permute.xlu0 %2453 }
 0x36a   : > { %8698 = vst [vmem:[#allocation286_spill] sm:$0xff] %v6556_v1  ;;  %v2908_v1 = vrot.slane %v2896_v2, 2  ;;  %3349 = vrot.lane.b32.xlu1 %v3337_v11, %s4492_s30  ;;  %v2934_v2 = vmul.f32 %v6251_v15, %v6077_v58 }
 0x36b   : > { %2877 = vrot.lane.b32.xlu0 %v2866_v40, %s4491_s24  ;;  %v3367_v40 = vmul.f32 %v6425_v12, %v6564_v4  ;;  %v6580_v9 = vpop.permute.xlu1 %2924 }
 0x36c   : > { %8701 = vst [vmem:[#allocation289_spill] sm:$0xff] %v6580_v9  ;;  %v2910_v36 = vsel %vm782_vm4, %v2908_v1, %v2909_v34  ;;  %v2946_v1 = vrot.slane %v2934_v2, 2 }
 0x36d   : > { %v6571_v52 = vpop.permute.xlu0 %2457 }
 0x36e   : > { %8700 = vst [vmem:[#allocation288_spill] sm:$0xff] %v6571_v52  ;;  %v3382_v52 = vrot.slane %v3367_v40, 3  ;;  %3386 = vrot.lane.b32.xlu1 %v3377_v31, %s4492_s30  ;;  %v2938_v40 = vmul.f32 %v6251_v15, %v6123_v35 }
 0x36f   : > { %2881 = vrot.lane.b32.xlu0 %v2870_v25, %s4491_s24  ;;  %v6592_v25 = vpop.permute.xlu1 %2958 }
 0x370   : > { %v3383_v11 = vsel %vm1123_vm9, %v3377_v31, %v3382_v52  ;;  %8703 = vst [vmem:[#allocation291_spill] sm:$0xff] %v6592_v25  ;;  %v6605_v31 = vstv %s4218_s6  ;;  %v2952_v25 = vrot.slane %v2938_v40, 2  ;;  %s6897_s6 = sld [smem:[#allocation5 + $0x7]] }
 0x371   : > { %v6582_v38 = vpop.permute.xlu0 %2461  ;;  %v3408_v34 = vmul.f32 %v6478_v13, %v6605_v31 }
 0x372   : > { %8702 = vst [vmem:[#allocation290_spill] sm:$0xff] %v6582_v38  ;;  %3390 = vrot.lane.b32.xlu1 %v3383_v11, %s4492_s30  ;;  %v2953_v2 = vsel %vm782_vm4, %v2947_v21, %v2952_v25  ;;  %v2981_v11 = vmul.f32 %v6281_v5, %v6093_v7 }
 0x373   : > { %2918 = vrot.lane.b32.xlu0 %v2910_v36, %s4491_s24  ;;  %v6601_v38 = vpop.permute.xlu1 %2962 }
 0x374   : > { %8705 = vst [vmem:[#allocation293_spill] sm:$0xff] %v6601_v38  ;;  %v2992_v40 = vrot.slane %v2981_v11, 2  ;;  %v3026_v11 = vmul.f32 %v6315_v18, %v6093_v7 }
 0x375   : > { %v6594_v59 = vpop.permute.xlu0 %2498 }
 0x376   : > { %8704 = vst [vmem:[#allocation292_spill] sm:$0xff] %v6594_v59  ;;  %v2948_v59 = vsel %vm782_vm4, %v2946_v1, %v2947_v21  ;;  %3394 = vrot.lane.b32.xlu1 %v3382_v52, %s4492_s30  ;;  %v2991_v1 = vrot.slane %v2979_v16, 2  ;;  %v2983_v21 = vmul.f32 %v6281_v5, %v6123_v35 }
 0x377   : > { %2922 = vrot.lane.b32.xlu0 %v2915_v22, %s4491_s24  ;;  %v6612_v15 = vpop.permute.xlu1 %2966 }
 0x378   : > { %8707 = vst [vmem:[#allocation295_spill] sm:$0xff] %v6612_v15 }
 0x379   : > { %v6603_v36 = vpop.permute.xlu0 %2502 }
 0x37a   : > { %8706 = vst [vmem:[#allocation294_spill] sm:$0xff] %v6603_v36  ;;  %3417 = vrot.lane.b32.xlu1 %v3408_v34, %s8378_s3 }
 0x37b   : > { %2956 = vrot.lane.b32.xlu0 %v2948_v59, %s4491_s24  ;;  %v6623_v52 = vpop.permute.xlu1 %3003  ;;  %v6627_v59 = vstv %s4219_s8  ;;  %s6899_s8 = sld [smem:[#allocation5 + $0xe]] }
 0x37c   : > { %8709 = vst [vmem:[#allocation297_spill] sm:$0xff] %v6623_v52  ;;  %v2997_v52 = vrot.slane %v2983_v21, 2 }
 0x37d   : > { %v6614_v60 = vpop.permute.xlu0 %2506 }
 0x37e   : > { %8708 = vst [vmem:[#allocation296_spill] sm:$0xff] %v6614_v60  ;;  %3421 = vrot.lane.b32.xlu1 %v3408_v34, %s8378_s3  ;;  %v3432_v60 = vmul.f32 %v6478_v13, %v6627_v59  ;;  %v2998_v16 = vsel %vm782_vm4, %v2992_v40, %v2997_v52 }
 0x37f   : > { %2960 = vrot.lane.b32.xlu0 %v2953_v2, %s4491_s24  ;;  %v6635_v36 = vpop.permute.xlu1 %3007 }
 0x380   : > { %8711 = vst [vmem:[#allocation299_spill] sm:$0xff] %v6635_v36 }
 0x381   : > { %v6625_v22 = vpop.permute.xlu0 %2535 }
 0x382   : > { %8710 = vst [vmem:[#allocation298_spill] sm:$0xff] %v6625_v22  ;;  %v2993_v22 = vsel %vm782_vm4, %v2991_v1, %v2992_v40  ;;  %3445 = vrot.lane.b32.xlu1 %v3432_v60, %s8378_s3  ;;  %v3436_v1 = vmul.f32 %v6425_v12, %v6627_v59 }
 0x383   : > { %2964 = vrot.lane.b32.xlu0 %v2952_v25, %s4491_s24  ;;  %v6642_v5 = vpop.permute.xlu1 %3011  ;;  %v3024_v25 = vmul.f32 %v6315_v18, %v6077_v58 }
 0x384   : > { %8713 = vst [vmem:[#allocation301_spill] sm:$0xff] %v6642_v5  ;;  %v3028_v5 = vmul.f32 %v6315_v18, %v6123_v35 }
 0x385   : > { %v6637_v2 = vpop.permute.xlu0 %2539  ;;  %v3036_v40 = vrot.slane %v3024_v25, 2 }
 0x386   : > { %8712 = vst [vmem:[#allocation300_spill] sm:$0xff] %v6637_v2  ;;  %3449 = vrot.lane.b32.xlu1 %v3432_v60, %s8378_s3  ;;  %v3037_v2 = vrot.slane %v3026_v11, 2  ;;  %v3042_v15 = vrot.slane %v3028_v5, 2 }
 0x387   : > { %3001 = vrot.lane.b32.xlu0 %v2993_v22, %s4491_s24  ;;  %v6655_v22 = vpop.permute.xlu1 %3048 }
 0x388   : > { %8715 = vst [vmem:[#allocation303_spill] sm:$0xff] %v6655_v22  ;;  %v3038_v22 = vsel %vm782_vm4, %v3036_v40, %v3037_v2  ;;  %v3043_v11 = vsel %vm782_vm4, %v3037_v2, %v3042_v15 }
 0x389   : > { %v6644_v34 = vpop.permute.xlu0 %2543 }
 0x38a   : > { %8714 = vst [vmem:[#allocation302_spill] sm:$0xff] %v6644_v34  ;;  %v6659_v34 = vstv %s4220_s15  ;;  %3453 = vrot.lane.b32.xlu1 %v3436_v1, %s8378_s3  ;;  %v3071_v1 = vmul.f32 %v6350_v30, %v6093_v7  ;;  %s6901_s15 = sld [smem:[#allocation5 + $0x2a]] }
 0x38b   : > { %3005 = vrot.lane.b32.xlu0 %v2998_v16, %s4491_s24  ;;  %v3467_v60 = vmul.f32 %v6478_v13, %v6659_v34  ;;  %v6667_v36 = vpop.permute.xlu1 %3052  ;;  %v3471_v5 = vmul.f32 %v6425_v12, %v6659_v34 }
 0x38c   : > { %8717 = vst [vmem:[#allocation305_spill] sm:$0xff] %v6667_v36  ;;  %v3082_v36 = vrot.slane %v3071_v1, 6 }
 0x38d   : > { %v6657_v21 = vpop.permute.xlu0 %2580 }
 0x38e   : > { %8716 = vst [vmem:[#allocation304_spill] sm:$0xff] %v6657_v21  ;;  %3480 = vrot.lane.b32.xlu1 %v3467_v60, %s8378_s3 }
 0x38f   : > { %3009 = vrot.lane.b32.xlu0 %v2997_v52, %s4491_s24  ;;  %v6674_v18 = vpop.permute.xlu1 %3056  ;;  %v3069_v52 = vmul.f32 %v6350_v30, %v6077_v58  ;;  %v3073_v58 = vmul.f32 %v6350_v30, %v6123_v35  ;;  %v6708_v30 = vld [vmem:[#allocation4 + $0x30] sm:$0xff] }
 0x390   : > { %8719 = vst [vmem:[#allocation307_spill] sm:$0xff] %v6674_v18  ;;  %v6691_v18 = vstv %s4221_s22  ;;  %v3107_v1 = vmul.f32 %v6708_v30, %v6374_v46  ;;  %s6905_s22 = sld [smem:[#allocation5]] }
 0x391   : > { %v6669_v16 = vpop.permute.xlu0 %2584  ;;  %8723 = vst [vmem:[#allocation311_spill] sm:$0xff] %v6691_v18  ;;  %v3081_v2 = vrot.slane %v3069_v52, 6 }
 0x392   : > { %8718 = vst [vmem:[#allocation306_spill] sm:$0xff] %v6669_v16  ;;  %3484 = vrot.lane.b32.xlu1 %v3467_v60, %s8378_s3  ;;  %v3502_v60 = vmul.f32 %v6478_v13, %v6691_v18 }
 0x393   : > { %3046 = vrot.lane.b32.xlu0 %v3038_v22, %s4491_s24  ;;  %v6689_v40 = vpop.permute.xlu1 %3093  ;;  %v3083_v38 = vsel %vm694_vm3, %v3081_v2, %v3082_v36  ;;  %v3506_v2 = vmul.f32 %v6425_v12, %v6691_v18 }
 0x394   : > { %8722 = vst [vmem:[#allocation310_spill] sm:$0xff] %v6689_v40 }
 0x395   : > { %v6676_v25 = vpop.permute.xlu0 %2618 }
 0x396   : > { %8720 = vst [vmem:[#allocation308_spill] sm:$0xff] %v6676_v25  ;;  %3488 = vrot.lane.b32.xlu1 %v3471_v5, %s8378_s3  ;;  %v3109_v5 = vmul.f32 %v6374_v46, %v6093_v7 }
 0x397   : > { %3050 = vrot.lane.b32.xlu0 %v3043_v11, %s4491_s24  ;;  %v6704_v52 = vpop.permute.xlu1 %3097 }
 0x398   : > { %8725 = vst [vmem:[#allocation313_spill] sm:$0xff] %v6704_v52  ;;  %v3117_v7 = vrot.slane %v3109_v5, 7 }
 0x399   : > { %v6687_v22 = vpop.permute.xlu0 %2622 }
 0x39a   : > { %8721 = vst [vmem:[#allocation309_spill] sm:$0xff] %v6687_v22  ;;  %v3087_v22 = vrot.slane %v3073_v58, 6  ;;  %3515 = vrot.lane.b32.xlu1 %v3502_v60, %s8378_s3 }
 0x39b   : > { %3054 = vrot.lane.b32.xlu0 %v3042_v15, %s4491_s24 }
 0x39c   : > { %v3088_v15 = vsel %vm694_vm3, %v3082_v36, %v3087_v22  ;;  %v6725_v36 = vpop.permute.xlu1 %3123  ;;  %vm1863_vm3 = vcmask 998400  }
 0x39d   : > { %v6699_v11 = vpop.permute.xlu0 %2626  ;;  %8729 = vst [vmem:[#allocation317_spill] sm:$0xff] %v6725_v36  ;;  %v6757_v36 = vld [vmem:[#allocation4 + $0x50] sm:$0x3f] }
 0x39e   : > { %8724 = vst [vmem:[#allocation312_spill] sm:$0xff] %v6699_v11  ;;  %3519 = vrot.lane.b32.xlu1 %v3502_v60, %s8378_s3  ;;  %v3115_v11 = vrot.slane %v3107_v1, 7  ;;  %v3148_v9 = vmul.f32 %v6757_v36, %v6405_v3  ;;  %v3238_v21 = vmul.f32 %v6757_v36, %v6474_v14 }
 0x39f   : > { %3091 = vrot.lane.b32.xlu0 %v3083_v38, %s4491_s24  ;;  %v6718_v38 = vstv %s4222_s18  ;;  %s6907_s18 = sld [smem:[#allocation5 + $0x31]] }
 0x3a0   : > { %8727 = vst [vmem:[#allocation315_spill] sm:$0xff] %v6718_v38  ;;  %v3537_v58 = vmul.f32 %v6478_v13, %v6718_v38  ;;  %v3541_v46 = vmul.f32 %v6425_v12, %v6718_v38  ;;  %v3118_v52 = vsel %vm990_vm8, %v3115_v11, %v3117_v7  ;;  %v6738_v1 = vpop.permute.xlu1 %3127 }
 0x3a1   : > { %v6706_v35 = vpop.permute.xlu0 %2663  ;;  %8732 = vst [vmem:[#allocation320_spill] sm:$0xff] %v6738_v1 }
 0x3a2   : > { %8726 = vst [vmem:[#allocation314_spill] sm:$0xff] %v6706_v35  ;;  %v3551_v22 = vrot.slane %v3537_v58, 4  ;;  %3523 = vrot.lane.b32.xlu1 %v3506_v2, %s8378_s3 }
 0x3a3   : > { %3095 = vrot.lane.b32.xlu0 %v3088_v15, %s4491_s24  ;;  %v3556_v15 = vrot.slane %v3541_v46, 4  ;;  %v3144_v46 = vmul.f32 %v6708_v30, %v6405_v3  ;;  %s4223_s24 = sld [smem:[#allocation5 + $0x59]] }
 0x3a4   : > { %v6755_v1 = vpop.permute.xlu1 %3131 }
 0x3a5   : > { %v6723_v35 = vpop.permute.xlu0 %2667  ;;  %v3557_v5 = vsel %vm341_vm10, %v3551_v22, %v3556_v15  ;;  %v3156_v15 = vrot.slane %v3144_v46, 7  ;;  %8735 = vst [vmem:[#allocation323_spill] sm:$0xff] %v6755_v1  ;;  %v3189_v1 = vmul.f32 %v6708_v30, %v6439_v8  ;;  %v2136_v56 = vstv %s6907_s18  ;;  %s4008_s18 = scalar_lea.sflag [#allocation7], %s4651_s7 }
 0x3a6   : > { %8728 = vst [vmem:[#allocation316_spill] sm:$0xff] %v6723_v35  ;;  %3560 = vrot.lane.b32.xlu1 %v3551_v22, %s8378_s3  ;;  %v6735_v35 = vstv %s4225_s19  ;;  %s6914_s19 = sld [smem:[#allocation5 + $0x38]]  ;;  %v6978_v18 = vmul.f32 %v6708_v30, %v2136_v56 }
 0x3a7   : > { %3121 = vrot.lane.b32.xlu0 %v3115_v11, %s4492_s30  ;;  %8731 = vst [vmem:[#allocation319_spill] sm:$0xff] %v6735_v35  ;;  %v3665_v2 = vmul.f32 %v6478_v13, %v6735_v35  ;;  %v3201_v25 = vrot.slane %v3189_v1, 7 }
 0x3a9   : > { %v6731_v60 = vpop.permute.xlu0 %2671  ;;  %v6767_v46 = vstv %s4223_s24  ;;  %s6916_s24 = sld [smem:[#allocation5 + $0x3f]] }
 0x3aa   : > { %8730 = vst [vmem:[#allocation318_spill] sm:$0xff] %v6731_v60  ;;  %v6747_v60 = vld [vmem:[#allocation4 + $0x40] sm:$0xff]  ;;  %3564 = vrot.lane.b32.xlu1 %v3557_v5, %s8378_s3  ;;  %8737 = vst [vmem:[#allocation325_spill] sm:$0xff] %v6767_v46 }
 0x3ab   : > { %3125 = vrot.lane.b32.xlu0 %v3118_v52, %s4492_s30  ;;  %v3146_v11 = vmul.f32 %v6747_v60, %v6405_v3  ;;  %v3673_v52 = vrot.slane %v3665_v2, 5  ;;  %v3575_v3 = vmul.f32 %v6478_v13, %v6767_v46 }
 0x3ac   : > { %v2151_v47 = vstv %s6914_s19  ;;  %s4495_s19 = smov [#allocation10]  }
 0x3ad   : > { %v6743_v58 = vpop.permute.xlu0 %2708 }
 0x3ae   : > { %8733 = vst [vmem:[#allocation321_spill] sm:$0xff] %v6743_v58  ;;  %v3158_v58 = vrot.slane %v3146_v11, 7  ;;  %3680 = vrot.lane.b32.xlu1 %v3673_v52, %s4494_s26  ;;  %v6770_v11 = vpop.permute.xlu1 %3168 }
 0x3af   : > { %3129 = vrot.lane.b32.xlu0 %v3117_v7, %s4492_s30  ;;  %v3162_v7 = vrot.slane %v3148_v9, 7  ;;  %8738 = vst [vmem:[#allocation326_spill] sm:$0xff] %v6770_v11  ;;  %v3191_v9 = vmul.f32 %v6747_v60, %v6439_v8 }
 0x3b0   : > { %v3159_v2 = vsel %vm990_vm8, %v3156_v15, %v3158_v58 }
 0x3b1   : > { %v6753_v22 = vpop.permute.xlu0 %2712 }
 0x3b2   : > { %8734 = vst [vmem:[#allocation322_spill] sm:$0xff] %v6753_v22  ;;  %3684 = vrot.lane.b32.xlu1 %v3673_v52, %s4494_s26  ;;  %v6787_v40 = vpop.permute.xlu1 %3172 }
 0x3b3   : > { %3166 = vrot.lane.b32.xlu0 %v3156_v15, %s4492_s30  ;;  %v3163_v15 = vsel %vm990_vm8, %v3158_v58, %v3162_v7  ;;  %8741 = vst [vmem:[#allocation329_spill] sm:$0xff] %v6787_v40  ;;  %v3193_v58 = vmul.f32 %v6757_v36, %v6439_v8  ;;  %v6802_v8 = vstv %s4229_s29  ;;  %s6923_s29 = sld [smem:[#allocation5 + $0x46]] }
 0x3b4   : > { %8743 = vst [vmem:[#allocation331_spill] sm:$0xff] %v6802_v8 }
 0x3b5   : > { %v6763_v5 = vpop.permute.xlu0 %2716 }
 0x3b6   : > { %8736 = vst [vmem:[#allocation324_spill] sm:$0xff] %v6763_v5  ;;  %v3589_v5 = vrot.slane %v3575_v3, 4  ;;  %3688 = vrot.lane.b32.xlu1 %v3673_v52, %s4494_s26  ;;  %v3203_v3 = vrot.slane %v3191_v9, 7  ;;  %v3236_v9 = vmul.f32 %v6747_v60, %v6474_v14 }
 0x3b7   : > { %3170 = vrot.lane.b32.xlu0 %v3159_v2, %s4492_s30  ;;  %v3579_v2 = vmul.f32 %v6425_v12, %v6767_v46 }
 0x3b8   : > { %v3204_v1 = vsel %vm990_vm8, %v3201_v25, %v3203_v3 }
 0x3b9   : > { %v6774_v22 = vpop.permute.xlu0 %2753  ;;  %v3594_v16 = vrot.slane %v3579_v2, 4  ;;  %v6805_v2 = vpop.permute.xlu1 %3176  ;;  %v6975_v35 = vstv %s6923_s29 }
 0x3ba   : > { %8739 = vst [vmem:[#allocation327_spill] sm:$0xff] %v6774_v22  ;;  %3598 = vrot.lane.b32.xlu1 %v3589_v5, %s8378_s3  ;;  %8744 = vst [vmem:[#allocation332_spill] sm:$0xff] %v6805_v2  ;;  %v3247_v22 = vrot.slane %v3236_v9, 3 }
 0x3bb   : > { %3174 = vrot.lane.b32.xlu0 %v3163_v15, %s4492_s30  ;;  %v3595_v52 = vsel %vm341_vm10, %v3589_v5, %v3594_v16  ;;  %v3234_v15 = vmul.f32 %v6708_v30, %v6474_v14  ;;  %v3830_v5 = vmul.f32 %v6478_v13, %v6802_v8  ;;  %v3274_v14 = vmul.f32 %v6747_v60, %v6497_v49 }
 0x3bd   : > { %v6785_v11 = vpop.permute.xlu0 %2757  ;;  %v6820_v2 = vpop.permute.xlu1 %3213 }
 0x3be   : > { %8740 = vst [vmem:[#allocation328_spill] sm:$0xff] %v6785_v11  ;;  %v3207_v11 = vrot.slane %v3193_v58, 7  ;;  %3602 = vrot.lane.b32.xlu1 %v3595_v52, %s8378_s3  ;;  %v3246_v58 = vrot.slane %v3234_v15, 3  ;;  %v3834_v52 = vmul.f32 %v6425_v12, %v6802_v8  ;;  %8747 = vst [vmem:[#allocation335_spill] sm:$0xff] %v6820_v2  ;;  %v3272_v15 = vmul.f32 %v6708_v30, %v6497_v49 }
 0x3bf   : > { %3211 = vrot.lane.b32.xlu0 %v3201_v25, %s4492_s30  ;;  %v6836_v2 = vstv %s4224_s5  ;;  %s6925_s5 = sld [smem:[#allocation5 + $0x4d]]  ;;  %v6969_v8 = vstv %s6916_s24  ;;  %s4398_s24 = sshll.u32 %s4495_s19, 4  ;;  %s4399_s24 = int_to_ptr.vmem [resolvable:$false] %s4398_s24 }
 0x3c0   : > { %v3208_v25 = vsel %vm990_vm8, %v3203_v3, %v3207_v11  ;;  %v3248_v11 = vsel %vm1123_vm9, %v3246_v58, %v3247_v22  ;;  %v3252_v3 = vrot.slane %v3238_v21, 3  ;;  %v3284_v21 = vrot.slane %v3272_v15, 3  ;;  %8749 = vst [vmem:[#allocation337_spill] sm:$0xff] %v6836_v2  ;;  %s4400_s29 = scalar_lea.vmem %s4399_s24, 512 }
 0x3c1   : > { %v6794_v7 = vpop.permute.xlu0 %2791 }
 0x3c2   : > { %8742 = vst [vmem:[#allocation330_spill] sm:$0xff] %v6794_v7  ;;  %v3844_v7 = vrot.slane %v3830_v5, 1  ;;  %3606 = vrot.lane.b32.xlu1 %v3594_v16, %s8378_s3  ;;  %v3849_v5 = vrot.slane %v3834_v52, 1  ;;  %v3253_v58 = vsel %vm1123_vm9, %v3247_v22, %v3252_v3  ;;  %v3285_v52 = vrot.slane %v3274_v14, 3 }
 0x3c3   : > { %3215 = vrot.lane.b32.xlu0 %v3204_v1, %s4492_s30  ;;  %v3624_v22 = vmul.f32 %v6425_v12, %v6836_v2 }
 0x3c4   : > { %v3850_v16 = vsel %vm441_vm2, %v3844_v7, %v3849_v5 }
 0x3c5   : > { %v6809_v40 = vpop.permute.xlu0 %2795  ;;  %v3639_v14 = vrot.slane %v3624_v22, 4  ;;  %v3321_v22 = vmul.f32 %v6757_v36, %v6528_v53 }
 0x3c6   : > { %8745 = vst [vmem:[#allocation333_spill] sm:$0xff] %v6809_v40  ;;  %3853 = vrot.lane.b32.xlu1 %v3844_v7, %s4494_s26  ;;  %v3620_v7 = vmul.f32 %v6478_v13, %v6836_v2  ;;  %v304_v2 = vstv %s6905_s22 }
 0x3c7   : > { %3219 = vrot.lane.b32.xlu0 %v3208_v25, %s4492_s30  ;;  %v3276_v25 = vmul.f32 %v6757_v36, %v6497_v49  ;;  %v3286_v49 = vsel %vm1123_vm9, %v3284_v21, %v3285_v52 }
 0x3c9   : > { %v6818_v1 = vpop.permute.xlu0 %2799  ;;  %v3290_v40 = vrot.slane %v3276_v25, 3  ;;  %v3319_v25 = vmul.f32 %v6747_v60, %v6528_v53 }
 0x3ca   : > { %8746 = vst [vmem:[#allocation334_spill] sm:$0xff] %v6818_v1  ;;  %3857 = vrot.lane.b32.xlu1 %v3850_v16, %s4494_s26  ;;  %v6839_v1 = vpop.permute.xlu1 %3217 }
 0x3cb   : > { %3256 = vrot.lane.b32.xlu0 %v3248_v11, %s4492_s30  ;;  %8750 = vst [vmem:[#allocation338_spill] sm:$0xff] %v6839_v1  ;;  %v3291_v16 = vsel %vm1123_vm9, %v3285_v52, %v3290_v40  ;;  %v6867_v52 = vstv %s4227_s16  ;;  %s6927_s16 = sld [smem:[#allocation5 + $0x54]] }
 0x3cc   : > { %8755 = vst [vmem:[#allocation343_spill] sm:$0xff] %v6867_v52 }
 0x3cd   : > { %v6830_v9 = vpop.permute.xlu0 %2828 }
 0x3ce   : > { %8748 = vst [vmem:[#allocation336_spill] sm:$0xff] %v6830_v9  ;;  %v3634_v9 = vrot.slane %v3620_v7, 4  ;;  %3861 = vrot.lane.b32.xlu1 %v3849_v5, %s4494_s26  ;;  %v6852_v15 = vpop.permute.xlu1 %3221 }
 0x3cf   : > { %3260 = vrot.lane.b32.xlu0 %v3253_v58, %s4492_s30  ;;  %8753 = vst [vmem:[#allocation341_spill] sm:$0xff] %v6852_v15  ;;  %v3317_v58 = vmul.f32 %v6708_v30, %v6528_v53  ;;  %v3744_v53 = vmul.f32 %v6425_v12, %v6867_v52 }
 0x3d0   : > { %v3640_v5 = vsel %vm341_vm10, %v3634_v9, %v3639_v14 }
 0x3d1   : > { %v6843_v11 = vpop.permute.xlu0 %2832  ;;  %v3329_v7 = vrot.slane %v3317_v58, 3 }
 0x3d2   : > { %8751 = vst [vmem:[#allocation339_spill] sm:$0xff] %v6843_v11  ;;  %3643 = vrot.lane.b32.xlu1 %v3634_v9, %s8378_s3  ;;  %v6870_v15 = vpop.permute.xlu1 %3258 }
 0x3d3   : > { %3294 = vrot.lane.b32.xlu0 %v3286_v49, %s4492_s30  ;;  %v3330_v49 = vrot.slane %v3319_v25, 3  ;;  %8756 = vst [vmem:[#allocation344_spill] sm:$0xff] %v6870_v15  ;;  %v3335_v25 = vrot.slane %v3321_v22, 3  ;;  %v6944_v15 = vld [vmem:[#allocation4] sm:$0xff] }
 0x3d5   : > { %v6850_v3 = vpop.permute.xlu0 %2836  ;;  %v3331_v58 = vsel %vm1123_vm9, %v3329_v7, %v3330_v49  ;;  %v3362_v7 = vmul.f32 %v6708_v30, %v6564_v4 }
 0x3d6   : > { %8752 = vst [vmem:[#allocation340_spill] sm:$0xff] %v6850_v3  ;;  %3647 = vrot.lane.b32.xlu1 %v3640_v5, %s8378_s3  ;;  %v6883_v5 = vpop.permute.xlu1 %3262  ;;  %v352_v3 = vstv %s6891_s27  ;;  %s4240_s27 = sshll.u32 %s4472_s12, 8 }
 0x3d7   : > { %3298 = vrot.lane.b32.xlu0 %v3291_v16, %s4492_s30  ;;  %v3740_v16 = vmul.f32 %v6478_v13, %v6867_v52  ;;  %8759 = vst [vmem:[#allocation347_spill] sm:$0xff] %v6883_v5  ;;  %v4346_v5 = vld [vmem:[#allocation4 + $0x20] sm:$0x3f]  ;;  %s8311_s22 = scalar_lea.hbm %s8365_s2, %s4240_s27 }
 0x3d9   : > { %v6862_v21 = vpop.permute.xlu0 %2873  ;;  %v3754_v9 = vrot.slane %v3740_v16, 1  ;;  %v3374_v16 = vrot.slane %v3362_v7, 3 }
 0x3da   : > { %8754 = vst [vmem:[#allocation342_spill] sm:$0xff] %v6862_v21  ;;  %3651 = vrot.lane.b32.xlu1 %v3639_v14, %s8378_s3  ;;  %v3759_v21 = vrot.slane %v3744_v53, 1  ;;  %v3364_v14 = vmul.f32 %v6747_v60, %v6564_v4  ;;  %v6919_v53 = vpop.permute.xlu1 %3296  ;;  %s6935_s3 = sld [smem:[#allocation5 + $0x61]] }
 0x3db   : > { %3302 = vrot.lane.b32.xlu0 %v3290_v40, %s4492_s30  ;;  %8762 = vst [vmem:[#allocation350_spill] sm:$0xff] %v6919_v53  ;;  %v326_v53 = vstv %s6895_s28 }
 0x3dc   : > { %v3760_v22 = vsel %vm441_vm2, %v3754_v9, %v3759_v21 }
 0x3dd   : > { %v6874_v1 = vpop.permute.xlu0 %2877 }
 0x3de   : > { %8757 = vst [vmem:[#allocation345_spill] sm:$0xff] %v6874_v1  ;;  %v3336_v1 = vsel %vm1123_vm9, %v3330_v49, %v3335_v25  ;;  %3763 = vrot.lane.b32.xlu1 %v3754_v9, %s4494_s26  ;;  %v6912_v9 = vstv %s4228_s17  ;;  %s6929_s17 = sld [smem:[#allocation5 + $0x5b]]  ;;  %v6959_v52 = vpop.permute.xlu1 %3300 }
 0x3df   : > { %3339 = vrot.lane.b32.xlu0 %v3331_v58, %s4492_s30  ;;  %v3375_v58 = vrot.slane %v3364_v14, 3  ;;  %8761 = vst [vmem:[#allocation349_spill] sm:$0xff] %v6912_v9  ;;  %v3785_v7 = vmul.f32 %v6478_v13, %v6912_v9  ;;  %v3789_v11 = vmul.f32 %v6425_v12, %v6912_v9  ;;  %8765 = vst [vmem:[#allocation353_spill] sm:$0xff] %v6959_v52 }
 0x3e1   : > { %v6881_v40 = vpop.permute.xlu0 %2881  ;;  %v3804_v48 = vrot.slane %v3789_v11, 1 }
 0x3e2   : > { %8758 = vst [vmem:[#allocation346_spill] sm:$0xff] %v6881_v40  ;;  %3767 = vrot.lane.b32.xlu1 %v3760_v22, %s4494_s26  ;;  %v3799_v22 = vrot.slane %v3785_v7, 1  ;;  %v6942_v7 = vmul.f32 %v4346_v5, %v352_v3 }
 0x3e3   : > { %3343 = vrot.lane.b32.xlu0 %v3336_v1, %s4492_s30  ;;  %v3366_v1 = vmul.f32 %v6757_v36, %v6564_v4  ;;  %v334_v4 = vstv %s4138_s23  ;;  %s7085_s23 = sld [smem:[#allocation5 + $0x5a]] }
 0x3e4   : > { %v337_v61 = vmul.f32 %v4346_v5, %v334_v4  ;;  %v3805_v11 = vsel %vm441_vm2, %v3799_v22, %v3804_v48  ;;  %v362_v52 = vrot.slane %v6942_v7, 4  ;;  %v6987_v38 = vstv %s6929_s17 }
 0x3e5   : > { %v6903_v49 = vpop.permute.xlu0 %2918  ;;  %v3380_v40 = vrot.slane %v3366_v1, 3  ;;  %v6994_v7 = vmul.f32 %v6747_v60, %v2136_v56 }
 0x3e6   : > { %8760 = vst [vmem:[#allocation348_spill] sm:$0xff] %v6903_v49  ;;  %3771 = vrot.lane.b32.xlu1 %v3759_v21, %s4494_s26  ;;  %v6947_v21 = vld [vmem:[#allocation4 + $0x10] sm:$0xff]  ;;  %v371_v49 = vstv %s6901_s15  ;;  %v345_v23 = vrot.slane %v337_v61, 4 }
 0x3e7   : > { %3347 = vrot.lane.b32.xlu0 %v3335_v25, %s4492_s30  ;;  %v3376_v25 = vsel %vm1123_vm9, %v3374_v16, %v3375_v58  ;;  %v335_v16 = vmul.f32 %v6944_v15, %v334_v4  ;;  %v336_v1 = vmul.f32 %v6947_v21, %v334_v4  ;;  %v6961_v10 = vmul.f32 %v4346_v5, %v371_v49 }
 0x3e8   : > { %v3381_v62 = vsel %vm1123_vm9, %v3375_v58, %v3380_v40  ;;  %v6981_v58 = vstv %s6925_s5  ;;  %v6984_v4 = vstv %s6927_s16  ;;  %v354_v32 = vmul.f32 %v6947_v21, %v352_v3 }
 0x3e9   : > { %v6931_v14 = vpop.permute.xlu0 %2922  ;;  %v343_v46 = vrot.slane %v336_v1, 4  ;;  %v7001_v1 = vmul.f32 %v6944_v15, %v326_v53  ;;  %v372_v28 = vmul.f32 %v6944_v15, %v371_v49  ;;  %v373_v39 = vmul.f32 %v6947_v21, %v371_v49 }
 0x3ea   : > { %8763 = vst [vmem:[#allocation351_spill] sm:$0xff] %v6931_v14  ;;  %v6954_v14 = vstv %s6899_s8  ;;  %3808 = vrot.lane.b32.xlu1 %v3799_v22, %s4494_s26  ;;  %v381_v22 = vrot.slane %v6961_v10, 4  ;;  %v306_v51 = vmul.f32 %v6947_v21, %v304_v2 }
 0x3eb   : > { %3384 = vrot.lane.b32.xlu0 %v3376_v25, %s4492_s30  ;;  %v6951_v25 = vstv %s6897_s6  ;;  %v321_v44 = vmul.f32 %v4346_v5, %v6954_v14  ;;  %v346_v49 = vsel %vm341_vm10, %v343_v46, %v345_v23  ;;  %v379_v6 = vrot.slane %v373_v39, 4 }
 0x3ec   : > { %v2154_v39 = vmul.f32 %v6757_v36, %v2151_v47 }
 0x3ed   : > { %v6957_v9 = vpop.permute.xlu0 %2956  ;;  %v7020_v50 = vadd.f32 %v381_v22, %v321_v44 }
 0x3ee   : > { %8764 = vst [vmem:[#allocation352_spill] sm:$0xff] %v6957_v9  ;;  %v342_v9 = vrot.slane %v335_v16, 4  ;;  %3812 = vrot.lane.b32.xlu1 %v3805_v11, %s4494_s26  ;;  %v6998_v16 = vstv %s6935_s3  ;;  %v353_v11 = vmul.f32 %v6944_v15, %v352_v3  ;;  %v7030_v3 = vmul.f32 %v6947_v21, %v326_v53  ;;  %s8769_s3 = smov 123  }
 0x3ef   : > { %3388 = vrot.lane.b32.xlu0 %v3381_v62, %s4492_s30  ;;  %v313_v62 = vmul.f32 %v4346_v5, %v6951_v25  ;;  %v3913_v10 = vmul.f32 %v6478_v13, %v6998_v16  ;;  %v3917_v44 = vmul.f32 %v6425_v12, %v6998_v16  ;;  %v312_v12 = vmul.f32 %v6947_v21, %v6951_v25 }
 0x3f0   : > { %v344_v56 = vsel %vm341_vm10, %v342_v9, %v343_v46  ;;  %v305_v9 = vmul.f32 %v6944_v15, %v304_v2  ;;  %v359_v2 = vrot.slane %v353_v11, 4  ;;  %v320_v11 = vmul.f32 %v6947_v21, %v6954_v14 }
 0x3f1   : > { %v6989_v24 = vpop.permute.xlu0 %2960  ;;  %v7009_v54 = vadd.f32 %v362_v52, %v313_v62  ;;  %v7022_v62 = vmul.f32 %v4346_v5, %v326_v53  ;;  %v3409_v53 = vmul.f32 %v6747_v60, %v6605_v31  ;;  %v3932_v46 = vrot.slane %v3917_v44, 5 }
 0x3f2   : > { %8766 = vst [vmem:[#allocation354_spill] sm:$0xff] %v6989_v24  ;;  %v7005_v24 = vpop.permute.xlu1 %3304  ;;  %3816 = vrot.lane.b32.xlu1 %v3804_v48, %s4494_s26  ;;  %v7036_v5 = vadd.f32 %v344_v56, %v305_v9  ;;  %v378_v48 = vrot.slane %v372_v28, 4  ;;  %v319_v56 = vmul.f32 %v6944_v15, %v6954_v14  ;;  %v2153_v28 = vmul.f32 %v6747_v60, %v2151_v47 }
 0x3f3   : > { %3392 = vrot.lane.b32.xlu0 %v3380_v40, %s4492_s30  ;;  %8767 = vst [vmem:[#allocation355_spill] sm:$0xff] %v7005_v24  ;;  %v3407_v40 = vmul.f32 %v6708_v30, %v6605_v31  ;;  %v3927_v24 = vrot.slane %v3913_v10, 5  ;;  %s7027_s30 = sld [smem:[#allocation5 + $0x3e]]  ;;  %v311_v10 = vmul.f32 %v6944_v15, %v6951_v25  ;;  %v7060_v31 = vmul.f32 %v6708_v30, %v6969_v8 }
 0x3f4   : > { %v2172_v9 = vmul.f32 %v6747_v60, %v6969_v8  ;;  %v2173_v44 = vmul.f32 %v6757_v36, %v6969_v8  ;;  %v2161_v8 = vrot.slane %v2154_v39, 7  ;;  %v2191_v14 = vmul.f32 %v6747_v60, %v6975_v35 }
 0x3f5   : > { %v7016_v61 = vpop.permute.xlu0 %2964  ;;  %8772 = vst [vmem:[#allocation359_spill] sm:$0xff] %v7060_v31 }
 0x3f6   : > { %8768 = vst [vmem:[#allocation356_spill] sm:$0xff] %v7016_v61  ;;  %v360_v61 = vrot.slane %v354_v32, 4  ;;  %v7044_v23 = vpop.permute.xlu1 %3341  ;;  %v7053_v32 = vmul.f32 %v6708_v30, %v2151_v47  ;;  %3936 = vrot.lane.b32.xlu1 %v3927_v24, %s4494_s26  ;;  %v380_v47 = vsel %vm341_vm10, %v378_v48, %v379_v6 }
 0x3f7   : > { %3415 = vrot.lane.b32.xlu0 %v3407_v40, %s8769_s3  ;;  %8771 = vst [vmem:[#allocation358_spill] sm:$0xff] %v7044_v23  ;;  %v7046_v40 = vadd.f32 %v346_v49, %v306_v51  ;;  %v3933_v51 = vsel %vm258_vm1, %v3927_v24, %v3932_v46  ;;  %v382_v49 = vsel %vm341_vm10, %v379_v6, %v381_v22  ;;  %v2159_v6 = vrot.slane %v2153_v28, 7 }
 0x3f8   : > { %v361_v15 = vsel %vm341_vm10, %v359_v2, %v360_v61  ;;  %v363_v25 = vsel %vm341_vm10, %v360_v61, %v362_v52  ;;  %v3431_v24 = vmul.f32 %v6708_v30, %v6627_v59  ;;  %v2178_v52 = vrot.slane %v2172_v9, 7 }
 0x3f9   : > { %v7040_v43 = vpop.permute.xlu0 %3001  ;;  %v7083_v21 = vstv %s7027_s30  ;;  %v2192_v28 = vmul.f32 %v6757_v36, %v6975_v35  ;;  %v7099_v39 = vadd.f32 %v361_v15, %v311_v10  ;;  %v2180_v22 = vrot.slane %v2173_v44, 7 }
 0x3fa   : > { %8770 = vst [vmem:[#allocation357_spill] sm:$0xff] %v7040_v43  ;;  %3940 = vrot.lane.b32.xlu1 %v3933_v51, %s4494_s26  ;;  %v7089_v2 = vpop.permute.xlu1 %3345  ;;  %v3702_v48 = vmul.f32 %v6478_v13, %v7083_v21  ;;  %v2190_v51 = vmul.f32 %v6708_v30, %v6975_v35  ;;  %v7105_v13 = vadd.f32 %v363_v25, %v312_v12  ;;  %v8777_v43 = vrot.slane %v6978_v18, 7 }
 0x3fb   : > { %3419 = vrot.lane.b32.xlu0 %v3409_v53, %s8769_s3  ;;  %8774 = vst [vmem:[#allocation361_spill] sm:$0xff] %v7089_v2  ;;  %v7107_v9 = vadd.f32 %v380_v47, %v319_v56  ;;  %v7109_v23 = vadd.f32 %v382_v49, %v320_v11  ;;  %v8778_v10 = vrot.slane %v7053_v32, 7  ;;  %v7125_v12 = vsel %vm990_vm8, %v2159_v6, %v2161_v8  ;;  %v4349_v56 = vld [vmem:[#allocation4 + $0x58] sm:$0x3f] }
 0x3fc   : > { %v3716_v2 = vrot.slane %v3702_v48, 1  ;;  %8779 = vst [vmem:[#allocation363_spill] sm:$0xff] %v7125_v12  ;;  %v3706_v25 = vmul.f32 %v4349_v56, %v7083_v21  ;;  %v8780_v11 = vrot.slane %v7060_v31, 7  ;;  %v2197_v47 = vrot.slane %v2191_v14, 3  ;;  %v8841_v12 = vld [vmem:[#allocation66_spill] sm:$0xff] }
 0x3fd   : > { %v7074_v53 = vpop.permute.xlu0 %3005  ;;  %v7122_v15 = vsel %vm990_vm8, %v8778_v10, %v2159_v6  ;;  %v2199_v49 = vrot.slane %v2192_v28, 3  ;;  %v7135_v44 = vsel %vm990_vm8, %v2178_v52, %v2180_v22  ;;  %v3435_v8 = vmul.f32 %v6757_v36, %v6627_v59 }
 0x3fe   : > { %8773 = vst [vmem:[#allocation360_spill] sm:$0xff] %v7074_v53  ;;  %v8776_v53 = vrot.slane %v6994_v7, 7  ;;  %3944 = vrot.lane.b32.xlu1 %v3932_v46, %s4494_s26  ;;  %v2196_v46 = vrot.slane %v2190_v51, 3  ;;  %8782 = vst [vmem:[#allocation365_spill] sm:$0xff] %v7135_v44  ;;  %v7143_v48 = vpop.permute.xlu1 %3349  ;;  %v2208_v51 = vmul.f32 %v6747_v60, %v6981_v58  ;;  %v7149_v14 = vmul.f32 %v6757_v36, %v6981_v58 }
 0x3ff   : > { %3443 = vrot.lane.b32.xlu0 %v3431_v24, %s8769_s3  ;;  %v3433_v24 = vmul.f32 %v6747_v60, %v6627_v59  ;;  %8784 = vst [vmem:[#allocation367_spill] sm:$0xff] %v7143_v48  ;;  %v7155_v22 = vstv %s7085_s23  ;;  %v2227_v59 = vmul.f32 %v6747_v60, %v6984_v4  ;;  %v7161_v28 = vmul.f32 %v6757_v36, %v6984_v4 }
 0x400   : > { %v7116_v35 = vsel %vm990_vm8, %v8777_v43, %v8776_v53  ;;  %v7132_v43 = vsel %vm990_vm8, %v8780_v11, %v2178_v52  ;;  %v2207_v53 = vmul.f32 %v6708_v30, %v6981_v58  ;;  %8785 = vst [vmem:[#allocation368_spill] sm:$0xff] %v7149_v14  ;;  %v2226_v52 = vmul.f32 %v6708_v30, %v6984_v4  ;;  %v4350_v58 = vld [vmem:[#allocation4 + $0x8] sm:$0xff] }
 0x401   : > { %v7101_v61 = vpop.permute.xlu0 %3009  ;;  %8781 = vst [vmem:[#allocation364_spill] sm:$0xff] %v7132_v43  ;;  %8786 = vst [vmem:[#allocation369_spill] sm:$0xff] %v7161_v28  ;;  %v7167_v11 = vsel %vm1123_vm9, %v2196_v46, %v2197_v47  ;;  %v7170_v48 = vsel %vm1123_vm9, %v2197_v47, %v2199_v49  ;;  %v2246_v4 = vmul.f32 %v6747_v60, %v6987_v38  ;;  %v2214_v49 = vrot.slane %v2208_v51, 3 }
 0x402   : > { %8775 = vst [vmem:[#allocation362_spill] sm:$0xff] %v7101_v61  ;;  %3725 = vrot.lane.b32.xlu1 %v3716_v2, %s4494_s26  ;;  %8787 = vst [vmem:[#allocation370_spill] sm:$0xff] %v7170_v48  ;;  %v2213_v61 = vrot.slane %v2207_v53, 3  ;;  %v3466_v46 = vmul.f32 %v6708_v30, %v6659_v34  ;;  %v418_v47 = vsel %vm417_vm11, %v5119_v27, %v4763_v37  ;;  %v2232_v44 = vrot.slane %v2226_v52, 3  ;;  %v8840_v48 = vld [vmem:[#allocation20_spill] sm:$0xff] }
 0x403   : > { %3447 = vrot.lane.b32.xlu0 %v3433_v24, %s8769_s3  ;;  %v3721_v24 = vrot.slane %v3706_v25, 1  ;;  %v3875_v25 = vmul.f32 %v4350_v58, %v7155_v22  ;;  %v8398_v58 = vrot.slane %v7149_v14, 3  ;;  %v2233_v53 = vrot.slane %v2227_v59, 3 }
 0x404   : > { %v3879_v43 = vmul.f32 %v4349_v56, %v7155_v22  ;;  %v420_v37 = vsel %vm417_vm11, %v5234_v42, %v4769_v41  ;;  %v2252_v51 = vrot.slane %v2246_v4, 3  ;;  %v549_v52 = vsel %vm417_vm11, %v5140_v57, %v4860_v29  ;;  %v8801_v4 = vld [vmem:[#allocation27_spill] sm:$0xff] }
 0x405   : > { %v7139_v6 = vpop.permute.xlu0 %3046  ;;  %v3722_v10 = vsel %vm441_vm2, %v3716_v2, %v3721_v24  ;;  %v3889_v24 = vrot.slane %v3875_v25, 5  ;;  %v504_v25 = vsel %vm417_vm11, %v5129_v33, %v4830_v17  ;;  %v3468_v56 = vmul.f32 %v6747_v60, %v6659_v34 }
 0x406   : > { %8783 = vst [vmem:[#allocation366_spill] sm:$0xff] %v7139_v6  ;;  %v2245_v6 = vmul.f32 %v6708_v30, %v6987_v38  ;;  %3729 = vrot.lane.b32.xlu1 %v3722_v10, %s4494_s26  ;;  %v7209_v17 = vadd.f32 %v418_v47, %v7001_v1  ;;  %v677_v41 = vsel %vm417_vm11, %v5163_v19, %v4959_v26 }
 0x407   : > { %3451 = vrot.lane.b32.xlu0 %v3435_v8, %s8769_s3  ;;  %v7178_v8 = vmul.f32 %v6757_v36, %v6987_v38  ;;  %v8397_v38 = vrot.slane %v7161_v28, 3  ;;  %v7215_v33 = vsel %vm1123_vm9, %v2213_v61, %v2214_v49  ;;  %v7220_v29 = vsel %vm1123_vm9, %v2214_v49, %v8398_v58  ;;  %v8803_v49 = vld [vmem:[#allocation29_spill] sm:$0xff] }
 0x408   : > { %v2251_v27 = vrot.slane %v2245_v6, 3  ;;  %8792 = vst [vmem:[#allocation375_spill] sm:$0xff] %v7215_v33  ;;  %8793 = vst [vmem:[#allocation376_spill] sm:$0xff] %v7220_v29  ;;  %v510_v57 = vadd.f32 %v504_v25, %v7009_v54  ;;  %v426_v42 = vadd.f32 %v420_v37, %v7022_v62  ;;  %v716_v1 = vsel %vm713_vm12, %v5246_v0, %v4986_v20  ;;  %v8843_v33 = vld [vmem:[#allocation68_spill] sm:$0xff] }
 0x409   : > { %8788 = vst [vmem:[#allocation371_spill] sm:$0xff] %v7178_v8  ;;  %v7180_v2 = vpop.permute.xlu0 %3050  ;;  %v8396_v59 = vrot.slane %v7178_v8, 3  ;;  %v555_v19 = vadd.f32 %v549_v52, %v7020_v50  ;;  %v845_v61 = vsel %vm713_vm12, %v5202_v45, %v5079_v63  ;;  %v7240_v54 = vsel %vm1123_vm9, %v2233_v53, %v8397_v38 }
 0x40a   : > { %8789 = vst [vmem:[#allocation372_spill] sm:$0xff] %v7180_v2  ;;  %v7191_v2 = vpop.permute.xlu1 %3386  ;;  %3898 = vrot.lane.b32.xlu1 %v3889_v24, %s4494_s26  ;;  %8795 = vst [vmem:[#allocation378_spill] sm:$0xff] %v7240_v54  ;;  %v683_v62 = vadd.f32 %v677_v41, %v510_v57  ;;  %v7243_v0 = vsel %vm1123_vm9, %v2251_v27, %v2252_v51  ;;  %v3470_v63 = vmul.f32 %v6757_v36, %v6659_v34  ;;  %v8805_v27 = vld [vmem:[#allocation38_spill] sm:$0xff] }
 0x40b   : > { %3478 = vrot.lane.b32.xlu0 %v3466_v46, %s8769_s3  ;;  %8790 = vst [vmem:[#allocation373_spill] sm:$0xff] %v7191_v2  ;;  %v3894_v46 = vrot.slane %v3879_v43, 5  ;;  %v7235_v43 = vsel %vm1123_vm9, %v2232_v44, %v2233_v53  ;;  %8796 = vst [vmem:[#allocation379_spill] sm:$0xff] %v7243_v0  ;;  %v7248_v20 = vsel %vm1123_vm9, %v2252_v51, %v8396_v59  ;;  %v8800_v44 = vld [vmem:[#allocation40_spill] sm:$0xff]  ;;  %v8804_v53 = vld [vmem:[#allocation45_spill] sm:$0xff] }
 0x40c   : > { %8794 = vst [vmem:[#allocation377_spill] sm:$0xff] %v7235_v43  ;;  %8797 = vst [vmem:[#allocation380_spill] sm:$0xff] %v7248_v20  ;;  %v594_v6 = vsel %vm417_vm11, %v8800_v44, %v4900_v55  ;;  %v7267_v25 = vsel %vm713_vm12, %v8804_v53, %v8803_v49  ;;  %v722_v37 = vadd.f32 %v716_v1, %v555_v19  ;;  %v8806_v51 = vld [vmem:[#allocation48_spill] sm:$0xff]  ;;  %v8807_v55 = vld [vmem:[#allocation42_spill] sm:$0xff] }
 0x40d   : > { %v7204_v10 = vpop.permute.xlu0 %3054  ;;  %v3895_v26 = vsel %vm258_vm1, %v3889_v24, %v3894_v46  ;;  %v8802_v24 = vld [vmem:[#allocation43_spill] sm:$0xff]  ;;  %v7270_v34 = vadd.f32 %v845_v61, %v683_v62  ;;  %v890_v52 = vsel %vm713_vm12, %v8806_v51, %v8805_v27  ;;  %v7280_v41 = vadd.f32 %v594_v6, %v426_v42  ;;  %v8809_v57 = vld [vmem:[#allocation14_spill] sm:$0xff]  ;;  %v8815_v53 = vld [vmem:[#allocation325_spill] sm:$0xff] }
 0x40e   : > { %8791 = vst [vmem:[#allocation374_spill] sm:$0xff] %v7204_v10  ;;  %v7254_v45 = vpop.permute.xlu1 %3390  ;;  %v7262_v47 = vsel %vm713_vm12, %v8802_v24, %v8801_v4  ;;  %3902 = vrot.lane.b32.xlu1 %v3895_v26, %s4494_s26  ;;  %v8810_v44 = vld [vmem:[#allocation54_spill] sm:$0xff]  ;;  %v8811_v26 = vld [vmem:[#allocation315_spill] sm:$0xff]  ;;  %v3574_v27 = vmul.f32 %v6708_v30, %v8815_v53  ;;  %v7306_v51 = vadd.f32 %v890_v52, %v722_v37  ;;  %v8818_v59 = vld [vmem:[#allocation56_spill] sm:$0xff] }
 0x40f   : > { %3482 = vrot.lane.b32.xlu0 %v3468_v56, %s8769_s3  ;;  %8799 = vst [vmem:[#allocation382_spill] sm:$0xff] %v7254_v45  ;;  %v8808_v56 = vld [vmem:[#allocation50_spill] sm:$0xff]  ;;  %v419_v1 = vsel %vm417_vm11, %v8810_v44, %v8809_v57  ;;  %v3536_v19 = vmul.f32 %v6708_v30, %v8811_v26  ;;  %v3538_v61 = vmul.f32 %v6747_v60, %v8811_v26  ;;  %v8813_v24 = vld [vmem:[#allocation311_spill] sm:$0xff] }
 0x410   : > { %v7278_v46 = vsel %vm713_vm12, %v8808_v56, %v8807_v55  ;;  %v3540_v62 = vmul.f32 %v6757_v36, %v8811_v26  ;;  %v3501_v42 = vmul.f32 %v6708_v30, %v8813_v24  ;;  %v8814_v6 = vld [vmem:[#allocation319_spill] sm:$0xff]  ;;  %v3576_v55 = vmul.f32 %v6747_v60, %v8815_v53  ;;  %v8821_v2 = vld [vmem:[#allocation58_spill] sm:$0xff] }
 0x411   : > { %v7250_v50 = vpop.permute.xlu0 %3091  ;;  %v7302_v49 = vmul.f32 %v6747_v60, %v8814_v6  ;;  %v7312_v56 = vmul.f32 %v6757_v36, %v8815_v53  ;;  %v8816_v57 = vld [vmem:[#allocation331_spill] sm:$0xff]  ;;  %v7317_v26 = vadd.f32 %v419_v1, %v7030_v3  ;;  %v3503_v37 = vmul.f32 %v6747_v60, %v8813_v24  ;;  %v8820_v1 = vld [vmem:[#allocation16_spill] sm:$0xff] }
 0x412   : > { %8798 = vst [vmem:[#allocation381_spill] sm:$0xff] %v7250_v50  ;;  %v3829_v44 = vmul.f32 %v6708_v30, %v8816_v57  ;;  %v3831_v52 = vmul.f32 %v6747_v60, %v8816_v57  ;;  %v7327_v53 = vpop.permute.xlu1 %3394  ;;  %v3548_v58 = vrot.slane %v3536_v19, 4  ;;  %v3549_v45 = vrot.slane %v3538_v61, 4  ;;  %v8825_v50 = vld [vmem:[#allocation60_spill] sm:$0xff] }
 0x413   : > { %3486 = vrot.lane.b32.xlu0 %v3470_v63, %s8769_s3  ;;  %v7298_v63 = vmul.f32 %v6708_v30, %v8814_v6  ;;  %v8817_v6 = vld [vmem:[#allocation15_spill] sm:$0xff]  ;;  %8819 = vst [vmem:[#allocation27_spill] sm:$0xff] %v7327_v53  ;;  %v3554_v10 = vrot.slane %v3540_v62, 4  ;;  %v7331_v3 = vmul.f32 %v6757_v36, %v8816_v57  ;;  %v3586_v8 = vrot.slane %v3574_v27, 4  ;;  %v8823_v62 = vld [vmem:[#allocation337_spill] sm:$0xff] }
 0x414   : > { %v460_v38 = vsel %vm417_vm11, %v8818_v59, %v8817_v6  ;;  %v461_v59 = vsel %vm417_vm11, %v8821_v2, %v8820_v1  ;;  %v3587_v20 = vrot.slane %v3576_v55, 4  ;;  %v3841_v61 = vrot.slane %v3829_v44, 1  ;;  %v8824_v57 = vld [vmem:[#allocation17_spill] sm:$0xff]  ;;  %v8827_v6 = vld [vmem:[#allocation343_spill] sm:$0xff] }
 0x415   : > { %v7292_v4 = vpop.permute.xlu0 %3095  ;;  %v3619_v53 = vmul.f32 %v6708_v30, %v8823_v62  ;;  %v502_v0 = vsel %vm417_vm11, %v8825_v50, %v8824_v57  ;;  %v3842_v2 = vrot.slane %v3831_v52, 1  ;;  %v3621_v1 = vmul.f32 %v6747_v60, %v8823_v62 }
 0x416   : > { %8812 = vst [vmem:[#allocation40_spill] sm:$0xff] %v7292_v4  ;;  %v8400_v4 = vrot.slane %v7302_v49, 5  ;;  %v7351_v27 = vmul.f32 %v6757_v36, %v8823_v62  ;;  %v7354_v55 = vadd.f32 %v460_v38, %v7036_v5  ;;  %v3505_v44 = vmul.f32 %v6757_v36, %v8813_v24  ;;  %v7370_v38 = vpop.permute.xlu1 %3417 }
 0x417   : > { %3513 = vrot.lane.b32.xlu0 %v3501_v42, %s8769_s3  ;;  %v3550_v19 = vsel %vm341_vm10, %v3548_v58, %v3549_v45  ;;  %v3555_v57 = vsel %vm341_vm10, %v3549_v45, %v3554_v10  ;;  %v3739_v62 = vmul.f32 %v6708_v30, %v8827_v6  ;;  %v3741_v5 = vmul.f32 %v6747_v60, %v8827_v6 }
 0x418   : > { %8828 = vst [vmem:[#allocation45_spill] sm:$0xff] %v7370_v38  ;;  %v7373_v24 = vadd.f32 %v502_v0, %v7099_v39  ;;  %v7383_v10 = vsel %vm341_vm10, %v3586_v8, %v3587_v20  ;;  %v8830_v45 = vrot.slane %v7312_v56, 4  ;;  %v7392_v39 = vsel %vm441_vm2, %v3841_v61, %v3842_v2 }
 0x419   : > { %v7336_v42 = vpop.permute.xlu0 %3121  ;;  %v3631_v0 = vrot.slane %v3619_v53, 4  ;;  %v3632_v50 = vrot.slane %v3621_v1, 4  ;;  %v7402_v8 = vmul.f32 %v6757_v36, %v8827_v6  ;;  %v8834_v53 = vld [vmem:[#allocation62_spill] sm:$0xff]  ;;  %v3752_v38 = vrot.slane %v3741_v5, 1  ;;  %v8836_v6 = vld [vmem:[#allocation19_spill] sm:$0xff] }
 0x41a   : > { %8822 = vst [vmem:[#allocation43_spill] sm:$0xff] %v7336_v42  ;;  %v3751_v42 = vrot.slane %v3739_v62, 1  ;;  %v3912_v54 = vmul.f32 %v6708_v30, %v6998_v16  ;;  %v3914_v43 = vmul.f32 %v6747_v60, %v6998_v16  ;;  %v8838_v5 = vrot.slane %v7351_v27, 4 }
 0x41b   : > { %3517 = vrot.lane.b32.xlu0 %v3503_v37, %s8769_s3  ;;  %v7361_v37 = vadd.f32 %v461_v59, %v7046_v40  ;;  %v8829_v40 = vrot.slane %v7298_v63, 5  ;;  %v7388_v59 = vsel %vm341_vm10, %v3587_v20, %v8830_v45  ;;  %v8832_v20 = vld [vmem:[#allocation349_spill] sm:$0xff]  ;;  %v7430_v62 = vsel %vm341_vm10, %v3631_v0, %v3632_v50 }
 0x41c   : > { %v3784_v45 = vmul.f32 %v6708_v30, %v8832_v20  ;;  %v3786_v61 = vmul.f32 %v6747_v60, %v8832_v20  ;;  %v3705_v0 = vmul.f32 %v6757_v36, %v7083_v21 }
 0x41d   : > { %v7363_v52 = vpop.permute.xlu0 %3125  ;;  %v7380_v58 = vsel %vm258_vm1, %v8829_v40, %v8400_v4  ;;  %v8831_v40 = vrot.slane %v7331_v3, 1 }
 0x41e   : > { %8826 = vst [vmem:[#allocation29_spill] sm:$0xff] %v7363_v52 }
 0x41f   : > { %3521 = vrot.lane.b32.xlu0 %v3505_v44, %s8769_s3  ;;  %v7398_v4 = vsel %vm441_vm2, %v3842_v2, %v8831_v40  ;;  %v8833_v44 = vld [vmem:[#allocation18_spill] sm:$0xff]  ;;  %v7415_v2 = vmul.f32 %v6757_v36, %v8832_v20  ;;  %v8837_v40 = vld [vmem:[#allocation64_spill] sm:$0xff]  ;;  %v7435_v20 = vsel %vm341_vm10, %v3632_v50, %v8838_v5 }
 0x420   : > { %v503_v1 = vsel %vm417_vm11, %v8834_v53, %v8833_v44  ;;  %v547_v28 = vsel %vm417_vm11, %v8837_v40, %v8836_v6  ;;  %v7426_v44 = vmul.f32 %v6757_v36, %v6998_v16  ;;  %v7437_v53 = vpop.permute.xlu1 %3421  ;;  %v3701_v6 = vmul.f32 %v6708_v30, %v7083_v21 }
 0x421   : > { %v7411_v52 = vpop.permute.xlu0 %3129  ;;  %8839 = vst [vmem:[#allocation48_spill] sm:$0xff] %v7437_v53  ;;  %v3703_v40 = vmul.f32 %v6747_v60, %v7083_v21  ;;  %v509_v14 = vadd.f32 %v503_v1, %v7105_v13  ;;  %v553_v50 = vadd.f32 %v547_v28, %v7107_v9  ;;  %v7451_v53 = vsel %vm441_vm2, %v3751_v42, %v3752_v38  ;;  %v8842_v21 = vld [vmem:[#allocation21_spill] sm:$0xff] }
 0x422   : > { %8835 = vst [vmem:[#allocation38_spill] sm:$0xff] %v7411_v52  ;;  %v3796_v52 = vrot.slane %v3784_v45, 1  ;;  %v8405_v31 = vrot.slane %v7415_v2, 1  ;;  %v548_v16 = vsel %vm417_vm11, %v8841_v12, %v8840_v48  ;;  %v3924_v45 = vrot.slane %v3912_v54, 5 }
 0x423   : > { %3558 = vrot.lane.b32.xlu0 %v3550_v19, %s8769_s3  ;;  %v3797_v19 = vrot.slane %v3786_v61, 1  ;;  %v3925_v61 = vrot.slane %v3914_v43, 5  ;;  %v8404_v29 = vrot.slane %v7426_v44, 5  ;;  %v592_v13 = vsel %vm417_vm11, %v8843_v33, %v8842_v21 }
 0x424   : > { %v3713_v9 = vrot.slane %v3701_v6, 1  ;;  %v3714_v28 = vrot.slane %v3703_v40, 1  ;;  %v7464_v42 = vmul.f32 %v6708_v30, %v7155_v22  ;;  %v8845_v1 = vrot.slane %v7402_v8, 1  ;;  %v7487_v6 = vpop.permute.xlu1 %3445  ;;  %v8848_v40 = vld [vmem:[#allocation31_spill] sm:$0xff] }
 0x425   : > { %v7448_v5 = vpop.permute.xlu0 %3166  ;;  %v7472_v48 = vsel %vm441_vm2, %v3796_v52, %v3797_v19  ;;  %v3719_v43 = vrot.slane %v3705_v0, 1  ;;  %v7476_v33 = vmul.f32 %v6747_v60, %v7155_v22  ;;  %v554_v54 = vadd.f32 %v548_v16, %v7109_v23  ;;  %v8849_v23 = vld [vmem:[#allocation84_spill] sm:$0xff]  ;;  %v8850_v0 = vld [vmem:[#allocation22_spill] sm:$0xff] }
 0x426   : > { %8844 = vst [vmem:[#allocation42_spill] sm:$0xff] %v7464_v42  ;;  %v7469_v12 = vsel %vm441_vm2, %v3752_v38, %v8845_v1  ;;  %v7485_v38 = vsel %vm441_vm2, %v3797_v19, %v8405_v31  ;;  %v7491_v52 = vmul.f32 %v6757_v36, %v7155_v22  ;;  %v598_v60 = vadd.f32 %v592_v13, %v7209_v17  ;;  %v8852_v36 = vld [vmem:[#allocation23_spill] sm:$0xff]  ;;  %v8853_v22 = vld [vmem:[#allocation72_spill] sm:$0xff] }
 0x427   : > { %3562 = vrot.lane.b32.xlu0 %v3555_v57, %s8769_s3  ;;  %8846 = vst [vmem:[#allocation50_spill] sm:$0xff] %v7476_v33  ;;  %v720_v57 = vadd.f32 %v7262_v47, %v553_v50  ;;  %v761_v47 = vsel %vm713_vm12, %v8849_v23, %v8848_v40  ;;  %v7498_v16 = vsel %vm258_vm1, %v3924_v45, %v3925_v61  ;;  %v8851_v50 = vld [vmem:[#allocation70_spill] sm:$0xff]  ;;  %v8854_v13 = vrot.slane %v7298_v63, 5  ;;  %v8856_v40 = vld [vmem:[#allocation24_spill] sm:$0xff]  ;;  %v8869_v33 = vld [vmem:[#allocation33_spill] sm:$0xff] }
 0x428   : > { %8847 = vst [vmem:[#allocation14_spill] sm:$0xff] %v7491_v52  ;;  %v7503_v19 = vsel %vm258_vm1, %v3925_v61, %v8404_v29  ;;  %v593_v21 = vsel %vm417_vm11, %v8851_v50, %v8850_v0  ;;  %v633_v17 = vsel %vm417_vm11, %v8853_v22, %v8852_v36  ;;  %v7515_v45 = vsel %vm441_vm2, %v3713_v9, %v3714_v28  ;;  %v8857_v61 = vld [vmem:[#allocation74_spill] sm:$0xff]  ;;  %v8858_v29 = vld [vmem:[#allocation25_spill] sm:$0xff]  ;;  %v8859_v31 = vld [vmem:[#allocation76_spill] sm:$0xff] }
 0x429   : > { %v7480_v30 = vpop.permute.xlu0 %3170  ;;  %8855 = vst [vmem:[#allocation54_spill] sm:$0xff] %v7515_v45  ;;  %v634_v23 = vsel %vm417_vm11, %v8857_v61, %v8856_v40  ;;  %v675_v0 = vsel %vm417_vm11, %v8859_v31, %v8858_v29  ;;  %v7525_v50 = vsel %vm441_vm2, %v3714_v28, %v3719_v43  ;;  %v8861_v63 = vld [vmem:[#allocation26_spill] sm:$0xff]  ;;  %v8864_v45 = vld [vmem:[#allocation80_spill] sm:$0xff]  ;;  %v767_v42 = vadd.f32 %v761_v47, %v7280_v41 }
 0x42a   : > { %8860 = vst [vmem:[#allocation315_spill] sm:$0xff] %v7525_v50  ;;  %v8862_v22 = vld [vmem:[#allocation78_spill] sm:$0xff]  ;;  %v599_v31 = vadd.f32 %v593_v21, %v7317_v26  ;;  %v637_v29 = vadd.f32 %v633_v17, %v7354_v55  ;;  %v8870_v61 = vld [vmem:[#allocation88_spill] sm:$0xff]  ;;  %v7554_v55 = vpop.permute.xlu1 %3449 }
 0x42b   : > { %3678 = vrot.lane.b32.xlu0 %v8854_v13, %s4494_s26  ;;  %v676_v9 = vsel %vm417_vm11, %v8862_v22, %v8861_v63  ;;  %v8863_v13 = vld [vmem:[#allocation28_spill] sm:$0xff]  ;;  %v8865_v28 = vld [vmem:[#allocation30_spill] sm:$0xff]  ;;  %v765_v63 = vadd.f32 %v7267_v25, %v598_v60  ;;  %v638_v22 = vadd.f32 %v634_v23, %v7361_v37  ;;  %v802_v26 = vsel %vm713_vm12, %v8870_v61, %v8869_v33  ;;  %v8877_v61 = vld [vmem:[#allocation37_spill] sm:$0xff] }
 0x42c   : > { %v715_v1 = vsel %vm713_vm12, %v8864_v45, %v8863_v13  ;;  %v8866_v43 = vld [vmem:[#allocation82_spill] sm:$0xff]  ;;  %v681_v45 = vadd.f32 %v675_v0, %v7373_v24  ;;  %v8867_v13 = vld [vmem:[#allocation32_spill] sm:$0xff]  ;;  %v682_v21 = vadd.f32 %v676_v9, %v509_v14  ;;  %v8873_v24 = vld [vmem:[#allocation35_spill] sm:$0xff]  ;;  %v941_v14 = vadd.f32 %v7278_v46, %v767_v42 }
 0x42d   : > { %v7535_v40 = vpop.permute.xlu0 %3174  ;;  %v760_v36 = vsel %vm713_vm12, %v8866_v43, %v8865_v28  ;;  %v8868_v41 = vld [vmem:[#allocation86_spill] sm:$0xff]  ;;  %v721_v17 = vadd.f32 %v715_v1, %v554_v54  ;;  %v8874_v23 = vld [vmem:[#allocation92_spill] sm:$0xff]  ;;  %v806_v9 = vadd.f32 %v802_v26, %v638_v22  ;;  %v8889_v26 = vld [vmem:[#allocation47_spill] sm:$0xff] }
 0x42e   : > { %v801_v47 = vsel %vm713_vm12, %v8868_v41, %v8867_v13  ;;  %v8871_v25 = vld [vmem:[#allocation34_spill] sm:$0xff]  ;;  %v844_v0 = vsel %vm713_vm12, %v8874_v23, %v8873_v24  ;;  %v766_v28 = vadd.f32 %v760_v36, %v599_v31  ;;  %v8875_v43 = vld [vmem:[#allocation36_spill] sm:$0xff]  ;;  %v8882_v24 = vld [vmem:[#allocation41_spill] sm:$0xff] }
 0x42f   : > { %3682 = vrot.lane.b32.xlu0 %v7380_v58, %s4494_s26  ;;  %v8872_v60 = vld [vmem:[#allocation90_spill] sm:$0xff]  ;;  %v8878_v41 = vld [vmem:[#allocation96_spill] sm:$0xff]  ;;  %v805_v1 = vadd.f32 %v801_v47, %v637_v29  ;;  %v8888_v29 = vrot.slane %v7302_v49, 5 }
 0x430   : > { %v843_v37 = vsel %vm713_vm12, %v8872_v60, %v8871_v25  ;;  %v8876_v13 = vld [vmem:[#allocation94_spill] sm:$0xff]  ;;  %v889_v58 = vsel %vm713_vm12, %v8878_v41, %v8877_v61  ;;  %v8880_v25 = vld [vmem:[#allocation39_spill] sm:$0xff]  ;;  %v8883_v36 = vld [vmem:[#allocation100_spill] sm:$0xff] }
 0x431   : > { %v888_v33 = vsel %vm713_vm12, %v8876_v13, %v8875_v43  ;;  %v7569_v54 = vpop.permute.xlu0 %3211  ;;  %v8881_v60 = vld [vmem:[#allocation98_spill] sm:$0xff]  ;;  %v934_v31 = vsel %vm713_vm12, %v8883_v36, %v8882_v24  ;;  %v849_v23 = vadd.f32 %v843_v37, %v681_v45  ;;  %v850_v43 = vadd.f32 %v844_v0, %v682_v21  ;;  %v8884_v13 = vld [vmem:[#allocation44_spill] sm:$0xff]  ;;  %v8891_v21 = vld [vmem:[#allocation49_spill] sm:$0xff] }
 0x432   : > { %8879 = vst [vmem:[#allocation311_spill] sm:$0xff] %v7569_v54  ;;  %v933_v52 = vsel %vm713_vm12, %v8881_v60, %v8880_v25  ;;  %v8885_v50 = vld [vmem:[#allocation102_spill] sm:$0xff]  ;;  %v8887_v46 = vld [vmem:[#allocation104_spill] sm:$0xff]  ;;  %v894_v22 = vadd.f32 %v888_v33, %v720_v57  ;;  %v895_v47 = vadd.f32 %v889_v58, %v721_v17  ;;  %v940_v60 = vadd.f32 %v934_v31, %v766_v28  ;;  %v8893_v24 = vld [vmem:[#allocation51_spill] sm:$0xff]  ;;  %v7600_v17 = vpop.permute.xlu1 %3453 }
 0x433   : > { %v974_v61 = vsel %vm713_vm12, %v8885_v50, %v8884_v13  ;;  %v8886_v41 = vld [vmem:[#allocation46_spill] sm:$0xff]  ;;  %3686 = vrot.lane.b32.xlu0 %v8888_v29, %s4494_s26  ;;  %v8892_v37 = vld [vmem:[#allocation108_spill] sm:$0xff]  ;;  %v939_v50 = vadd.f32 %v933_v52, %v765_v63  ;;  %v8898_v29 = vld [vmem:[#allocation53_spill] sm:$0xff] }
 0x434   : > { %v975_v42 = vsel %vm713_vm12, %v8887_v46, %v8886_v41  ;;  %v8890_v25 = vld [vmem:[#allocation106_spill] sm:$0xff]  ;;  %v1011_v0 = vsel %vm1009_vm13, %v8892_v37, %v8891_v21  ;;  %v8895_v41 = vld [vmem:[#allocation52_spill] sm:$0xff]  ;;  %v978_v33 = vadd.f32 %v974_v61, %v805_v1  ;;  %v8900_v52 = vld [vmem:[#allocation55_spill] sm:$0xff] }
 0x435   : > { %v1010_v45 = vsel %vm1009_vm13, %v8890_v25, %v8889_v26  ;;  %v8894_v36 = vld [vmem:[#allocation110_spill] sm:$0xff]  ;;  %v8896_v46 = vld [vmem:[#allocation112_spill] sm:$0xff]  ;;  %v7598_v57 = vpop.permute.xlu0 %3215  ;;  %v979_v58 = vadd.f32 %v975_v42, %v806_v9  ;;  %v1017_v21 = vadd.f32 %v1011_v0, %v850_v43  ;;  %v8902_v37 = vld [vmem:[#allocation57_spill] sm:$0xff] }
 0x436   : > { %v1012_v13 = vsel %vm1009_vm13, %v8894_v36, %v8893_v24  ;;  %v1055_v49 = vsel %vm1009_vm13, %v8896_v46, %v8895_v41  ;;  %8897 = vst [vmem:[#allocation319_spill] sm:$0xff] %v7598_v57  ;;  %v8899_v26 = vld [vmem:[#allocation114_spill] sm:$0xff]  ;;  %v8901_v63 = vld [vmem:[#allocation116_spill] sm:$0xff]  ;;  %v1016_v31 = vadd.f32 %v1010_v45, %v849_v23  ;;  %v8904_v41 = vld [vmem:[#allocation59_spill] sm:$0xff] }
 0x437   : > { %v1056_v25 = vsel %vm1009_vm13, %v8899_v26, %v8898_v29  ;;  %v1057_v28 = vsel %vm1009_vm13, %v8901_v63, %v8900_v52  ;;  %v8903_v24 = vld [vmem:[#allocation118_spill] sm:$0xff]  ;;  %v8905_v46 = vld [vmem:[#allocation120_spill] sm:$0xff]  ;;  %3596 = vrot.lane.b32.xlu0 %v7383_v10, %s8769_s3  ;;  %v1018_v1 = vadd.f32 %v1012_v13, %v7270_v34  ;;  %v1061_v9 = vadd.f32 %v1055_v49, %v894_v22  ;;  %v8906_v61 = vld [vmem:[#allocation61_spill] sm:$0xff] }
 0x438   : > { %v1100_v36 = vsel %vm1009_vm13, %v8903_v24, %v8902_v37  ;;  %v1101_v57 = vsel %vm1009_vm13, %v8905_v46, %v8904_v41  ;;  %v8907_v42 = vld [vmem:[#allocation122_spill] sm:$0xff]  ;;  %v8908_v23 = vld [vmem:[#allocation63_spill] sm:$0xff]  ;;  %v8909_v43 = vld [vmem:[#allocation124_spill] sm:$0xff]  ;;  %v1062_v0 = vadd.f32 %v1056_v25, %v895_v47  ;;  %v1063_v26 = vadd.f32 %v1057_v28, %v7306_v51 }
 0x439   : > { %v1102_v29 = vsel %vm1009_vm13, %v8907_v42, %v8906_v61  ;;  %v1142_v45 = vsel %vm1009_vm13, %v8909_v43, %v8908_v23  ;;  %v8910_v52 = vld [vmem:[#allocation65_spill] sm:$0xff]  ;;  %v8911_v63 = vld [vmem:[#allocation126_spill] sm:$0xff]  ;;  %v8912_v24 = vld [vmem:[#allocation67_spill] sm:$0xff]  ;;  %v7630_v22 = vpop.permute.xlu0 %3219  ;;  %v1106_v13 = vadd.f32 %v1100_v36, %v939_v50  ;;  %v1107_v49 = vadd.f32 %v1101_v57, %v940_v60  ;;  %v7646_v50 = vpop.permute.xlu1 %3480 }
 0x43a   : > { %v1143_v37 = vsel %vm1009_vm13, %v8911_v63, %v8910_v52  ;;  %v8913_v10 = vld [vmem:[#allocation128_spill] sm:$0xff]  ;;  %8914 = vst [vmem:[#allocation325_spill] sm:$0xff] %v7630_v22  ;;  %v8915_v41 = vld [vmem:[#allocation69_spill] sm:$0xff]  ;;  %v8916_v46 = vld [vmem:[#allocation130_spill] sm:$0xff]  ;;  %v1108_v25 = vadd.f32 %v1102_v29, %v941_v14  ;;  %v1146_v28 = vadd.f32 %v1142_v45, %v978_v33 }
 0x43b   : > { %v1184_v34 = vsel %vm1009_vm13, %v8913_v10, %v8912_v24  ;;  %v1185_v61 = vsel %vm1009_vm13, %v8916_v46, %v8915_v41  ;;  %v8917_v42 = vld [vmem:[#allocation71_spill] sm:$0xff]  ;;  %v8918_v47 = vld [vmem:[#allocation132_spill] sm:$0xff]  ;;  %v8919_v23 = vld [vmem:[#allocation73_spill] sm:$0xff]  ;;  %3600 = vrot.lane.b32.xlu0 %v7388_v59, %s8769_s3  ;;  %v1147_v60 = vadd.f32 %v1143_v37, %v979_v58 }
 0x43c   : > { %v1186_v51 = vsel %vm1009_vm13, %v8918_v47, %v8917_v42  ;;  %v8920_v43 = vld [vmem:[#allocation134_spill] sm:$0xff]  ;;  %v8921_v63 = vld [vmem:[#allocation75_spill] sm:$0xff]  ;;  %v8922_v24 = vld [vmem:[#allocation136_spill] sm:$0xff]  ;;  %v1190_v57 = vadd.f32 %v1184_v34, %v1016_v31  ;;  %v1191_v46 = vadd.f32 %v1185_v61, %v1017_v21 }
 0x43d   : > { %v1229_v52 = vsel %vm1009_vm13, %v8920_v43, %v8919_v23  ;;  %v1230_v10 = vsel %vm1009_vm13, %v8922_v24, %v8921_v63  ;;  %v8923_v36 = vld [vmem:[#allocation77_spill] sm:$0xff]  ;;  %v8924_v41 = vld [vmem:[#allocation138_spill] sm:$0xff]  ;;  %v8925_v33 = vld [vmem:[#allocation79_spill] sm:$0xff]  ;;  %v1192_v42 = vadd.f32 %v1186_v51, %v1018_v1  ;;  %v7660_v31 = vpop.permute.xlu0 %3256 }
 0x43e   : > { %v1231_v14 = vsel %vm1009_vm13, %v8924_v41, %v8923_v36  ;;  %v8926_v29 = vld [vmem:[#allocation140_spill] sm:$0xff]  ;;  %v8927_v47 = vld [vmem:[#allocation81_spill] sm:$0xff]  ;;  %v8928_v23 = vld [vmem:[#allocation142_spill] sm:$0xff]  ;;  %v1235_v37 = vadd.f32 %v1229_v52, %v1061_v9  ;;  %v1236_v34 = vadd.f32 %v1230_v10, %v1062_v0  ;;  %v8939_v9 = vrot.slane %v7312_v56, 4 }
 0x43f   : > { %v1274_v45 = vsel %vm1009_vm13, %v8926_v29, %v8925_v33  ;;  %v1275_v43 = vsel %vm1009_vm13, %v8928_v23, %v8927_v47  ;;  %v8929_v59 = vld [vmem:[#allocation83_spill] sm:$0xff]  ;;  %v8930_v63 = vld [vmem:[#allocation144_spill] sm:$0xff]  ;;  %v8931_v24 = vld [vmem:[#allocation85_spill] sm:$0xff]  ;;  %v1237_v1 = vadd.f32 %v1231_v14, %v1063_v26 }
 0x440   : > { %v1276_v58 = vsel %vm1009_vm13, %v8930_v63, %v8929_v59  ;;  %v8932_v36 = vld [vmem:[#allocation146_spill] sm:$0xff]  ;;  %v8933_v33 = vld [vmem:[#allocation87_spill] sm:$0xff]  ;;  %v8934_v29 = vld [vmem:[#allocation148_spill] sm:$0xff]  ;;  %v1280_v61 = vadd.f32 %v1274_v45, %v1106_v13  ;;  %3604 = vrot.lane.b32.xlu0 %v8939_v9, %s8769_s3  ;;  %v1281_v0 = vadd.f32 %v1275_v43, %v1107_v49 }
 0x441   : > { %v1302_v41 = vsel %vm1301_vm14, %v8932_v36, %v8931_v24  ;;  %v1303_v21 = vsel %vm1301_vm14, %v8934_v29, %v8933_v33  ;;  %v8935_v51 = vld [vmem:[#allocation89_spill] sm:$0xff]  ;;  %v8936_v47 = vld [vmem:[#allocation150_spill] sm:$0xff]  ;;  %v8937_v22 = vld [vmem:[#allocation91_spill] sm:$0xff]  ;;  %v1282_v52 = vadd.f32 %v1276_v58, %v1108_v25  ;;  %v7689_v49 = vpop.permute.xlu0 %3260  ;;  %v7691_v25 = vpop.permute.xlu1 %3484 }
 0x442   : > { %v1334_v23 = vsel %vm1301_vm14, %v8936_v47, %v8935_v51  ;;  %v8938_v59 = vld [vmem:[#allocation152_spill] sm:$0xff]  ;;  %v8940_v10 = vld [vmem:[#allocation93_spill] sm:$0xff]  ;;  %v8941_v24 = vld [vmem:[#allocation154_spill] sm:$0xff]  ;;  %v1306_v45 = vadd.f32 %v1302_v41, %v1146_v28  ;;  %v1307_v33 = vadd.f32 %v1303_v21, %v1147_v60 }
 0x443   : > { %v1335_v63 = vsel %vm1301_vm14, %v8938_v59, %v8937_v22  ;;  %v1336_v36 = vsel %vm1301_vm14, %v8941_v24, %v8940_v10  ;;  %v8942_v26 = vld [vmem:[#allocation95_spill] sm:$0xff]  ;;  %v8943_v13 = vld [vmem:[#allocation156_spill] sm:$0xff]  ;;  %v8944_v29 = vld [vmem:[#allocation97_spill] sm:$0xff]  ;;  %v1340_v43 = vadd.f32 %v1334_v23, %v1190_v57 }
 0x444   : > { %v1369_v14 = vsel %vm1301_vm14, %v8943_v13, %v8942_v26  ;;  %v8945_v51 = vld [vmem:[#allocation158_spill] sm:$0xff]  ;;  %v8946_v47 = vld [vmem:[#allocation99_spill] sm:$0xff]  ;;  %v8947_v59 = vld [vmem:[#allocation160_spill] sm:$0xff]  ;;  %v1341_v58 = vadd.f32 %v1335_v63, %v1191_v46  ;;  %v1342_v21 = vadd.f32 %v1336_v36, %v1192_v42  ;;  %3851 = vrot.lane.b32.xlu0 %v7392_v39, %s4494_s26 }
 0x445   : > { %v1370_v22 = vsel %vm1301_vm14, %v8945_v51, %v8944_v29  ;;  %v1371_v56 = vsel %vm1301_vm14, %v8947_v59, %v8946_v47  ;;  %v8948_v9 = vld [vmem:[#allocation101_spill] sm:$0xff]  ;;  %v8949_v10 = vld [vmem:[#allocation162_spill] sm:$0xff]  ;;  %v8950_v28 = vld [vmem:[#allocation103_spill] sm:$0xff]  ;;  %v1375_v26 = vadd.f32 %v1369_v14, %v1235_v37 }
 0x446   : > { %v1404_v24 = vsel %vm1301_vm14, %v8949_v10, %v8948_v9  ;;  %v8951_v60 = vld [vmem:[#allocation164_spill] sm:$0xff]  ;;  %v8952_v13 = vld [vmem:[#allocation105_spill] sm:$0xff]  ;;  %v8953_v29 = vld [vmem:[#allocation166_spill] sm:$0xff]  ;;  %v1376_v57 = vadd.f32 %v1370_v22, %v1236_v34  ;;  %v1377_v46 = vadd.f32 %v1371_v56, %v1237_v1  ;;  %v7719_v34 = vpop.permute.xlu0 %3294 }
 0x447   : > { %v1405_v41 = vsel %vm1301_vm14, %v8951_v60, %v8950_v28  ;;  %v1406_v51 = vsel %vm1301_vm14, %v8953_v29, %v8952_v13  ;;  %v8954_v47 = vld [vmem:[#allocation107_spill] sm:$0xff]  ;;  %v8955_v59 = vld [vmem:[#allocation168_spill] sm:$0xff]  ;;  %v8956_v23 = vld [vmem:[#allocation109_spill] sm:$0xff]  ;;  %v1410_v36 = vadd.f32 %v1404_v24, %v1280_v61 }
 0x448   : > { %v1445_v54 = vsel %vm1301_vm14, %v8955_v59, %v8954_v47  ;;  %v8957_v63 = vld [vmem:[#allocation170_spill] sm:$0xff]  ;;  %v8958_v10 = vld [vmem:[#allocation111_spill] sm:$0xff]  ;;  %v8959_v42 = vld [vmem:[#allocation172_spill] sm:$0xff]  ;;  %v1411_v14 = vadd.f32 %v1405_v41, %v1281_v0  ;;  %v1412_v1 = vadd.f32 %v1406_v51, %v1282_v52  ;;  %3855 = vrot.lane.b32.xlu0 %v7398_v4, %s4494_s26 }
 0x449   : > { %v1446_v9 = vsel %vm1301_vm14, %v8957_v63, %v8956_v23  ;;  %v1487_v37 = vsel %vm1301_vm14, %v8959_v42, %v8958_v10  ;;  %v8960_v28 = vld [vmem:[#allocation113_spill] sm:$0xff]  ;;  %v8961_v60 = vld [vmem:[#allocation174_spill] sm:$0xff]  ;;  %v8962_v29 = vld [vmem:[#allocation115_spill] sm:$0xff]  ;;  %v1449_v22 = vadd.f32 %v1445_v54, %v1306_v45  ;;  %v7735_v54 = vpop.permute.xlu1 %3488 }
 0x44a   : > { %v1488_v13 = vsel %vm1301_vm14, %v8961_v60, %v8960_v28  ;;  %v8963_v47 = vld [vmem:[#allocation176_spill] sm:$0xff]  ;;  %v8964_v56 = vld [vmem:[#allocation117_spill] sm:$0xff]  ;;  %v8965_v59 = vld [vmem:[#allocation178_spill] sm:$0xff]  ;;  %v1450_v0 = vadd.f32 %v1446_v9, %v1307_v33  ;;  %v1493_v24 = vadd.f32 %v1487_v37, %v1340_v43  ;;  %8972 = vst [vmem:[#allocation331_spill] sm:$0xff] %v7735_v54 }
 0x44b   : > { %v1489_v39 = vsel %vm1301_vm14, %v8963_v47, %v8962_v29  ;;  %v1532_v23 = vsel %vm1301_vm14, %v8965_v59, %v8964_v56  ;;  %v8966_v63 = vld [vmem:[#allocation119_spill] sm:$0xff]  ;;  %v8967_v10 = vld [vmem:[#allocation180_spill] sm:$0xff]  ;;  %v8968_v41 = vld [vmem:[#allocation121_spill] sm:$0xff]  ;;  %v1494_v45 = vadd.f32 %v1488_v13, %v1341_v58  ;;  %v7749_v58 = vpop.permute.xlu0 %3298 }
 0x44c   : > { %v1533_v61 = vsel %vm1301_vm14, %v8967_v10, %v8966_v63  ;;  %v8969_v42 = vld [vmem:[#allocation182_spill] sm:$0xff]  ;;  %v8970_v60 = vld [vmem:[#allocation123_spill] sm:$0xff]  ;;  %v8971_v29 = vld [vmem:[#allocation184_spill] sm:$0xff]  ;;  %v1495_v51 = vadd.f32 %v1489_v39, %v1342_v21  ;;  %v1538_v59 = vadd.f32 %v1532_v23, %v1375_v26 }
 0x44d   : > { %v1534_v28 = vsel %vm1301_vm14, %v8969_v42, %v8968_v41  ;;  %v1570_v52 = vsel %vm1569_vm15, %v8971_v29, %v8970_v60  ;;  %v8973_v47 = vld [vmem:[#allocation125_spill] sm:$0xff]  ;;  %v8974_v56 = vld [vmem:[#allocation186_spill] sm:$0xff]  ;;  %v8975_v43 = vld [vmem:[#allocation127_spill] sm:$0xff]  ;;  %v1539_v63 = vadd.f32 %v1533_v61, %v1376_v57 }
 0x44e   : > { %v1571_v33 = vsel %vm1569_vm15, %v8974_v56, %v8973_v47  ;;  %v8976_v9 = vld [vmem:[#allocation188_spill] sm:$0xff]  ;;  %v8977_v10 = vld [vmem:[#allocation129_spill] sm:$0xff]  ;;  %v8978_v41 = vld [vmem:[#allocation190_spill] sm:$0xff]  ;;  %v1540_v21 = vadd.f32 %v1534_v28, %v1377_v46  ;;  %v1576_v13 = vadd.f32 %v1570_v52, %v1410_v36  ;;  %v8989_v46 = vrot.slane %v7331_v3, 1 }
 0x44f   : > { %v1572_v37 = vsel %vm1569_vm15, %v8976_v9, %v8975_v43  ;;  %v1611_v42 = vsel %vm1569_vm15, %v8978_v41, %v8977_v10  ;;  %v8979_v60 = vld [vmem:[#allocation131_spill] sm:$0xff]  ;;  %v8980_v4 = vld [vmem:[#allocation192_spill] sm:$0xff]  ;;  %v8981_v39 = vld [vmem:[#allocation133_spill] sm:$0xff]  ;;  %v1577_v57 = vadd.f32 %v1571_v33, %v1411_v14 }
 0x450   : > { %v1612_v29 = vsel %vm1569_vm15, %v8980_v4, %v8979_v60  ;;  %v8982_v47 = vld [vmem:[#allocation194_spill] sm:$0xff]  ;;  %v8983_v54 = vld [vmem:[#allocation135_spill] sm:$0xff]  ;;  %v8984_v43 = vld [vmem:[#allocation196_spill] sm:$0xff]  ;;  %v1578_v23 = vadd.f32 %v1572_v37, %v1412_v1  ;;  %3859 = vrot.lane.b32.xlu0 %v8989_v46, %s4494_s26  ;;  %v1615_v36 = vadd.f32 %v1611_v42, %v1449_v22  ;;  %v7778_v22 = vpop.permute.xlu0 %3302 }
 0x451   : > { %v1653_v56 = vsel %vm1569_vm15, %v8982_v47, %v8981_v39  ;;  %v1654_v26 = vsel %vm1569_vm15, %v8984_v43, %v8983_v54  ;;  %v8985_v61 = vld [vmem:[#allocation137_spill] sm:$0xff]  ;;  %v8986_v9 = vld [vmem:[#allocation198_spill] sm:$0xff]  ;;  %v8987_v41 = vld [vmem:[#allocation139_spill] sm:$0xff]  ;;  %v1616_v28 = vadd.f32 %v1612_v29, %v1450_v0  ;;  %v7780_v0 = vpop.permute.xlu1 %3515 }
 0x452   : > { %v1655_v10 = vsel %vm1569_vm15, %v8986_v9, %v8985_v61  ;;  %v8988_v60 = vld [vmem:[#allocation200_spill] sm:$0xff]  ;;  %v8990_v52 = vld [vmem:[#allocation141_spill] sm:$0xff]  ;;  %v8991_v39 = vld [vmem:[#allocation202_spill] sm:$0xff]  ;;  %v1659_v37 = vadd.f32 %v1653_v56, %v1493_v24  ;;  %v1660_v47 = vadd.f32 %v1654_v26, %v1494_v45  ;;  %8998 = vst [vmem:[#allocation15_spill] sm:$0xff] %v7780_v0 }
 0x453   : > { %v1698_v4 = vsel %vm1569_vm15, %v8988_v60, %v8987_v41  ;;  %v1699_v54 = vsel %vm1569_vm15, %v8991_v39, %v8990_v52  ;;  %v8992_v14 = vld [vmem:[#allocation143_spill] sm:$0xff]  ;;  %v8993_v1 = vld [vmem:[#allocation204_spill] sm:$0xff]  ;;  %v8994_v43 = vld [vmem:[#allocation145_spill] sm:$0xff]  ;;  %v1661_v42 = vadd.f32 %v1655_v10, %v1495_v51 }
 0x454   : > { %v1700_v33 = vsel %vm1569_vm15, %v8993_v1, %v8992_v14  ;;  %v8995_v61 = vld [vmem:[#allocation206_spill] sm:$0xff]  ;;  %v8996_v41 = vld [vmem:[#allocation147_spill] sm:$0xff]  ;;  %v8997_v60 = vld [vmem:[#allocation208_spill] sm:$0xff]  ;;  %v1704_v29 = vadd.f32 %v1698_v4, %v1538_v59  ;;  %v1705_v26 = vadd.f32 %v1699_v54, %v1539_v63  ;;  %3641 = vrot.lane.b32.xlu0 %v7430_v62, %s8769_s3 }
 0x455   : > { %v1743_v9 = vsel %vm1569_vm15, %v8995_v61, %v8994_v43  ;;  %v1744_v3 = vsel %vm1569_vm15, %v8997_v60, %v8996_v41  ;;  %v8999_v46 = vld [vmem:[#allocation149_spill] sm:$0xff]  ;;  %v9000_v52 = vld [vmem:[#allocation210_spill] sm:$0xff]  ;;  %v9001_v24 = vld [vmem:[#allocation151_spill] sm:$0xff]  ;;  %v1706_v14 = vadd.f32 %v1700_v33, %v1540_v21 }
 0x456   : > { %v1745_v39 = vsel %vm1569_vm15, %v9000_v52, %v8999_v46  ;;  %v9002_v45 = vld [vmem:[#allocation212_spill] sm:$0xff]  ;;  %v9003_v1 = vld [vmem:[#allocation153_spill] sm:$0xff]  ;;  %v9004_v43 = vld [vmem:[#allocation214_spill] sm:$0xff]  ;;  %v1749_v51 = vadd.f32 %v1743_v9, %v1576_v13  ;;  %v1750_v59 = vadd.f32 %v1744_v3, %v1577_v57  ;;  %v7808_v13 = vpop.permute.xlu0 %3339 }
 0x457   : > { %v1784_v56 = vsel %vm1569_vm15, %v9002_v45, %v9001_v24  ;;  %v1785_v61 = vsel %vm1569_vm15, %v9004_v43, %v9003_v1  ;;  %v9005_v41 = vld [vmem:[#allocation155_spill] sm:$0xff]  ;;  %v9006_v60 = vld [vmem:[#allocation216_spill] sm:$0xff]  ;;  %v9007_v10 = vld [vmem:[#allocation157_spill] sm:$0xff]  ;;  %v1751_v54 = vadd.f32 %v1745_v39, %v1578_v23 }
 0x458   : > { %v1826_v0 = vsel %vm1569_vm15, %v9006_v60, %v9005_v41  ;;  %v9008_v4 = vld [vmem:[#allocation218_spill] sm:$0xff]  ;;  %v9009_v52 = vld [vmem:[#allocation159_spill] sm:$0xff]  ;;  %v9010_v63 = vld [vmem:[#allocation220_spill] sm:$0xff]  ;;  %v1788_v33 = vadd.f32 %v1784_v56, %v1615_v36  ;;  %v1789_v57 = vadd.f32 %v1785_v61, %v1616_v28  ;;  %3645 = vrot.lane.b32.xlu0 %v7435_v20, %s8769_s3  ;;  %v7824_v28 = vpop.permute.xlu1 %3519 }
 0x459   : > { %v1827_v46 = vsel %vm1569_vm15, %v9008_v4, %v9007_v10  ;;  %v1828_v21 = vsel %vm1569_vm15, %v9010_v63, %v9009_v52  ;;  %v9011_v24 = vld [vmem:[#allocation161_spill] sm:$0xff]  ;;  %v9012_v45 = vld [vmem:[#allocation222_spill] sm:$0xff]  ;;  %v9013_v43 = vld [vmem:[#allocation163_spill] sm:$0xff]  ;;  %v1832_v9 = vadd.f32 %v1826_v0, %v1659_v37  ;;  %9023 = vst [vmem:[#allocation56_spill] sm:$0xff] %v7824_v28 }
 0x45a   : > { %v1864_v1 = vsel %vm1863_vm3, %v9012_v45, %v9011_v24  ;;  %v9014_v41 = vld [vmem:[#allocation224_spill] sm:$0xff]  ;;  %v9015_v3 = vld [vmem:[#allocation173_spill] sm:$0xff]  ;;  %v9016_v60 = vld [vmem:[#allocation234_spill] sm:$0xff]  ;;  %v1833_v36 = vadd.f32 %v1827_v46, %v1660_v47  ;;  %v1834_v39 = vadd.f32 %v1828_v21, %v1661_v42 }
 0x45b   : > { %v1865_v62 = vsel %vm1863_vm3, %v9014_v41, %v9013_v43  ;;  %v1950_v10 = vsel %vm1863_vm3, %v9016_v60, %v9015_v3  ;;  %v9017_v4 = vld [vmem:[#allocation177_spill] sm:$0xff]  ;;  %v9018_v52 = vld [vmem:[#allocation238_spill] sm:$0xff]  ;;  %v9021_v45 = vld [vmem:[#allocation179_spill] sm:$0xff]  ;;  %v1870_v37 = vadd.f32 %v1864_v1, %v1704_v29  ;;  %v7838_v29 = vpop.permute.xlu0 %3343 }
 0x45c   : > { %v1992_v23 = vsel %vm1863_vm3, %v9018_v52, %v9017_v4  ;;  %v9019_v56 = vld [vmem:[#allocation165_spill] sm:$0xff]  ;;  %v9020_v63 = vld [vmem:[#allocation226_spill] sm:$0xff]  ;;  %v9022_v43 = vld [vmem:[#allocation240_spill] sm:$0xff]  ;;  %v1871_v0 = vadd.f32 %v1865_v62, %v1705_v26  ;;  %v1954_v60 = vadd.f32 %v1950_v10, %v1788_v33 }
 0x45d   : > { %v1866_v24 = vsel %vm1863_vm3, %v9020_v63, %v9019_v56  ;;  %v1993_v41 = vsel %vm1863_vm3, %v9022_v43, %v9021_v45  ;;  %v9024_v61 = vld [vmem:[#allocation167_spill] sm:$0xff]  ;;  %v9025_v3 = vld [vmem:[#allocation228_spill] sm:$0xff]  ;;  %v1998_v63 = vadd.f32 %v1992_v23, %v1832_v9  ;;  %v9030_v45 = vld [vmem:[#allocation181_spill] sm:$0xff] }
 0x45e   : > { %v1909_v47 = vsel %vm1863_vm3, %v9025_v3, %v9024_v61  ;;  %v9026_v42 = vld [vmem:[#allocation195_spill] sm:$0xff]  ;;  %v9027_v46 = vld [vmem:[#allocation256_spill] sm:$0xff]  ;;  %v9031_v20 = vld [vmem:[#allocation242_spill] sm:$0xff]  ;;  %v1872_v26 = vadd.f32 %v1866_v24, %v1706_v14  ;;  %v1999_v1 = vadd.f32 %v1993_v41, %v1833_v36  ;;  %v9040_v14 = vrot.slane %v7351_v27, 4 }
 0x45f   : > { %v2123_v21 = vsel %vm1863_vm3, %v9027_v46, %v9026_v42  ;;  %v9028_v4 = vld [vmem:[#allocation175_spill] sm:$0xff]  ;;  %v9029_v52 = vld [vmem:[#allocation236_spill] sm:$0xff]  ;;  %v1994_v43 = vsel %vm1863_vm3, %v9031_v20, %v9030_v45  ;;  %v9034_v28 = vld [vmem:[#allocation185_spill] sm:$0xff]  ;;  %v1915_v10 = vadd.f32 %v1909_v47, %v1749_v51 }
 0x460   : > { %v1951_v56 = vsel %vm1863_vm3, %v9029_v52, %v9028_v4  ;;  %v9032_v62 = vld [vmem:[#allocation183_spill] sm:$0xff]  ;;  %v9033_v61 = vld [vmem:[#allocation244_spill] sm:$0xff]  ;;  %v9035_v42 = vld [vmem:[#allocation246_spill] sm:$0xff]  ;;  %v2127_v20 = vadd.f32 %v2123_v21, %v1954_v60  ;;  %3649 = vrot.lane.b32.xlu0 %v9040_v14, %s8769_s3  ;;  %v2000_v24 = vadd.f32 %v1994_v43, %v1834_v39  ;;  %v2148_v43 = vadd.f32 %v7116_v35, %v1999_v1 }
 0x461   : > { %v2037_v3 = vsel %vm1863_vm3, %v9033_v61, %v9032_v62  ;;  %v2038_v33 = vsel %vm1863_vm3, %v9035_v42, %v9034_v28  ;;  %v9036_v46 = vld [vmem:[#allocation169_spill] sm:$0xff]  ;;  %v9037_v4 = vld [vmem:[#allocation230_spill] sm:$0xff]  ;;  %v9038_v23 = vld [vmem:[#allocation171_spill] sm:$0xff]  ;;  %v1955_v36 = vadd.f32 %v1951_v56, %v1789_v57  ;;  %v9045_v42 = vrot.slane %v6978_v18, 7  ;;  %v7868_v57 = vpop.permute.xlu1 %3523 }
 0x462   : > { %v1910_v9 = vsel %vm1863_vm3, %v9037_v4, %v9036_v46  ;;  %v9039_v52 = vld [vmem:[#allocation232_spill] sm:$0xff]  ;;  %v9041_v41 = vld [vmem:[#allocation187_spill] sm:$0xff]  ;;  %v9043_v51 = vld [vmem:[#allocation197_spill] sm:$0xff]  ;;  %v2043_v4 = vadd.f32 %v2037_v3, %v1870_v37 }
 0x463   : > { %v1911_v45 = vsel %vm1863_vm3, %v9039_v52, %v9038_v23  ;;  %v9042_v62 = vld [vmem:[#allocation248_spill] sm:$0xff]  ;;  %v9044_v47 = vld [vmem:[#allocation258_spill] sm:$0xff]  ;;  %v2147_v46 = vadd.f32 %v9045_v42, %v1998_v63  ;;  %v2044_v23 = vadd.f32 %v2038_v33, %v1871_v0  ;;  %v9046_v21 = vld [vmem:[#allocation189_spill] sm:$0xff]  ;;  %v7866_v52 = vpop.permute.xlu0 %3347  ;;  %v1916_v39 = vadd.f32 %v1910_v9, %v1750_v59 }
 0x464   : > { %v2039_v28 = vsel %vm1863_vm3, %v9042_v62, %v9041_v41  ;;  %v2124_v61 = vsel %vm1863_vm3, %v9044_v47, %v9043_v51  ;;  %v9047_v60 = vld [vmem:[#allocation250_spill] sm:$0xff]  ;;  %v1917_v56 = vadd.f32 %v1911_v45, %v1751_v54  ;;  %v9048_v14 = vld [vmem:[#allocation199_spill] sm:$0xff]  ;;  %v9049_v41 = vld [vmem:[#allocation260_spill] sm:$0xff]  ;;  %v2203_v33 = vadd.f32 %v7167_v11, %v2127_v20  ;;  %3761 = vrot.lane.b32.xlu0 %v7451_v53, %s4494_s26 }
 0x465   : > { %v2082_v27 = vsel %vm1863_vm3, %v9047_v60, %v9046_v21  ;;  %v2280_v62 = vsel %vm417_vm11, %v9049_v41, %v9048_v14  ;;  %v2045_v18 = vadd.f32 %v2039_v28, %v1872_v26  ;;  %v9050_v63 = vld [vmem:[#allocation191_spill] sm:$0xff]  ;;  %v9051_v37 = vld [vmem:[#allocation252_spill] sm:$0xff]  ;;  %v2128_v3 = vadd.f32 %v2124_v61, %v1955_v36  ;;  %v9053_v35 = vld [vmem:[#allocation193_spill] sm:$0xff] }
 0x466   : > { %v2083_v0 = vsel %vm1863_vm3, %v9051_v37, %v9050_v63  ;;  %v9052_v59 = vrot.slane %v6994_v7, 7  ;;  %v2088_v9 = vadd.f32 %v2082_v27, %v1915_v10  ;;  %v9054_v1 = vld [vmem:[#allocation254_spill] sm:$0xff]  ;;  %v9055_v51 = vld [vmem:[#allocation221_spill] sm:$0xff]  ;;  %v9057_v47 = vrot.slane %v7053_v32, 7  ;;  %v9058_v61 = vld [vmem:[#allocation375_spill] sm:$0xff] }
 0x467   : > { %v2084_v45 = vsel %vm1863_vm3, %v9054_v1, %v9053_v35  ;;  %v9056_v26 = vld [vmem:[#allocation282_spill] sm:$0xff]  ;;  %v2167_v11 = vadd.f32 %v7122_v15, %v2044_v23  ;;  %v2284_v20 = vadd.f32 %v2280_v62, %v2203_v33  ;;  %v2221_v53 = vadd.f32 %v9058_v61, %v2147_v46  ;;  %v7892_v42 = vpop.permute.xlu0 %3384  ;;  %v9059_v10 = vld [vmem:[#allocation201_spill] sm:$0xff]  ;;  %v9061_v60 = vld [vmem:[#allocation376_spill] sm:$0xff]  ;;  %v7905_v46 = vpop.permute.xlu1 %3560 }
 0x468   : > { %v2149_v54 = vadd.f32 %v9052_v59, %v2000_v24  ;;  %v2423_v28 = vsel %vm417_vm11, %v9056_v26, %v9055_v51  ;;  %v2166_v36 = vadd.f32 %v9057_v47, %v2043_v4  ;;  %v2089_v7 = vadd.f32 %v2083_v0, %v1916_v39  ;;  %v9060_v24 = vld [vmem:[#allocation262_spill] sm:$0xff]  ;;  %v9062_v14 = vld [vmem:[#allocation243_spill] sm:$0xff]  ;;  %v9063_v41 = vld [vmem:[#allocation304_spill] sm:$0xff]  ;;  %3765 = vrot.lane.b32.xlu0 %v7469_v12, %s4494_s26 }
 0x469   : > { %v2281_v21 = vsel %vm417_vm11, %v9060_v24, %v9059_v10  ;;  %v2222_v27 = vadd.f32 %v9061_v60, %v2148_v43  ;;  %v2588_v63 = vsel %vm713_vm12, %v9063_v41, %v9062_v14  ;;  %v9064_v32 = vld [vmem:[#allocation363_spill] sm:$0xff]  ;;  %v2090_v37 = vadd.f32 %v2084_v45, %v1917_v56  ;;  %v9065_v15 = vld [vmem:[#allocation370_spill] sm:$0xff]  ;;  %v9068_v59 = vld [vmem:[#allocation368_spill] sm:$0xff] }
 0x46a   : > { %v2168_v4 = vadd.f32 %v9064_v32, %v2045_v18  ;;  %v2204_v23 = vadd.f32 %v9065_v15, %v2128_v3  ;;  %v2427_v62 = vadd.f32 %v2423_v28, %v2284_v20  ;;  %v9066_v39 = vld [vmem:[#allocation359_spill] sm:$0xff]  ;;  %v9069_v43 = vrot.slane %v9068_v59, 3  ;;  %v9071_v51 = vld [vmem:[#allocation284_spill] sm:$0xff]  ;;  %v9072_v18 = vld [vmem:[#allocation265_spill] sm:$0xff] }
 0x46b   : > { %v9067_v0 = vrot.slane %v9066_v39, 7  ;;  %v9070_v1 = vld [vmem:[#allocation223_spill] sm:$0xff]  ;;  %v9074_v28 = vld [vmem:[#allocation377_spill] sm:$0xff]  ;;  %v9075_v12 = vld [vmem:[#allocation378_spill] sm:$0xff] }
 0x46c   : > { %v2223_v35 = vadd.f32 %v9069_v43, %v2149_v54  ;;  %v2424_v26 = vsel %vm417_vm11, %v9071_v51, %v9070_v1  ;;  %v9073_v56 = vld [vmem:[#allocation327_spill] sm:$0xff]  ;;  %v2285_v45 = vadd.f32 %v2281_v21, %v2204_v23  ;;  %v7918_v47 = vadd.f32 %v9074_v28, %v2166_v36  ;;  %v9076_v10 = vld [vmem:[#allocation364_spill] sm:$0xff]  ;;  %v9079_v41 = vld [vmem:[#allocation245_spill] sm:$0xff] }
 0x46d   : > { %v2185_v33 = vadd.f32 %v9067_v0, %v2088_v9  ;;  %v2761_v3 = vsel %vm713_vm12, %v9073_v56, %v9072_v18  ;;  %v7921_v20 = vadd.f32 %v9075_v12, %v2167_v11  ;;  %v2592_v61 = vadd.f32 %v2588_v63, %v2427_v62  ;;  %v7923_v9 = vpop.permute.xlu0 %3388  ;;  %v9077_v24 = vld [vmem:[#allocation203_spill] sm:$0xff]  ;;  %v9078_v60 = vld [vmem:[#allocation264_spill] sm:$0xff]  ;;  %v9080_v32 = vld [vmem:[#allocation306_spill] sm:$0xff] }
 0x46e   : > { %v2186_v54 = vadd.f32 %v9076_v10, %v2089_v7  ;;  %v2312_v14 = vsel %vm417_vm11, %v9078_v60, %v9077_v24  ;;  %v2589_v15 = vsel %vm713_vm12, %v9080_v32, %v9079_v41  ;;  %v9081_v21 = vld [vmem:[#allocation287_spill] sm:$0xff]  ;;  %v9082_v23 = vld [vmem:[#allocation348_spill] sm:$0xff]  ;;  %v9083_v39 = vld [vmem:[#allocation365_spill] sm:$0xff]  ;;  %v2428_v59 = vadd.f32 %v2424_v26, %v2285_v45  ;;  %v7960_v32 = vpop.permute.xlu1 %3564 }
 0x46f   : > { %v2926_v36 = vsel %vm1009_vm13, %v9082_v23, %v9081_v21  ;;  %v2187_v11 = vadd.f32 %v9083_v39, %v2090_v37  ;;  %v9084_v0 = vld [vmem:[#allocation369_spill] sm:$0xff]  ;;  %v2765_v7 = vadd.f32 %v2761_v3, %v2592_v61  ;;  %v9086_v43 = vrot.slane %v7402_v8, 1  ;;  %v9087_v1 = vld [vmem:[#allocation379_spill] sm:$0xff]  ;;  %v9089_v56 = vld [vmem:[#allocation286_spill] sm:$0xff] }
 0x470   : > { %v9085_v63 = vrot.slane %v9084_v0, 3  ;;  %v7944_v51 = vadd.f32 %v9087_v1, %v2185_v33  ;;  %v9088_v18 = vld [vmem:[#allocation225_spill] sm:$0xff]  ;;  %v9090_v12 = vld [vmem:[#allocation267_spill] sm:$0xff]  ;;  %v9091_v10 = vld [vmem:[#allocation328_spill] sm:$0xff]  ;;  %v2318_v3 = vadd.f32 %v2312_v14, %v2221_v53  ;;  %v2593_v60 = vadd.f32 %v2589_v15, %v2428_v59 }
 0x471   : > { %3769 = vrot.lane.b32.xlu0 %v9086_v43, %s4494_s26  ;;  %v2465_v28 = vsel %vm417_vm11, %v9089_v56, %v9088_v18  ;;  %v2762_v37 = vsel %vm713_vm12, %v9091_v10, %v9090_v12  ;;  %v9092_v24 = vld [vmem:[#allocation310_spill] sm:$0xff]  ;;  %v9094_v45 = vld [vmem:[#allocation205_spill] sm:$0xff]  ;;  %v2930_v33 = vadd.f32 %v2926_v36, %v2765_v7  ;;  %v7958_v41 = vpop.permute.xlu0 %3392  ;;  %v9096_v21 = vld [vmem:[#allocation380_spill] sm:$0xff] }
 0x472   : > { %v7938_v62 = vadd.f32 %v9085_v63, %v2168_v4  ;;  %v9093_v4 = vld [vmem:[#allocation381_spill] sm:$0xff]  ;;  %v9095_v61 = vld [vmem:[#allocation266_spill] sm:$0xff]  ;;  %v7963_v23 = vadd.f32 %v9096_v21, %v2186_v54  ;;  %v9097_v39 = vld [vmem:[#allocation247_spill] sm:$0xff]  ;;  %v2471_v18 = vadd.f32 %v2465_v28, %v2318_v3  ;;  %v2766_v56 = vadd.f32 %v2762_v37, %v2593_v60 }
 0x473   : > { %v3099_v26 = vsel %vm1009_vm13, %v9093_v4, %v9092_v24  ;;  %v2313_v8 = vsel %vm417_vm11, %v9095_v61, %v9094_v45  ;;  %v9098_v0 = vld [vmem:[#allocation308_spill] sm:$0xff]  ;;  %v9099_v43 = vld [vmem:[#allocation289_spill] sm:$0xff]  ;;  %v9100_v1 = vld [vmem:[#allocation351_spill] sm:$0xff] }
 0x474   : > { %v2630_v63 = vsel %vm713_vm12, %v9098_v0, %v9097_v39  ;;  %v2927_v53 = vsel %vm1009_vm13, %v9100_v1, %v9099_v43  ;;  %v9101_v14 = vld [vmem:[#allocation344_spill] sm:$0xff]  ;;  %v9102_v36 = vld [vmem:[#allocation371_spill] sm:$0xff]  ;;  %v3103_v54 = vadd.f32 %v3099_v26, %v2930_v33  ;;  %v2319_v12 = vadd.f32 %v2313_v8, %v2222_v27  ;;  %v9106_v45 = vld [vmem:[#allocation269_spill] sm:$0xff] }
 0x475   : > { %v3264_v15 = vsel %vm1301_vm14, %v7660_v31, %v9101_v14  ;;  %v9103_v59 = vrot.slane %v9102_v36, 3  ;;  %3806 = vrot.lane.b32.xlu0 %v7472_v48, %s4494_s26  ;;  %v9104_v10 = vld [vmem:[#allocation227_spill] sm:$0xff]  ;;  %v9105_v24 = vld [vmem:[#allocation288_spill] sm:$0xff]  ;;  %v9107_v61 = vld [vmem:[#allocation330_spill] sm:$0xff]  ;;  %v2636_v26 = vadd.f32 %v2630_v63, %v2471_v18  ;;  %v2931_v3 = vadd.f32 %v2927_v53, %v2766_v56  ;;  %v3416_v27 = vpop.permute.xlu0 %3415  ;;  %v8007_v18 = vpop.permute.xlu1 %3680 }
 0x476   : > { %v2466_v4 = vsel %vm417_vm11, %v9105_v24, %v9104_v10  ;;  %v2803_v21 = vsel %vm713_vm12, %v9107_v61, %v9106_v45  ;;  %v9108_v31 = vld [vmem:[#allocation313_spill] sm:$0xff]  ;;  %v9109_v39 = vld [vmem:[#allocation40_spill] sm:$0xff]  ;;  %v9110_v0 = vld [vmem:[#allocation207_spill] sm:$0xff]  ;;  %v3268_v48 = vadd.f32 %v3264_v15, %v3103_v54 }
 0x477   : > { %v7976_v7 = vadd.f32 %v9103_v59, %v2187_v11  ;;  %v3100_v11 = vsel %vm1009_vm13, %v9109_v39, %v9108_v31  ;;  %v9111_v28 = vld [vmem:[#allocation268_spill] sm:$0xff]  ;;  %v9112_v8 = vld [vmem:[#allocation249_spill] sm:$0xff]  ;;  %v9114_v43 = vld [vmem:[#allocation291_spill] sm:$0xff]  ;;  %v2472_v45 = vadd.f32 %v2466_v4, %v2319_v12  ;;  %v2809_v63 = vadd.f32 %v2803_v21, %v2636_v26 }
 0x478   : > { %v2314_v37 = vsel %vm417_vm11, %v9111_v28, %v9110_v0  ;;  %v9113_v60 = vld [vmem:[#allocation309_spill] sm:$0xff]  ;;  %v9115_v1 = vld [vmem:[#allocation352_spill] sm:$0xff]  ;;  %v9116_v36 = vld [vmem:[#allocation347_spill] sm:$0xff]  ;;  %v3104_v53 = vadd.f32 %v3100_v11, %v2931_v3 }
 0x479   : > { %v2631_v33 = vsel %vm713_vm12, %v9113_v60, %v9112_v8  ;;  %v2968_v14 = vsel %vm1009_vm13, %v9115_v1, %v9114_v43  ;;  %v3265_v59 = vsel %vm1301_vm14, %v7689_v49, %v9116_v36  ;;  %v9117_v10 = vld [vmem:[#allocation45_spill] sm:$0xff]  ;;  %3810 = vrot.lane.b32.xlu0 %v7485_v38, %s4494_s26  ;;  %v2320_v56 = vadd.f32 %v2314_v37, %v2223_v35  ;;  %v9119_v61 = vld [vmem:[#allocation290_spill] sm:$0xff]  ;;  %v9120_v39 = vld [vmem:[#allocation271_spill] sm:$0xff]  ;;  %v3420_v35 = vpop.permute.xlu0 %3419 }
 0x47a   : > { %v3423_v24 = vsel %vm1569_vm15, %v3416_v27, %v9117_v10  ;;  %v9118_v54 = vld [vmem:[#allocation229_spill] sm:$0xff]  ;;  %v9123_v12 = vld [vmem:[#allocation43_spill] sm:$0xff]  ;;  %v9125_v11 = vld [vmem:[#allocation270_spill] sm:$0xff]  ;;  %v2637_v38 = vadd.f32 %v2631_v33, %v2472_v45  ;;  %v2974_v3 = vadd.f32 %v2968_v14, %v2809_v63  ;;  %v9132_v45 = vrot.slane %v7415_v2, 1 }
 0x47b   : > { %v8003_v15 = vadd.f32 %v3423_v24, %v3268_v48  ;;  %v2467_v31 = vsel %vm417_vm11, %v9119_v61, %v9118_v54  ;;  %v9121_v49 = vld [vmem:[#allocation333_spill] sm:$0xff]  ;;  %v3269_v48 = vadd.f32 %v3265_v59, %v3104_v53  ;;  %v9126_v37 = vld [vmem:[#allocation251_spill] sm:$0xff]  ;;  %v9127_v27 = vld [vmem:[#allocation312_spill] sm:$0xff] }
 0x47c   : > { %v2804_v0 = vsel %vm713_vm12, %v9121_v49, %v9120_v39  ;;  %v9122_v28 = vld [vmem:[#allocation317_spill] sm:$0xff]  ;;  %v2632_v8 = vsel %vm713_vm12, %v9127_v27, %v9126_v37  ;;  %v9129_v43 = vld [vmem:[#allocation354_spill] sm:$0xff]  ;;  %v9131_v24 = vld [vmem:[#allocation48_spill] sm:$0xff]  ;;  %v2473_v61 = vadd.f32 %v2467_v31, %v2320_v56 }
 0x47d   : > { %v3133_v4 = vsel %vm1301_vm14, %v9123_v12, %v9122_v28  ;;  %v9124_v21 = vld [vmem:[#allocation209_spill] sm:$0xff]  ;;  %v9130_v36 = vld [vmem:[#allocation350_spill] sm:$0xff]  ;;  %v3424_v54 = vsel %vm1569_vm15, %v3420_v35, %v9131_v24  ;;  %v2810_v33 = vadd.f32 %v2804_v0, %v2637_v38  ;;  %3814 = vrot.lane.b32.xlu0 %v9132_v45, %s4494_s26  ;;  %v9133_v53 = vld [vmem:[#allocation231_spill] sm:$0xff] }
 0x47e   : > { %v2347_v26 = vsel %vm417_vm11, %v9125_v11, %v9124_v21  ;;  %v9128_v60 = vld [vmem:[#allocation293_spill] sm:$0xff]  ;;  %v3306_v10 = vsel %vm1301_vm14, %v7719_v34, %v9130_v36  ;;  %v3139_v14 = vadd.f32 %v3133_v4, %v2974_v3  ;;  %v8032_v59 = vadd.f32 %v3424_v54, %v3269_v48  ;;  %v9134_v39 = vld [vmem:[#allocation292_spill] sm:$0xff]  ;;  %v9136_v34 = vld [vmem:[#allocation334_spill] sm:$0xff] }
 0x47f   : > { %v2969_v1 = vsel %vm1009_vm13, %v9129_v43, %v9128_v60  ;;  %v2353_v63 = vadd.f32 %v2347_v26, %v7918_v47  ;;  %v2510_v49 = vsel %vm417_vm11, %v9134_v39, %v9133_v53  ;;  %v9135_v28 = vld [vmem:[#allocation273_spill] sm:$0xff]  ;;  %v9137_v21 = vld [vmem:[#allocation320_spill] sm:$0xff]  ;;  %v9139_v0 = vld [vmem:[#allocation211_spill] sm:$0xff]  ;;  %v2638_v2 = vadd.f32 %v2632_v8, %v2473_v61  ;;  %v3444_v47 = vpop.permute.xlu0 %3443  ;;  %v8050_v26 = vpop.permute.xlu1 %3684 }
 0x480   : > { %v2805_v12 = vsel %vm713_vm12, %v9136_v34, %v9135_v28  ;;  %v9138_v56 = vld [vmem:[#allocation29_spill] sm:$0xff]  ;;  %v9140_v4 = vld [vmem:[#allocation272_spill] sm:$0xff]  ;;  %v2975_v38 = vadd.f32 %v2969_v1, %v2810_v33  ;;  %v3312_v3 = vadd.f32 %v3306_v10, %v3139_v14  ;;  %v9142_v35 = vld [vmem:[#allocation314_spill] sm:$0xff]  ;;  %v3455_v8 = vsel %vm1569_vm15, %v3444_v47, %v7487_v6 }
 0x481   : > { %v3134_v31 = vsel %vm1301_vm14, %v9138_v56, %v9137_v21  ;;  %v2348_v11 = vsel %vm417_vm11, %v9140_v4, %v9139_v0  ;;  %v9141_v48 = vld [vmem:[#allocation253_spill] sm:$0xff]  ;;  %v9143_v27 = vld [vmem:[#allocation295_spill] sm:$0xff]  ;;  %v9144_v60 = vld [vmem:[#allocation356_spill] sm:$0xff]  ;;  %v2516_v1 = vadd.f32 %v2510_v49, %v2353_v63  ;;  %v2811_v10 = vadd.f32 %v2805_v12, %v2638_v2  ;;  %3934 = vrot.lane.b32.xlu0 %v7498_v16, %s4494_s26 }
 0x482   : > { %v2675_v37 = vsel %vm713_vm12, %v9142_v35, %v9141_v48  ;;  %v2970_v43 = vsel %vm1009_vm13, %v9144_v60, %v9143_v27  ;;  %v9145_v36 = vld [vmem:[#allocation353_spill] sm:$0xff]  ;;  %v3140_v54 = vadd.f32 %v3134_v31, %v2975_v38  ;;  %v8063_v61 = vadd.f32 %v3455_v8, %v3312_v3  ;;  %v9147_v45 = vld [vmem:[#allocation294_spill] sm:$0xff]  ;;  %v9148_v39 = vld [vmem:[#allocation275_spill] sm:$0xff] }
 0x483   : > { %v3307_v24 = vsel %vm1301_vm14, %v7749_v58, %v9145_v36  ;;  %v2354_v33 = vadd.f32 %v2348_v11, %v7921_v20  ;;  %v9146_v14 = vld [vmem:[#allocation233_spill] sm:$0xff]  ;;  %v9149_v28 = vld [vmem:[#allocation336_spill] sm:$0xff]  ;;  %v9150_v34 = vld [vmem:[#allocation323_spill] sm:$0xff]  ;;  %v2681_v56 = vadd.f32 %v2675_v37, %v2516_v1  ;;  %v2976_v16 = vadd.f32 %v2970_v43, %v2811_v10  ;;  %v3448_v20 = vpop.permute.xlu0 %3447  ;;  %v8095_v36 = vpop.permute.xlu1 %3688 }
 0x484   : > { %v2511_v53 = vsel %vm417_vm11, %v9147_v45, %v9146_v14  ;;  %v2840_v58 = vsel %vm1009_vm13, %v9149_v28, %v9148_v39  ;;  %v9151_v6 = vld [vmem:[#allocation38_spill] sm:$0xff]  ;;  %v9152_v49 = vld [vmem:[#allocation213_spill] sm:$0xff]  ;;  %v3313_v31 = vadd.f32 %v3307_v24, %v3140_v54  ;;  %v9154_v0 = vld [vmem:[#allocation255_spill] sm:$0xff]  ;;  %v3456_v35 = vsel %vm1569_vm15, %v3448_v20, %v7554_v55 }
 0x485   : > { %v3135_v63 = vsel %vm1301_vm14, %v9151_v6, %v9150_v34  ;;  %v9153_v12 = vld [vmem:[#allocation274_spill] sm:$0xff]  ;;  %v9155_v4 = vld [vmem:[#allocation316_spill] sm:$0xff]  ;;  %v9156_v2 = vld [vmem:[#allocation297_spill] sm:$0xff]  ;;  %v2517_v27 = vadd.f32 %v2511_v53, %v2354_v33  ;;  %v2846_v37 = vadd.f32 %v2840_v58, %v2681_v56  ;;  %3938 = vrot.lane.b32.xlu0 %v7503_v19, %s4494_s26 }
 0x486   : > { %v2349_v21 = vsel %vm417_vm11, %v9153_v12, %v9152_v49  ;;  %v2676_v11 = vsel %vm713_vm12, %v9155_v4, %v9154_v0  ;;  %v9157_v38 = vld [vmem:[#allocation357_spill] sm:$0xff]  ;;  %v9158_v47 = vld [vmem:[#allocation355_spill] sm:$0xff]  ;;  %v3141_v60 = vadd.f32 %v3135_v63, %v2976_v16  ;;  %v8091_v43 = vadd.f32 %v3456_v35, %v3313_v31  ;;  %v9160_v1 = vld [vmem:[#allocation296_spill] sm:$0xff] }
 0x487   : > { %v3013_v3 = vsel %vm1009_vm13, %v9157_v38, %v9156_v2  ;;  %v3308_v48 = vsel %vm1301_vm14, %v7778_v22, %v9158_v47  ;;  %v2355_v24 = vadd.f32 %v2349_v21, %v7938_v62  ;;  %v9159_v8 = vld [vmem:[#allocation235_spill] sm:$0xff]  ;;  %v9161_v22 = vld [vmem:[#allocation277_spill] sm:$0xff]  ;;  %v9163_v33 = vld [vmem:[#allocation326_spill] sm:$0xff]  ;;  %v2682_v39 = vadd.f32 %v2676_v11, %v2517_v27  ;;  %v3452_v62 = vpop.permute.xlu0 %3451 }
 0x488   : > { %v2512_v10 = vsel %vm417_vm11, %v9160_v1, %v9159_v8  ;;  %v9162_v54 = vld [vmem:[#allocation339_spill] sm:$0xff]  ;;  %v3178_v14 = vsel %vm1301_vm14, %v7448_v5, %v9163_v33  ;;  %v9165_v53 = vld [vmem:[#allocation276_spill] sm:$0xff]  ;;  %v3019_v28 = vadd.f32 %v3013_v3, %v2846_v37  ;;  %v3314_v58 = vadd.f32 %v3308_v48, %v3141_v60  ;;  %v9166_v34 = vld [vmem:[#allocation257_spill] sm:$0xff] }
 0x489   : > { %v2841_v55 = vsel %vm1009_vm13, %v9162_v54, %v9161_v22  ;;  %v9164_v45 = vld [vmem:[#allocation215_spill] sm:$0xff]  ;;  %v9167_v6 = vld [vmem:[#allocation318_spill] sm:$0xff]  ;;  %v9169_v12 = vld [vmem:[#allocation360_spill] sm:$0xff]  ;;  %v3457_v16 = vsel %vm1569_vm15, %v3452_v62, %v7600_v17  ;;  %v2518_v31 = vadd.f32 %v2512_v10, %v2355_v24  ;;  %v9171_v11 = vrot.slane %v7426_v44, 5  ;;  %v8139_v10 = vpop.permute.xlu1 %3598 }
 0x48a   : > { %v2382_v19 = vsel %vm417_vm11, %v9165_v53, %v9164_v45  ;;  %v2677_v63 = vsel %vm713_vm12, %v9167_v6, %v9166_v34  ;;  %v9168_v49 = vld [vmem:[#allocation299_spill] sm:$0xff]  ;;  %v9170_v56 = vld [vmem:[#allocation358_spill] sm:$0xff]  ;;  %v2847_v20 = vadd.f32 %v2841_v55, %v2682_v39  ;;  %v3184_v0 = vadd.f32 %v3178_v14, %v3019_v28  ;;  %v9172_v38 = vld [vmem:[#allocation237_spill] sm:$0xff] }
 0x48b   : > { %v3014_v21 = vsel %vm1009_vm13, %v9169_v12, %v9168_v49  ;;  %v3351_v5 = vsel %vm1301_vm14, %v7808_v13, %v9170_v56  ;;  %v8121_v4 = vadd.f32 %v3457_v16, %v3314_v58  ;;  %3942 = vrot.lane.b32.xlu0 %v9171_v11, %s4494_s26  ;;  %v2388_v2 = vadd.f32 %v2382_v19, %v7944_v51  ;;  %v9173_v3 = vld [vmem:[#allocation298_spill] sm:$0xff]  ;;  %v9174_v48 = vld [vmem:[#allocation279_spill] sm:$0xff]  ;;  %v9175_v13 = vld [vmem:[#allocation340_spill] sm:$0xff]  ;;  %v3479_v51 = vpop.permute.xlu0 %3478 }
 0x48c   : > { %v2547_v47 = vsel %vm713_vm12, %v9173_v3, %v9172_v38  ;;  %v2842_v35 = vsel %vm1009_vm13, %v9175_v13, %v9174_v48  ;;  %v9176_v17 = vld [vmem:[#allocation329_spill] sm:$0xff]  ;;  %v9178_v60 = vld [vmem:[#allocation278_spill] sm:$0xff]  ;;  %v2683_v44 = vadd.f32 %v2677_v63, %v2518_v31  ;;  %v3020_v8 = vadd.f32 %v3014_v21, %v2847_v20  ;;  %v9179_v22 = vld [vmem:[#allocation259_spill] sm:$0xff] }
 0x48d   : > { %v3179_v27 = vsel %vm1301_vm14, %v7480_v30, %v9176_v17  ;;  %v9177_v37 = vld [vmem:[#allocation217_spill] sm:$0xff]  ;;  %v3357_v1 = vadd.f32 %v3351_v5, %v3184_v0  ;;  %v9182_v14 = vld [vmem:[#allocation362_spill] sm:$0xff]  ;;  %v3490_v19 = vsel %vm1569_vm15, %v3479_v51, %v7646_v50  ;;  %v2553_v39 = vadd.f32 %v2547_v47, %v2388_v2  ;;  %v9185_v63 = vld [vmem:[#allocation239_spill] sm:$0xff] }
 0x48e   : > { %v2383_v24 = vsel %vm417_vm11, %v9178_v60, %v9177_v37  ;;  %v9180_v54 = vld [vmem:[#allocation321_spill] sm:$0xff]  ;;  %v2848_v28 = vadd.f32 %v2842_v35, %v2683_v44  ;;  %v3185_v58 = vadd.f32 %v3179_v27, %v3020_v8  ;;  %v9184_v34 = vld [vmem:[#allocation54_spill] sm:$0xff]  ;;  %v9186_v49 = vld [vmem:[#allocation300_spill] sm:$0xff] }
 0x48f   : > { %v2720_v55 = vsel %vm713_vm12, %v9180_v54, %v9179_v22  ;;  %v9181_v33 = vld [vmem:[#allocation301_spill] sm:$0xff]  ;;  %v8152_v62 = vadd.f32 %v3490_v19, %v3357_v1  ;;  %3723 = vrot.lane.b32.xlu0 %v9184_v34, %s4494_s26  ;;  %v2389_v6 = vadd.f32 %v2383_v24, %v7963_v23  ;;  %v2548_v12 = vsel %vm713_vm12, %v9186_v49, %v9185_v63  ;;  %v9188_v56 = vld [vmem:[#allocation342_spill] sm:$0xff]  ;;  %v9189_v5 = vld [vmem:[#allocation332_spill] sm:$0xff]  ;;  %v3483_v23 = vpop.permute.xlu0 %3482  ;;  %v8184_v1 = vpop.permute.xlu1 %3602 }
 0x490   : > { %v3015_v45 = vsel %vm1009_vm13, %v9182_v14, %v9181_v33  ;;  %v9183_v53 = vld [vmem:[#allocation361_spill] sm:$0xff]  ;;  %v3180_v50 = vsel %vm1301_vm14, %v7535_v40, %v9189_v5  ;;  %v9190_v16 = vld [vmem:[#allocation219_spill] sm:$0xff]  ;;  %v9191_v31 = vld [vmem:[#allocation280_spill] sm:$0xff]  ;;  %v2726_v0 = vadd.f32 %v2720_v55, %v2553_v39  ;;  %v3491_v27 = vsel %vm1569_vm15, %v3483_v23, %v7691_v25 }
 0x491   : > { %v3352_v30 = vsel %vm1301_vm14, %v7838_v29, %v9183_v53  ;;  %v9187_v21 = vld [vmem:[#allocation281_spill] sm:$0xff]  ;;  %v2384_v20 = vsel %vm417_vm11, %v9191_v31, %v9190_v16  ;;  %v3021_v11 = vadd.f32 %v3015_v45, %v2848_v28  ;;  %v9193_v3 = vld [vmem:[#allocation322_spill] sm:$0xff]  ;;  %v9194_v48 = vld [vmem:[#allocation303_spill] sm:$0xff]  ;;  %v2554_v37 = vadd.f32 %v2548_v12, %v2389_v6 }
 0x492   : > { %v2885_v29 = vsel %vm1009_vm13, %v9188_v56, %v9187_v21  ;;  %v3358_v2 = vadd.f32 %v3352_v30, %v3185_v58  ;;  %v9192_v38 = vld [vmem:[#allocation261_spill] sm:$0xff]  ;;  %v9195_v13 = vld [vmem:[#allocation366_spill] sm:$0xff]  ;;  %v9196_v17 = vld [vmem:[#allocation367_spill] sm:$0xff]  ;;  %v2390_v58 = vadd.f32 %v2384_v20, %v7976_v7 }
 0x493   : > { %v2721_v47 = vsel %vm713_vm12, %v9193_v3, %v9192_v38  ;;  %v3058_v35 = vsel %vm1009_vm13, %v9195_v13, %v9194_v48  ;;  %v3353_v40 = vsel %vm1301_vm14, %v7866_v52, %v9196_v17  ;;  %v2891_v60 = vadd.f32 %v2885_v29, %v2726_v0  ;;  %v9197_v8 = vld [vmem:[#allocation315_spill] sm:$0xff]  ;;  %v9198_v51 = vld [vmem:[#allocation241_spill] sm:$0xff]  ;;  %v9199_v22 = vld [vmem:[#allocation302_spill] sm:$0xff]  ;;  %v3487_v49 = vpop.permute.xlu0 %3486 }
 0x494   : > { %v3186_v24 = vadd.f32 %v3180_v50, %v3021_v11  ;;  %v8180_v44 = vadd.f32 %v3491_v27, %v3358_v2  ;;  %3727 = vrot.lane.b32.xlu0 %v9197_v8, %s4494_s26  ;;  %v2549_v54 = vsel %vm713_vm12, %v9199_v22, %v9198_v51  ;;  %v9200_v55 = vld [vmem:[#allocation283_spill] sm:$0xff]  ;;  %v9201_v33 = vld [vmem:[#allocation345_spill] sm:$0xff]  ;;  %v9204_v53 = vld [vmem:[#allocation50_spill] sm:$0xff]  ;;  %v2727_v34 = vadd.f32 %v2721_v47, %v2554_v37  ;;  %v3607_v37 = vpop.permute.xlu1 %3606 }
 0x495   : > { %v2886_v52 = vsel %vm1009_vm13, %v9201_v33, %v9200_v55  ;;  %v9202_v14 = vld [vmem:[#allocation335_spill] sm:$0xff]  ;;  %v9205_v30 = vrot.slane %v9204_v53, 5  ;;  %v9206_v19 = vld [vmem:[#allocation42_spill] sm:$0xff]  ;;  %v3064_v6 = vadd.f32 %v3058_v35, %v2891_v60  ;;  %v9209_v21 = vld [vmem:[#allocation324_spill] sm:$0xff]  ;;  %v2555_v7 = vadd.f32 %v2549_v54, %v2390_v58 }
 0x496   : > { %v9203_v25 = vld [vmem:[#allocation311_spill] sm:$0xff]  ;;  %v9207_v39 = vrot.slane %v9206_v19, 5  ;;  %v3359_v63 = vadd.f32 %v3353_v40, %v3186_v24  ;;  %v9210_v29 = vld [vmem:[#allocation305_spill] sm:$0xff]  ;;  %v9211_v5 = vld [vmem:[#allocation372_spill] sm:$0xff]  ;;  %v2892_v20 = vadd.f32 %v2886_v52, %v2727_v34 }
 0x497   : > { %v3223_v45 = vsel %vm1301_vm14, %v9203_v25, %v9202_v14  ;;  %v9208_v12 = vld [vmem:[#allocation263_spill] sm:$0xff]  ;;  %v3059_v50 = vsel %vm1009_vm13, %v9211_v5, %v9210_v29  ;;  %v9212_v16 = vld [vmem:[#allocation373_spill] sm:$0xff]  ;;  %v9215_v3 = vld [vmem:[#allocation346_spill] sm:$0xff]  ;;  %v3514_v27 = vpop.permute.xlu0 %3513  ;;  %v9224_v14 = vmov %v9205_v30 }
 0x498   : > { %v3888_v28 = vsel %vm258_vm1, %v9207_v39, %v9205_v30  ;;  %v2722_v56 = vsel %vm713_vm12, %v9209_v21, %v9208_v12  ;;  %v3396_v31 = vsel %vm1301_vm14, %v7892_v42, %v9212_v16  ;;  %v9213_v0 = vld [vmem:[#allocation331_spill] sm:$0xff]  ;;  %v3229_v2 = vadd.f32 %v3223_v45, %v3064_v6  ;;  %v9214_v38 = vld [vmem:[#allocation285_spill] sm:$0xff]  ;;  %v9216_v48 = vld [vmem:[#allocation338_spill] sm:$0xff]  ;;  %v3854_v29 = vpop.permute.xlu1 %3853 }
 0x499   : > { %v3492_v11 = vsel %vm1569_vm15, %v3487_v49, %v9213_v0  ;;  %3896 = vrot.lane.b32.xlu0 %v3888_v28, %s4494_s26  ;;  %v2887_v47 = vsel %vm1009_vm13, %v9215_v3, %v9214_v38  ;;  %v9217_v13 = vld [vmem:[#allocation319_spill] sm:$0xff]  ;;  %v2728_v17 = vadd.f32 %v2722_v56, %v2555_v7  ;;  %v3065_v42 = vadd.f32 %v3059_v50, %v2892_v20  ;;  %v9219_v24 = vld [vmem:[#allocation374_spill] sm:$0xff]  ;;  %v9225_v39 = vld [vmem:[#allocation341_spill] sm:$0xff] }
 0x49a   : > { %v8212_v23 = vadd.f32 %v3492_v11, %v3359_v63  ;;  %v3224_v35 = vsel %vm1301_vm14, %v9217_v13, %v9216_v48  ;;  %v3402_v40 = vadd.f32 %v3396_v31, %v3229_v2  ;;  %v9218_v60 = vld [vmem:[#allocation307_spill] sm:$0xff]  ;;  %v9220_v51 = vld [vmem:[#allocation382_spill] sm:$0xff]  ;;  %v9226_v28 = vld [vmem:[#allocation325_spill] sm:$0xff] }
 0x49b   : > { %v3060_v8 = vsel %vm1009_vm13, %v9219_v24, %v9218_v60  ;;  %v3397_v22 = vsel %vm1301_vm14, %v7923_v9, %v9220_v51  ;;  %v9221_v54 = vld [vmem:[#allocation15_spill] sm:$0xff]  ;;  %v9222_v33 = vld [vmem:[#allocation14_spill] sm:$0xff]  ;;  %v2893_v45 = vadd.f32 %v2887_v47, %v2728_v17  ;;  %v3230_v30 = vadd.f32 %v3224_v35, %v3065_v42  ;;  %v3518_v6 = vpop.permute.xlu0 %3517  ;;  %v9228_v12 = vld [vmem:[#allocation56_spill] sm:$0xff] }
 0x49c   : > { %v3525_v55 = vsel %vm1569_vm15, %v3514_v27, %v9221_v54  ;;  %v9223_v52 = vrot.slane %v9222_v33, 5  ;;  %v3225_v58 = vsel %vm1301_vm14, %v9226_v28, %v9225_v39  ;;  %v9227_v63 = vld [vmem:[#allocation27_spill] sm:$0xff]  ;;  %v3526_v53 = vsel %vm1569_vm15, %v3518_v6, %v9228_v12  ;;  %v3858_v11 = vpop.permute.xlu1 %3857 }
 0x49d   : > { %v3531_v19 = vadd.f32 %v3525_v55, %v3402_v40  ;;  %v3066_v34 = vadd.f32 %v3060_v8, %v2893_v45  ;;  %v3403_v9 = vadd.f32 %v3397_v22, %v3230_v30  ;;  %v3398_v49 = vsel %vm1301_vm14, %v7958_v41, %v9227_v63 }
 0x49e   : > { %v3893_v25 = vsel %vm258_vm1, %v9224_v14, %v9223_v52 }
 0x49f   : > { %3900 = vrot.lane.b32.xlu0 %v3893_v25, %s4494_s26  ;;  %v3231_v21 = vadd.f32 %v3225_v58, %v3066_v34  ;;  %v3532_v56 = vadd.f32 %v3526_v53, %v3403_v9  ;;  %v3522_v50 = vpop.permute.xlu0 %3521  ;;  %s4128_s26 = sshll.u32 %s4651_s7, 4 }
 0x4a0   : > { %v3527_v16 = vsel %vm1569_vm15, %v3522_v50, %v7868_v57  ;;  %v3862_v3 = vpop.permute.xlu1 %3861  ;;  %s190_s28 = scalar_lea.vmem [#allocation10], %s4128_s26 }
 0x4a1   : > { %v3404_v5 = vadd.f32 %v3398_v49, %v3231_v21  ;;  %s4021_s6 = sshll.u32 %s190_s28, 4  ;;  %s8313_s6 = int_to_ptr.vmem [resolvable:$true] %s4021_s6 }
 0x4a2   : > { %s4394_s12 = scalar_lea.vmem %s8313_s6, 256  ;;  %p4401_p6 = scmp.lt.s32.totalorder %s8313_s6, %s4399_s24 }
 0x4a3   : > { %v3533_v31 = vadd.f32 %v3527_v16, %v3404_v5  ;;  %v3559_v0 = vpop.permute.xlu0 %3558  ;;  %p4395_p8 = scmp.ne.s32.totalorder %s8313_s6, %s4394_s12  ;;  %p4402_p1 = scmp.lt.s32.totalorder %s4400_s29, %s4394_s12 }
 0x4a4   : > { %v3566_v7 = vsel %vm1569_vm15, %v3559_v0, %v7905_v46  ;;  %v3644_v35 = vpop.permute.xlu1 %3643 }
 0x4a5   : > { %v8248_v20 = vadd.f32 %v3566_v7, %v8003_v15  ;;  %p4396_p0 = pnand %p4395_p8, %p9229_p13  ;;  %p4403_p7 = por %p4402_p1, %p4401_p6 }
 0x4a7   : > { %v3563_v41 = vpop.permute.xlu0 %3562  ;;  %p4397_p2 = pneg %p4396_p0 }
 0x4a8   : > { %v3567_v2 = vsel %vm1569_vm15, %v3563_v41, %v7960_v32  ;;  %v3648_v40 = vpop.permute.xlu1 %3647 }
 0x4a9   : > { %v8253_v38 = vadd.f32 %v3567_v2, %v8032_v59  ;;  %p4404_p12 = pnand %p4403_p7, %p4397_p2 }
 0x4ab   : > { %v3679_v47 = vpop.permute.xlu0 %3678 }
 0x4ac   : > { %v3690_v57 = vsel %vm1863_vm3, %v3679_v47, %v8007_v18  ;;  %v3652_v24 = vpop.permute.xlu1 %3651 }
 0x4ad   : > { %v3696_v48 = vadd.f32 %v3690_v57, %v3531_v19 }
 0x4af   : > { %v3683_v13 = vpop.permute.xlu0 %3682 }
 0x4b0   : > { %v3691_v46 = vsel %vm1863_vm3, %v3683_v13, %v8050_v26  ;;  %v3764_v54 = vpop.permute.xlu1 %3763 }
 0x4b1   : > { %v3697_v15 = vadd.f32 %v3691_v46, %v3532_v56 }
 0x4b3   : > { %v3687_v17 = vpop.permute.xlu0 %3686 }
 0x4b4   : > { %v3692_v42 = vsel %vm1863_vm3, %v3687_v17, %v8095_v36  ;;  %v3768_v52 = vpop.permute.xlu1 %3767 }
 0x4b5   : > { %v3698_v32 = vadd.f32 %v3692_v42, %v3533_v31 }
 0x4b7   : > { %v3597_v59 = vpop.permute.xlu0 %3596 }
 0x4b8   : > { %v3608_v27 = vsel %vm1569_vm15, %v3597_v59, %v8139_v10 }
 0x4b9   : > { %v8264_v60 = vadd.f32 %v3608_v27, %v8063_v61 }
 0x4bb   : > { %v3601_v18 = vpop.permute.xlu0 %3600 }
 0x4bc   : > { %v3609_v8 = vsel %vm1569_vm15, %v3601_v18, %v8184_v1 }
 0x4bd   : > { %v3615_v26 = vadd.f32 %v3609_v8, %v8091_v43 }
 0x4bf   : > { %v3605_v51 = vpop.permute.xlu0 %3604 }
 0x4c0   : > { %v3610_v22 = vsel %vm1569_vm15, %v3605_v51, %v3607_v37  ;;  %v3772_v37 = vpop.permute.xlu1 %3771 }
 0x4c1   : > { %v8271_v36 = vadd.f32 %v3610_v22, %v8121_v4 }
 0x4c3   : > { %v3852_v55 = vpop.permute.xlu0 %3851 }
 0x4c4   : > { %v3863_v10 = vsel %vm1863_vm3, %v3852_v55, %v3854_v29  ;;  %v3809_v9 = vpop.permute.xlu1 %3808 }
 0x4c5   : > { %v3869_v33 = vadd.f32 %v3863_v10, %v3696_v48 }
 0x4c7   : > { %v3856_v61 = vpop.permute.xlu0 %3855  ;;  %v3970_v45 = vrot.slane %v3869_v33, 1 }
 0x4c8   : > { %v3864_v14 = vsel %vm1863_vm3, %v3856_v61, %v3858_v11  ;;  %v3813_v63 = vpop.permute.xlu1 %3812 }
 0x4c9   : > { %v3870_v25 = vadd.f32 %v3864_v14, %v3697_v15 }
 0x4cb   : > { %v3971_v1 = vrot.slane %v3870_v25, 1  ;;  %v3860_v30 = vpop.permute.xlu0 %3859 }
 0x4cc   : > { %v3865_v43 = vsel %vm1863_vm3, %v3860_v30, %v3862_v3  ;;  %v3817_v53 = vpop.permute.xlu1 %3816 }
 0x4cd   : > { %v3871_v19 = vadd.f32 %v3865_v43, %v3698_v32  ;;  %v3972_v4 = vsel %vm441_vm2, %v3970_v45, %v3971_v1 }
 0x4cf   : > { %v3973_v39 = vrot.slane %v3871_v19, 1  ;;  %v3642_v28 = vpop.permute.xlu0 %3641 }
 0x4d0   : > { %v3653_v56 = vsel %vm1569_vm15, %v3642_v28, %v3644_v35  ;;  %v3937_v29 = vpop.permute.xlu1 %3936 }
 0x4d1   : > { %v3974_v58 = vsel %vm441_vm2, %v3971_v1, %v3973_v39  ;;  %v3659_v5 = vadd.f32 %v3653_v56, %v8152_v62 }
 0x4d3   : > { %v3646_v34 = vpop.permute.xlu0 %3645 }
 0x4d4   : > { %v3654_v16 = vsel %vm1569_vm15, %v3646_v34, %v3648_v40  ;;  %v3941_v2 = vpop.permute.xlu1 %3940 }
 0x4d5   : > { %v3660_v11 = vadd.f32 %v3654_v16, %v8180_v44 }
 0x4d7   : > { %v3650_v6 = vpop.permute.xlu0 %3649 }
 0x4d8   : > { %v3655_v3 = vsel %vm1569_vm15, %v3650_v6, %v3652_v24  ;;  %v3945_v42 = vpop.permute.xlu1 %3944 }
 0x4d9   : > { %v3661_v48 = vadd.f32 %v3655_v3, %v8212_v23 }
 0x4db   : > { %v3762_v49 = vpop.permute.xlu0 %3761 }
 0x4dc   : > { %v3773_v44 = vsel %vm1863_vm3, %v3762_v49, %v3764_v54  ;;  %v3726_v55 = vpop.permute.xlu1 %3725 }
 0x4dd   : > { %v3779_v23 = vadd.f32 %v3773_v44, %v8264_v60 }
 0x4df   : > { %v3766_v12 = vpop.permute.xlu0 %3765 }
 0x4e0   : > { %v3774_v27 = vsel %vm1863_vm3, %v3766_v12, %v3768_v52  ;;  %v3730_v30 = vpop.permute.xlu1 %3729 }
 0x4e1   : > { %v3780_v8 = vadd.f32 %v3774_v27, %v3615_v26 }
 0x4e3   : > { %v3770_v21 = vpop.permute.xlu0 %3769 }
 0x4e4   : > { %v3775_v33 = vsel %vm1863_vm3, %v3770_v21, %v3772_v37  ;;  %v3899_v37 = vpop.permute.xlu1 %3898 }
 0x4e5   : > { %v3781_v14 = vadd.f32 %v3775_v33, %v8271_v36 }
 0x4e7   : > { %v3807_v50 = vpop.permute.xlu0 %3806 }
 0x4e8   : > { %v3818_v31 = vsel %vm1863_vm3, %v3807_v50, %v3809_v9 }
 0x4e9   : > { %v3824_v0 = vadd.f32 %v3818_v31, %v3659_v5 }
 0x4eb   : > { %v3978_v7 = vadd.f32 %v3972_v4, %v3824_v0  ;;  %v3811_v41 = vpop.permute.xlu0 %3810 }
 0x4ec   : > { %v3819_v47 = vsel %vm1863_vm3, %v3811_v41, %v3813_v63  ;;  %v3903_v63 = vpop.permute.xlu1 %3902 }
 0x4ed   : > { %v3825_v57 = vadd.f32 %v3819_v47, %v3660_v11  ;;  %v3984_v46 = vrot.slane %v3978_v7, 2 }
 0x4ef   : > { %v3979_v13 = vadd.f32 %v3974_v58, %v3825_v57  ;;  %v3815_v62 = vpop.permute.xlu0 %3814 }
 0x4f0   : > { %v3820_v35 = vsel %vm1863_vm3, %v3815_v62, %v3817_v53 }
 0x4f1   : > { %v3985_v15 = vrot.slane %v3979_v13, 2  ;;  %v3826_v17 = vadd.f32 %v3820_v35, %v3661_v48 }
 0x4f3   : > { %v3980_v32 = vadd.f32 %v3973_v39, %v3826_v17  ;;  %v3935_v40 = vpop.permute.xlu0 %3934  ;;  %v3986_v59 = vsel %vm782_vm4, %v3984_v46, %v3985_v15 }
 0x4f4   : > { %v3946_v18 = vsel %vm1863_vm3, %v3935_v40, %v3937_v29 }
 0x4f5   : > { %v3987_v24 = vrot.slane %v3980_v32, 2  ;;  %v3952_v51 = vadd.f32 %v3946_v18, %v3779_v23 }
 0x4f7   : > { %v3939_v22 = vpop.permute.xlu0 %3938  ;;  %v3988_v10 = vsel %vm782_vm4, %v3985_v15, %v3987_v24  ;;  %v3958_v25 = vrot.slane %v3952_v51, 1 }
 0x4f8   : > { %v3947_v54 = vsel %vm1863_vm3, %v3939_v22, %v3941_v2 }
 0x4f9   : > { %v3953_v61 = vadd.f32 %v3947_v54, %v3780_v8 }
 0x4fb   : > { %v3959_v52 = vrot.slane %v3953_v61, 1 }
 0x4fd   : > { %v3943_v45 = vpop.permute.xlu0 %3942  ;;  %v3960_v26 = vsel %vm441_vm2, %v3958_v25, %v3959_v52 }
 0x4fe   : > { %v3948_v1 = vsel %vm1863_vm3, %v3943_v45, %v3945_v42 }
 0x4ff   : > { %v3954_v60 = vadd.f32 %v3948_v1, %v3781_v14 }
 0x501   : > { %v3961_v43 = vrot.slane %v3954_v60, 1  ;;  %v3724_v19 = vpop.permute.xlu0 %3723 }
 0x502   : > { %v3731_v28 = vsel %vm1863_vm3, %v3724_v19, %v3726_v55 }
 0x503   : > { %v3962_v4 = vsel %vm441_vm2, %v3959_v52, %v3961_v43  ;;  %v3735_v58 = vadd.f32 %v3731_v28, %v8248_v20 }
 0x506   : > { %v3728_v39 = vpop.permute.xlu0 %3727 }
 0x507   : > { %v3732_v34 = vsel %vm1863_vm3, %v3728_v39, %v3730_v30 }
 0x508   : > { %v3736_v49 = vadd.f32 %v3732_v34, %v8253_v38 }
 0x50b   : > { %v3897_v36 = vpop.permute.xlu0 %3896 }
 0x50c   : > { %v3904_v9 = vsel %vm1863_vm3, %v3897_v36, %v3899_v37 }
 0x50d   : > { %v3908_v6 = vadd.f32 %v3904_v9, %v3735_v58 }
 0x50f   : > { %v3965_v12 = vadd.f32 %v3960_v26, %v3908_v6 }
 0x511   : > { %v3901_v53 = vpop.permute.xlu0 %3900  ;;  %v3991_v56 = vadd.f32 %v3986_v59, %v3965_v12 }
 0x512   : > { %v3905_v21 = vsel %vm1863_vm3, %v3901_v53, %v3903_v63 }
 0x513   : > { %v3909_v29 = vadd.f32 %v3905_v21, %v3736_v49  ;;  %v4232_v5 = vmul.f32 -1.442695, %v3991_v56 }
 0x515   : > { %v3966_v50 = vadd.f32 %v3962_v4, %v3909_v29  ;;  %4327 = vpow2.f32 %v4232_v5 }
 0x517   : > { %v3992_v20 = vadd.f32 %v3988_v10, %v3966_v50 }
 0x519   : > { %v4233_v16 = vmul.f32 -1.442695, %v3992_v20 }
 0x51b   : > { %4329 = vpow2.f32 %v4233_v16 }
 0x51f   : > { %v4328_v31 = vpop.eup %4327 }
 0x520   : > { %v3999_v0 = vadd.f32 1.0, %v4328_v31 }
 0x522   : > { %4331 = vrcp.f32 %v3999_v0 }
 0x525   : > { %v4330_v11 = vpop.eup %4329 }
 0x526   : > { %v4000_v38 = vadd.f32 1.0, %v4330_v11 }
 0x528   : > { %4333 = vrcp.f32 %v4000_v38 }
 0x52c   : > { %v4332_v7 = vpop.eup %4331 }
 0x52d   : > { %4005 = vst.msk [vmem:[%s190_s28] sm:$0xff] %vm196_vm0, %v4332_v7 }
 0x532   : > { %v4334_v41 = vpop.eup %4333 }
 0x533   : > { %4006 = vst.msk [vmem:[%s190_s28 + $0x8] sm:$0xff] %vm196_vm0, %v4334_v41 }
 0x534   : > { %4407 = shalt.err (!%p4404_p12)
}
 0x535   : > { %s4408_s5 = scalar_lea.hbm %s8311_s22, 256  ;;  %s4412_s30 = scalar_lea.hbm %s8365_s2, 512 }
 0x536   : > { %p4409_p4 = scmp.ne.s32.totalorder %s8311_s22, %s4408_s5  ;;  %p4413_p5 = scmp.lt.u32.totalorder %s8311_s22, %s8365_s2 }
 0x537   : > { %p4414_p9 = scmp.lt.u32.totalorder %s4412_s30, %s4408_s5  ;;  %p4416_p8 = scmp.lt.u32.totalorder %s4408_s5, %s8311_s22 }
 0x538   : > { %p4410_p10 = pnand %p4409_p4, %p9229_p13 }
 0x539   : > { %p4415_p3 = por %p4414_p9, %p4413_p5 }
 0x53a   : > { %p4411_p11 = pneg %p4410_p10 }
 0x53b   : > { %p4417_p0 = por %p4416_p8, %p4415_p3 }
 0x53d   : > { %p4418_p2 = pnand %p4417_p0, %p4411_p11 }
 0x53f   : > { %4421 = shalt.err (!%p4418_p2)
}
 0x540   : > { %s4496_s26 = smov 128   ;;  %s4497_s27 = smov 8  }
 0x541   : > { %4247 = dma.vmem_to_hbm [thread:$0]  (%p9229_p13), %s8313_s6, 256, %s8311_s22, %s4008_s18, %s4496_s26, %s4496_s26, %s4497_s27  }
 0x542 PF: > { %s4036_s28 = sand.u32 1, %s4460_s9   ;;  %p9230_p6 = scmp.ne.s32.totalorder %s8413_s21, 0 }
 0x543   : > { %p9231_p1 = scmp.ge.s32.totalorder %s4480_s14, 2  ;;  %s4037_s8 = scalar_lea.sflag [#allocation7], %s4036_s28 }
 0x545   : > { %p4258_p7 = pnand %p9231_p1, %p9230_p6 }
 0x547   : > { %4455 = dma.done.wait (!%p4258_p7), %s4037_s8, 256  }
 0x548   : > { %4457 = vsyncadd (!%p4258_p7), %s4037_s8, 4294967040  ;;  %s19_s14 = sadd.s32 1, %s4480_s14   ;;  %s9232_s9 = smov %s4464_s10 }
 0x549   : > { %p16_p12 = scmp.ge.s32.totalorder %s19_s14, 4   ;;  %s9233_s10 = smov %s4468_s11 }
 0x54a   : > { %s9234_s11 = smov %s4614_s4  ;;  %s9235_s12 = smov %s4476_s13 }
 0x54b   : > { %s9236_s13 = smov %s9238_s25  ;;  %18 = sbr.rel (!%p16_p12) target bundleno = 7 (0x7), region = 90 }
 0x552   :  { %4042 = vsyncpa [#allocation6], 1 }
 0x553   :  { %4044 = vsyncpa [#allocation6 + $0x1], 1 }
 0x554   :  { %4045 = vsyncpa [#allocation7], 1 }
 0x555   :  { %4047 = vsyncpa [#allocation7 + $0x1], 1 }
 0x556   :  { %4048 = vsyncpa [#allocation8], 1 }
 0x557   :  { %4050 = vsyncpa [#allocation8 + $0x1], 1 }

</bundles_post_ra>
